<compile_context>
chip_gen: v5e
topology: v5e:2x2
jax: 0.10.0
libtpu: 0.0.40
codegen_flags: <defaults>
</compile_context>

<pallas_src>
import math
import jax
import jax.numpy as jnp
from jax.experimental import pallas as pl
from jax.experimental.pallas import tpu as pltpu


# ------------------------------- fused kernel -------------------------------

def _affinity_kernel(q_ref, k_ref, v_ref,
                     w1_ref, vec1_ref, gs1_ref, ge1_ref,
                     w2_ref, vec2_ref, gs2_ref, ge2_ref,
                     w3_ref, vec3_ref, gs3_ref, ge3_ref,
                     wo_ref, veco_ref,
                     o_ref):
    d = q_ref.shape[-1]
    c = v_ref.shape[0]

    # ---- cross-attention; QK^T + softmax shared across all classes of this batch ----
    # TODO(synk): `transformer` is an injected nn.Module with unspecified architecture;
    # a deterministic single-head cross-attention stand-in is used.
    s = jax.lax.dot_general(q_ref[...], k_ref[...], (((1,), (1,)), ((), ())),
                            preferred_element_type=jnp.float32)        # (hw, lk)
    s = s * (1.0 / math.sqrt(d))
    s = s - jnp.max(s, axis=-1, keepdims=True)
    p = jnp.exp(s)
    p = (p / jnp.sum(p, axis=-1, keepdims=True)).astype(jnp.bfloat16)  # exact softmax

    # per-class P @ V, stacked along rows -> (c*hw, d): every later matmul sees M=c*hw.
    x = jnp.concatenate(
        [jnp.dot(p, v_ref[ci], preferred_element_type=jnp.float32) for ci in range(c)],
        axis=0)

    def ln_gelu(y, gs_ref, ge_ref, vec_ref):
        # LayerNorm2d over each contiguous channel group, via thin group-sum (F,G) and
        # group-broadcast (G,F) matmuls in f32 (two-pass: no bf16 loss, no cancellation).
        gsum = gs_ref[...]
        gexp = ge_ref[...]
        mu = jnp.dot(jnp.dot(y, gsum, preferred_element_type=jnp.float32),
                     gexp, preferred_element_type=jnp.float32)
        yc = y - mu
        var = jnp.dot(jnp.dot(yc * yc, gsum, preferred_element_type=jnp.float32),
                      gexp, preferred_element_type=jnp.float32)
        yn = yc * jax.lax.rsqrt(var + 1e-6)
        yn = yn * vec_ref[1:2, :] + vec_ref[2:3, :]
        # TODO(synk): nn.GELU() defaults to the exact erf form; the tanh approximation
        # is used for robust Mosaic lowering.
        return jax.nn.gelu(yn, approximate=True)

    # ---- output_upscaling: 3x [ConvT(2,2) -> LayerNorm2d -> GELU] + 1x1 conv, all
    # folded into per-input-pixel matmuls (ConvT k=2,s=2 never mixes pixels). ----
    y1 = jnp.dot(x.astype(jnp.bfloat16), w1_ref[...],
                 preferred_element_type=jnp.float32) + vec1_ref[0:1, :]     # (M, 2d)
    z1 = ln_gelu(y1, gs1_ref, ge1_ref, vec1_ref)

    y2 = jnp.dot(z1.astype(jnp.bfloat16), w2_ref[...],
                 preferred_element_type=jnp.float32) + vec2_ref[0:1, :]     # (M, 4d)
    z2 = ln_gelu(y2, gs2_ref, ge2_ref, vec2_ref)

    y3 = jnp.dot(z2.astype(jnp.bfloat16), w3_ref[...],
                 preferred_element_type=jnp.float32) + vec3_ref[0:1, :]     # (M, 8d)
    z3 = ln_gelu(y3, gs3_ref, ge3_ref, vec3_ref)

    o_ref[...] = (jnp.dot(z3.astype(jnp.bfloat16), wo_ref[...],
                          preferred_element_type=jnp.float32) + veco_ref[...])


# ---------------------------- parameter plumbing ----------------------------

def convT_to_mat(w):
    # torch ConvTranspose2d weight (Cin, Cout, 2, 2) -> (Cin, 4*Cout), group order (ki, kj).
    cin, cout = w.shape[0], w.shape[1]
    return jnp.transpose(w, (0, 2, 3, 1)).reshape(cin, 4 * cout)


def block_diag_repeat(m, r):
    # r identical diagonal copies of m: (A, B) -> (r*A, r*B)
    a, b_ = m.shape
    eye = jnp.eye(r, dtype=m.dtype)
    return jnp.einsum('st,ab->satb', eye, m).reshape(r * a, r * b_)


def group_stat_mats(f, g):
    # thin group-mean (F, G') and group-broadcast (G', F) matrices for G groups of size
    # F//G, zero-padded to G' = max(G, 8) so MXU operands stay sublane-aligned.
    gsz = f // g
    gexp = jnp.repeat(jnp.eye(g, dtype=jnp.float32), gsz, axis=1)      # (G, F)
    gsum = gexp.T / gsz                                                # (F, G)
    gp = max(g, 8)
    if gp != g:
        gexp = jnp.concatenate([gexp, jnp.zeros((gp - g, f), jnp.float32)], axis=0)
        gsum = jnp.concatenate([gsum, jnp.zeros((f, gp - g), jnp.float32)], axis=1)
    return gsum, gexp


def make_decoder_weights(params, d):
    assert d % 8 == 0, "transformer_dim must be a multiple of 8"
    c1, c2, c3 = d // 2, d // 4, d // 8
    (w1, b1, g1, be1, w2, b2, g2, be2, w3, b3, g3, be3, wo, bo) = params

    # un-duplicated per-stage conv weights (feature layout: (ki1,kj1,ki2,kj2,ki3,kj3,ch))
    w1m = convT_to_mat(w1).astype(jnp.bfloat16)                          # (d,  2d)
    w2m = block_diag_repeat(convT_to_mat(w2), 4).astype(jnp.bfloat16)    # (2d, 4d)
    w3m = block_diag_repeat(convT_to_mat(w3), 16).astype(jnp.bfloat16)   # (4d, 8d)
    wom = block_diag_repeat(wo.reshape(c3, 1), 64).astype(jnp.bfloat16)  # (8d, 64)

    gs1, ge1 = group_stat_mats(2 * d, 4)      # 4 groups of c1
    gs2, ge2 = group_stat_mats(4 * d, 16)     # 16 groups of c2
    gs3, ge3 = group_stat_mats(8 * d, 64)     # 64 groups of c3

    def vec_pack(bias, gamma, beta, g):
        # rows: 0 = ConvT bias, 1 = LN gamma, 2 = LN beta (tiled over the g groups)
        return jnp.stack([jnp.tile(bias, g), jnp.tile(gamma, g), jnp.tile(beta, g)],
                         axis=0).astype(jnp.float32)

    vec1 = vec_pack(b1, g1, be1, 4)        # (3, 2d)
    vec2 = vec_pack(b2, g2, be2, 16)       # (3, 4d)
    vec3 = vec_pack(b3, g3, be3, 64)       # (3, 8d)
    veco = jnp.broadcast_to(bo.reshape(1, 1), (1, 64)).astype(jnp.float32)

    return (w1m, vec1, gs1, ge1, w2m, vec2, gs2, ge2,
            w3m, vec3, gs3, ge3, wom, veco)


# ------------------------------- forward glue -------------------------------

def affinity_decoder_forward(query_embeddings, support_embeddings, image_pe,
                             examples_class_src, examples_class_embs,
                             flag_examples, weights):
    b, n, d, h, w = support_embeddings.shape
    c = examples_class_embs.shape[2]
    hw = h * w
    lk = n * hw
    m_rows = c * hw
    weight_args = tuple(weights)

    # support_masks: '(b n c) d (h w) -> b n c d h w'; class_fusion == 'sum'
    support_masks = examples_class_src.reshape(b, n, c, d, h, w)
    support_masks = support_masks + examples_class_embs[..., None, None]

    # attention values per class: 'b n c d h w -> b c (n h w) d'
    vals = jnp.transpose(support_masks, (0, 2, 1, 4, 5, 3)).reshape(b, c, lk, d)
    vals = vals.astype(jnp.bfloat16)
    # attention keys (class independent, so softmax is shared): 'b n d h w -> b (n h w) d'
    keys = jnp.transpose(support_embeddings, (0, 1, 3, 4, 2)).reshape(b, lk, d)
    keys = keys.astype(jnp.bfloat16)
    # queries + positional encoding: 'b d h w -> b (h w) d'
    q = jnp.transpose(query_embeddings, (0, 2, 3, 1)).reshape(b, hw, d)
    pe = jnp.transpose(image_pe, (0, 2, 3, 1)).reshape(1, hw, d)
    q = (q + pe).astype(jnp.bfloat16)

    def const_spec(arr):
        return pl.BlockSpec(arr.shape, lambda i: (0, 0))   # all packed weights are 2-D

    # advisory cost estimate so XLA schedules the surrounding transposes around the call
    mm = lambda mr, kk, nn: 2 * mr * kk * nn
    flops = b * (mm(hw, d, lk) + c * mm(hw, lk, d)
                 + mm(m_rows, d, 2 * d) + mm(m_rows, 2 * d, 4 * d)
                 + mm(m_rows, 4 * d, 8 * d) + mm(m_rows, 8 * d, 64)
                 + 2 * (mm(m_rows, 2 * d, 8) + mm(m_rows, 8, 2 * d)
                        + mm(m_rows, 4 * d, 16) + mm(m_rows, 16, 4 * d)
                        + mm(m_rows, 8 * d, 64) + mm(m_rows, 64, 8 * d)))
    transcendentals = b * (hw * lk + 2 * m_rows * (2 * d + 4 * d + 8 * d))
    bytes_accessed = (b * ((hw * d + lk * d + c * lk * d) * 2 + m_rows * 64 * 4)
                      + sum(int(a.size) * a.dtype.itemsize for a in weight_args))

    out = pl.pallas_call(
        _affinity_kernel,
        out_shape=jax.ShapeDtypeStruct((b, m_rows, 64), jnp.float32),
        grid=(b,),
        in_specs=[
            pl.BlockSpec((None, hw, d), lambda i: (i, 0, 0)),         # queries (+pe)
            pl.BlockSpec((None, lk, d), lambda i: (i, 0, 0)),         # keys
            pl.BlockSpec((None, c, lk, d), lambda i: (i, 0, 0, 0)),   # per-class values
        ] + [const_spec(a) for a in weight_args],
        out_specs=pl.BlockSpec((None, m_rows, 64), lambda i: (i, 0, 0)),
        compiler_params=pltpu.CompilerParams(
            dimension_semantics=("parallel",),
            vmem_limit_bytes=32 * 1024 * 1024),
        cost_estimate=pl.CostEstimate(flops=flops,
                                      transcendentals=transcendentals,
                                      bytes_accessed=bytes_accessed),
    )(q, keys, vals, *weight_args)

    # unfold the 64 sub-pixels (ki1,kj1,ki2,kj2,ki3,kj3) of each input pixel -> (8h, 8w)
    up = out.reshape(b * c, h, w, 2, 2, 2, 2, 2, 2)
    up = jnp.transpose(up, (0, 1, 3, 5, 7, 2, 4, 6, 8)).reshape(b * c, 8 * h, 8 * w)

    # padded_logits: -inf where no example carries this class
    present = jnp.any(flag_examples, axis=1).reshape(b * c)
    logits = jnp.where(present[:, None, None], up, -jnp.inf)
    return logits.reshape(b, c, 8 * h, 8 * w)


# ----------------------------------- main -----------------------------------

if __name__ == "__main__":
    b, n, c, d, h, w = 2, 2, 3, 32, 8, 8          # transformer_dim=32, downsample_rate=8
    c1, c2, c3 = d // 2, d // 4, d // 8

    key = jax.random.PRNGKey(0)
    ks = jax.random.split(key, 19)

    query_embeddings = 0.1 * jax.random.normal(ks[0], (b, d, h, w), jnp.float32)
    support_embeddings = 0.1 * jax.random.normal(ks[1], (b, n, d, h, w), jnp.float32)
    image_pe = 0.1 * jax.random.normal(ks[2], (1, d, h, w), jnp.float32)
    examples_class_src = 0.1 * jax.random.normal(ks[3], (b * n * c, d, h * w), jnp.float32)
    examples_class_embs = 0.1 * jax.random.normal(ks[4], (b, n, c, d), jnp.float32)
    flag_examples = jnp.array([[[1, 1, 0], [1, 0, 0]],
                               [[1, 1, 1], [0, 0, 1]]], dtype=bool)

    # output_upscaling parameters in torch layouts, deterministic init.
    params = (
        0.1 * jax.random.normal(ks[5], (d, c1, 2, 2), jnp.float32),    # ConvT1 weight
        0.01 * jax.random.normal(ks[6], (c1,), jnp.float32),           # ConvT1 bias
        1.0 + 0.01 * jax.random.normal(ks[7], (c1,), jnp.float32),     # LN1 gamma
        0.01 * jax.random.normal(ks[8], (c1,), jnp.float32),           # LN1 beta
        0.1 * jax.random.normal(ks[9], (c1, c2, 2, 2), jnp.float32),   # ConvT2 weight
        0.01 * jax.random.normal(ks[10], (c2,), jnp.float32),
        1.0 + 0.01 * jax.random.normal(ks[11], (c2,), jnp.float32),
        0.01 * jax.random.normal(ks[12], (c2,), jnp.float32),
        0.1 * jax.random.normal(ks[13], (c2, c3, 2, 2), jnp.float32),  # ConvT3 weight
        0.01 * jax.random.normal(ks[14], (c3,), jnp.float32),
        1.0 + 0.01 * jax.random.normal(ks[15], (c3,), jnp.float32),
        0.01 * jax.random.normal(ks[16], (c3,), jnp.float32),
        0.1 * jax.random.normal(ks[17], (1, c3, 1, 1), jnp.float32),   # Conv2d 1x1 weight
        0.01 * jax.random.normal(ks[18], (1,), jnp.float32),           # Conv2d 1x1 bias
    )
    decoder_weights = make_decoder_weights(params, d)

    forward = jax.jit(affinity_decoder_forward)
    logits = forward(query_embeddings, support_embeddings, image_pe,
                     examples_class_src, examples_class_embs,
                     flag_examples, decoder_weights)
    jax.block_until_ready(logits)

    assert logits.shape == (b, c, 8 * h, 8 * w)
    present = jnp.any(flag_examples, axis=1).reshape(b * c)
    flat = logits.reshape(b * c, 8 * h, 8 * w)
    finite_ok = bool(jnp.all(jnp.where(present[:, None, None], jnp.isfinite(flat), True)))
    assert finite_ok, "non-finite logits for present classes"
    print("KERNEL_OK")
</pallas_src>

<mosaic_0001>
module attributes {stable_mosaic.version = 11 : i64} {
  func.func @_affinity_kernel(%arg0: i32, %arg1: memref<1x64x32xbf16, #tpu.memory_space<vmem>>, %arg2: memref<1x128x32xbf16, #tpu.memory_space<vmem>>, %arg3: memref<1x3x128x32xbf16, #tpu.memory_space<vmem>>, %arg4: memref<32x64xbf16, #tpu.memory_space<vmem>>, %arg5: memref<3x64xf32, #tpu.memory_space<vmem>>, %arg6: memref<64x8xf32, #tpu.memory_space<vmem>>, %arg7: memref<8x64xf32, #tpu.memory_space<vmem>>, %arg8: memref<64x128xbf16, #tpu.memory_space<vmem>>, %arg9: memref<3x128xf32, #tpu.memory_space<vmem>>, %arg10: memref<128x16xf32, #tpu.memory_space<vmem>>, %arg11: memref<16x128xf32, #tpu.memory_space<vmem>>, %arg12: memref<128x256xbf16, #tpu.memory_space<vmem>>, %arg13: memref<3x256xf32, #tpu.memory_space<vmem>>, %arg14: memref<256x64xf32, #tpu.memory_space<vmem>>, %arg15: memref<64x256xf32, #tpu.memory_space<vmem>>, %arg16: memref<256x64xbf16, #tpu.memory_space<vmem>>, %arg17: memref<1x64xf32, #tpu.memory_space<vmem>>, %arg18: memref<1x192x64xf32, #tpu.memory_space<vmem>>) attributes {dimension_semantics = [#tpu.dimension_semantics<parallel>], iteration_bounds = array<i64: 2>, scalar_prefetch = 0 : i64, scratch_operands = 0 : i64, tpu.core_type = #tpu.core_type<tc>, window_params = [{transform_indices = @transform_0, window_bounds = array<i64: 1, 64, 32>}, {transform_indices = @transform_1, window_bounds = array<i64: 1, 128, 32>}, {transform_indices = @transform_2, window_bounds = array<i64: 1, 3, 128, 32>}, {pipeline_mode = #tpu.pipeline_mode<synchronous>, transform_indices = @transform_3, window_bounds = array<i64: 32, 64>}, {pipeline_mode = #tpu.pipeline_mode<synchronous>, transform_indices = @transform_4, window_bounds = array<i64: 3, 64>}, {pipeline_mode = #tpu.pipeline_mode<synchronous>, transform_indices = @transform_5, window_bounds = array<i64: 64, 8>}, {pipeline_mode = #tpu.pipeline_mode<synchronous>, transform_indices = @transform_6, window_bounds = array<i64: 8, 64>}, {pipeline_mode = #tpu.pipeline_mode<synchronous>, transform_indices = @transform_7, window_bounds = array<i64: 64, 128>}, {pipeline_mode = #tpu.pipeline_mode<synchronous>, transform_indices = @transform_8, window_bounds = array<i64: 3, 128>}, {pipeline_mode = #tpu.pipeline_mode<synchronous>, transform_indices = @transform_9, window_bounds = array<i64: 128, 16>}, {pipeline_mode = #tpu.pipeline_mode<synchronous>, transform_indices = @transform_10, window_bounds = array<i64: 16, 128>}, {pipeline_mode = #tpu.pipeline_mode<synchronous>, transform_indices = @transform_11, window_bounds = array<i64: 128, 256>}, {pipeline_mode = #tpu.pipeline_mode<synchronous>, transform_indices = @transform_12, window_bounds = array<i64: 3, 256>}, {pipeline_mode = #tpu.pipeline_mode<synchronous>, transform_indices = @transform_13, window_bounds = array<i64: 256, 64>}, {pipeline_mode = #tpu.pipeline_mode<synchronous>, transform_indices = @transform_14, window_bounds = array<i64: 64, 256>}, {pipeline_mode = #tpu.pipeline_mode<synchronous>, transform_indices = @transform_15, window_bounds = array<i64: 256, 64>}, {pipeline_mode = #tpu.pipeline_mode<synchronous>, transform_indices = @transform_16, window_bounds = array<i64: 1, 64>}, {transform_indices = @transform_17, window_bounds = array<i64: 1, 192, 64>}]} {
    %c0 = arith.constant 0 : index
    %c0_0 = arith.constant 0 : index
    %c0_1 = arith.constant 0 : index
    %0 = vector.load %arg1[%c0, %c0_0, %c0_1] : memref<1x64x32xbf16, #tpu.memory_space<vmem>>, vector<1x64x32xbf16>
    %1 = vector.shape_cast %0 : vector<1x64x32xbf16> to vector<64x32xbf16>
    %c0_2 = arith.constant 0 : index
    %c0_3 = arith.constant 0 : index
    %c0_4 = arith.constant 0 : index
    %2 = vector.load %arg2[%c0_2, %c0_3, %c0_4] : memref<1x128x32xbf16, #tpu.memory_space<vmem>>, vector<1x128x32xbf16>
    %3 = vector.shape_cast %2 : vector<1x128x32xbf16> to vector<128x32xbf16>
    %cst = arith.constant dense<0.000000e+00> : vector<64x128xf32>
    %4 = tpu.matmul %1, %3, %cst {dimension_numbers = #tpu.dot_dimension_numbers<[1], [1], [0], [0], [0, 0, 1, 0], [], []>} : vector<64x32xbf16>, vector<128x32xbf16>, vector<64x128xf32> -> vector<64x128xf32>
    %cst_5 = arith.constant 0.176776692 : f32
    %5 = vector.broadcast %cst_5 : f32 to vector<64x128xf32>
    %6 = arith.mulf %4, %5 : vector<64x128xf32>
    %cst_6 = arith.constant dense<0xFF800000> : vector<64xf32>
    %7 = vector.multi_reduction <maximumf>, %6, %cst_6 [1] : vector<64x128xf32> to vector<64xf32>
    %8 = vector.shape_cast %7 : vector<64xf32> to vector<64x1xf32>
    %9 = vector.broadcast %8 : vector<64x1xf32> to vector<64x128xf32>
    %10 = arith.subf %6, %9 : vector<64x128xf32>
    %11 = math.exp %10 : vector<64x128xf32>
    %cst_7 = arith.constant dense<0.000000e+00> : vector<64xf32>
    %12 = vector.multi_reduction <add>, %11, %cst_7 [1] : vector<64x128xf32> to vector<64xf32>
    %13 = vector.shape_cast %12 : vector<64xf32> to vector<64x1xf32>
    %14 = vector.broadcast %13 : vector<64x1xf32> to vector<64x128xf32>
    %15 = arith.divf %11, %14 : vector<64x128xf32>
    %16 = arith.truncf %15 : vector<64x128xf32> to vector<64x128xbf16>
    %c0_8 = arith.constant 0 : index
    %c0_9 = arith.constant 0 : index
    %c0_10 = arith.constant 0 : index
    %c0_11 = arith.constant 0 : index
    %17 = vector.load %arg3[%c0_8, %c0_9, %c0_10, %c0_11] : memref<1x3x128x32xbf16, #tpu.memory_space<vmem>>, vector<1x1x128x32xbf16>
    %18 = vector.shape_cast %17 : vector<1x1x128x32xbf16> to vector<128x32xbf16>
    %cst_12 = arith.constant dense<0.000000e+00> : vector<64x32xf32>
    %19 = tpu.matmul %16, %18, %cst_12 {dimension_numbers = #tpu.dot_dimension_numbers<[1], [0], [0], [1], [0, 0, 1, 1], [], []>} : vector<64x128xbf16>, vector<128x32xbf16>, vector<64x32xf32> -> vector<64x32xf32>
    %c0_13 = arith.constant 0 : index
    %c1 = arith.constant 1 : index
    %c0_14 = arith.constant 0 : index
    %c0_15 = arith.constant 0 : index
    %20 = vector.load %arg3[%c0_13, %c1, %c0_14, %c0_15] : memref<1x3x128x32xbf16, #tpu.memory_space<vmem>>, vector<1x1x128x32xbf16>
    %21 = vector.shape_cast %20 : vector<1x1x128x32xbf16> to vector<128x32xbf16>
    %cst_16 = arith.constant dense<0.000000e+00> : vector<64x32xf32>
    %22 = tpu.matmul %16, %21, %cst_16 {dimension_numbers = #tpu.dot_dimension_numbers<[1], [0], [0], [1], [0, 0, 1, 1], [], []>} : vector<64x128xbf16>, vector<128x32xbf16>, vector<64x32xf32> -> vector<64x32xf32>
    %c0_17 = arith.constant 0 : index
    %c2 = arith.constant 2 : index
    %c0_18 = arith.constant 0 : index
    %c0_19 = arith.constant 0 : index
    %23 = vector.load %arg3[%c0_17, %c2, %c0_18, %c0_19] : memref<1x3x128x32xbf16, #tpu.memory_space<vmem>>, vector<1x1x128x32xbf16>
    %24 = vector.shape_cast %23 : vector<1x1x128x32xbf16> to vector<128x32xbf16>
    %cst_20 = arith.constant dense<0.000000e+00> : vector<64x32xf32>
    %25 = tpu.matmul %16, %24, %cst_20 {dimension_numbers = #tpu.dot_dimension_numbers<[1], [0], [0], [1], [0, 0, 1, 1], [], []>} : vector<64x128xbf16>, vector<128x32xbf16>, vector<64x32xf32> -> vector<64x32xf32>
    %26 = tpu.concatenate %19, %22, %25 in 0 : vector<64x32xf32>, vector<64x32xf32>, vector<64x32xf32> -> vector<192x32xf32>
    %27 = arith.truncf %26 : vector<192x32xf32> to vector<192x32xbf16>
    %c0_21 = arith.constant 0 : index
    %c0_22 = arith.constant 0 : index
    %28 = vector.load %arg4[%c0_21, %c0_22] : memref<32x64xbf16, #tpu.memory_space<vmem>>, vector<32x64xbf16>
    %cst_23 = arith.constant dense<0.000000e+00> : vector<192x64xf32>
    %29 = tpu.matmul %27, %28, %cst_23 {dimension_numbers = #tpu.dot_dimension_numbers<[1], [0], [0], [1], [0, 0, 1, 1], [], []>} : vector<192x32xbf16>, vector<32x64xbf16>, vector<192x64xf32> -> vector<192x64xf32>
    %c0_24 = arith.constant 0 : index
    %c0_25 = arith.constant 0 : index
    %30 = vector.load %arg5[%c0_24, %c0_25] : memref<3x64xf32, #tpu.memory_space<vmem>>, vector<1x64xf32>
    %31 = vector.broadcast %30 : vector<1x64xf32> to vector<192x64xf32>
    %32 = arith.addf %29, %31 : vector<192x64xf32>
    %c0_26 = arith.constant 0 : index
    %c0_27 = arith.constant 0 : index
    %33 = vector.load %arg6[%c0_26, %c0_27] : memref<64x8xf32, #tpu.memory_space<vmem>>, vector<64x8xf32>
    %c0_28 = arith.constant 0 : index
    %c0_29 = arith.constant 0 : index
    %34 = vector.load %arg7[%c0_28, %c0_29] : memref<8x64xf32, #tpu.memory_space<vmem>>, vector<8x64xf32>
    %cst_30 = arith.constant dense<0.000000e+00> : vector<192x8xf32>
    %35 = tpu.matmul %32, %33, %cst_30 {dimension_numbers = #tpu.dot_dimension_numbers<[1], [0], [0], [1], [0, 0, 1, 1], [], []>} : vector<192x64xf32>, vector<64x8xf32>, vector<192x8xf32> -> vector<192x8xf32>
    %cst_31 = arith.constant dense<0.000000e+00> : vector<192x64xf32>
    %36 = tpu.matmul %35, %34, %cst_31 {dimension_numbers = #tpu.dot_dimension_numbers<[1], [0], [0], [1], [0, 0, 1, 1], [], []>} : vector<192x8xf32>, vector<8x64xf32>, vector<192x64xf32> -> vector<192x64xf32>
    %37 = arith.subf %32, %36 : vector<192x64xf32>
    %38 = arith.mulf %37, %37 : vector<192x64xf32>
    %cst_32 = arith.constant dense<0.000000e+00> : vector<192x8xf32>
    %39 = tpu.matmul %38, %33, %cst_32 {dimension_numbers = #tpu.dot_dimension_numbers<[1], [0], [0], [1], [0, 0, 1, 1], [], []>} : vector<192x64xf32>, vector<64x8xf32>, vector<192x8xf32> -> vector<192x8xf32>
    %cst_33 = arith.constant dense<0.000000e+00> : vector<192x64xf32>
    %40 = tpu.matmul %39, %34, %cst_33 {dimension_numbers = #tpu.dot_dimension_numbers<[1], [0], [0], [1], [0, 0, 1, 1], [], []>} : vector<192x8xf32>, vector<8x64xf32>, vector<192x64xf32> -> vector<192x64xf32>
    %cst_34 = arith.constant 9.99999997E-7 : f32
    %41 = vector.broadcast %cst_34 : f32 to vector<192x64xf32>
    %42 = arith.addf %40, %41 : vector<192x64xf32>
    %43 = math.rsqrt %42 : vector<192x64xf32>
    %44 = arith.mulf %37, %43 : vector<192x64xf32>
    %c1_35 = arith.constant 1 : index
    %c0_36 = arith.constant 0 : index
    %45 = vector.load %arg5[%c1_35, %c0_36] : memref<3x64xf32, #tpu.memory_space<vmem>>, vector<1x64xf32>
    %46 = vector.broadcast %45 : vector<1x64xf32> to vector<192x64xf32>
    %47 = arith.mulf %44, %46 : vector<192x64xf32>
    %c2_37 = arith.constant 2 : index
    %c0_38 = arith.constant 0 : index
    %48 = vector.load %arg5[%c2_37, %c0_38] : memref<3x64xf32, #tpu.memory_space<vmem>>, vector<1x64xf32>
    %49 = vector.broadcast %48 : vector<1x64xf32> to vector<192x64xf32>
    %50 = arith.addf %47, %49 : vector<192x64xf32>
    %51 = arith.mulf %50, %50 : vector<192x64xf32>
    %52 = arith.mulf %50, %51 : vector<192x64xf32>
    %cst_39 = arith.constant 4.471500e-02 : f32
    %53 = vector.broadcast %cst_39 : f32 to vector<192x64xf32>
    %54 = arith.mulf %53, %52 : vector<192x64xf32>
    %55 = arith.addf %50, %54 : vector<192x64xf32>
    %cst_40 = arith.constant 0.797884583 : f32
    %56 = vector.broadcast %cst_40 : f32 to vector<192x64xf32>
    %57 = arith.mulf %56, %55 : vector<192x64xf32>
    %58 = math.tanh %57 : vector<192x64xf32>
    %cst_41 = arith.constant 1.000000e+00 : f32
    %59 = vector.broadcast %cst_41 : f32 to vector<192x64xf32>
    %60 = arith.addf %59, %58 : vector<192x64xf32>
    %cst_42 = arith.constant 5.000000e-01 : f32
    %61 = vector.broadcast %cst_42 : f32 to vector<192x64xf32>
    %62 = arith.mulf %61, %60 : vector<192x64xf32>
    %63 = arith.mulf %50, %62 : vector<192x64xf32>
    %64 = arith.truncf %63 : vector<192x64xf32> to vector<192x64xbf16>
    %c0_43 = arith.constant 0 : index
    %c0_44 = arith.constant 0 : index
    %65 = vector.load %arg8[%c0_43, %c0_44] : memref<64x128xbf16, #tpu.memory_space<vmem>>, vector<64x128xbf16>
    %cst_45 = arith.constant dense<0.000000e+00> : vector<192x128xf32>
    %66 = tpu.matmul %64, %65, %cst_45 {dimension_numbers = #tpu.dot_dimension_numbers<[1], [0], [0], [1], [0, 0, 1, 1], [], []>} : vector<192x64xbf16>, vector<64x128xbf16>, vector<192x128xf32> -> vector<192x128xf32>
    %c0_46 = arith.constant 0 : index
    %c0_47 = arith.constant 0 : index
    %67 = vector.load %arg9[%c0_46, %c0_47] : memref<3x128xf32, #tpu.memory_space<vmem>>, vector<1x128xf32>
    %68 = vector.broadcast %67 : vector<1x128xf32> to vector<192x128xf32>
    %69 = arith.addf %66, %68 : vector<192x128xf32>
    %c0_48 = arith.constant 0 : index
    %c0_49 = arith.constant 0 : index
    %70 = vector.load %arg10[%c0_48, %c0_49] : memref<128x16xf32, #tpu.memory_space<vmem>>, vector<128x16xf32>
    %c0_50 = arith.constant 0 : index
    %c0_51 = arith.constant 0 : index
    %71 = vector.load %arg11[%c0_50, %c0_51] : memref<16x128xf32, #tpu.memory_space<vmem>>, vector<16x128xf32>
    %cst_52 = arith.constant dense<0.000000e+00> : vector<192x16xf32>
    %72 = tpu.matmul %69, %70, %cst_52 {dimension_numbers = #tpu.dot_dimension_numbers<[1], [0], [0], [1], [0, 0, 1, 1], [], []>} : vector<192x128xf32>, vector<128x16xf32>, vector<192x16xf32> -> vector<192x16xf32>
    %cst_53 = arith.constant dense<0.000000e+00> : vector<192x128xf32>
    %73 = tpu.matmul %72, %71, %cst_53 {dimension_numbers = #tpu.dot_dimension_numbers<[1], [0], [0], [1], [0, 0, 1, 1], [], []>} : vector<192x16xf32>, vector<16x128xf32>, vector<192x128xf32> -> vector<192x128xf32>
    %74 = arith.subf %69, %73 : vector<192x128xf32>
    %75 = arith.mulf %74, %74 : vector<192x128xf32>
    %cst_54 = arith.constant dense<0.000000e+00> : vector<192x16xf32>
    %76 = tpu.matmul %75, %70, %cst_54 {dimension_numbers = #tpu.dot_dimension_numbers<[1], [0], [0], [1], [0, 0, 1, 1], [], []>} : vector<192x128xf32>, vector<128x16xf32>, vector<192x16xf32> -> vector<192x16xf32>
    %cst_55 = arith.constant dense<0.000000e+00> : vector<192x128xf32>
    %77 = tpu.matmul %76, %71, %cst_55 {dimension_numbers = #tpu.dot_dimension_numbers<[1], [0], [0], [1], [0, 0, 1, 1], [], []>} : vector<192x16xf32>, vector<16x128xf32>, vector<192x128xf32> -> vector<192x128xf32>
    %cst_56 = arith.constant 9.99999997E-7 : f32
    %78 = vector.broadcast %cst_56 : f32 to vector<192x128xf32>
    %79 = arith.addf %77, %78 : vector<192x128xf32>
    %80 = math.rsqrt %79 : vector<192x128xf32>
    %81 = arith.mulf %74, %80 : vector<192x128xf32>
    %c1_57 = arith.constant 1 : index
    %c0_58 = arith.constant 0 : index
    %82 = vector.load %arg9[%c1_57, %c0_58] : memref<3x128xf32, #tpu.memory_space<vmem>>, vector<1x128xf32>
    %83 = vector.broadcast %82 : vector<1x128xf32> to vector<192x128xf32>
    %84 = arith.mulf %81, %83 : vector<192x128xf32>
    %c2_59 = arith.constant 2 : index
    %c0_60 = arith.constant 0 : index
    %85 = vector.load %arg9[%c2_59, %c0_60] : memref<3x128xf32, #tpu.memory_space<vmem>>, vector<1x128xf32>
    %86 = vector.broadcast %85 : vector<1x128xf32> to vector<192x128xf32>
    %87 = arith.addf %84, %86 : vector<192x128xf32>
    %88 = arith.mulf %87, %87 : vector<192x128xf32>
    %89 = arith.mulf %87, %88 : vector<192x128xf32>
    %cst_61 = arith.constant 4.471500e-02 : f32
    %90 = vector.broadcast %cst_61 : f32 to vector<192x128xf32>
    %91 = arith.mulf %90, %89 : vector<192x128xf32>
    %92 = arith.addf %87, %91 : vector<192x128xf32>
    %cst_62 = arith.constant 0.797884583 : f32
    %93 = vector.broadcast %cst_62 : f32 to vector<192x128xf32>
    %94 = arith.mulf %93, %92 : vector<192x128xf32>
    %95 = math.tanh %94 : vector<192x128xf32>
    %cst_63 = arith.constant 1.000000e+00 : f32
    %96 = vector.broadcast %cst_63 : f32 to vector<192x128xf32>
    %97 = arith.addf %96, %95 : vector<192x128xf32>
    %cst_64 = arith.constant 5.000000e-01 : f32
    %98 = vector.broadcast %cst_64 : f32 to vector<192x128xf32>
    %99 = arith.mulf %98, %97 : vector<192x128xf32>
    %100 = arith.mulf %87, %99 : vector<192x128xf32>
    %101 = arith.truncf %100 : vector<192x128xf32> to vector<192x128xbf16>
    %c0_65 = arith.constant 0 : index
    %c0_66 = arith.constant 0 : index
    %102 = vector.load %arg12[%c0_65, %c0_66] : memref<128x256xbf16, #tpu.memory_space<vmem>>, vector<128x256xbf16>
    %cst_67 = arith.constant dense<0.000000e+00> : vector<192x256xf32>
    %103 = tpu.matmul %101, %102, %cst_67 {dimension_numbers = #tpu.dot_dimension_numbers<[1], [0], [0], [1], [0, 0, 1, 1], [], []>} : vector<192x128xbf16>, vector<128x256xbf16>, vector<192x256xf32> -> vector<192x256xf32>
    %c0_68 = arith.constant 0 : index
    %c0_69 = arith.constant 0 : index
    %104 = vector.load %arg13[%c0_68, %c0_69] : memref<3x256xf32, #tpu.memory_space<vmem>>, vector<1x256xf32>
    %105 = vector.broadcast %104 : vector<1x256xf32> to vector<192x256xf32>
    %106 = arith.addf %103, %105 : vector<192x256xf32>
    %c0_70 = arith.constant 0 : index
    %c0_71 = arith.constant 0 : index
    %107 = vector.load %arg14[%c0_70, %c0_71] : memref<256x64xf32, #tpu.memory_space<vmem>>, vector<256x64xf32>
    %c0_72 = arith.constant 0 : index
    %c0_73 = arith.constant 0 : index
    %108 = vector.load %arg15[%c0_72, %c0_73] : memref<64x256xf32, #tpu.memory_space<vmem>>, vector<64x256xf32>
    %cst_74 = arith.constant dense<0.000000e+00> : vector<192x64xf32>
    %109 = tpu.matmul %106, %107, %cst_74 {dimension_numbers = #tpu.dot_dimension_numbers<[1], [0], [0], [1], [0, 0, 1, 1], [], []>} : vector<192x256xf32>, vector<256x64xf32>, vector<192x64xf32> -> vector<192x64xf32>
    %cst_75 = arith.constant dense<0.000000e+00> : vector<192x256xf32>
    %110 = tpu.matmul %109, %108, %cst_75 {dimension_numbers = #tpu.dot_dimension_numbers<[1], [0], [0], [1], [0, 0, 1, 1], [], []>} : vector<192x64xf32>, vector<64x256xf32>, vector<192x256xf32> -> vector<192x256xf32>
    %111 = arith.subf %106, %110 : vector<192x256xf32>
    %112 = arith.mulf %111, %111 : vector<192x256xf32>
    %cst_76 = arith.constant dense<0.000000e+00> : vector<192x64xf32>
    %113 = tpu.matmul %112, %107, %cst_76 {dimension_numbers = #tpu.dot_dimension_numbers<[1], [0], [0], [1], [0, 0, 1, 1], [], []>} : vector<192x256xf32>, vector<256x64xf32>, vector<192x64xf32> -> vector<192x64xf32>
    %cst_77 = arith.constant dense<0.000000e+00> : vector<192x256xf32>
    %114 = tpu.matmul %113, %108, %cst_77 {dimension_numbers = #tpu.dot_dimension_numbers<[1], [0], [0], [1], [0, 0, 1, 1], [], []>} : vector<192x64xf32>, vector<64x256xf32>, vector<192x256xf32> -> vector<192x256xf32>
    %cst_78 = arith.constant 9.99999997E-7 : f32
    %115 = vector.broadcast %cst_78 : f32 to vector<192x256xf32>
    %116 = arith.addf %114, %115 : vector<192x256xf32>
    %117 = math.rsqrt %116 : vector<192x256xf32>
    %118 = arith.mulf %111, %117 : vector<192x256xf32>
    %c1_79 = arith.constant 1 : index
    %c0_80 = arith.constant 0 : index
    %119 = vector.load %arg13[%c1_79, %c0_80] : memref<3x256xf32, #tpu.memory_space<vmem>>, vector<1x256xf32>
    %120 = vector.broadcast %119 : vector<1x256xf32> to vector<192x256xf32>
    %121 = arith.mulf %118, %120 : vector<192x256xf32>
    %c2_81 = arith.constant 2 : index
    %c0_82 = arith.constant 0 : index
    %122 = vector.load %arg13[%c2_81, %c0_82] : memref<3x256xf32, #tpu.memory_space<vmem>>, vector<1x256xf32>
    %123 = vector.broadcast %122 : vector<1x256xf32> to vector<192x256xf32>
    %124 = arith.addf %121, %123 : vector<192x256xf32>
    %125 = arith.mulf %124, %124 : vector<192x256xf32>
    %126 = arith.mulf %124, %125 : vector<192x256xf32>
    %cst_83 = arith.constant 4.471500e-02 : f32
    %127 = vector.broadcast %cst_83 : f32 to vector<192x256xf32>
    %128 = arith.mulf %127, %126 : vector<192x256xf32>
    %129 = arith.addf %124, %128 : vector<192x256xf32>
    %cst_84 = arith.constant 0.797884583 : f32
    %130 = vector.broadcast %cst_84 : f32 to vector<192x256xf32>
    %131 = arith.mulf %130, %129 : vector<192x256xf32>
    %132 = math.tanh %131 : vector<192x256xf32>
    %cst_85 = arith.constant 1.000000e+00 : f32
    %133 = vector.broadcast %cst_85 : f32 to vector<192x256xf32>
    %134 = arith.addf %133, %132 : vector<192x256xf32>
    %cst_86 = arith.constant 5.000000e-01 : f32
    %135 = vector.broadcast %cst_86 : f32 to vector<192x256xf32>
    %136 = arith.mulf %135, %134 : vector<192x256xf32>
    %137 = arith.mulf %124, %136 : vector<192x256xf32>
    %138 = arith.truncf %137 : vector<192x256xf32> to vector<192x256xbf16>
    %c0_87 = arith.constant 0 : index
    %c0_88 = arith.constant 0 : index
    %139 = vector.load %arg16[%c0_87, %c0_88] : memref<256x64xbf16, #tpu.memory_space<vmem>>, vector<256x64xbf16>
    %cst_89 = arith.constant dense<0.000000e+00> : vector<192x64xf32>
    %140 = tpu.matmul %138, %139, %cst_89 {dimension_numbers = #tpu.dot_dimension_numbers<[1], [0], [0], [1], [0, 0, 1, 1], [], []>} : vector<192x256xbf16>, vector<256x64xbf16>, vector<192x64xf32> -> vector<192x64xf32>
    %c0_90 = arith.constant 0 : index
    %c0_91 = arith.constant 0 : index
    %141 = vector.load %arg17[%c0_90, %c0_91] : memref<1x64xf32, #tpu.memory_space<vmem>>, vector<1x64xf32>
    %142 = vector.broadcast %141 : vector<1x64xf32> to vector<192x64xf32>
    %143 = arith.addf %140, %142 : vector<192x64xf32>
    %c0_92 = arith.constant 0 : index
    %c0_93 = arith.constant 0 : index
    %c0_94 = arith.constant 0 : index
    %144 = vector.load %arg18[%c0_92, %c0_93, %c0_94] : memref<1x192x64xf32, #tpu.memory_space<vmem>>, vector<1x192x64xf32>
    %145 = vector.shape_cast %144 : vector<1x192x64xf32> to vector<192x64xf32>
    %146 = vector.shape_cast %143 : vector<192x64xf32> to vector<1x192x64xf32>
    tpu.vector_store %arg18[%c0_92, %c0_93, %c0_94], %146 {strides = array<i32>} : memref<1x192x64xf32, #tpu.memory_space<vmem>>, vector<1x192x64xf32>,
    return
  }
  func.func @transform_0(%arg0: i32) -> (i32, i32, i32) {
    %c0_i32 = arith.constant 0 : i32
    %c0_i32_0 = arith.constant 0 : i32
    %c0_i32_1 = arith.constant 0 : i32
    return %arg0, %c0_i32, %c0_i32_0 : i32, i32, i32
  }
  func.func @transform_1(%arg0: i32) -> (i32, i32, i32) {
    %c0_i32 = arith.constant 0 : i32
    %c0_i32_0 = arith.constant 0 : i32
    %c0_i32_1 = arith.constant 0 : i32
    return %arg0, %c0_i32, %c0_i32_0 : i32, i32, i32
  }
  func.func @transform_2(%arg0: i32) -> (i32, i32, i32, i32) {
    %c0_i32 = arith.constant 0 : i32
    %c0_i32_0 = arith.constant 0 : i32
    %c0_i32_1 = arith.constant 0 : i32
    %c0_i32_2 = arith.constant 0 : i32
    return %arg0, %c0_i32, %c0_i32_0, %c0_i32_1 : i32, i32, i32, i32
  }
  func.func @transform_3(%arg0: i32) -> (i32, i32) {
    %c0_i32 = arith.constant 0 : i32
    %c0_i32_0 = arith.constant 0 : i32
    %c0_i32_1 = arith.constant 0 : i32
    return %c0_i32, %c0_i32_0 : i32, i32
  }
  func.func @transform_4(%arg0: i32) -> (i32, i32) {
    %c0_i32 = arith.constant 0 : i32
    %c0_i32_0 = arith.constant 0 : i32
    %c0_i32_1 = arith.constant 0 : i32
    return %c0_i32, %c0_i32_0 : i32, i32
  }
  func.func @transform_5(%arg0: i32) -> (i32, i32) {
    %c0_i32 = arith.constant 0 : i32
    %c0_i32_0 = arith.constant 0 : i32
    %c0_i32_1 = arith.constant 0 : i32
    return %c0_i32, %c0_i32_0 : i32, i32
  }
  func.func @transform_6(%arg0: i32) -> (i32, i32) {
    %c0_i32 = arith.constant 0 : i32
    %c0_i32_0 = arith.constant 0 : i32
    %c0_i32_1 = arith.constant 0 : i32
    return %c0_i32, %c0_i32_0 : i32, i32
  }
  func.func @transform_7(%arg0: i32) -> (i32, i32) {
    %c0_i32 = arith.constant 0 : i32
    %c0_i32_0 = arith.constant 0 : i32
    %c0_i32_1 = arith.constant 0 : i32
    return %c0_i32, %c0_i32_0 : i32, i32
  }
  func.func @transform_8(%arg0: i32) -> (i32, i32) {
    %c0_i32 = arith.constant 0 : i32
    %c0_i32_0 = arith.constant 0 : i32
    %c0_i32_1 = arith.constant 0 : i32
    return %c0_i32, %c0_i32_0 : i32, i32
  }
  func.func @transform_9(%arg0: i32) -> (i32, i32) {
    %c0_i32 = arith.constant 0 : i32
    %c0_i32_0 = arith.constant 0 : i32
    %c0_i32_1 = arith.constant 0 : i32
    return %c0_i32, %c0_i32_0 : i32, i32
  }
  func.func @transform_10(%arg0: i32) -> (i32, i32) {
    %c0_i32 = arith.constant 0 : i32
    %c0_i32_0 = arith.constant 0 : i32
    %c0_i32_1 = arith.constant 0 : i32
    return %c0_i32, %c0_i32_0 : i32, i32
  }
  func.func @transform_11(%arg0: i32) -> (i32, i32) {
    %c0_i32 = arith.constant 0 : i32
    %c0_i32_0 = arith.constant 0 : i32
    %c0_i32_1 = arith.constant 0 : i32
    return %c0_i32, %c0_i32_0 : i32, i32
  }
  func.func @transform_12(%arg0: i32) -> (i32, i32) {
    %c0_i32 = arith.constant 0 : i32
    %c0_i32_0 = arith.constant 0 : i32
    %c0_i32_1 = arith.constant 0 : i32
    return %c0_i32, %c0_i32_0 : i32, i32
  }
  func.func @transform_13(%arg0: i32) -> (i32, i32) {
    %c0_i32 = arith.constant 0 : i32
    %c0_i32_0 = arith.constant 0 : i32
    %c0_i32_1 = arith.constant 0 : i32
    return %c0_i32, %c0_i32_0 : i32, i32
  }
  func.func @transform_14(%arg0: i32) -> (i32, i32) {
    %c0_i32 = arith.constant 0 : i32
    %c0_i32_0 = arith.constant 0 : i32
    %c0_i32_1 = arith.constant 0 : i32
    return %c0_i32, %c0_i32_0 : i32, i32
  }
  func.func @transform_15(%arg0: i32) -> (i32, i32) {
    %c0_i32 = arith.constant 0 : i32
    %c0_i32_0 = arith.constant 0 : i32
    %c0_i32_1 = arith.constant 0 : i32
    return %c0_i32, %c0_i32_0 : i32, i32
  }
  func.func @transform_16(%arg0: i32) -> (i32, i32) {
    %c0_i32 = arith.constant 0 : i32
    %c0_i32_0 = arith.constant 0 : i32
    %c0_i32_1 = arith.constant 0 : i32
    return %c0_i32, %c0_i32_0 : i32, i32
  }
  func.func @transform_17(%arg0: i32) -> (i32, i32, i32) {
    %c0_i32 = arith.constant 0 : i32
    %c0_i32_0 = arith.constant 0 : i32
    %c0_i32_1 = arith.constant 0 : i32
    return %arg0, %c0_i32, %c0_i32_0 : i32, i32, i32
  }
}

</mosaic_0001>

<bundles_post_ra>
// kernel: affinity_decoder_forward.1
= control target key start
LH: loop header
LB: loop body
LE: loop exit
PB: predicated region body
PF: predicated region fallthrough
CT: control target
= control target key end

     0   :  { %s12380_s0 = inlined_call_operand.vmem [shape: bf16[2,64,32], index: 0, kind: input, shape index: {}]   ;;  %s12381_s1 = inlined_call_operand.vmem [shape: bf16[2,128,32], index: 1, kind: input, shape index: {}]   ;;  %s12382_s2 = inlined_call_operand.vmem [shape: bf16[2,3,128,32], index: 2, kind: input, shape index: {}]   ;;  %s12383_s3 = inlined_call_operand.hbm [shape: bf16[32,64], index: 3, kind: input, shape index: {}]   ;;  %s12384_s4 = inlined_call_operand.hbm [shape: f32[3,64], index: 4, kind: input, shape index: {}]   ;;  %s12385_s5 = inlined_call_operand.vmem [shape: f32[64,8], index: 5, kind: input, shape index: {}]   ;;  %s12386_s6 = inlined_call_operand.hbm [shape: f32[8,64], index: 6, kind: input, shape index: {}]   ;;  %s12387_s7 = inlined_call_operand.hbm [shape: bf16[64,128], index: 7, kind: input, shape index: {}]   ;;  %s12388_s8 = inlined_call_operand.hbm [shape: f32[3,128], index: 8, kind: input, shape index: {}]   ;;  %s12389_s9 = inlined_call_operand.vmem [shape: f32[128,16], index: 9, kind: input, shape index: {}]   ;;  %s12390_s10 = inlined_call_operand.hbm [shape: f32[16,128], index: 10, kind: input, shape index: {}]   ;;  %s12391_s11 = inlined_call_operand.hbm [shape: bf16[128,256], index: 11, kind: input, shape index: {}]   ;;  %s12392_s12 = inlined_call_operand.hbm [shape: f32[3,256], index: 12, kind: input, shape index: {}]   ;;  %s12393_s13 = inlined_call_operand.vmem [shape: f32[256,64], index: 13, kind: input, shape index: {}]   ;;  %s12394_s14 = inlined_call_operand.hbm [shape: f32[64,256], index: 14, kind: input, shape index: {}]   ;;  %s12395_s15 = inlined_call_operand.vmem [shape: bf16[256,64], index: 15, kind: input, shape index: {}]   ;;  %s12396_s16 = inlined_call_operand.hbm [shape: f32[1,64], index: 16, kind: input, shape index: {}]   ;;  %s12397_s17 = inlined_call_operand.vmem [shape: f32[2,192,64], index: 17, kind: output, shape index: {}]  }
   0x1   :  { %12418 = sst [smem:[#allocation43_spill]] %s12380_s0 }
   0x2   :  { %12419 = sst [smem:[#allocation44_spill]] %s12381_s1 }
   0x3   :  { %12420 = sst [smem:[#allocation45_spill]] %s12384_s4 }
   0x4   :  { %12421 = sst [smem:[#allocation46_spill]] %s12387_s7 }
   0x5   :  { %12422 = sst [smem:[#allocation47_spill]] %s12390_s10 }
   0x6   :  { %12423 = sst [smem:[#allocation48_spill]] %s12395_s15 }
   0x7   :  { %12424 = sst [smem:[#allocation49_spill]] %s12397_s17 }
   0x8   :  { %22 = vsyncpa [#allocation3], 0 }
   0x9   :  { %23 = vsyncpa [#allocation5], 0 }
   0xa   :  { %24 = vsyncpa [#allocation8], 0 }
   0xb   :  { %25 = vsyncpa [#allocation11], 0 }
   0xc   :  { %26 = vsyncpa [#allocation14], 0 }
   0xd   :  { %27 = vsyncpa [#allocation17], 0  ;;  %s8506_s24 = smov 0  }
   0xe LB: > { %12425 = sst [smem:[#allocation24_spill]] %s8398_s24  ;;  %s8515_s28 = sadd.s32 4294967295, %s8398_s24   ;;  %s8398_s24 = sphi %s8506_s24, %s33_s24  }
   0xf   : > { %s12426_s4 = sld [smem:[#allocation45_spill]]  ;;  %p6804_p0 = scmp.ge.s32.totalorder %s8398_s24, 1 }
  0x10   : > { %p436_p1 = scmp.lt.s32.totalorder %s8398_s24, 3  ;;  %p7587_p2 = scmp.eq.s32.totalorder %s8515_s28, 0 }
  0x11   : > { %s8400_s0 = smov [#allocation4]   ;;  %s12428_s7 = sld [smem:[#allocation46_spill]] }
  0x12   : > { %p8520_p3 = pnand %p6804_p0, %p436_p1  ;;  %s464_s30 = sshll.u32 %s8400_s0, 4  ;;  %s465_s30 = int_to_ptr.vmem [resolvable:$true] %s464_s30 }
  0x13   : > { %s8401_s21 = smov [#allocation7]   ;;  %s12430_s10 = sld [smem:[#allocation47_spill]] }
  0x14   : > { %p7556_p4 = pneg %p8520_p3  ;;  %s490_s22 = sshll.u32 %s8401_s21, 4  ;;  %s491_s22 = int_to_ptr.vmem [resolvable:$true] %s490_s22 }
  0x15   : > { %s462_s27 = sshll.u32 %s12426_s4, 4  ;;  %s8402_s0 = smov 64   ;;  %s463_s27 = int_to_ptr.hbm [resolvable:$true] %s462_s27 }
  0x16   : > { %p8531_p5 = pnand %p7587_p2, %p7556_p4  ;;  %s8403_s18 = smov 4  }
  0x17   : > { %s488_s1 = sshll.u32 %s12428_s7, 4  ;;  %s8404_s19 = smov [#allocation10]   ;;  %s489_s1 = int_to_ptr.hbm [resolvable:$true] %s488_s1 }
  0x18   : > { %7562 = dma.hbm_to_vmem [thread:$0]  (!%p8531_p5), %s463_s27, 64, %s465_s30, [#allocation5]  }
  0x19   : > { %s517_s26 = sshll.u32 %s12430_s10, 4  ;;  %s519_s4 = sshll.u32 %s8404_s19, 4  ;;  %s518_s26 = int_to_ptr.hbm [resolvable:$true] %s517_s26  ;;  %s520_s4 = int_to_ptr.vmem [resolvable:$true] %s519_s4 }
  0x1a   : > { %7568 = dma.hbm_to_vmem [thread:$0]  (!%p8531_p5), %s489_s1, 512, %s491_s22, [#allocation8], %s8402_s0, %s8402_s0, %s8403_s18  }
  0x1b   : > { %s8405_s7 = smov 128   ;;  %s8406_s24 = smov 8  }
  0x1c   : > { %7574 = dma.hbm_to_vmem [thread:$0]  (!%p8531_p5), %s518_s26, 256, %s520_s4, [#allocation11], %s8405_s7, %s8405_s7, %s8406_s24  }
  0x1d   : > { %s546_s27 = sshll.u32 %s12392_s12, 4  ;;  %s8407_s30 = smov [#allocation13]   ;;  %s547_s27 = int_to_ptr.hbm [resolvable:$true] %s546_s27 }
  0x1e   : > { %s548_s25 = sshll.u32 %s8407_s30, 4  ;;  %s447_s19 = sshll.u32 %s12383_s3, 4  ;;  %s549_s25 = int_to_ptr.vmem [resolvable:$true] %s548_s25  ;;  %s448_s19 = int_to_ptr.hbm [resolvable:$true] %s447_s19 }
  0x1f   : > { %7580 = dma.hbm_to_vmem [thread:$0]  (!%p8531_p5), %s547_s27, 128, %s549_s25, [#allocation14]  }
  0x20   : > { %s8408_s10 = smov [#allocation2]   ;;  %s477_s26 = sshll.u32 %s12386_s6, 4  ;;  %s478_s26 = int_to_ptr.hbm [resolvable:$true] %s477_s26 }
  0x21   : > { %s449_s17 = sshll.u32 %s8408_s10, 4  ;;  %s503_s30 = sshll.u32 %s12388_s8, 4  ;;  %s450_s17 = int_to_ptr.vmem [resolvable:$true] %s449_s17  ;;  %s504_s30 = int_to_ptr.hbm [resolvable:$true] %s503_s30 }
  0x22   : > { %7559 = dma.hbm_to_vmem [thread:$0]  (!%p8531_p5), %s448_s19, 256, %s450_s17, [#allocation3], %s8402_s0, %s8402_s0, %s8403_s18  }
  0x23   : > { %s8409_s1 = smov [#allocation6]   ;;  %s8410_s10 = smov [#allocation9]  }
  0x24   : > { %s479_s22 = sshll.u32 %s8409_s1, 4  ;;  %s505_s27 = sshll.u32 %s8410_s10, 4  ;;  %s480_s22 = int_to_ptr.vmem [resolvable:$true] %s479_s22  ;;  %s506_s27 = int_to_ptr.vmem [resolvable:$true] %s505_s27 }
  0x25   : > { %7565 = dma.hbm_to_vmem [thread:$0]  (!%p8531_p5), %s478_s26, 128, %s480_s22, [#allocation5]  }
  0x26   : > { %s531_s4 = sshll.u32 %s12391_s11, 4  ;;  %s560_s18 = sshll.u32 %s12394_s14, 4  ;;  %s532_s4 = int_to_ptr.hbm [resolvable:$true] %s531_s4  ;;  %s561_s18 = int_to_ptr.hbm [resolvable:$true] %s560_s18 }
  0x27   : > { %7571 = dma.hbm_to_vmem [thread:$0]  (!%p8531_p5), %s504_s30, 64, %s506_s27, [#allocation8]  }
  0x28   : > { %s8411_s19 = smov [#allocation12]   ;;  %s8412_s26 = smov [#allocation15]  }
  0x29   : > { %s533_s21 = sshll.u32 %s8411_s19, 4  ;;  %s562_s23 = sshll.u32 %s8412_s26, 4  ;;  %s534_s21 = int_to_ptr.vmem [resolvable:$true] %s533_s21  ;;  %s563_s23 = int_to_ptr.vmem [resolvable:$true] %s562_s23 }
  0x2a   : > { %7577 = dma.hbm_to_vmem [thread:$0]  (!%p8531_p5), %s532_s4, 2048, %s534_s21, [#allocation11], %s8405_s7, %s8405_s7, %s8406_s24  }
  0x2b   : > { %s8413_s1 = smov 256   ;;  %s8414_s22 = smov 16  }
  0x2c   : > { %7583 = dma.hbm_to_vmem [thread:$0]  (!%p8531_p5), %s561_s18, 2048, %s563_s23, [#allocation14], %s8413_s1, %s8413_s1, %s8414_s22  }
  0x2d   : > { %s578_s27 = sshll.u32 %s12396_s16, 4  ;;  %s8415_s15 = smov [#allocation16]   ;;  %s579_s27 = int_to_ptr.hbm [resolvable:$true] %s578_s27 }
  0x2e   : > { %s580_s25 = sshll.u32 %s8415_s15, 4  ;;  %617 = sbr.rel (%p8520_p3) target bundleno = 3266 (0xcc2), region = 88  ;;  %s581_s25 = int_to_ptr.vmem [resolvable:$true] %s580_s25 }
  0x2f   : > { %7586 = dma.hbm_to_vmem [thread:$0]  (!%p8531_p5), %s579_s27, 16, %s581_s25, [#allocation17]  }
  0x33   : > { %8373 = dma.done.wait (%p7587_p2), [#allocation3], 256  }
  0x34   : > { %8375 = vsyncadd (%p7587_p2), [#allocation3], 4294967040 }
  0x35   : > { %8377 = dma.done.wait (%p7587_p2), [#allocation5], 192  }
  0x36   : > { %8379 = vsyncadd (%p7587_p2), [#allocation5], 4294967104 }
  0x37   : > { %8381 = dma.done.wait (%p7587_p2), [#allocation8], 576  }
  0x38   : > { %8383 = vsyncadd (%p7587_p2), [#allocation8], 4294966720 }
  0x39   : > { %8385 = dma.done.wait (%p7587_p2), [#allocation11], 2304  }
  0x3a   : > { %8387 = vsyncadd (%p7587_p2), [#allocation11], 4294964992 }
  0x3b   : > { %8389 = dma.done.wait (%p7587_p2), [#allocation14], 2176  }
  0x3c   : > { %8391 = vsyncadd (%p7587_p2), [#allocation14], 4294965120 }
  0x3d   : > { %8393 = dma.done.wait (%p7587_p2), [#allocation17], 16  }
  0x3e   : > { %8395 = vsyncadd (%p7587_p2), [#allocation17], 4294967280  ;;  %p725_p6 = scmp.lt.s32.totalorder %s8515_s28, 1  ;;  %s12431_s20 = sld [smem:[#allocation44_spill]]  ;;  %vm830_vm0 = vcmask 261120  }
  0x3f   : > { %s12432_s19 = sld [smem:[#allocation43_spill]] }
  0x40   : > { %s12547_s28 = smov (!%p725_p6, %s8515_s28), 1  ;;  %s12541_s24 = sld [smem:[#allocation49_spill]] }
  0x41   : > { %s7432_s7 = sshll.u32 %s12547_s28, 6  ;;  %s7431_s17 = sshll.u32 %s12547_s28, 5 }
  0x42   : > { %s7515_s26 = smul.u32 192, %s12547_s28 }
  0x44   : > { %s734_s4 = scalar_lea.vmem %s12431_s20, %s7432_s7  ;;  %s8650_s22 = scalar_lea.vmem %s12382_s2, %s7515_s26 }
  0x45   : > { %v7444_v0 = vld [vmem:[%s734_s4 + $0x38] sm:$0xff]  ;;  %v7443_v2 = vld [vmem:[%s734_s4 + $0x30] sm:$0xff]  ;;  %v7442_v4 = vld [vmem:[%s734_s4 + $0x28] sm:$0xff]  ;;  %s729_s21 = scalar_lea.vmem %s12432_s19, %s7431_s17  ;;  %s12439_s20 = sld [smem:[#allocation48_spill]] }
  0x46   : > { %v865_v1 = vsel %vm830_vm0, %v7444_v0, 0  ;;  %v862_v3 = vsel %vm830_vm0, %v7443_v2, 0  ;;  %v859_v5 = vsel %vm830_vm0, %v7442_v4, 0  ;;  %v7441_v6 = vld [vmem:[%s734_s4 + $0x20] sm:$0xff]  ;;  %v7440_v8 = vld [vmem:[%s734_s4 + $0x18] sm:$0xff]  ;;  %v7439_v10 = vld [vmem:[%s734_s4 + $0x10] sm:$0xff]  ;;  %s12188_s29 = scalar_lea.vmem %s12541_s24, %s7515_s26 }
  0x47   : > { %867 = vmatpush.bf16.xpose.msra.mxu0 %v865_v1  ;;  %v856_v7 = vsel %vm830_vm0, %v7441_v6, 0  ;;  %v853_v9 = vsel %vm830_vm0, %v7440_v8, 0  ;;  %v850_v11 = vsel %vm830_vm0, %v7439_v10, 0  ;;  %v7438_v12 = vld [vmem:[%s734_s4 + $0x8] sm:$0xff]  ;;  %v7437_v14 = vld [vmem:[%s734_s4] sm:$0xff]  ;;  %v7435_v18 = vld [vmem:[%s729_s21 + $0x10] sm:$0xff] }
  0x48   : > { %v847_v13 = vsel %vm830_vm0, %v7438_v12, 0  ;;  %v844_v15 = vsel %vm830_vm0, %v7437_v14, 0  ;;  %v7433_v16 = vld [vmem:[%s729_s21] sm:$0xff]  ;;  %v7434_v17 = vld [vmem:[%s729_s21 + $0x8] sm:$0xff]  ;;  %v7436_v19 = vld [vmem:[%s729_s21 + $0x18] sm:$0xff] }
  0x49   : > { %v7452_v55 = vld [vmem:[%s8650_s22 + $0x38] sm:$0xff]  ;;  %v7451_v6 = vld [vmem:[%s8650_s22 + $0x30] sm:$0xff]  ;;  %v7450_v8 = vld [vmem:[%s8650_s22 + $0x28] sm:$0xff] }
  0x4a   : > { %v7460_v56 = vld [vmem:[%s8650_s22 + $0x78] sm:$0xff]  ;;  %1148 = vmatpush.bf16.msra.mxu3 %v7452_v55  ;;  %v7449_v10 = vld [vmem:[%s8650_s22 + $0x20] sm:$0xff]  ;;  %v7447_v14 = vld [vmem:[%s8650_s22 + $0x10] sm:$0xff] }
  0x4b   : > { %v7448_v12 = vld [vmem:[%s8650_s22 + $0x18] sm:$0xff] }
  0x4e   : > { %1149 = vmatpush.bf16.msra.mxu3 %v7451_v6 }
  0x4f   : > { %868 = vmatpush.bf16.xpose.msra.mxu0 %v862_v3 }
  0x52   : > { %1150 = vmatpush.bf16.msra.mxu3 %v7450_v8 }
  0x56   : > { %1151 = vmatpush.bf16.msra.mxu3 %v7449_v10  ;;  %v7466_v10 = vld [vmem:[%s8650_s22 + $0xa8] sm:$0xff] }
  0x57   : > { %869 = vmatpush.bf16.xpose.msra.mxu0 %v859_v5 }
  0x5a   : > { %1152 = vmatpush.bf16.msra.mxu3 %v7448_v12 }
  0x5e   : > { %1153 = vmatpush.bf16.msra.mxu3 %v7447_v14 }
  0x5f   : > { %870 = vmatpush.bf16.xpose.msra.mxu0 %v856_v7  ;;  %v7459_v7 = vld [vmem:[%s8650_s22 + $0x70] sm:$0xff] }
  0x67   : > { %871 = vmatpush.bf16.xpose.msra.mxu0 %v853_v9  ;;  %v7458_v9 = vld [vmem:[%s8650_s22 + $0x68] sm:$0xff] }
  0x6f   : > { %872 = vmatpush.bf16.xpose.msra.mxu0 %v850_v11  ;;  %v7457_v11 = vld [vmem:[%s8650_s22 + $0x60] sm:$0xff] }
  0x77   : > { %873 = vmatpush.bf16.xpose.msra.mxu0 %v847_v13  ;;  %v7456_v13 = vld [vmem:[%s8650_s22 + $0x58] sm:$0xff] }
  0x7f   : > { %874 = vmatpush.bf16.xpose.msra.mxu0 %v844_v15  ;;  %v7455_v15 = vld [vmem:[%s8650_s22 + $0x50] sm:$0xff] }
  0x86   : > { %6881 = vmatmul.msk.bf16.vlgmr.msra.gmra.mxu0 %vm830_vm0, %v7433_v16  ;;  %v7446_v16 = vld [vmem:[%s8650_s22 + $0x8] sm:$0xff] }
  0x87   : > { %1242 = vmatpush.bf16.msrb.mxu0 %v7460_v56  ;;  %1154 = vmatpush.bf16.msra.mxu3 %v7446_v16  ;;  %v7468_v56 = vld [vmem:[%s8650_s22 + $0xb8] sm:$0xff] }
  0x8b   : > { %1243 = vmatpush.bf16.msrb.mxu0 %v7459_v7 }
  0x8f   : > { %1244 = vmatpush.bf16.msrb.mxu0 %v7458_v9 }
  0x93   : > { %1245 = vmatpush.bf16.msrb.mxu0 %v7457_v11 }
  0x96   : > { %6882 = vmatmul.msk.bf16.gmra.mxu0 %vm830_vm0, %v7434_v17  ;;  %v7454_v17 = vld [vmem:[%s8650_s22 + $0x48] sm:$0xff] }
  0x97   : > { %1246 = vmatpush.bf16.msrb.mxu0 %v7456_v13 }
  0x9b   : > { %1247 = vmatpush.bf16.msrb.mxu0 %v7455_v15 }
  0x9f   : > { %1248 = vmatpush.bf16.msrb.mxu0 %v7454_v17  ;;  %v7465_v17 = vld [vmem:[%s8650_s22 + $0xa0] sm:$0xff] }
  0xa6   : > { %6883 = vmatmul.msk.bf16.gmra.mxu0 %vm830_vm0, %v7435_v18  ;;  %v7445_v18 = vld [vmem:[%s8650_s22] sm:$0xff] }
  0xa7   : > { %1155 = vmatpush.bf16.msra.mxu3 %v7445_v18 }
  0xab   : > { %1336 = vmatpush.bf16.msrb.mxu3 %v7468_v56 }
  0xb6   : > { %6884 = vmatmul.msk.bf16.gmra.mxu0 %vm830_vm0, %v7436_v19  ;;  %v7453_v19 = vld [vmem:[%s8650_s22 + $0x40] sm:$0xff] }
  0xb7   : > { %1249 = vmatpush.bf16.msrb.mxu0 %v7453_v19 }
 0x103   : > { %v876_v20 = vpop.f32.mrf.mxu0 }
 0x104   : > { %v896_v21 = vmul.f32 0.17677669, %v876_v20 }
 0x106   : > { %904 = vmax.xlane.f32.xlu0 %v896_v21 }
 0x10b   : > { %v878_v22 = vpop.f32.mrf.mxu0 }
 0x10c   : > { %v897_v23 = vmul.f32 0.17677669, %v878_v22 }
 0x10e   : > { %906 = vmax.xlane.f32.xlu0 %v897_v23 }
 0x113   : > { %v881_v24 = vpop.f32.mrf.mxu0 }
 0x114   : > { %v898_v25 = vmul.f32 0.17677669, %v881_v24 }
 0x116   : > { %908 = vmax.xlane.f32.xlu1 %v898_v25 }
 0x11b   : > { %v883_v26 = vpop.f32.mrf.mxu0 }
 0x11c   : > { %v899_v27 = vmul.f32 0.17677669, %v883_v26 }
 0x11e   : > { %910 = vmax.xlane.f32.xlu1 %v899_v27 }
 0x123   : > { %v886_v28 = vpop.f32.mrf.mxu0 }
 0x124   : > { %v900_v29 = vmul.f32 0.17677669, %v886_v28 }
 0x126   : > { %912 = vmax.xlane.f32.xlu2 %v900_v29 }
 0x12b   : > { %v888_v30 = vpop.f32.mrf.mxu0 }
 0x12c   : > { %v901_v31 = vmul.f32 0.17677669, %v888_v30 }
 0x12e   : > { %914 = vmax.xlane.f32.xlu2 %v901_v31 }
 0x133   : > { %v891_v32 = vpop.f32.mrf.mxu0 }
 0x134   : > { %v902_v33 = vmul.f32 0.17677669, %v891_v32 }
 0x136   : > { %916 = vmax.xlane.f32.xlu0 %v902_v33 }
 0x13b   : > { %v893_v34 = vpop.f32.mrf.mxu0 }
 0x13c   : > { %v903_v35 = vmul.f32 0.17677669, %v893_v34 }
 0x13e   : > { %918 = vmax.xlane.f32.xlu1 %v903_v35 }
 0x179   : > { %v905_v36 = vpop.xlane.xlu0 %904 }
 0x17a   : > { %v920_v37 = vsub.f32 %v896_v21, %v905_v36 }
 0x17c   : > { %v928_v38 = vmul.f32 1.442695, %v920_v37 }
 0x17e   : > { %7638 = vpow2.f32 %v928_v38 }
 0x181   : > { %v907_v39 = vpop.xlane.xlu0 %906 }
 0x182   : > { %v921_v40 = vsub.f32 %v897_v23, %v907_v39 }
 0x184   : > { %v8635_v41 = vpop.eup %7638  ;;  %v930_v42 = vmul.f32 1.442695, %v921_v40 }
 0x185   : > { %944 = vadd.xlane.f32.xlu2 %v8635_v41 }
 0x186   : > { %7640 = vpow2.f32 %v930_v42 }
 0x189   : > { %v909_v43 = vpop.xlane.xlu1 %908 }
 0x18a   : > { %v922_v44 = vsub.f32 %v898_v25, %v909_v43 }
 0x18c   : > { %v8638_v45 = vpop.eup %7640  ;;  %v932_v46 = vmul.f32 1.442695, %v922_v44 }
 0x18d   : > { %946 = vadd.xlane.f32.xlu0 %v8638_v45 }
 0x18e   : > { %7642 = vpow2.f32 %v932_v46 }
 0x191   : > { %v911_v47 = vpop.xlane.xlu1 %910 }
 0x192   : > { %v923_v48 = vsub.f32 %v899_v27, %v911_v47 }
 0x194   : > { %v8641_v49 = vpop.eup %7642  ;;  %v934_v50 = vmul.f32 1.442695, %v923_v48 }
 0x195   : > { %948 = vadd.xlane.f32.xlu1 %v8641_v49 }
 0x196   : > { %7644 = vpow2.f32 %v934_v50 }
 0x199   : > { %v913_v51 = vpop.xlane.xlu2 %912 }
 0x19a   : > { %v924_v52 = vsub.f32 %v900_v29, %v913_v51 }
 0x19c   : > { %v8652_v53 = vpop.eup %7644  ;;  %v936_v54 = vmul.f32 1.442695, %v924_v52 }
 0x19d   : > { %950 = vadd.xlane.f32.xlu2 %v8652_v53 }
 0x19e   : > { %7646 = vpow2.f32 %v936_v54 }
 0x1a1   : > { %v915_v57 = vpop.xlane.xlu2 %914 }
 0x1a2   : > { %v925_v58 = vsub.f32 %v901_v31, %v915_v57 }
 0x1a4   : > { %v8657_v59 = vpop.eup %7646  ;;  %v938_v60 = vmul.f32 1.442695, %v925_v58 }
 0x1a5   : > { %952 = vadd.xlane.f32.xlu0 %v8657_v59 }
 0x1a6   : > { %7648 = vpow2.f32 %v938_v60 }
 0x1a9   : > { %v917_v61 = vpop.xlane.xlu0 %916 }
 0x1aa   : > { %v926_v62 = vsub.f32 %v902_v33, %v917_v61 }
 0x1ac   : > { %v8660_v63 = vpop.eup %7648  ;;  %v940_v0 = vmul.f32 1.442695, %v926_v62  ;;  %v7467_v62 = vld [vmem:[%s8650_s22 + $0xb0] sm:$0xff] }
 0x1ad   : > { %954 = vadd.xlane.f32.xlu1 %v8660_v63  ;;  %1337 = vmatpush.bf16.msrb.mxu3 %v7467_v62 }
 0x1ae   : > { %7650 = vpow2.f32 %v940_v0 }
 0x1b1   : > { %v919_v1 = vpop.xlane.xlu1 %918  ;;  %1338 = vmatpush.bf16.msrb.mxu3 %v7466_v10 }
 0x1b2   : > { %v927_v2 = vsub.f32 %v903_v35, %v919_v1 }
 0x1b4   : > { %v8663_v3 = vpop.eup %7650  ;;  %v942_v4 = vmul.f32 1.442695, %v927_v2 }
 0x1b5   : > { %956 = vadd.xlane.f32.xlu2 %v8663_v3  ;;  %1339 = vmatpush.bf16.msrb.mxu3 %v7465_v17 }
 0x1b6   : > { %7652 = vpow2.f32 %v942_v4 }
 0x1bc   : > { %v8666_v5 = vpop.eup %7652 }
 0x1bd   : > { %958 = vadd.xlane.f32.xlu0 %v8666_v5 }
 0x1f8   : > { %v945_v20 = vpop.xlane.xlu2 %944 }
 0x1f9   : > { %7654 = vrcp.f32 %v945_v20  ;;  %v971_v30 = vand.u32 2147483648, %v945_v20  ;;  %vm965_vm2 = vweird.f32 %v945_v20  ;;  %v969_v32 = vand.u32 2147483647, %v945_v20 }
 0x1fb   : > { %v972_v38 = vor.u32 1.1754944e-38, %v971_v30  ;;  %vm970_vm6 = vcmp.eq.f32.partialorder %v969_v32, 8.507059e+37 }
 0x1ff   : > { %v7655_v21 = vpop.eup %7654 }
 0x200   : > { %v961_v22 = vmul.f32 %v7655_v21, %v945_v20  ;;  %v947_v23 = vpop.xlane.xlu0 %946  ;;  %vm966_vm1 = vweird.f32 %v7655_v21 }
 0x201   : > { %7656 = vrcp.f32 %v947_v23  ;;  %vm8683_vm3 = vmor %vm965_vm2, %vm966_vm1  ;;  %v986_v35 = vand.u32 2147483648, %v947_v23  ;;  %v984_v36 = vand.u32 2147483647, %v947_v23  ;;  %vm980_vm5 = vweird.f32 %v947_v23 }
 0x202   : > { %v962_v24 = vsub.f32 1.0, %v961_v22 }
 0x203   : > { %v987_v42 = vor.u32 1.1754944e-38, %v986_v35  ;;  %vm985_vm8 = vcmp.eq.f32.partialorder %v984_v36, 8.507059e+37 }
 0x204   : > { %v963_v25 = vmul.f32 %v7655_v21, %v962_v24  ;;  %v7464_v24 = vld [vmem:[%s8650_s22 + $0x98] sm:$0xff] }
 0x205   : > { %1340 = vmatpush.bf16.msrb.mxu3 %v7464_v24 }
 0x206   : > { %v964_v29 = vadd.f32 %v7655_v21, %v963_v25 }
 0x207   : > { %v7657_v26 = vpop.eup %7656 }
 0x208   : > { %v976_v27 = vmul.f32 %v7657_v26, %v947_v23  ;;  %v949_v28 = vpop.xlane.xlu1 %948  ;;  %vm981_vm4 = vweird.f32 %v7657_v26  ;;  %v968_v37 = vsel %vm8683_vm3, %v7655_v21, %v964_v29 }
 0x209   : > { %7658 = vrcp.f32 %v949_v28  ;;  %vm982_vm7 = vmor %vm980_vm5, %vm981_vm4  ;;  %v973_v46 = vsel %vm970_vm6, %v972_v38, %v968_v37  ;;  %vm995_vm10 = vweird.f32 %v949_v28  ;;  %v999_v0 = vand.u32 2147483647, %v949_v28 }
 0x20a   : > { %v977_v31 = vsub.f32 1.0, %v976_v27  ;;  %v974_v51 = vmul.f32 %v8635_v41, %v973_v46  ;;  %v1001_v41 = vand.u32 2147483648, %v949_v28 }
 0x20b   : > { %vm1000_vm14 = vcmp.eq.f32.partialorder %v999_v0, 8.507059e+37 }
 0x20c   : > { %v978_v34 = vmul.f32 %v7657_v26, %v977_v31  ;;  %v1002_v8 = vor.u32 1.1754944e-38, %v1001_v41  ;;  %v1504_v31 = vld [vmem:[%s12385_s5 + $0x20] sm:$0xff] }
 0x20e   : > { %v979_v39 = vadd.f32 %v7657_v26, %v978_v34  ;;  %v7462_v34 = vld [vmem:[%s8650_s22 + $0x88] sm:$0xff] }
 0x20f   : > { %v7659_v40 = vpop.eup %7658 }
 0x210   : > { %v991_v43 = vmul.f32 %v7659_v40, %v949_v28  ;;  %v951_v44 = vpop.xlane.xlu2 %950  ;;  %v983_v47 = vsel %vm982_vm7, %v7657_v26, %v979_v39  ;;  %vm996_vm9 = vweird.f32 %v7659_v40  ;;  %v7463_v28 = vld [vmem:[%s8650_s22 + $0x90] sm:$0xff] }
 0x211   : > { %7660 = vrcp.f32 %v951_v44  ;;  %v988_v50 = vsel %vm985_vm8, %v987_v42, %v983_v47  ;;  %vm8700_vm11 = vmor %vm995_vm10, %vm996_vm9  ;;  %v1016_v4 = vand.u32 2147483648, %v951_v44  ;;  %v1014_v6 = vand.u32 2147483647, %v951_v44  ;;  %1341 = vmatpush.bf16.msrb.mxu3 %v7463_v28  ;;  %v7461_v47 = vld [vmem:[%s8650_s22 + $0x80] sm:$0xff] }
 0x212   : > { %v992_v48 = vsub.f32 1.0, %v991_v43  ;;  %v989_v52 = vmul.f32 %v8638_v45, %v988_v50  ;;  %vm1010_vm13 = vweird.f32 %v951_v44 }
 0x213   : > { %v1017_v12 = vor.u32 1.1754944e-38, %v1016_v4  ;;  %vm1015_vm1 = vcmp.eq.f32.partialorder %v1014_v6, 8.507059e+37 }
 0x214   : > { %v993_v54 = vmul.f32 %v7659_v40, %v992_v48  ;;  %v8691_v55 = vpack.c.bf16 %v989_v52, %v974_v51 }
 0x215   : > { %1342 = vmatpush.bf16.msrb.mxu3 %v7462_v34  ;;  %v1502_v34 = vld [vmem:[%s12385_s5 + $0x10] sm:$0xff] }
 0x216   : > { %1156 = vmatmul.bf16.vlgmr.msra.gmra.mxu3 %v8691_v55  ;;  %1250 = vmatmul.bf16.vlgmr.msrb.gmra.mxu0 %v8691_v55  ;;  %v994_v61 = vadd.f32 %v7659_v40, %v993_v54 }
 0x217   : > { %v7661_v57 = vpop.eup %7660 }
 0x218   : > { %v1006_v58 = vmul.f32 %v7661_v57, %v951_v44  ;;  %v8696_v60 = vpop.xlane.xlu0 %952  ;;  %vm1011_vm12 = vweird.f32 %v7661_v57  ;;  %v998_v7 = vsel %vm8700_vm11, %v7659_v40, %v994_v61 }
 0x219   : > { %7662 = vrcp.f32 %v8696_v60  ;;  %vm1012_vm15 = vmor %vm1010_vm13, %vm1011_vm12  ;;  %v1003_v15 = vsel %vm1000_vm14, %v1002_v8, %v998_v7  ;;  %vm1025_vm3 = vweird.f32 %v8696_v60  ;;  %v1029_v30 = vand.u32 2147483647, %v8696_v60  ;;  %1343 = vmatpush.bf16.msrb.mxu3 %v7461_v47 }
 0x21a   : > { %v1007_v45 = vsub.f32 1.0, %v1006_v58  ;;  %v1004_v20 = vmul.f32 %v8641_v49, %v1003_v15  ;;  %v1031_v49 = vand.u32 2147483648, %v8696_v60 }
 0x21b   : > { %vm1030_vm7 = vcmp.eq.f32.partialorder %v1029_v30, 8.507059e+37  ;;  %v1505_v30 = vld [vmem:[%s12385_s5 + $0x28] sm:$0xff] }
 0x21c   : > { %v1008_v2 = vmul.f32 %v7661_v57, %v1007_v45  ;;  %v1032_v37 = vor.u32 1.1754944e-38, %v1031_v49  ;;  %v1507_v49 = vld [vmem:[%s12385_s5 + $0x38] sm:$0xff] }
 0x21d   : > { %1590 = vmatpush.msra.mxu2 %v1507_v49  ;;  %7507 = vmatpush.msra.mxu3 %v1507_v49 }
 0x21e   : > { %v1009_v9 = vadd.f32 %v7661_v57, %v1008_v2  ;;  %1961 = vmatpush.msra.mxu0 %v1507_v49  ;;  %v1508_v49 = vld [vmem:[#allocation6] sm:$0xff] }
 0x21f   : > { %v7663_v11 = vpop.eup %7662 }
 0x220   : > { %v1021_v13 = vmul.f32 %v7663_v11, %v8696_v60  ;;  %v955_v14 = vpop.xlane.xlu1 %954  ;;  %v1013_v16 = vsel %vm1012_vm15, %v7661_v57, %v1009_v9  ;;  %vm1026_vm2 = vweird.f32 %v7663_v11 }
 0x221   : > { %7664 = vrcp.f32 %v955_v14  ;;  %v1018_v19 = vsel %vm1015_vm1, %v1017_v12, %v1013_v16  ;;  %vm8720_vm4 = vmor %vm1025_vm3, %vm1026_vm2  ;;  %v1046_v33 = vand.u32 2147483648, %v955_v14  ;;  %v1044_v35 = vand.u32 2147483647, %v955_v14  ;;  %v7470_v12 = vld [vmem:[#allocation2 + $0x8] sm:$0xff] }
 0x222   : > { %v1022_v18 = vsub.f32 1.0, %v1021_v13  ;;  %v1019_v21 = vmul.f32 %v8652_v53, %v1018_v19  ;;  %vm1040_vm6 = vweird.f32 %v955_v14  ;;  %1437 = vmatpush.bf16.msra.mxu1 %v7470_v12  ;;  %v7469_v13 = vld [vmem:[#allocation2] sm:$0xff]  ;;  %vm1509_vm3 = vcmask 523264  }
 0x223   : > { %v1047_v42 = vor.u32 1.1754944e-38, %v1046_v33  ;;  %vm1045_vm9 = vcmp.eq.f32.partialorder %v1044_v35, 8.507059e+37  ;;  %v1501_v35 = vld [vmem:[%s12385_s5 + $0x8] sm:$0xff] }
 0x224   : > { %v1023_v22 = vmul.f32 %v7663_v11, %v1022_v18  ;;  %v8711_v23 = vpack.c.bf16 %v1019_v21, %v1004_v20 }
 0x226   : > { %1161 = vmatmul.bf16.gmra.mxu3 %v8711_v23  ;;  %1255 = vmatmul.bf16.gmra.mxu0 %v8711_v23  ;;  %v1024_v29 = vadd.f32 %v7663_v11, %v1023_v22 }
 0x227   : > { %v7665_v25 = vpop.eup %7664  ;;  %1438 = vmatpush.bf16.msra.mxu1 %v7469_v13 }
 0x228   : > { %v1036_v26 = vmul.f32 %v7665_v25, %v955_v14  ;;  %v957_v27 = vpop.xlane.xlu2 %956  ;;  %vm1041_vm5 = vweird.f32 %v7665_v25  ;;  %v1028_v36 = vsel %vm8720_vm4, %v7663_v11, %v1024_v29 }
 0x229   : > { %7666 = vrcp.f32 %v957_v27  ;;  %vm1042_vm8 = vmor %vm1040_vm6, %vm1041_vm5  ;;  %v1033_v46 = vsel %vm1030_vm7, %v1032_v37, %v1028_v36  ;;  %v1061_v61 = vand.u32 2147483648, %v957_v27  ;;  %vm1055_vm11 = vweird.f32 %v957_v27  ;;  %v1500_v37 = vld [vmem:[%s12385_s5] sm:$0xff] }
 0x22a   : > { %v1037_v53 = vsub.f32 1.0, %v1036_v26  ;;  %v1034_v51 = vmul.f32 %v8657_v59, %v1033_v46  ;;  %v1059_v41 = vand.u32 2147483647, %v957_v27  ;;  %v8766_v46 = vld [vmem:[#allocation4] ss:$0 sm:$0xff] }
 0x22b   : > { %2129 = vmatpush.msrb.mxu1 %v1508_v49 }
 0x22c   : > { %v1038_v32 = vmul.f32 %v7665_v25, %v1037_v53  ;;  %vm1060_vm14 = vcmp.eq.f32.partialorder %v1059_v41, 8.507059e+37  ;;  %v1506_v53 = vld [vmem:[%s12385_s5 + $0x30] sm:$0xff] }
 0x22d   : > { %1591 = vmatpush.msra.mxu2 %v1506_v53  ;;  %7508 = vmatpush.msra.mxu3 %v1506_v53 }
 0x22e   : > { %v1039_v38 = vadd.f32 %v7665_v25, %v1038_v32  ;;  %1962 = vmatpush.msra.mxu0 %v1506_v53  ;;  %v1503_v32 = vld [vmem:[%s12385_s5 + $0x18] sm:$0xff] }
 0x22f   : > { %v7667_v39 = vpop.eup %7666  ;;  %1592 = vmatpush.msra.mxu2 %v1505_v30  ;;  %7509 = vmatpush.msra.mxu3 %v1505_v30 }
 0x230   : > { %v1043_v40 = vsel %vm1042_vm8, %v7665_v25, %v1039_v38  ;;  %v1051_v43 = vmul.f32 %v7667_v39, %v957_v27  ;;  %v959_v44 = vpop.xlane.xlu0 %958  ;;  %vm1056_vm10 = vweird.f32 %v7667_v39  ;;  %1963 = vmatpush.msra.mxu0 %v1505_v30 }
 0x231   : > { %7668 = vrcp.f32 %v959_v44  ;;  %v1048_v50 = vsel %vm1045_vm9, %v1047_v42, %v1043_v40  ;;  %vm1057_vm12 = vmor %vm1055_vm11, %vm1056_vm10  ;;  %v1076_v62 = vand.u32 2147483648, %v959_v44  ;;  %v1074_v59 = vand.u32 2147483647, %v959_v44  ;;  %1593 = vmatpush.msra.mxu2 %v1504_v31  ;;  %7510 = vmatpush.msra.mxu3 %v1504_v31 }
 0x232   : > { %v1052_v48 = vsub.f32 1.0, %v1051_v43  ;;  %v1049_v52 = vmul.f32 %v8660_v63, %v1048_v50  ;;  %v1062_v63 = vor.u32 1.1754944e-38, %v1061_v61  ;;  %vm1070_vm15 = vweird.f32 %v959_v44  ;;  %1964 = vmatpush.msra.mxu0 %v1504_v31 }
 0x233   : > { %v1077_v4 = vor.u32 1.1754944e-38, %v1076_v62  ;;  %vm1075_vm2 = vcmp.eq.f32.partialorder %v1074_v59, 8.507059e+37  ;;  %1594 = vmatpush.msra.mxu2 %v1503_v32  ;;  %7511 = vmatpush.msra.mxu3 %v1503_v32 }
 0x234   : > { %v1053_v54 = vmul.f32 %v7667_v39, %v1052_v48  ;;  %v1082_v56 = vpack.c.bf16 %v1049_v52, %v1034_v51  ;;  %1965 = vmatpush.msra.mxu0 %v1503_v32 }
 0x235   : > { %1595 = vmatpush.msra.mxu2 %v1502_v34  ;;  %7512 = vmatpush.msra.mxu3 %v1502_v34 }
 0x236   : > { %1166 = vmatmul.bf16.gmra.mxu3 %v1082_v56  ;;  %1260 = vmatmul.bf16.gmra.mxu0 %v1082_v56  ;;  %v1054_v58 = vadd.f32 %v7667_v39, %v1053_v54 }
 0x237   : > { %v7669_v57 = vpop.eup %7668  ;;  %1966 = vmatpush.msra.mxu0 %v1502_v34  ;;  %1596 = vmatpush.msra.mxu2 %v1501_v35 }
 0x238   : > { %v1066_v60 = vmul.f32 %v7669_v57, %v959_v44  ;;  %v1058_v0 = vsel %vm1057_vm12, %v7667_v39, %v1054_v58  ;;  %vm1071_vm13 = vweird.f32 %v7669_v57  ;;  %7513 = vmatpush.msra.mxu3 %v1501_v35 }
 0x239   : > { %vm1072_vm1 = vmor %vm1070_vm15, %vm1071_vm13  ;;  %v1063_v6 = vsel %vm1060_vm14, %v1062_v63, %v1058_v0  ;;  %1967 = vmatpush.msra.mxu0 %v1501_v35  ;;  %1597 = vmatpush.msra.mxu2 %v1500_v37 }
 0x23a   : > { %v1067_v45 = vsub.f32 1.0, %v1066_v60  ;;  %v1064_v9 = vmul.f32 %v8663_v3, %v1063_v6  ;;  %7514 = vmatpush.msra.mxu3 %v1500_v37 }
 0x23b   : > { %1968 = vmatpush.msra.mxu0 %v1500_v37 }
 0x23c   : > { %v1068_v1 = vmul.f32 %v7669_v57, %v1067_v45 }
 0x23e   : > { %v1069_v2 = vadd.f32 %v7669_v57, %v1068_v1 }
 0x240   : > { %v1073_v7 = vsel %vm1072_vm1, %v7669_v57, %v1069_v2 }
 0x241   : > { %v1078_v8 = vsel %vm1075_vm2, %v1077_v4, %v1073_v7 }
 0x242   : > { %v1079_v10 = vmul.f32 %v8666_v5, %v1078_v8 }
 0x244   : > { %v1083_v11 = vpack.c.bf16 %v1079_v10, %v1064_v9 }
 0x246   : > { %1171 = vmatmul.bf16.gmra.mxu3 %v1083_v11  ;;  %1265 = vmatmul.bf16.gmra.mxu0 %v1083_v11 }
 0x256   : > { %1344 = vmatmul.bf16.vlgmr.msrb.gmra.mxu3 %v8691_v55 }
 0x257   : > { %1759 = vmatpush.msrb.mxu3 %v1508_v49 }
 0x266   : > { %1349 = vmatmul.bf16.gmra.mxu3 %v8711_v23 }
 0x276   : > { %1354 = vmatmul.bf16.gmra.mxu3 %v1082_v56 }
 0x286   : > { %1359 = vmatmul.bf16.gmra.mxu3 %v1083_v11 }
 0x293   : > { %v1251_v20 = vpop.f32.mrf.mxu0 }
 0x299   : > { %v1157_v14 = vpop.f32.mrf.mxu3 }
 0x29b   : > { %v1253_v24 = vpop.f32.mrf.mxu0 }
 0x29c   : > { %v1369_v26 = vpack.c.bf16 %v1253_v24, %v1251_v20 }
 0x2a1   : > { %v1159_v15 = vpop.f32.mrf.mxu3 }
 0x2a2   : > { %v1365_v16 = vpack.c.bf16 %v1159_v15, %v1157_v14 }
 0x2a3   : > { %v1256_v25 = vpop.f32.mrf.mxu0 }
 0x2a4   : > { %7021 = vmatmul.msk.bf16.vlgmr.msra.gmra.mxu1 %vm830_vm0, %v1365_v16 }
 0x2a9   : > { %v1162_v3 = vpop.f32.mrf.mxu3 }
 0x2ab   : > { %v1258_v27 = vpop.f32.mrf.mxu0 }
 0x2ac   : > { %v1370_v29 = vpack.c.bf16 %v1258_v27, %v1256_v25 }
 0x2b1   : > { %v1164_v5 = vpop.f32.mrf.mxu3 }
 0x2b2   : > { %v1366_v17 = vpack.c.bf16 %v1164_v5, %v1162_v3 }
 0x2b3   : > { %v1261_v28 = vpop.f32.mrf.mxu0 }
 0x2b4   : > { %7022 = vmatmul.msk.bf16.gmra.mxu1 %vm830_vm0, %v1366_v17 }
 0x2b9   : > { %v1167_v18 = vpop.f32.mrf.mxu3 }
 0x2bb   : > { %v1263_v33 = vpop.f32.mrf.mxu0 }
 0x2bc   : > { %v1371_v36 = vpack.c.bf16 %v1263_v33, %v1261_v28 }
 0x2c1   : > { %v1169_v55 = vpop.f32.mrf.mxu3 }
 0x2c2   : > { %v1367_v19 = vpack.c.bf16 %v1169_v55, %v1167_v18 }
 0x2c3   : > { %v1266_v38 = vpop.f32.mrf.mxu0 }
 0x2c4   : > { %7023 = vmatmul.msk.bf16.gmra.mxu1 %vm830_vm0, %v1367_v19 }
 0x2c9   : > { %v1172_v21 = vpop.f32.mrf.mxu3 }
 0x2cb   : > { %v1268_v40 = vpop.f32.mrf.mxu0 }
 0x2cc   : > { %v1372_v42 = vpack.c.bf16 %v1268_v40, %v1266_v38 }
 0x2d1   : > { %v1174_v22 = vpop.f32.mrf.mxu3 }
 0x2d2   : > { %v1368_v23 = vpack.c.bf16 %v1174_v22, %v1172_v21 }
 0x2d4   : > { %7024 = vmatmul.msk.bf16.gmra.mxu1 %vm830_vm0, %v1368_v23 }
 0x2d9   : > { %v1345_v39 = vpop.f32.mrf.mxu3 }
 0x2e1   : > { %v1347_v43 = vpop.f32.mrf.mxu3 }
 0x2e2   : > { %v1373_v48 = vpack.c.bf16 %v1347_v43, %v1345_v39 }
 0x2e4   : > { %7025 = vmatmul.msk.bf16.gmra.mxu1 %vm830_vm0, %v1369_v26 }
 0x2e9   : > { %v1350_v44 = vpop.f32.mrf.mxu3 }
 0x2f1   : > { %v1352_v51 = vpop.f32.mrf.mxu3 }
 0x2f2   : > { %v1374_v58 = vpack.c.bf16 %v1352_v51, %v1350_v44 }
 0x2f4   : > { %7026 = vmatmul.msk.bf16.gmra.mxu1 %vm830_vm0, %v1370_v29 }
 0x2f9   : > { %v1355_v56 = vpop.f32.mrf.mxu3 }
 0x301   : > { %v1357_v45 = vpop.f32.mrf.mxu3 }
 0x302   : > { %v1375_v0 = vpack.c.bf16 %v1357_v45, %v1355_v56 }
 0x304   : > { %7027 = vmatmul.msk.bf16.gmra.mxu1 %vm830_vm0, %v1371_v36 }
 0x309   : > { %v1360_v59 = vpop.f32.mrf.mxu3 }
 0x311   : > { %v1362_v4 = vpop.f32.mrf.mxu3 }
 0x312   : > { %v1376_v7 = vpack.c.bf16 %v1362_v4, %v1360_v59 }
 0x314   : > { %7028 = vmatmul.msk.bf16.gmra.mxu1 %vm830_vm0, %v1372_v42 }
 0x321   : > { %v1440_v47 = vpop.f32.mrf.mxu1 }
 0x322   : > { %v8769_v50 = vadd.f32 %v8766_v46, %v1440_v47 }
 0x324   : > { %7029 = vmatmul.msk.bf16.gmra.mxu1 %vm830_vm0, %v1373_v48  ;;  %7033 = vmatmul.msk.f32.vlgmr.msra.gmra.mxu2 %vm1509_vm3, %v8769_v50 }
 0x329   : > { %v1442_v52 = vpop.f32.mrf.mxu1 }
 0x32a   : > { %v8775_v54 = vadd.f32 %v8766_v46, %v1442_v52 }
 0x32c   : > { %7034 = vmatmul.msk.f32.gmra.mxu2 %vm1509_vm3, %v8775_v54 }
 0x331   : > { %v1445_v57 = vpop.f32.mrf.mxu1 }
 0x332   : > { %v8780_v60 = vadd.f32 %v8766_v46, %v1445_v57 }
 0x334   : > { %7030 = vmatmul.msk.bf16.gmra.mxu1 %vm830_vm0, %v1374_v58  ;;  %7035 = vmatmul.msk.f32.gmra.mxu2 %vm1509_vm3, %v8780_v60 }
 0x339   : > { %v1447_v61 = vpop.f32.mrf.mxu1 }
 0x33a   : > { %v8786_v41 = vadd.f32 %v8766_v46, %v1447_v61 }
 0x33c   : > { %7036 = vmatmul.msk.f32.gmra.mxu2 %vm1509_vm3, %v8786_v41 }
 0x341   : > { %v1450_v62 = vpop.f32.mrf.mxu1 }
 0x342   : > { %v8791_v1 = vadd.f32 %v8766_v46, %v1450_v62 }
 0x344   : > { %7031 = vmatmul.msk.bf16.gmra.mxu1 %vm830_vm0, %v1375_v0  ;;  %7037 = vmatmul.msk.f32.gmra.mxu2 %vm1509_vm3, %v8791_v1 }
 0x349   : > { %v1452_v63 = vpop.f32.mrf.mxu1 }
 0x34a   : > { %v8797_v2 = vadd.f32 %v8766_v46, %v1452_v63 }
 0x34c   : > { %7038 = vmatmul.msk.f32.gmra.mxu2 %vm1509_vm3, %v8797_v2 }
 0x351   : > { %v1455_v6 = vpop.f32.mrf.mxu1 }
 0x352   : > { %v8802_v8 = vadd.f32 %v8766_v46, %v1455_v6 }
 0x354   : > { %7032 = vmatmul.msk.bf16.gmra.mxu1 %vm830_vm0, %v1376_v7  ;;  %7039 = vmatmul.msk.f32.gmra.mxu2 %vm1509_vm3, %v8802_v8  ;;  %vm1671_vm0 = vcmask 64512  }
 0x359   : > { %v1457_v9 = vpop.f32.mrf.mxu1 }
 0x35a   : > { %v8808_v10 = vadd.f32 %v8766_v46, %v1457_v9 }
 0x35c   : > { %7040 = vmatmul.msk.f32.gmra.mxu2 %vm1509_vm3, %v8808_v10 }
 0x361   : > { %v1460_v11 = vpop.f32.mrf.mxu1 }
 0x362   : > { %v8813_v12 = vadd.f32 %v8766_v46, %v1460_v11 }
 0x364   : > { %7041 = vmatmul.msk.f32.gmra.mxu2 %vm1509_vm3, %v8813_v12 }
 0x369   : > { %v1462_v13 = vpop.f32.mrf.mxu1 }
 0x36a   : > { %v8818_v14 = vadd.f32 %v8766_v46, %v1462_v13 }
 0x36c   : > { %7042 = vmatmul.msk.f32.gmra.mxu2 %vm1509_vm3, %v8818_v14 }
 0x371   : > { %v1465_v15 = vpop.f32.mrf.mxu1 }
 0x372   : > { %v8823_v16 = vadd.f32 %v8766_v46, %v1465_v15 }
 0x374   : > { %7043 = vmatmul.msk.f32.gmra.mxu2 %vm1509_vm3, %v8823_v16 }
 0x379   : > { %v1467_v3 = vpop.f32.mrf.mxu1 }
 0x37a   : > { %v8828_v5 = vadd.f32 %v8766_v46, %v1467_v3 }
 0x37c   : > { %7044 = vmatmul.msk.f32.gmra.mxu2 %vm1509_vm3, %v8828_v5 }
 0x381   : > { %v1470_v17 = vpop.f32.mrf.mxu1 }
 0x382   : > { %v8833_v18 = vadd.f32 %v8766_v46, %v1470_v17 }
 0x384   : > { %7045 = vmatmul.msk.f32.gmra.mxu2 %vm1509_vm3, %v8833_v18 }
 0x389   : > { %v1472_v55 = vpop.f32.mrf.mxu1 }
 0x38a   : > { %v8838_v19 = vadd.f32 %v8766_v46, %v1472_v55 }
 0x38c   : > { %7046 = vmatmul.msk.f32.gmra.mxu2 %vm1509_vm3, %v8838_v19 }
 0x391   : > { %v1475_v20 = vpop.f32.mrf.mxu1 }
 0x392   : > { %v8843_v21 = vadd.f32 %v8766_v46, %v1475_v20 }
 0x394   : > { %7047 = vmatmul.msk.f32.gmra.mxu2 %vm1509_vm3, %v8843_v21 }
 0x399   : > { %v1477_v22 = vpop.f32.mrf.mxu1 }
 0x39a   : > { %v8848_v23 = vadd.f32 %v8766_v46, %v1477_v22 }
 0x39c   : > { %7048 = vmatmul.msk.f32.gmra.mxu2 %vm1509_vm3, %v8848_v23 }
 0x3a1   : > { %v1480_v24 = vpop.f32.mrf.mxu1 }
 0x3a2   : > { %v8853_v25 = vadd.f32 %v8766_v46, %v1480_v24 }
 0x3a4   : > { %7049 = vmatmul.msk.f32.gmra.mxu2 %vm1509_vm3, %v8853_v25 }
 0x3a7   : > { %v1599_v53 = vpop.f32.mrf.mxu2 }
 0x3a9   : > { %v1482_v26 = vpop.f32.mrf.mxu1 }
 0x3aa   : > { %v8858_v27 = vadd.f32 %v8766_v46, %v1482_v26 }
 0x3ac   : > { %7050 = vmatmul.msk.f32.gmra.mxu2 %vm1509_vm3, %v8858_v27 }
 0x3af   : > { %v1602_v34 = vpop.f32.mrf.mxu2 }
 0x3b1   : > { %v1485_v28 = vpop.f32.mrf.mxu1 }
 0x3b2   : > { %v8863_v29 = vadd.f32 %v8766_v46, %v1485_v28 }
 0x3b4   : > { %7051 = vmatmul.msk.f32.gmra.mxu2 %vm1509_vm3, %v8863_v29 }
 0x3b7   : > { %v1605_v37 = vpop.f32.mrf.mxu2 }
 0x3b9   : > { %v1487_v30 = vpop.f32.mrf.mxu1 }
 0x3ba   : > { %v8868_v31 = vadd.f32 %v8766_v46, %v1487_v30 }
 0x3bc   : > { %7052 = vmatmul.msk.f32.gmra.mxu2 %vm1509_vm3, %v8868_v31 }
 0x3bf   : > { %v1608_v40 = vpop.f32.mrf.mxu2 }
 0x3c1   : > { %v1490_v32 = vpop.f32.mrf.mxu1 }
 0x3c2   : > { %v8873_v33 = vadd.f32 %v8766_v46, %v1490_v32 }
 0x3c4   : > { %7053 = vmatmul.msk.f32.gmra.mxu2 %vm1509_vm3, %v8873_v33 }
 0x3c7   : > { %v1611_v44 = vpop.f32.mrf.mxu2 }
 0x3c9   : > { %v1492_v35 = vpop.f32.mrf.mxu1 }
 0x3ca   : > { %v8878_v36 = vadd.f32 %v8766_v46, %v1492_v35 }
 0x3cc   : > { %7054 = vmatmul.msk.f32.gmra.mxu2 %vm1509_vm3, %v8878_v36 }
 0x3cf   : > { %v1614_v47 = vpop.f32.mrf.mxu2 }
 0x3d1   : > { %v1495_v38 = vpop.f32.mrf.mxu1 }
 0x3d2   : > { %v8883_v39 = vadd.f32 %v8766_v46, %v1495_v38 }
 0x3d4   : > { %7055 = vmatmul.msk.f32.vlgmr.msra.gmra.mxu3 %vm1509_vm3, %v8883_v39 }
 0x3d7   : > { %v1617_v48 = vpop.f32.mrf.mxu2 }
 0x3d9   : > { %v1497_v42 = vpop.f32.mrf.mxu1 }
 0x3da   : > { %v8888_v43 = vadd.f32 %v8766_v46, %v1497_v42 }
 0x3dc   : > { %7056 = vmatmul.msk.f32.gmra.mxu3 %vm1509_vm3, %v8888_v43 }
 0x3df   : > { %v1620_v51 = vpop.f32.mrf.mxu2 }
 0x3e4   : > { %7057 = vmatmul.msk.f32.vlgmr.msrb.gmra.mxu3 %vm1671_vm0, %v1599_v53 }
 0x3e7   : > { %v1623_v46 = vpop.f32.mrf.mxu2 }
 0x3ec   : > { %7058 = vmatmul.msk.f32.gmra.mxu3 %vm1671_vm0, %v1602_v34 }
 0x3ef   : > { %v1626_v52 = vpop.f32.mrf.mxu2 }
 0x3f4   : > { %7059 = vmatmul.msk.f32.gmra.mxu3 %vm1671_vm0, %v1605_v37 }
 0x3f7   : > { %v1629_v56 = vpop.f32.mrf.mxu2 }
 0x3fc   : > { %7060 = vmatmul.msk.f32.gmra.mxu3 %vm1671_vm0, %v1608_v40 }
 0x3ff   : > { %v1632_v57 = vpop.f32.mrf.mxu2 }
 0x404   : > { %7061 = vmatmul.msk.f32.gmra.mxu3 %vm1671_vm0, %v1611_v44 }
 0x407   : > { %v1635_v58 = vpop.f32.mrf.mxu2 }
 0x40c   : > { %7062 = vmatmul.msk.f32.gmra.mxu3 %vm1671_vm0, %v1614_v47 }
 0x40f   : > { %v1638_v61 = vpop.f32.mrf.mxu2 }
 0x414   : > { %7063 = vmatmul.msk.f32.gmra.mxu3 %vm1671_vm0, %v1617_v48 }
 0x417   : > { %v1641_v45 = vpop.f32.mrf.mxu2 }
 0x41c   : > { %7064 = vmatmul.msk.f32.gmra.mxu3 %vm1671_vm0, %v1620_v51 }
 0x41f   : > { %v1644_v62 = vpop.f32.mrf.mxu2 }
 0x424   : > { %7065 = vmatmul.msk.f32.gmra.mxu3 %vm1671_vm0, %v1623_v46 }
 0x427   : > { %v1647_v59 = vpop.f32.mrf.mxu2 }
 0x42c   : > { %7066 = vmatmul.msk.f32.gmra.mxu3 %vm1671_vm0, %v1626_v52 }
 0x42f   : > { %v1650_v4 = vpop.f32.mrf.mxu2 }
 0x434   : > { %7067 = vmatmul.msk.f32.gmra.mxu3 %vm1671_vm0, %v1629_v56 }
 0x437   : > { %v1653_v11 = vpop.f32.mrf.mxu2 }
 0x43c   : > { %7068 = vmatmul.msk.f32.gmra.mxu3 %vm1671_vm0, %v1632_v57 }
 0x444   : > { %7069 = vmatmul.msk.f32.gmra.mxu3 %vm1671_vm0, %v1635_v58 }
 0x44c   : > { %7070 = vmatmul.msk.f32.gmra.mxu3 %vm1671_vm0, %v1638_v61 }
 0x454   : > { %7071 = vmatmul.msk.f32.gmra.mxu3 %vm1671_vm0, %v1641_v45  ;;  %v7474_v45 = vld [vmem:[#allocation7 + $0x18] sm:$0xff] }
 0x455   : > { %2821 = vmatpush.bf16.msrb.mxu2 %v7474_v45 }
 0x457   : > { %v1665_v0 = vpop.f32.mrf.mxu3 }
 0x45c   : > { %7072 = vmatmul.msk.f32.gmra.mxu3 %vm1671_vm0, %v1644_v62 }
 0x45f   : > { %v1668_v63 = vpop.f32.mrf.mxu3 }
 0x464   : > { %7073 = vmatmul.msk.f32.gmra.mxu3 %vm1671_vm0, %v1647_v59 }
 0x467   : > { %v1761_v6 = vpop.f32.mrf.mxu3 }
 0x468   : > { %v8910_v7 = vsub.f32 %v8769_v50, %v1761_v6  ;;  %v1656_v50 = vpop.f32.mrf.mxu2 }
 0x46a   : > { %v1857_v9 = vmul.f32 %v8910_v7, %v8910_v7 }
 0x46c   : > { %7074 = vmatmul.msk.f32.gmra.mxu3 %vm1671_vm0, %v1650_v4  ;;  %7081 = vmatmul.msk.f32.vlgmr.msra.gmra.mxu0 %vm1509_vm3, %v1857_v9 }
 0x46f   : > { %v1764_v13 = vpop.f32.mrf.mxu3 }
 0x470   : > { %v8917_v15 = vsub.f32 %v8775_v54, %v1764_v13  ;;  %v1659_v24 = vpop.f32.mrf.mxu2 }
 0x472   : > { %v1858_v3 = vmul.f32 %v8917_v15, %v8917_v15 }
 0x474   : > { %7075 = vmatmul.msk.f32.gmra.mxu3 %vm1671_vm0, %v1653_v11  ;;  %7082 = vmatmul.msk.f32.gmra.mxu0 %vm1509_vm3, %v1858_v3 }
 0x477   : > { %v1767_v17 = vpop.f32.mrf.mxu3 }
 0x478   : > { %v8924_v55 = vsub.f32 %v8780_v60, %v1767_v17  ;;  %v1662_v53 = vpop.f32.mrf.mxu2 }
 0x47a   : > { %v1859_v20 = vmul.f32 %v8924_v55, %v8924_v55 }
 0x47c   : > { %7076 = vmatmul.msk.f32.gmra.mxu3 %vm1671_vm0, %v1656_v50  ;;  %7083 = vmatmul.msk.f32.gmra.mxu0 %vm1509_vm3, %v1859_v20 }
 0x47f   : > { %v1770_v54 = vpop.f32.mrf.mxu3 }
 0x480   : > { %v8931_v22 = vsub.f32 %v8786_v41, %v1770_v54 }
 0x482   : > { %v1860_v26 = vmul.f32 %v8931_v22, %v8931_v22 }
 0x484   : > { %7077 = vmatmul.msk.f32.gmra.mxu3 %vm1671_vm0, %v1659_v24  ;;  %7084 = vmatmul.msk.f32.gmra.mxu0 %vm1509_vm3, %v1860_v26 }
 0x487   : > { %v1773_v60 = vpop.f32.mrf.mxu3 }
 0x488   : > { %v8938_v28 = vsub.f32 %v8791_v1, %v1773_v60 }
 0x48a   : > { %v1861_v49 = vmul.f32 %v8938_v28, %v8938_v28 }
 0x48c   : > { %7078 = vmatmul.msk.f32.gmra.mxu3 %vm1671_vm0, %v1662_v53  ;;  %7085 = vmatmul.msk.f32.gmra.mxu0 %vm1509_vm3, %v1861_v49 }
 0x48f   : > { %v1776_v41 = vpop.f32.mrf.mxu3 }
 0x490   : > { %v8945_v30 = vsub.f32 %v8797_v2, %v1776_v41 }
 0x492   : > { %v1862_v32 = vmul.f32 %v8945_v30, %v8945_v30 }
 0x494   : > { %7079 = vmatmul.msk.f32.gmra.mxu3 %vm1671_vm0, %v1665_v0  ;;  %7086 = vmatmul.msk.f32.gmra.mxu0 %vm1509_vm3, %v1862_v32 }
 0x497   : > { %v1779_v1 = vpop.f32.mrf.mxu3 }
 0x498   : > { %v8952_v34 = vsub.f32 %v8802_v8, %v1779_v1 }
 0x49a   : > { %v1863_v35 = vmul.f32 %v8952_v34, %v8952_v34 }
 0x49c   : > { %7080 = vmatmul.msk.f32.gmra.mxu3 %vm1671_vm0, %v1668_v63  ;;  %7087 = vmatmul.msk.f32.gmra.mxu0 %vm1509_vm3, %v1863_v35 }
 0x49f   : > { %v1782_v2 = vpop.f32.mrf.mxu3 }
 0x4a0   : > { %v8959_v37 = vsub.f32 %v8808_v10, %v1782_v2 }
 0x4a2   : > { %v1864_v38 = vmul.f32 %v8959_v37, %v8959_v37 }
 0x4a4   : > { %7088 = vmatmul.msk.f32.gmra.mxu0 %vm1509_vm3, %v1864_v38 }
 0x4a7   : > { %v1785_v40 = vpop.f32.mrf.mxu3 }
 0x4a8   : > { %v8965_v8 = vsub.f32 %v8813_v12, %v1785_v40 }
 0x4aa   : > { %v1865_v42 = vmul.f32 %v8965_v8, %v8965_v8 }
 0x4ac   : > { %7089 = vmatmul.msk.f32.gmra.mxu0 %vm1509_vm3, %v1865_v42 }
 0x4af   : > { %v1788_v44 = vpop.f32.mrf.mxu3 }
 0x4b0   : > { %v8971_v47 = vsub.f32 %v8818_v14, %v1788_v44 }
 0x4b2   : > { %v1866_v10 = vmul.f32 %v8971_v47, %v8971_v47 }
 0x4b4   : > { %7090 = vmatmul.msk.f32.gmra.mxu0 %vm1509_vm3, %v1866_v10 }
 0x4b7   : > { %v1791_v48 = vpop.f32.mrf.mxu3 }
 0x4b8   : > { %v8977_v51 = vsub.f32 %v8823_v16, %v1791_v48  ;;  %v7472_v48 = vld [vmem:[#allocation7 + $0x8] sm:$0xff] }
 0x4ba   : > { %v1867_v12 = vmul.f32 %v8977_v51, %v8977_v51 }
 0x4bc   : > { %7091 = vmatmul.msk.f32.gmra.mxu0 %vm1509_vm3, %v1867_v12 }
 0x4bf   : > { %v1794_v46 = vpop.f32.mrf.mxu3 }
 0x4c0   : > { %v8983_v52 = vsub.f32 %v8828_v5, %v1794_v46 }
 0x4c2   : > { %v1868_v14 = vmul.f32 %v8983_v52, %v8983_v52 }
 0x4c4   : > { %7092 = vmatmul.msk.f32.gmra.mxu0 %vm1509_vm3, %v1868_v14 }
 0x4c7   : > { %v1797_v56 = vpop.f32.mrf.mxu3 }
 0x4c8   : > { %v8989_v57 = vsub.f32 %v8833_v18, %v1797_v56 }
 0x4ca   : > { %v1869_v16 = vmul.f32 %v8989_v57, %v8989_v57 }
 0x4cc   : > { %7093 = vmatmul.msk.f32.gmra.mxu0 %vm1509_vm3, %v1869_v16 }
 0x4cf   : > { %v1800_v58 = vpop.f32.mrf.mxu3 }
 0x4d0   : > { %v8995_v61 = vsub.f32 %v8838_v19, %v1800_v58  ;;  %v2901_v58 = vld [vmem:[%s12389_s9 + $0x78] sm:$0xff] }
 0x4d1   : > { %2904 = vmatpush.msra.mxu3 %v2901_v58  ;;  %3203 = vmatpush.msra.mxu1 %v2901_v58 }
 0x4d2   : > { %v1870_v5 = vmul.f32 %v8995_v61, %v8995_v61 }
 0x4d4   : > { %7094 = vmatmul.msk.f32.gmra.mxu0 %vm1509_vm3, %v1870_v5 }
 0x4d7   : > { %v1803_v62 = vpop.f32.mrf.mxu3 }
 0x4d8   : > { %v9001_v18 = vsub.f32 %v8843_v21, %v1803_v62 }
 0x4da   : > { %v1871_v0 = vmul.f32 %v9001_v18, %v9001_v18 }
 0x4dc   : > { %7095 = vmatmul.msk.f32.gmra.mxu0 %vm1509_vm3, %v1871_v0  ;;  %v2900_v0 = vld [vmem:[%s12389_s9 + $0x70] sm:$0xff] }
 0x4dd   : > { %2905 = vmatpush.msra.mxu3 %v2900_v0  ;;  %3204 = vmatpush.msra.mxu1 %v2900_v0 }
 0x4df   : > { %v1806_v59 = vpop.f32.mrf.mxu3 }
 0x4e0   : > { %v9007_v19 = vsub.f32 %v8848_v23, %v1806_v59 }
 0x4e2   : > { %v1872_v63 = vmul.f32 %v9007_v19, %v9007_v19 }
 0x4e4   : > { %7096 = vmatmul.msk.f32.gmra.mxu0 %vm1509_vm3, %v1872_v63 }
 0x4e7   : > { %v1809_v4 = vpop.f32.mrf.mxu3 }
 0x4e8   : > { %v9013_v6 = vsub.f32 %v8853_v25, %v1809_v4 }
 0x4e9   : > { %v1970_v21 = vpop.f32.mrf.mxu0 }
 0x4ea   : > { %v1873_v9 = vmul.f32 %v9013_v6, %v9013_v6  ;;  %7105 = vmatmul.msk.f32.vlgmr.msrb.gmra.mxu1 %vm1671_vm0, %v1970_v21 }
 0x4ec   : > { %7097 = vmatmul.msk.f32.gmra.mxu0 %vm1509_vm3, %v1873_v9  ;;  %v7471_v9 = vld [vmem:[#allocation7] sm:$0xff] }
 0x4ef   : > { %v1812_v11 = vpop.f32.mrf.mxu3 }
 0x4f0   : > { %v9020_v23 = vsub.f32 %v8858_v27, %v1812_v11 }
 0x4f1   : > { %v1973_v13 = vpop.f32.mrf.mxu0 }
 0x4f2   : > { %v1874_v3 = vmul.f32 %v9020_v23, %v9020_v23  ;;  %7106 = vmatmul.msk.f32.gmra.mxu1 %vm1671_vm0, %v1973_v13 }
 0x4f4   : > { %7098 = vmatmul.msk.f32.gmra.mxu0 %vm1509_vm3, %v1874_v3 }
 0x4f7   : > { %v1815_v25 = vpop.f32.mrf.mxu3 }
 0x4f8   : > { %v9027_v50 = vsub.f32 %v8863_v29, %v1815_v25  ;;  %v7473_v29 = vld [vmem:[#allocation7 + $0x10] sm:$0xff] }
 0x4f9   : > { %v1976_v17 = vpop.f32.mrf.mxu0  ;;  %2822 = vmatpush.bf16.msrb.mxu2 %v7473_v29 }
 0x4fa   : > { %v1875_v20 = vmul.f32 %v9027_v50, %v9027_v50  ;;  %7107 = vmatmul.msk.f32.gmra.mxu1 %vm1671_vm0, %v1976_v17 }
 0x4fc   : > { %7099 = vmatmul.msk.f32.gmra.mxu0 %vm1509_vm3, %v1875_v20 }
 0x4fd   : > { %2823 = vmatpush.bf16.msrb.mxu2 %v7472_v48 }
 0x4ff   : > { %v1818_v27 = vpop.f32.mrf.mxu3 }
 0x500   : > { %v9034_v54 = vsub.f32 %v8868_v31, %v1818_v27 }
 0x501   : > { %v1979_v24 = vpop.f32.mrf.mxu0  ;;  %2824 = vmatpush.bf16.msrb.mxu2 %v7471_v9 }
 0x502   : > { %v1876_v26 = vmul.f32 %v9034_v54, %v9034_v54  ;;  %7108 = vmatmul.msk.f32.gmra.mxu1 %vm1671_vm0, %v1979_v24 }
 0x504   : > { %7100 = vmatmul.msk.f32.gmra.mxu0 %vm1509_vm3, %v1876_v26  ;;  %v2899_v26 = vld [vmem:[%s12389_s9 + $0x68] sm:$0xff] }
 0x505   : > { %2906 = vmatpush.msra.mxu3 %v2899_v26  ;;  %3205 = vmatpush.msra.mxu1 %v2899_v26 }
 0x507   : > { %v1821_v60 = vpop.f32.mrf.mxu3 }
 0x508   : > { %v9041_v49 = vsub.f32 %v8873_v33, %v1821_v60 }
 0x509   : > { %v1982_v53 = vpop.f32.mrf.mxu0 }
 0x50a   : > { %v1877_v41 = vmul.f32 %v9041_v49, %v9041_v49  ;;  %7109 = vmatmul.msk.f32.gmra.mxu1 %vm1671_vm0, %v1982_v53 }
 0x50c   : > { %7101 = vmatmul.msk.f32.gmra.mxu0 %vm1509_vm3, %v1877_v41  ;;  %v9087_v41 = vld [vmem:[#allocation4 + $0x1] ss:$0 sm:$0xff] }
 0x50f   : > { %v1824_v31 = vpop.f32.mrf.mxu3 }
 0x510   : > { %v9048_v32 = vsub.f32 %v8878_v36, %v1824_v31 }
 0x511   : > { %v1985_v1 = vpop.f32.mrf.mxu0 }
 0x512   : > { %v1878_v35 = vmul.f32 %v9048_v32, %v9048_v32  ;;  %7110 = vmatmul.msk.f32.gmra.mxu1 %vm1671_vm0, %v1985_v1 }
 0x514   : > { %7102 = vmatmul.msk.f32.gmra.mxu0 %vm1509_vm3, %v1878_v35 }
 0x517   : > { %v1827_v33 = vpop.f32.mrf.mxu3 }
 0x518   : > { %v9055_v2 = vsub.f32 %v8883_v39, %v1827_v33  ;;  %v9091_v33 = vld [vmem:[#allocation4 + $0x2] ss:$0 sm:$0xff] }
 0x519   : > { %v1988_v38 = vpop.f32.mrf.mxu0 }
 0x51a   : > { %v1879_v40 = vmul.f32 %v9055_v2, %v9055_v2  ;;  %7111 = vmatmul.msk.f32.gmra.mxu1 %vm1671_vm0, %v1988_v38 }
 0x51c   : > { %7103 = vmatmul.msk.f32.gmra.mxu0 %vm1509_vm3, %v1879_v40 }
 0x51f   : > { %v1830_v36 = vpop.f32.mrf.mxu3 }
 0x520   : > { %v9062_v42 = vsub.f32 %v8888_v43, %v1830_v36 }
 0x521   : > { %v1991_v44 = vpop.f32.mrf.mxu0 }
 0x522   : > { %v1880_v10 = vmul.f32 %v9062_v42, %v9062_v42  ;;  %7112 = vmatmul.msk.f32.gmra.mxu1 %vm1671_vm0, %v1991_v44 }
 0x524   : > { %7104 = vmatmul.msk.f32.gmra.mxu0 %vm1509_vm3, %v1880_v10 }
 0x529   : > { %v1994_v39 = vpop.f32.mrf.mxu0 }
 0x52a   : > { %7113 = vmatmul.msk.f32.gmra.mxu1 %vm1671_vm0, %v1994_v39 }
 0x531   : > { %v1997_v12 = vpop.f32.mrf.mxu0 }
 0x532   : > { %7114 = vmatmul.msk.f32.gmra.mxu1 %vm1671_vm0, %v1997_v12  ;;  %v2898_v12 = vld [vmem:[%s12389_s9 + $0x60] sm:$0xff] }
 0x533   : > { %2907 = vmatpush.msra.mxu3 %v2898_v12  ;;  %3206 = vmatpush.msra.mxu1 %v2898_v12 }
 0x539   : > { %v2000_v46 = vpop.f32.mrf.mxu0 }
 0x53a   : > { %7115 = vmatmul.msk.f32.gmra.mxu1 %vm1671_vm0, %v2000_v46 }
 0x541   : > { %v2003_v43 = vpop.f32.mrf.mxu0 }
 0x542   : > { %7116 = vmatmul.msk.f32.gmra.mxu1 %vm1671_vm0, %v2003_v43 }
 0x549   : > { %v2006_v14 = vpop.f32.mrf.mxu0 }
 0x54a   : > { %7117 = vmatmul.msk.f32.gmra.mxu1 %vm1671_vm0, %v2006_v14 }
 0x551   : > { %v2009_v56 = vpop.f32.mrf.mxu0 }
 0x552   : > { %7118 = vmatmul.msk.f32.gmra.mxu1 %vm1671_vm0, %v2009_v56 }
 0x559   : > { %v2012_v16 = vpop.f32.mrf.mxu0 }
 0x55a   : > { %7119 = vmatmul.msk.f32.gmra.mxu1 %vm1671_vm0, %v2012_v16 }
 0x561   : > { %v2015_v5 = vpop.f32.mrf.mxu0 }
 0x562   : > { %7120 = vmatmul.msk.f32.gmra.mxu1 %vm1671_vm0, %v2015_v5 }
 0x567   : > { %v2131_v45 = vpop.f32.mrf.mxu1 }
 0x568   : > { %v2132_v62 = vadd.f32 1e-06, %v2131_v45 }
 0x569   : > { %v2018_v59 = vpop.f32.mrf.mxu0 }
 0x56a   : > { %7670 = vrsqrt.f32 %v2132_v62  ;;  %7121 = vmatmul.msk.f32.gmra.mxu1 %vm1671_vm0, %v2018_v59  ;;  %vm2209_vm5 = vweird.f32 %v2132_v62 }
 0x56f   : > { %v2134_v63 = vpop.f32.mrf.mxu1 }
 0x570   : > { %v7671_v4 = vpop.eup %7670  ;;  %v2135_v21 = vadd.f32 1e-06, %v2134_v63 }
 0x571   : > { %v2204_v11 = vmul.f32 %v7671_v4, %v2132_v62  ;;  %v2021_v13 = vpop.f32.mrf.mxu0  ;;  %vm2210_vm4 = vweird.f32 %v7671_v4 }
 0x572   : > { %7672 = vrsqrt.f32 %v2135_v21  ;;  %7122 = vmatmul.msk.f32.gmra.mxu1 %vm1671_vm0, %v2021_v13  ;;  %vm2211_vm6 = vmor %vm2209_vm5, %vm2210_vm4  ;;  %vm2219_vm8 = vweird.f32 %v2135_v21 }
 0x573   : > { %v2205_v3 = vmul.f32 %v7671_v4, %v2204_v11 }
 0x575   : > { %v2206_v25 = vmul.f32 0.5, %v2205_v3 }
 0x577   : > { %v2207_v17 = vsub.f32 1.5, %v2206_v25  ;;  %v2137_v20 = vpop.f32.mrf.mxu1 }
 0x578   : > { %v7673_v27 = vpop.eup %7672  ;;  %v2138_v24 = vadd.f32 1e-06, %v2137_v20 }
 0x579   : > { %v2208_v29 = vmul.f32 %v7671_v4, %v2207_v17  ;;  %v2214_v60 = vmul.f32 %v7673_v27, %v2135_v21  ;;  %v2024_v53 = vpop.f32.mrf.mxu0  ;;  %vm2220_vm7 = vweird.f32 %v7673_v27 }
 0x57a   : > { %7674 = vrsqrt.f32 %v2138_v24  ;;  %7123 = vmatmul.msk.f32.gmra.mxu1 %vm1671_vm0, %v2024_v53  ;;  %vm2221_vm9 = vmor %vm2219_vm8, %vm2220_vm7  ;;  %vm2229_vm11 = vweird.f32 %v2138_v24 }
 0x57b   : > { %v2212_v31 = vsel %vm2211_vm6, %v7671_v4, %v2208_v29  ;;  %v2215_v1 = vmul.f32 %v7673_v27, %v2214_v60 }
 0x57c   : > { %v2443_v35 = vmul.f32 %v2212_v31, %v8910_v7 }
 0x57d   : > { %v2216_v38 = vmul.f32 0.5, %v2215_v1 }
 0x57e   : > { %v2469_v40 = vmul.f32 %v9087_v41, %v2443_v35 }
 0x57f   : > { %v2217_v36 = vsub.f32 1.5, %v2216_v38  ;;  %v2140_v44 = vpop.f32.mrf.mxu1 }
 0x580   : > { %v7675_v10 = vpop.eup %7674  ;;  %v9095_v39 = vadd.f32 %v9091_v33, %v2469_v40  ;;  %v2141_v48 = vadd.f32 1e-06, %v2140_v44 }
 0x581   : > { %v2218_v46 = vmul.f32 %v7673_v27, %v2217_v36  ;;  %v2224_v7 = vmul.f32 %v7675_v10, %v2138_v24  ;;  %v2027_v43 = vpop.f32.mrf.mxu0  ;;  %vm2230_vm10 = vweird.f32 %v7675_v10 }
 0x582   : > { %7676 = vrsqrt.f32 %v2141_v48  ;;  %7124 = vmatmul.msk.f32.gmra.mxu1 %vm1671_vm0, %v2027_v43  ;;  %v2519_v14 = vmul.f32 %v9095_v39, %v9095_v39  ;;  %vm2231_vm12 = vmor %vm2229_vm11, %vm2230_vm10  ;;  %vm2239_vm14 = vweird.f32 %v2141_v48 }
 0x583   : > { %v2222_v56 = vsel %vm2221_vm9, %v7673_v27, %v2218_v46  ;;  %v2225_v16 = vmul.f32 %v7675_v10, %v2224_v7 }
 0x584   : > { %v2444_v58 = vmul.f32 %v2222_v56, %v8917_v15  ;;  %v2543_v5 = vmul.f32 %v2519_v14, %v9095_v39 }
 0x585   : > { %v2226_v45 = vmul.f32 0.5, %v2225_v16 }
 0x586   : > { %v2470_v62 = vmul.f32 %v9087_v41, %v2444_v58  ;;  %v2567_v0 = vmul.f32 0.044715, %v2543_v5 }
 0x587   : > { %v2227_v59 = vsub.f32 1.5, %v2226_v45  ;;  %v2143_v63 = vpop.f32.mrf.mxu1 }
 0x588   : > { %v7677_v4 = vpop.eup %7676  ;;  %v9107_v21 = vadd.f32 %v9091_v33, %v2470_v62  ;;  %v9109_v9 = vadd.f32 1e-06, %v2143_v63  ;;  %v2591_v11 = vadd.f32 %v2567_v0, %v9095_v39 }
 0x589   : > { %v2228_v13 = vmul.f32 %v7675_v10, %v2227_v59  ;;  %v2234_v15 = vmul.f32 %v7677_v4, %v2141_v48  ;;  %v2030_v3 = vpop.f32.mrf.mxu0  ;;  %vm2240_vm13 = vweird.f32 %v7677_v4 }
 0x58a   : > { %7678 = vrsqrt.f32 %v9109_v9  ;;  %7125 = vmatmul.msk.f32.gmra.mxu1 %vm1671_vm0, %v2030_v3  ;;  %v2520_v25 = vmul.f32 %v9107_v21, %v9107_v21  ;;  %v2615_v17 = vmul.f32 0.7978846, %v2591_v11  ;;  %vm2241_vm15 = vmor %vm2239_vm14, %vm2240_vm13  ;;  %vm2249_vm2 = vweird.f32 %v9109_v9 }
 0x58b   : > { %v2232_v20 = vsel %vm2231_vm12, %v7675_v10, %v2228_v13  ;;  %v2235_v27 = vmul.f32 %v7677_v4, %v2234_v15 }
 0x58c   : > { %v2445_v26 = vmul.f32 %v2232_v20, %v8924_v55  ;;  %v2544_v29 = vmul.f32 %v2520_v25, %v9107_v21  ;;  %7680 = vtanh.f32 %v2615_v17  ;;  %v2897_v55 = vld [vmem:[%s12389_s9 + $0x58] sm:$0xff] }
 0x58d   : > { %v2236_v60 = vmul.f32 0.5, %v2235_v27  ;;  %2908 = vmatpush.msra.mxu3 %v2897_v55  ;;  %3207 = vmatpush.msra.mxu1 %v2897_v55 }
 0x58e   : > { %v2471_v24 = vmul.f32 %v9087_v41, %v2445_v26  ;;  %v2568_v53 = vmul.f32 0.044715, %v2544_v29 }
 0x58f   : > { %v2237_v31 = vsub.f32 1.5, %v2236_v60  ;;  %v2146_v1 = vpop.f32.mrf.mxu1 }
 0x590   : > { %v7679_v35 = vpop.eup %7678  ;;  %v9120_v38 = vadd.f32 %v9091_v33, %v2471_v24  ;;  %v9122_v40 = vadd.f32 1e-06, %v2146_v1  ;;  %v2592_v36 = vadd.f32 %v2568_v53, %v9107_v21 }
 0x591   : > { %v2238_v44 = vmul.f32 %v7677_v4, %v2237_v31  ;;  %v2244_v10 = vmul.f32 %v7679_v35, %v9109_v9  ;;  %v2033_v12 = vpop.f32.mrf.mxu0  ;;  %vm2250_vm1 = vweird.f32 %v7679_v35 }
 0x592   : > { %7682 = vrsqrt.f32 %v9122_v40  ;;  %7126 = vmatmul.msk.f32.gmra.mxu1 %vm1671_vm0, %v2033_v12  ;;  %v2616_v46 = vmul.f32 0.7978846, %v2592_v36  ;;  %v2521_v7 = vmul.f32 %v9120_v38, %v9120_v38  ;;  %v7681_v56 = vpop.eup %7680  ;;  %vm2251_vm4 = vmor %vm2249_vm2, %vm2250_vm1  ;;  %vm2259_vm6 = vweird.f32 %v9122_v40 }
 0x593   : > { %v2242_v43 = vsel %vm2241_vm15, %v7677_v4, %v2238_v44  ;;  %v2245_v14 = vmul.f32 %v7679_v35, %v2244_v10  ;;  %v2663_v59 = vadd.f32 1.0, %v7681_v56 }
 0x594   : > { %v2446_v16 = vmul.f32 %v2242_v43, %v8931_v22  ;;  %7684 = vtanh.f32 %v2616_v46  ;;  %v2545_v48 = vmul.f32 %v2521_v7, %v9120_v38  ;;  %v2896_v22 = vld [vmem:[%s12389_s9 + $0x50] sm:$0xff] }
 0x595   : > { %v2246_v58 = vmul.f32 0.5, %v2245_v14  ;;  %2909 = vmatpush.msra.mxu3 %v2896_v22  ;;  %3208 = vmatpush.msra.mxu1 %v2896_v22  ;;  %v2687_v9 = vmul.f32 0.5, %v2663_v59 }
 0x596   : > { %v2472_v5 = vmul.f32 %v9087_v41, %v2446_v16  ;;  %v2569_v45 = vmul.f32 0.044715, %v2545_v48 }
 0x597   : > { %v2247_v62 = vsub.f32 1.5, %v2246_v58  ;;  %v2149_v0 = vpop.f32.mrf.mxu1  ;;  %v2711_v12 = vmul.f32 %v2687_v9, %v9095_v39 }
 0x598   : > { %v7683_v63 = vpop.eup %7682  ;;  %v9137_v11 = vadd.f32 %v9091_v33, %v2472_v5  ;;  %v9139_v4 = vadd.f32 1e-06, %v2149_v0  ;;  %v2593_v13 = vadd.f32 %v2569_v45, %v9120_v38 }
 0x599   : > { %v2248_v15 = vmul.f32 %v7679_v35, %v2247_v62  ;;  %v2254_v3 = vmul.f32 %v7683_v63, %v9122_v40  ;;  %v2036_v25 = vpop.f32.mrf.mxu0  ;;  %vm2260_vm5 = vweird.f32 %v7683_v63 }
 0x59a   : > { %v7685_v17 = vpop.eup %7684  ;;  %7686 = vrsqrt.f32 %v9139_v4  ;;  %7127 = vmatmul.msk.f32.gmra.mxu1 %vm1671_vm0, %v2036_v25  ;;  %v2522_v20 = vmul.f32 %v9137_v11, %v9137_v11  ;;  %v2617_v27 = vmul.f32 0.7978846, %v2593_v13  ;;  %vm2261_vm7 = vmor %vm2259_vm6, %vm2260_vm5  ;;  %vm2269_vm8 = vweird.f32 %v9139_v4 }
 0x59b   : > { %v2252_v26 = vsel %vm2251_vm4, %v7679_v35, %v2248_v15  ;;  %v2255_v29 = vmul.f32 %v7683_v63, %v2254_v3  ;;  %v2664_v60 = vadd.f32 1.0, %v7685_v17 }
 0x59c   : > { %v2447_v24 = vmul.f32 %v2252_v26, %v8938_v28  ;;  %v2546_v53 = vmul.f32 %v2522_v20, %v9137_v11  ;;  %7688 = vtanh.f32 %v2617_v27 }
 0x59d   : > { %v2256_v31 = vmul.f32 0.5, %v2255_v29  ;;  %v2688_v1 = vmul.f32 0.5, %v2664_v60 }
 0x59e   : > { %v2473_v55 = vmul.f32 %v9087_v41, %v2447_v24  ;;  %v2570_v36 = vmul.f32 0.044715, %v2546_v53 }
 0x59f   : > { %v2257_v44 = vsub.f32 1.5, %v2256_v31  ;;  %v2152_v10 = vpop.f32.mrf.mxu1  ;;  %v2712_v35 = vmul.f32 %v2688_v1, %v9107_v21 }
 0x5a0   : > { %v7687_v46 = vpop.eup %7686  ;;  %v9158_v7 = vadd.f32 %v9091_v33, %v2473_v55  ;;  %v9160_v28 = vadd.f32 1e-06, %v2152_v10  ;;  %v2594_v43 = vadd.f32 %v2570_v36, %v9137_v11 }
 0x5a1   : > { %v2258_v14 = vmul.f32 %v7683_v63, %v2257_v44  ;;  %v2264_v56 = vmul.f32 %v7687_v46, %v9139_v4  ;;  %v2039_v16 = vpop.f32.mrf.mxu0  ;;  %v2735_v48 = vpack.c.bf16 %v2712_v35, %v2711_v12 }
 0x5a2   : > { %7690 = vrsqrt.f32 %v9160_v28  ;;  %7128 = vmatmul.msk.f32.gmra.mxu1 %vm1671_vm0, %v2039_v16  ;;  %v2618_v39 = vmul.f32 0.7978846, %v2594_v43  ;;  %v2523_v21 = vmul.f32 %v9158_v7, %v9158_v7  ;;  %v7689_v45 = vpop.eup %7688  ;;  %vm2270_vm0 = vweird.f32 %v7687_v46 }
 0x5a3   : > { %v2262_v58 = vsel %vm2261_vm7, %v7683_v63, %v2258_v14  ;;  %v2265_v5 = vmul.f32 %v7687_v46, %v2264_v56  ;;  %7145 = vmatmul.msk.bf16.vlgmr.msrb.gmra.mxu2 %vm1509_vm3, %v2735_v48  ;;  %v2665_v3 = vadd.f32 1.0, %v7689_v45  ;;  %vm2271_vm9 = vmor %vm2269_vm8, %vm2270_vm0  ;;  %v2894_v48 = vld [vmem:[%s12389_s9 + $0x40] sm:$0xff]  ;;  %vm2279_vm11 = vweird.f32 %v9160_v28 }
 0x5a4   : > { %v2448_v40 = vmul.f32 %v2262_v58, %v8945_v30  ;;  %7692 = vtanh.f32 %v2618_v39  ;;  %v2547_v62 = vmul.f32 %v2523_v21, %v9158_v7  ;;  %v2895_v30 = vld [vmem:[%s12389_s9 + $0x48] sm:$0xff] }
 0x5a5   : > { %v2266_v0 = vmul.f32 0.5, %v2265_v5  ;;  %2910 = vmatpush.msra.mxu3 %v2895_v30  ;;  %3209 = vmatpush.msra.mxu1 %v2895_v30  ;;  %v2689_v1 = vmul.f32 0.5, %v2665_v3 }
 0x5a6   : > { %v2474_v59 = vmul.f32 %v9087_v41, %v2448_v40  ;;  %v2571_v22 = vmul.f32 0.044715, %v2547_v62 }
 0x5a7   : > { %v2267_v13 = vsub.f32 1.5, %v2266_v0  ;;  %v2155_v15 = vpop.f32.mrf.mxu1  ;;  %v2713_v14 = vmul.f32 %v2689_v1, %v9120_v38  ;;  %2911 = vmatpush.msra.mxu3 %v2894_v48  ;;  %3210 = vmatpush.msra.mxu1 %v2894_v48 }
 0x5a8   : > { %v7691_v25 = vpop.eup %7690  ;;  %v9174_v63 = vadd.f32 %v9091_v33, %v2474_v59  ;;  %v9176_v17 = vadd.f32 1e-06, %v2155_v15  ;;  %v2595_v20 = vadd.f32 %v2571_v22, %v9158_v7 }
 0x5a9   : > { %v2268_v27 = vmul.f32 %v7687_v46, %v2267_v13  ;;  %v2274_v26 = vmul.f32 %v7691_v25, %v9160_v28  ;;  %vm2280_vm10 = vweird.f32 %v7691_v25 }
 0x5aa   : > { %v7693_v29 = vpop.eup %7692  ;;  %7694 = vrsqrt.f32 %v9176_v17  ;;  %v2524_v60 = vmul.f32 %v9174_v63, %v9174_v63  ;;  %v2619_v9 = vmul.f32 0.7978846, %v2595_v20  ;;  %vm2281_vm12 = vmor %vm2279_vm11, %vm2280_vm10  ;;  %vm2289_vm14 = vweird.f32 %v9176_v17 }
 0x5ab   : > { %v2272_v24 = vsel %vm2271_vm9, %v7687_v46, %v2268_v27  ;;  %v2275_v53 = vmul.f32 %v7691_v25, %v2274_v26  ;;  %v2666_v31 = vadd.f32 1.0, %v7693_v29 }
 0x5ac   : > { %v2449_v55 = vmul.f32 %v2272_v24, %v8952_v34  ;;  %v2548_v4 = vmul.f32 %v2524_v60, %v9174_v63  ;;  %7696 = vtanh.f32 %v2619_v9 }
 0x5ad   : > { %v2276_v36 = vmul.f32 0.5, %v2275_v53  ;;  %v2690_v44 = vmul.f32 0.5, %v2666_v31 }
 0x5ae   : > { %v2475_v10 = vmul.f32 %v9087_v41, %v2449_v55  ;;  %v2572_v12 = vmul.f32 0.044715, %v2548_v4 }
 0x5af   : > { %v2277_v35 = vsub.f32 1.5, %v2276_v36  ;;  %v2158_v43 = vpop.f32.mrf.mxu1  ;;  %v2714_v46 = vmul.f32 %v2690_v44, %v9137_v11 }
 0x5b0   : > { %v7695_v56 = vpop.eup %7694  ;;  %v9193_v16 = vadd.f32 %v9091_v33, %v2475_v10  ;;  %v9195_v34 = vadd.f32 1e-06, %v2158_v43  ;;  %v2596_v39 = vadd.f32 %v2572_v12, %v9174_v63 }
 0x5b1   : > { %v2278_v21 = vmul.f32 %v7691_v25, %v2277_v35  ;;  %v2284_v58 = vmul.f32 %v7695_v56, %v9176_v17  ;;  %v2736_v38 = vpack.c.bf16 %v2714_v46, %v2713_v14  ;;  %vm2290_vm13 = vweird.f32 %v7695_v56 }
 0x5b2   : > { %7698 = vrsqrt.f32 %v9195_v34  ;;  %v2620_v11 = vmul.f32 0.7978846, %v2596_v39  ;;  %v2525_v5 = vmul.f32 %v9193_v16, %v9193_v16  ;;  %v7697_v62 = vpop.eup %7696  ;;  %vm2291_vm15 = vmor %vm2289_vm14, %vm2290_vm13  ;;  %v2893_v39 = vld [vmem:[%s12389_s9 + $0x38] sm:$0xff]  ;;  %vm2299_vm2 = vweird.f32 %v9195_v34 }
 0x5b3   : > { %v2282_v45 = vsel %vm2281_vm12, %v7691_v25, %v2278_v21  ;;  %v2285_v40 = vmul.f32 %v7695_v56, %v2284_v58  ;;  %7146 = vmatmul.msk.bf16.gmra.mxu2 %vm1509_vm3, %v2736_v38  ;;  %v2667_v30 = vadd.f32 1.0, %v7697_v62  ;;  %2912 = vmatpush.msra.mxu3 %v2893_v39 }
 0x5b4   : > { %v2450_v28 = vmul.f32 %v2282_v45, %v8959_v37  ;;  %7700 = vtanh.f32 %v2620_v11  ;;  %v2549_v0 = vmul.f32 %v2525_v5, %v9193_v16  ;;  %3211 = vmatpush.msra.mxu1 %v2893_v39 }
 0x5b5   : > { %v2286_v59 = vmul.f32 0.5, %v2285_v40  ;;  %v2691_v55 = vmul.f32 0.5, %v2667_v30 }
 0x5b6   : > { %v2476_v22 = vmul.f32 %v9087_v41, %v2450_v28  ;;  %v2573_v13 = vmul.f32 0.044715, %v2549_v0 }
 0x5b7   : > { %v2287_v15 = vsub.f32 1.5, %v2286_v59  ;;  %v2161_v3 = vpop.f32.mrf.mxu1  ;;  %v2715_v14 = vmul.f32 %v2691_v55, %v9158_v7 }
 0x5b8   : > { %v7699_v20 = vpop.eup %7698  ;;  %v9212_v25 = vadd.f32 %v9091_v33, %v2476_v22  ;;  %v9214_v27 = vadd.f32 1e-06, %v2161_v3  ;;  %v2597_v26 = vadd.f32 %v2573_v13, %v9193_v16 }
 0x5b9   : > { %v2288_v37 = vmul.f32 %v7695_v56, %v2287_v15  ;;  %v2294_v29 = vmul.f32 %v7699_v20, %v9195_v34  ;;  %vm2300_vm1 = vweird.f32 %v7699_v20 }
 0x5ba   : > { %v7701_v60 = vpop.eup %7700  ;;  %7702 = vrsqrt.f32 %v9214_v27  ;;  %v2526_v9 = vmul.f32 %v9212_v25, %v9212_v25  ;;  %v2621_v24 = vmul.f32 0.7978846, %v2597_v26  ;;  %vm2301_vm4 = vmor %vm2299_vm2, %vm2300_vm1  ;;  %vm2309_vm6 = vweird.f32 %v9214_v27 }
 0x5bb   : > { %v2292_v53 = vsel %vm2291_vm15, %v7695_v56, %v2288_v37  ;;  %v2295_v31 = vmul.f32 %v7699_v20, %v2294_v29  ;;  %v2668_v1 = vadd.f32 1.0, %v7701_v60 }
 0x5bc   : > { %v2451_v4 = vmul.f32 %v2292_v53, %v8965_v8  ;;  %v2550_v36 = vmul.f32 %v2526_v9, %v9212_v25  ;;  %7704 = vtanh.f32 %v2621_v24 }
 0x5bd   : > { %v2296_v44 = vmul.f32 0.5, %v2295_v31  ;;  %v2692_v17 = vmul.f32 0.5, %v2668_v1 }
 0x5be   : > { %v2477_v10 = vmul.f32 %v9087_v41, %v2451_v4  ;;  %v2574_v12 = vmul.f32 0.044715, %v2550_v36 }
 0x5bf   : > { %v2297_v35 = vsub.f32 1.5, %v2296_v44  ;;  %v2164_v43 = vpop.f32.mrf.mxu1  ;;  %v2716_v46 = vmul.f32 %v2692_v17, %v9174_v63 }
 0x5c0   : > { %v7703_v56 = vpop.eup %7702  ;;  %v9228_v48 = vadd.f32 %v9091_v33, %v2477_v10  ;;  %v9230_v8 = vadd.f32 1e-06, %v2164_v43  ;;  %v2598_v21 = vadd.f32 %v2574_v12, %v9212_v25 }
 0x5c1   : > { %v2298_v58 = vmul.f32 %v7699_v20, %v2297_v35  ;;  %v2304_v38 = vmul.f32 %v7703_v56, %v9214_v27  ;;  %v2737_v7 = vpack.c.bf16 %v2716_v46, %v2715_v14  ;;  %vm2310_vm5 = vweird.f32 %v7703_v56 }
 0x5c2   : > { %7706 = vrsqrt.f32 %v9230_v8  ;;  %v2622_v63 = vmul.f32 0.7978846, %v2598_v21  ;;  %v2527_v11 = vmul.f32 %v9228_v48, %v9228_v48  ;;  %v7705_v40 = vpop.eup %7704  ;;  %vm2311_vm7 = vmor %vm2309_vm6, %vm2310_vm5  ;;  %vm2319_vm8 = vweird.f32 %v9230_v8 }
 0x5c3   : > { %v2302_v5 = vsel %vm2301_vm4, %v7699_v20, %v2298_v58  ;;  %v2305_v45 = vmul.f32 %v7703_v56, %v2304_v38  ;;  %7147 = vmatmul.msk.bf16.gmra.mxu2 %vm1509_vm3, %v2737_v7  ;;  %v2669_v15 = vadd.f32 1.0, %v7705_v40 }
 0x5c4   : > { %v2452_v34 = vmul.f32 %v2302_v5, %v8971_v47  ;;  %7708 = vtanh.f32 %v2622_v63  ;;  %v2551_v62 = vmul.f32 %v2527_v11, %v9228_v48  ;;  %v2892_v47 = vld [vmem:[%s12389_s9 + $0x30] sm:$0xff] }
 0x5c5   : > { %v2306_v28 = vmul.f32 0.5, %v2305_v45  ;;  %2913 = vmatpush.msra.mxu3 %v2892_v47  ;;  %3212 = vmatpush.msra.mxu1 %v2892_v47  ;;  %v2693_v55 = vmul.f32 0.5, %v2669_v15 }
 0x5c6   : > { %v2478_v0 = vmul.f32 %v9087_v41, %v2452_v34  ;;  %v2575_v59 = vmul.f32 0.044715, %v2551_v62 }
 0x5c7   : > { %v2307_v22 = vsub.f32 1.5, %v2306_v28  ;;  %v2167_v13 = vpop.f32.mrf.mxu1  ;;  %v2717_v43 = vmul.f32 %v2693_v55, %v9193_v16 }
 0x5c8   : > { %v7707_v3 = vpop.eup %7706  ;;  %v9247_v30 = vadd.f32 %v9091_v33, %v2478_v0  ;;  %v9249_v20 = vadd.f32 1e-06, %v2167_v13  ;;  %v2599_v26 = vadd.f32 %v2575_v59, %v9228_v48 }
 0x5c9   : > { %v2308_v37 = vmul.f32 %v7703_v56, %v2307_v22  ;;  %v2314_v29 = vmul.f32 %v7707_v3, %v9230_v8  ;;  %vm2320_vm0 = vweird.f32 %v7707_v3 }
 0x5ca   : > { %v7709_v60 = vpop.eup %7708  ;;  %7710 = vrsqrt.f32 %v9249_v20  ;;  %v2528_v9 = vmul.f32 %v9247_v30, %v9247_v30  ;;  %v2623_v24 = vmul.f32 0.7978846, %v2599_v26  ;;  %vm2321_vm9 = vmor %vm2319_vm8, %vm2320_vm0  ;;  %vm2329_vm11 = vweird.f32 %v9249_v20 }
 0x5cb   : > { %v2312_v53 = vsel %vm2311_vm7, %v7703_v56, %v2308_v37  ;;  %v2315_v31 = vmul.f32 %v7707_v3, %v2314_v29  ;;  %v2670_v1 = vadd.f32 1.0, %v7709_v60 }
 0x5cc   : > { %v2453_v4 = vmul.f32 %v2312_v53, %v8977_v51  ;;  %v2552_v27 = vmul.f32 %v2528_v9, %v9247_v30  ;;  %7712 = vtanh.f32 %v2623_v24 }
 0x5cd   : > { %v2316_v36 = vmul.f32 0.5, %v2315_v31  ;;  %v2694_v44 = vmul.f32 0.5, %v2670_v1 }
 0x5ce   : > { %v2479_v17 = vmul.f32 %v9087_v41, %v2453_v4  ;;  %v2576_v10 = vmul.f32 0.044715, %v2552_v27 }
 0x5cf   : > { %v2317_v12 = vsub.f32 1.5, %v2316_v36  ;;  %v2170_v35 = vpop.f32.mrf.mxu1  ;;  %v2718_v14 = vmul.f32 %v2694_v44, %v9212_v25 }
 0x5d0   : > { %v7711_v46 = vpop.eup %7710  ;;  %v9266_v56 = vadd.f32 %v9091_v33, %v2479_v17  ;;  %v9268_v51 = vadd.f32 1e-06, %v2170_v35  ;;  %v2600_v39 = vadd.f32 %v2576_v10, %v9247_v30 }
 0x5d1   : > { %v2318_v21 = vmul.f32 %v7707_v3, %v2317_v12  ;;  %v2324_v58 = vmul.f32 %v7711_v46, %v9249_v20  ;;  %v2738_v38 = vpack.c.bf16 %v2718_v14, %v2717_v43  ;;  %vm2330_vm10 = vweird.f32 %v7711_v46  ;;  %v2890_v43 = vld [vmem:[%s12389_s9 + $0x20] sm:$0xff]  ;;  %v2903_v14 = vld [vmem:[#allocation10 + $0x8] sm:$0xff] }
 0x5d2   : > { %7714 = vrsqrt.f32 %v9268_v51  ;;  %v2624_v16 = vmul.f32 0.7978846, %v2600_v39  ;;  %v2529_v25 = vmul.f32 %v9266_v56, %v9266_v56  ;;  %v7713_v11 = vpop.eup %7712  ;;  %vm2331_vm12 = vmor %vm2329_vm11, %vm2330_vm10  ;;  %vm2339_vm14 = vweird.f32 %v9268_v51  ;;  %3080 = vmatpush.msrb.mxu0 %v2903_v14  ;;  %3378 = vmatpush.msra.mxu2 %v2903_v14 }
 0x5d3   : > { %v2322_v7 = vsel %vm2321_vm9, %v7707_v3, %v2318_v21  ;;  %v2325_v63 = vmul.f32 %v7711_v46, %v2324_v58  ;;  %7148 = vmatmul.msk.bf16.gmra.mxu2 %vm1509_vm3, %v2738_v38  ;;  %v2671_v0 = vadd.f32 1.0, %v7713_v11 }
 0x5d4   : > { %v2454_v5 = vmul.f32 %v2322_v7, %v8983_v52  ;;  %7716 = vtanh.f32 %v2624_v16  ;;  %v2553_v8 = vmul.f32 %v2529_v25, %v9266_v56  ;;  %v2891_v52 = vld [vmem:[%s12389_s9 + $0x28] sm:$0xff] }
 0x5d5   : > { %v2326_v45 = vmul.f32 0.5, %v2325_v63  ;;  %2914 = vmatpush.msra.mxu3 %v2891_v52  ;;  %3213 = vmatpush.msra.mxu1 %v2891_v52  ;;  %v2695_v53 = vmul.f32 0.5, %v2671_v0 }
 0x5d6   : > { %v2480_v40 = vmul.f32 %v9087_v41, %v2454_v5  ;;  %v2577_v34 = vmul.f32 0.044715, %v2553_v8 }
 0x5d7   : > { %v2327_v62 = vsub.f32 1.5, %v2326_v45  ;;  %v2173_v28 = vpop.f32.mrf.mxu1  ;;  %v2719_v17 = vmul.f32 %v2695_v53, %v9228_v48  ;;  %2915 = vmatpush.msra.mxu3 %v2890_v43  ;;  %3214 = vmatpush.msra.mxu1 %v2890_v43 }
 0x5d8   : > { %v7715_v59 = vpop.eup %7714  ;;  %v9281_v22 = vadd.f32 %v9091_v33, %v2480_v40  ;;  %v9283_v13 = vadd.f32 1e-06, %v2173_v28  ;;  %v2601_v15 = vadd.f32 %v2577_v34, %v9266_v56 }
 0x5d9   : > { %v2328_v3 = vmul.f32 %v7711_v46, %v2327_v62  ;;  %v2334_v47 = vmul.f32 %v7715_v59, %v9268_v51  ;;  %vm2340_vm13 = vweird.f32 %v7715_v59 }
 0x5da   : > { %v7717_v26 = vpop.eup %7716  ;;  %7718 = vrsqrt.f32 %v9283_v13  ;;  %v2530_v37 = vmul.f32 %v9281_v22, %v9281_v22  ;;  %v2625_v29 = vmul.f32 0.7978846, %v2601_v15  ;;  %vm2341_vm15 = vmor %vm2339_vm14, %vm2340_vm13  ;;  %vm2349_vm2 = vweird.f32 %v9283_v13 }
 0x5db   : > { %v2332_v60 = vsel %vm2331_vm12, %v7711_v46, %v2328_v3  ;;  %v2335_v9 = vmul.f32 %v7715_v59, %v2334_v47  ;;  %v2672_v24 = vadd.f32 1.0, %v7717_v26 }
 0x5dc   : > { %v2455_v31 = vmul.f32 %v2332_v60, %v8989_v57  ;;  %v2554_v20 = vmul.f32 %v2530_v37, %v9281_v22  ;;  %7720 = vtanh.f32 %v2625_v29 }
 0x5dd   : > { %v2336_v1 = vmul.f32 0.5, %v2335_v9  ;;  %v2696_v55 = vmul.f32 0.5, %v2672_v24 }
 0x5de   : > { %v2481_v4 = vmul.f32 %v9087_v41, %v2455_v31  ;;  %v2578_v27 = vmul.f32 0.044715, %v2554_v20 }
 0x5df   : > { %v2337_v36 = vsub.f32 1.5, %v2336_v1  ;;  %v2176_v44 = vpop.f32.mrf.mxu1  ;;  %v2720_v10 = vmul.f32 %v2696_v55, %v9247_v30 }
 0x5e0   : > { %v7719_v12 = vpop.eup %7718  ;;  %v9300_v35 = vadd.f32 %v9091_v33, %v2481_v4  ;;  %v9302_v57 = vadd.f32 1e-06, %v2176_v44  ;;  %v2602_v46 = vadd.f32 %v2578_v27, %v9281_v22  ;;  %v2889_v44 = vld [vmem:[%s12389_s9 + $0x18] sm:$0xff] }
 0x5e1   : > { %v2338_v39 = vmul.f32 %v7715_v59, %v2337_v36  ;;  %v2344_v48 = vmul.f32 %v7719_v12, %v9283_v13  ;;  %v2739_v21 = vpack.c.bf16 %v2720_v10, %v2719_v17  ;;  %vm2350_vm1 = vweird.f32 %v7719_v12  ;;  %2916 = vmatpush.msra.mxu3 %v2889_v44  ;;  %3215 = vmatpush.msra.mxu1 %v2889_v44 }
 0x5e2   : > { %7722 = vrsqrt.f32 %v9302_v57  ;;  %v2626_v30 = vmul.f32 0.7978846, %v2602_v46  ;;  %v2531_v58 = vmul.f32 %v9300_v35, %v9300_v35  ;;  %v7721_v51 = vpop.eup %7720  ;;  %vm2351_vm4 = vmor %vm2349_vm2, %vm2350_vm1  ;;  %vm2359_vm6 = vweird.f32 %v9302_v57 }
 0x5e3   : > { %v2342_v38 = vsel %vm2341_vm15, %v7715_v59, %v2338_v39  ;;  %v2345_v16 = vmul.f32 %v7719_v12, %v2344_v48  ;;  %7149 = vmatmul.msk.bf16.gmra.mxu2 %vm1509_vm3, %v2739_v21  ;;  %v2673_v40 = vadd.f32 1.0, %v7721_v51 }
 0x5e4   : > { %v2456_v25 = vmul.f32 %v2342_v38, %v8995_v61  ;;  %7724 = vtanh.f32 %v2626_v30  ;;  %v2555_v7 = vmul.f32 %v2531_v58, %v9300_v35 }
 0x5e5   : > { %v2346_v63 = vmul.f32 0.5, %v2345_v16  ;;  %v2697_v29 = vmul.f32 0.5, %v2673_v40 }
 0x5e6   : > { %v2482_v11 = vmul.f32 %v9087_v41, %v2456_v25  ;;  %v2579_v5 = vmul.f32 0.044715, %v2555_v7 }
 0x5e7   : > { %v2347_v8 = vsub.f32 1.5, %v2346_v63  ;;  %v2179_v45 = vpop.f32.mrf.mxu1  ;;  %v2721_v55 = vmul.f32 %v2697_v29, %v9266_v56 }
 0x5e8   : > { %v7723_v34 = vpop.eup %7722  ;;  %v9319_v62 = vadd.f32 %v9091_v33, %v2482_v11  ;;  %v9321_v28 = vadd.f32 1e-06, %v2179_v45  ;;  %v2603_v0 = vadd.f32 %v2579_v5, %v9300_v35 }
 0x5e9   : > { %v2348_v61 = vmul.f32 %v7719_v12, %v2347_v8  ;;  %v2354_v59 = vmul.f32 %v7723_v34, %v9302_v57  ;;  %vm2360_vm5 = vweird.f32 %v7723_v34 }
 0x5ea   : > { %v7725_v52 = vpop.eup %7724  ;;  %7726 = vrsqrt.f32 %v9321_v28  ;;  %v2532_v15 = vmul.f32 %v9319_v62, %v9319_v62  ;;  %v2627_v3 = vmul.f32 0.7978846, %v2603_v0  ;;  %vm2361_vm7 = vmor %vm2359_vm6, %vm2360_vm5  ;;  %vm2369_vm8 = vweird.f32 %v9321_v28 }
 0x5eb   : > { %v2352_v47 = vsel %vm2351_vm4, %v7719_v12, %v2348_v61  ;;  %v2355_v26 = vmul.f32 %v7723_v34, %v2354_v59  ;;  %v2674_v37 = vadd.f32 1.0, %v7725_v52 }
 0x5ec   : > { %v2457_v60 = vmul.f32 %v2352_v47, %v9001_v18  ;;  %v2556_v9 = vmul.f32 %v2532_v15, %v9319_v62  ;;  %7728 = vtanh.f32 %v2627_v3 }
 0x5ed   : > { %v2356_v24 = vmul.f32 0.5, %v2355_v26  ;;  %v2698_v13 = vmul.f32 0.5, %v2674_v37 }
 0x5ee   : > { %v2483_v53 = vmul.f32 %v9087_v41, %v2457_v60  ;;  %v2580_v31 = vmul.f32 0.044715, %v2556_v9 }
 0x5ef   : > { %v2357_v20 = vsub.f32 1.5, %v2356_v24  ;;  %v2182_v1 = vpop.f32.mrf.mxu1  ;;  %v2722_v4 = vmul.f32 %v2698_v13, %v9281_v22 }
 0x5f0   : > { %v7727_v27 = vpop.eup %7726  ;;  %v9335_v36 = vadd.f32 %v9091_v33, %v2483_v53  ;;  %v9337_v18 = vadd.f32 1e-06, %v2182_v1  ;;  %v2604_v17 = vadd.f32 %v2580_v31, %v9319_v62 }
 0x5f1   : > { %v2358_v10 = vmul.f32 %v7723_v34, %v2357_v20  ;;  %v2364_v12 = vmul.f32 %v7727_v27, %v9321_v28  ;;  %v2740_v56 = vpack.c.bf16 %v2722_v4, %v2721_v55  ;;  %vm2370_vm0 = vweird.f32 %v7727_v27 }
 0x5f2   : > { %7730 = vrsqrt.f32 %v9337_v18  ;;  %v2628_v22 = vmul.f32 0.7978846, %v2604_v17  ;;  %v2533_v43 = vmul.f32 %v9335_v36, %v9335_v36  ;;  %v7729_v39 = vpop.eup %7728  ;;  %vm2371_vm9 = vmor %vm2369_vm8, %vm2370_vm0  ;;  %vm2379_vm11 = vweird.f32 %v9337_v18 }
 0x5f3   : > { %v2362_v14 = vsel %vm2361_vm7, %v7723_v34, %v2358_v10  ;;  %v2365_v46 = vmul.f32 %v7727_v27, %v2364_v12  ;;  %7150 = vmatmul.msk.bf16.gmra.mxu2 %vm1509_vm3, %v2740_v56  ;;  %v2675_v51 = vadd.f32 1.0, %v7729_v39  ;;  %v2887_v12 = vld [vmem:[%s12389_s9 + $0x8] sm:$0xff] }
 0x5f4   : > { %v2458_v57 = vmul.f32 %v2362_v14, %v9007_v19  ;;  %7732 = vtanh.f32 %v2628_v22  ;;  %v2557_v48 = vmul.f32 %v2533_v43, %v9335_v36  ;;  %v2888_v19 = vld [vmem:[%s12389_s9 + $0x10] sm:$0xff] }
 0x5f5   : > { %v2366_v21 = vmul.f32 0.5, %v2365_v46  ;;  %2917 = vmatpush.msra.mxu3 %v2888_v19  ;;  %3216 = vmatpush.msra.mxu1 %v2888_v19  ;;  %v2699_v52 = vmul.f32 0.5, %v2675_v51 }
 0x5f6   : > { %v2484_v30 = vmul.f32 %v9087_v41, %v2458_v57  ;;  %v2581_v58 = vmul.f32 0.044715, %v2557_v48 }
 0x5f7   : > { %v2367_v38 = vsub.f32 1.5, %v2366_v21  ;;  %v2185_v16 = vpop.f32.mrf.mxu1  ;;  %v2723_v9 = vmul.f32 %v2699_v52, %v9300_v35  ;;  %2918 = vmatpush.msra.mxu3 %v2887_v12  ;;  %3217 = vmatpush.msra.mxu1 %v2887_v12 }
 0x5f8   : > { %v7731_v25 = vpop.eup %7730  ;;  %v9354_v7 = vadd.f32 %v9091_v33, %v2484_v30  ;;  %v9356_v63 = vadd.f32 1e-06, %v2185_v16  ;;  %v2605_v11 = vadd.f32 %v2581_v58, %v9335_v36 }
 0x5f9   : > { %v2368_v5 = vmul.f32 %v7727_v27, %v2367_v38  ;;  %v2374_v8 = vmul.f32 %v7731_v25, %v9337_v18  ;;  %vm2380_vm10 = vweird.f32 %v7731_v25 }
 0x5fa   : > { %v7733_v45 = vpop.eup %7732  ;;  %7734 = vrsqrt.f32 %v9356_v63  ;;  %v2534_v40 = vmul.f32 %v9354_v7, %v9354_v7  ;;  %v2629_v34 = vmul.f32 0.7978846, %v2605_v11  ;;  %vm2381_vm12 = vmor %vm2379_vm11, %vm2380_vm10  ;;  %vm2389_vm14 = vweird.f32 %v9356_v63 }
 0x5fb   : > { %v2372_v0 = vsel %vm2371_vm9, %v7727_v27, %v2368_v5  ;;  %v2375_v61 = vmul.f32 %v7731_v25, %v2374_v8  ;;  %v2676_v59 = vadd.f32 1.0, %v7733_v45  ;;  %v9406_v45 = vld [vmem:[#allocation4 + $0x1] ss:$0 sm:$0xff] }
 0x5fc   : > { %v2459_v15 = vmul.f32 %v2372_v0, %v9013_v6  ;;  %v2558_v28 = vmul.f32 %v2534_v40, %v9354_v7  ;;  %7736 = vtanh.f32 %v2629_v34 }
 0x5fd   : > { %v2376_v3 = vmul.f32 0.5, %v2375_v61  ;;  %v2700_v47 = vmul.f32 0.5, %v2676_v59 }
 0x5fe   : > { %v2485_v26 = vmul.f32 %v9087_v41, %v2459_v15  ;;  %v2582_v37 = vmul.f32 0.044715, %v2558_v28  ;;  %v9411_v28 = vld [vmem:[#allocation4 + $0x2] ss:$0 sm:$0xff] }
 0x5ff   : > { %v2377_v29 = vsub.f32 1.5, %v2376_v3  ;;  %v2188_v60 = vpop.f32.mrf.mxu1  ;;  %v2724_v24 = vmul.f32 %v2700_v47, %v9319_v62 }
 0x600   : > { %v7735_v13 = vpop.eup %7734  ;;  %v9373_v53 = vadd.f32 %v9091_v33, %v2485_v26  ;;  %v9375_v6 = vadd.f32 1e-06, %v2188_v60  ;;  %v2606_v31 = vadd.f32 %v2582_v37, %v9354_v7 }
 0x601   : > { %v2378_v20 = vmul.f32 %v7731_v25, %v2377_v29  ;;  %v2384_v1 = vmul.f32 %v7735_v13, %v9356_v63  ;;  %v2741_v55 = vpack.c.bf16 %v2724_v24, %v2723_v9  ;;  %vm2390_vm13 = vweird.f32 %v7735_v13 }
 0x602   : > { %7738 = vrsqrt.f32 %v9375_v6  ;;  %v2630_v35 = vmul.f32 0.7978846, %v2606_v31  ;;  %v2535_v62 = vmul.f32 %v9373_v53, %v9373_v53  ;;  %v7737_v44 = vpop.eup %7736  ;;  %vm2391_vm15 = vmor %vm2389_vm14, %vm2390_vm13  ;;  %vm2399_vm2 = vweird.f32 %v9375_v6 }
 0x603   : > { %v2382_v4 = vsel %vm2381_vm12, %v7731_v25, %v2378_v20  ;;  %v2385_v27 = vmul.f32 %v7735_v13, %v2384_v1  ;;  %7151 = vmatmul.msk.bf16.gmra.mxu2 %vm1509_vm3, %v2741_v55  ;;  %v2677_v46 = vadd.f32 1.0, %v7737_v44 }
 0x604   : > { %v2460_v17 = vmul.f32 %v2382_v4, %v9020_v23  ;;  %7740 = vtanh.f32 %v2630_v35  ;;  %v2559_v18 = vmul.f32 %v2535_v62, %v9373_v53  ;;  %v2886_v23 = vld [vmem:[%s12389_s9] sm:$0xff] }
 0x605   : > { %v2386_v10 = vmul.f32 0.5, %v2385_v27  ;;  %2919 = vmatpush.msra.mxu3 %v2886_v23  ;;  %3218 = vmatpush.msra.mxu1 %v2886_v23  ;;  %v2701_v19 = vmul.f32 0.5, %v2677_v46 }
 0x606   : > { %v2486_v56 = vmul.f32 %v9087_v41, %v2460_v17  ;;  %v2583_v22 = vmul.f32 0.044715, %v2559_v18 }
 0x607   : > { %v2387_v43 = vsub.f32 1.5, %v2386_v10  ;;  %v2191_v14 = vpop.f32.mrf.mxu1  ;;  %v2725_v59 = vmul.f32 %v2701_v19, %v9335_v36 }
 0x608   : > { %v7739_v39 = vpop.eup %7738  ;;  %v9394_v57 = vadd.f32 %v9091_v33, %v2486_v56  ;;  %v9396_v48 = vadd.f32 1e-06, %v2191_v14  ;;  %v2607_v41 = vadd.f32 %v2583_v22, %v9373_v53 }
 0x609   : > { %v2388_v21 = vmul.f32 %v7735_v13, %v2387_v43  ;;  %v2394_v30 = vmul.f32 %v7739_v39, %v9375_v6  ;;  %vm2400_vm1 = vweird.f32 %v7739_v39 }
 0x60a   : > { %v7741_v58 = vpop.eup %7740  ;;  %7742 = vrsqrt.f32 %v9396_v48  ;;  %v2536_v38 = vmul.f32 %v9394_v57, %v9394_v57  ;;  %v2631_v33 = vmul.f32 0.7978846, %v2607_v41  ;;  %vm2401_vm4 = vmor %vm2399_vm2, %vm2400_vm1  ;;  %vm2409_vm6 = vweird.f32 %v9396_v48 }
 0x60b   : > { %v2392_v16 = vsel %vm2391_vm15, %v7735_v13, %v2388_v21  ;;  %v2395_v51 = vmul.f32 %v7739_v39, %v2394_v30  ;;  %v2678_v25 = vadd.f32 1.0, %v7741_v58  ;;  %vm2993_vm1 = vcmask 130048  }
 0x60c   : > { %v2461_v11 = vmul.f32 %v2392_v16, %v9027_v50  ;;  %v2560_v5 = vmul.f32 %v2536_v38, %v9394_v57  ;;  %7744 = vtanh.f32 %v2631_v33 }
 0x60d   : > { %v2396_v8 = vmul.f32 0.5, %v2395_v51  ;;  %v2702_v63 = vmul.f32 0.5, %v2678_v25 }
 0x60e   : > { %v2487_v40 = vmul.f32 %v9406_v45, %v2461_v11  ;;  %v2584_v34 = vmul.f32 0.044715, %v2560_v5 }
 0x60f   : > { %v2397_v0 = vsub.f32 1.5, %v2396_v8  ;;  %v2194_v61 = vpop.f32.mrf.mxu1  ;;  %v2726_v52 = vmul.f32 %v2702_v63, %v9354_v7 }
 0x610   : > { %v7743_v15 = vpop.eup %7742  ;;  %v9414_v50 = vadd.f32 %v9411_v28, %v2487_v40  ;;  %v2195_v3 = vadd.f32 1e-06, %v2194_v61  ;;  %v2608_v47 = vadd.f32 %v2584_v34, %v9394_v57 }
 0x611   : > { %v2398_v26 = vmul.f32 %v7739_v39, %v2397_v0  ;;  %v2404_v37 = vmul.f32 %v7743_v15, %v9396_v48  ;;  %v2742_v29 = vpack.c.bf16 %v2726_v52, %v2725_v59  ;;  %vm2410_vm5 = vweird.f32 %v7743_v15  ;;  %v9451_v0 = vld [vmem:[#allocation9] ss:$0 sm:$0xff] }
 0x612   : > { %7746 = vrsqrt.f32 %v2195_v3  ;;  %v2632_v36 = vmul.f32 0.7978846, %v2608_v47  ;;  %v2537_v7 = vmul.f32 %v9414_v50, %v9414_v50  ;;  %v7745_v24 = vpop.eup %7744  ;;  %vm2411_vm7 = vmor %vm2409_vm6, %vm2410_vm5  ;;  %vm2419_vm8 = vweird.f32 %v2195_v3 }
 0x613   : > { %v2402_v60 = vsel %vm2401_vm4, %v7739_v39, %v2398_v26  ;;  %v2405_v9 = vmul.f32 %v7743_v15, %v2404_v37  ;;  %7152 = vmatmul.msk.bf16.gmra.mxu2 %vm1509_vm3, %v2742_v29  ;;  %v2679_v62 = vadd.f32 1.0, %v7745_v24  ;;  %v2902_v24 = vld [vmem:[#allocation10] sm:$0xff] }
 0x614   : > { %v2462_v13 = vmul.f32 %v2402_v60, %v9034_v54  ;;  %7748 = vtanh.f32 %v2632_v36  ;;  %v2561_v31 = vmul.f32 %v2537_v7, %v9414_v50  ;;  %3081 = vmatpush.msrb.mxu0 %v2902_v24  ;;  %3379 = vmatpush.msra.mxu2 %v2902_v24 }
 0x615   : > { %v2406_v6 = vmul.f32 0.5, %v2405_v9  ;;  %v2703_v46 = vmul.f32 0.5, %v2679_v62 }
 0x616   : > { %v2488_v20 = vmul.f32 %v9406_v45, %v2462_v13  ;;  %v2585_v1 = vmul.f32 0.044715, %v2561_v31 }
 0x617   : > { %v2407_v55 = vsub.f32 1.5, %v2406_v6  ;;  %v2197_v35 = vpop.f32.mrf.mxu1  ;;  %v2727_v33 = vmul.f32 %v2703_v46, %v9373_v53 }
 0x618   : > { %v7747_v4 = vpop.eup %7746  ;;  %v9426_v27 = vadd.f32 %v9411_v28, %v2488_v20  ;;  %v9428_v44 = vadd.f32 1e-06, %v2197_v35  ;;  %v2609_v17 = vadd.f32 %v2585_v1, %v9414_v50 }
 0x619   : > { %v2408_v54 = vmul.f32 %v7743_v15, %v2407_v55  ;;  %v2414_v18 = vmul.f32 %v7747_v4, %v2195_v3  ;;  %vm2420_vm0 = vweird.f32 %v7747_v4 }
 0x61a   : > { %v7749_v10 = vpop.eup %7748  ;;  %7750 = vrsqrt.f32 %v9428_v44  ;;  %v2538_v12 = vmul.f32 %v9426_v27, %v9426_v27  ;;  %v2633_v56 = vmul.f32 0.7978846, %v2609_v17  ;;  %vm2421_vm9 = vmor %vm2419_vm8, %vm2420_vm0  ;;  %vm2429_vm11 = vweird.f32 %v9428_v44 }
 0x61b   : > { %v2412_v22 = vsel %vm2411_vm7, %v7743_v15, %v2408_v54  ;;  %v2415_v43 = vmul.f32 %v7747_v4, %v2414_v18  ;;  %v2680_v14 = vadd.f32 1.0, %v7749_v10 }
 0x61c   : > { %v2463_v23 = vmul.f32 %v2412_v22, %v9041_v49  ;;  %v2562_v39 = vmul.f32 %v2538_v12, %v9426_v27  ;;  %7752 = vtanh.f32 %v2633_v56 }
 0x61d   : > { %v2416_v41 = vmul.f32 0.5, %v2415_v43  ;;  %v2704_v21 = vmul.f32 0.5, %v2680_v14 }
 0x61e   : > { %v2489_v48 = vmul.f32 %v9406_v45, %v2463_v23  ;;  %v2586_v30 = vmul.f32 0.044715, %v2562_v39 }
 0x61f   : > { %v2417_v58 = vsub.f32 1.5, %v2416_v41  ;;  %v2200_v38 = vpop.f32.mrf.mxu1  ;;  %v2728_v16 = vmul.f32 %v2704_v21, %v9394_v57 }
 0x620   : > { %v7751_v51 = vpop.eup %7750  ;;  %v9441_v25 = vadd.f32 %v9411_v28, %v2489_v48  ;;  %v9443_v49 = vadd.f32 1e-06, %v2200_v38  ;;  %v2610_v19 = vadd.f32 %v2586_v30, %v9426_v27 }
 0x621   : > { %v2418_v11 = vmul.f32 %v7747_v4, %v2417_v58  ;;  %v2424_v5 = vmul.f32 %v7751_v51, %v9428_v44  ;;  %v2743_v8 = vpack.c.bf16 %v2728_v16, %v2727_v33  ;;  %vm2430_vm10 = vweird.f32 %v7751_v51 }
 0x622   : > { %7754 = vrsqrt.f32 %v9443_v49  ;;  %v2634_v63 = vmul.f32 0.7978846, %v2610_v19  ;;  %v2539_v53 = vmul.f32 %v9441_v25, %v9441_v25  ;;  %v7753_v57 = vpop.eup %7752  ;;  %vm2431_vm12 = vmor %vm2429_vm11, %vm2430_vm10  ;;  %vm2439_vm14 = vweird.f32 %v9443_v49 }
 0x623   : > { %v2422_v40 = vsel %vm2421_vm9, %v7747_v4, %v2418_v11  ;;  %v2425_v34 = vmul.f32 %v7751_v51, %v2424_v5  ;;  %7153 = vmatmul.msk.bf16.gmra.mxu2 %vm1509_vm3, %v2743_v8  ;;  %v2681_v47 = vadd.f32 1.0, %v7753_v57 }
 0x624   : > { %v2464_v61 = vmul.f32 %v2422_v40, %v9048_v32  ;;  %7756 = vtanh.f32 %v2634_v63  ;;  %v2563_v59 = vmul.f32 %v2539_v53, %v9441_v25 }
 0x625   : > { %v2426_v52 = vmul.f32 0.5, %v2425_v34  ;;  %v2705_v31 = vmul.f32 0.5, %v2681_v47 }
 0x626   : > { %v2490_v15 = vmul.f32 %v9406_v45, %v2464_v61  ;;  %v2826_v3 = vpop.f32.mrf.mxu2  ;;  %v2587_v26 = vmul.f32 0.044715, %v2563_v59 }
 0x627   : > { %v2427_v37 = vsub.f32 1.5, %v2426_v52  ;;  %v9457_v29 = vadd.f32 %v9451_v0, %v2826_v3  ;;  %v2729_v10 = vmul.f32 %v2705_v31, %v9414_v50 }
 0x628   : > { %v7755_v36 = vpop.eup %7754  ;;  %v9460_v7 = vadd.f32 %v9411_v28, %v2490_v15  ;;  %v2611_v32 = vadd.f32 %v2587_v26, %v9441_v25 }
 0x629   : > { %v2428_v60 = vmul.f32 %v7751_v51, %v2427_v37  ;;  %v2434_v9 = vmul.f32 %v7755_v36, %v9443_v49  ;;  %2920 = vmatmul.f32.vlgmr.msra.gmra.mxu3 %v9457_v29  ;;  %vm2440_vm13 = vweird.f32 %v7755_v36 }
 0x62a   : > { %v7757_v13 = vpop.eup %7756  ;;  %v2540_v6 = vmul.f32 %v9460_v7, %v9460_v7  ;;  %v2635_v20 = vmul.f32 0.7978846, %v2611_v32  ;;  %vm2441_vm15 = vmor %vm2439_vm14, %vm2440_vm13 }
 0x62b   : > { %v2432_v1 = vsel %vm2431_vm12, %v7751_v51, %v2428_v60  ;;  %v2435_v55 = vmul.f32 %v7755_v36, %v2434_v9  ;;  %v2682_v35 = vadd.f32 1.0, %v7757_v13 }
 0x62c   : > { %v2465_v62 = vmul.f32 %v2432_v1, %v9055_v2  ;;  %v2564_v4 = vmul.f32 %v2540_v6, %v9460_v7  ;;  %7758 = vtanh.f32 %v2635_v20 }
 0x62d   : > { %v2436_v44 = vmul.f32 0.5, %v2435_v55  ;;  %v2706_v17 = vmul.f32 0.5, %v2682_v35 }
 0x62e   : > { %v2491_v54 = vmul.f32 %v9406_v45, %v2465_v62  ;;  %v2828_v18 = vpop.f32.mrf.mxu2  ;;  %v2588_v12 = vmul.f32 0.044715, %v2564_v4 }
 0x62f   : > { %v2437_v56 = vsub.f32 1.5, %v2436_v44  ;;  %v9473_v22 = vadd.f32 %v9451_v0, %v2828_v18  ;;  %v2730_v43 = vmul.f32 %v2706_v17, %v9426_v27 }
 0x630   : > { %v2517_v2 = vadd.f32 %v9411_v28, %v2491_v54  ;;  %v2612_v14 = vadd.f32 %v2588_v12, %v9460_v7 }
 0x631   : > { %v2438_v46 = vmul.f32 %v7755_v36, %v2437_v56  ;;  %2923 = vmatmul.f32.gmra.mxu3 %v9473_v22  ;;  %v2744_v23 = vpack.c.bf16 %v2730_v43, %v2729_v10 }
 0x632   : > { %v2636_v50 = vmul.f32 0.7978846, %v2612_v14  ;;  %v2541_v39 = vmul.f32 %v2517_v2, %v2517_v2  ;;  %v7759_v21 = vpop.eup %7758 }
 0x633   : > { %v2442_v41 = vsel %vm2441_vm15, %v7755_v36, %v2438_v46  ;;  %7154 = vmatmul.msk.bf16.gmra.mxu2 %vm1509_vm3, %v2744_v23  ;;  %v2683_v16 = vadd.f32 1.0, %v7759_v21 }
 0x634   : > { %v2466_v48 = vmul.f32 %v2442_v41, %v9062_v42  ;;  %7760 = vtanh.f32 %v2636_v50  ;;  %v2565_v27 = vmul.f32 %v2541_v39, %v2517_v2 }
 0x635   : > { %v2707_v42 = vmul.f32 0.5, %v2683_v16 }
 0x636   : > { %v2492_v30 = vmul.f32 %v9406_v45, %v2466_v48  ;;  %v2831_v58 = vpop.f32.mrf.mxu2  ;;  %v2589_v38 = vmul.f32 0.044715, %v2565_v27 }
 0x637   : > { %v9484_v33 = vadd.f32 %v9451_v0, %v2831_v58  ;;  %v2731_v34 = vmul.f32 %v2707_v42, %v9441_v25 }
 0x638   : > { %v2518_v51 = vadd.f32 %v9411_v28, %v2492_v30  ;;  %v2613_v49 = vadd.f32 %v2589_v38, %v2517_v2 }
 0x639   : > { %2926 = vmatmul.f32.gmra.mxu3 %v9484_v33 }
 0x63a   : > { %v7761_v19 = vpop.eup %7760  ;;  %v2542_v11 = vmul.f32 %v2518_v51, %v2518_v51  ;;  %v2637_v5 = vmul.f32 0.7978846, %v2613_v49 }
 0x63b   : > { %v2684_v8 = vadd.f32 1.0, %v7761_v19 }
 0x63c   : > { %v2566_v63 = vmul.f32 %v2542_v11, %v2518_v51  ;;  %7762 = vtanh.f32 %v2637_v5 }
 0x63d   : > { %v2708_v53 = vmul.f32 0.5, %v2684_v8 }
 0x63e   : > { %v2833_v57 = vpop.f32.mrf.mxu2  ;;  %v2590_v45 = vmul.f32 0.044715, %v2566_v63 }
 0x63f   : > { %v9489_v40 = vadd.f32 %v9451_v0, %v2833_v57  ;;  %v2732_v28 = vmul.f32 %v2708_v53, %v9460_v7 }
 0x640   : > { %v2614_v61 = vadd.f32 %v2590_v45, %v2518_v51 }
 0x641   : > { %2929 = vmatmul.f32.gmra.mxu3 %v9489_v40  ;;  %v2745_v59 = vpack.c.bf16 %v2732_v28, %v2731_v34 }
 0x642   : > { %v2638_v52 = vmul.f32 0.7978846, %v2614_v61  ;;  %v7763_v15 = vpop.eup %7762 }
 0x643   : > { %7155 = vmatmul.msk.bf16.gmra.mxu2 %vm1509_vm3, %v2745_v59  ;;  %v2685_v26 = vadd.f32 1.0, %v7763_v15 }
 0x644   : > { %7764 = vtanh.f32 %v2638_v52 }
 0x645   : > { %v2709_v36 = vmul.f32 0.5, %v2685_v26 }
 0x646   : > { %v2836_v3 = vpop.f32.mrf.mxu2 }
 0x647   : > { %v9496_v47 = vadd.f32 %v9451_v0, %v2836_v3  ;;  %v2733_v9 = vmul.f32 %v2709_v36, %v2517_v2 }
 0x649   : > { %2932 = vmatmul.f32.gmra.mxu3 %v9496_v47 }
 0x64a   : > { %v7765_v37 = vpop.eup %7764 }
 0x64b   : > { %v2686_v25 = vadd.f32 1.0, %v7765_v37 }
 0x64d   : > { %v2710_v7 = vmul.f32 0.5, %v2686_v25 }
 0x64e   : > { %v2838_v32 = vpop.f32.mrf.mxu2 }
 0x64f   : > { %v9500_v60 = vadd.f32 %v9451_v0, %v2838_v32  ;;  %v2734_v24 = vmul.f32 %v2710_v7, %v2518_v51 }
 0x651   : > { %2935 = vmatmul.f32.gmra.mxu3 %v9500_v60  ;;  %v2746_v13 = vpack.c.bf16 %v2734_v24, %v2733_v9 }
 0x653   : > { %7156 = vmatmul.msk.bf16.gmra.mxu2 %vm1509_vm3, %v2746_v13 }
 0x656   : > { %v2841_v31 = vpop.f32.mrf.mxu2 }
 0x657   : > { %v9505_v6 = vadd.f32 %v9451_v0, %v2841_v31 }
 0x659   : > { %2938 = vmatmul.f32.gmra.mxu3 %v9505_v6 }
 0x65e   : > { %v2843_v20 = vpop.f32.mrf.mxu2 }
 0x65f   : > { %v9509_v1 = vadd.f32 %v9451_v0, %v2843_v20 }
 0x661   : > { %2941 = vmatmul.f32.gmra.mxu3 %v9509_v1 }
 0x666   : > { %v2846_v55 = vpop.f32.mrf.mxu2 }
 0x667   : > { %v9513_v35 = vadd.f32 %v9451_v0, %v2846_v55 }
 0x669   : > { %2944 = vmatmul.f32.gmra.mxu3 %v9513_v35 }
 0x66e   : > { %v2848_v62 = vpop.f32.mrf.mxu2 }
 0x66f   : > { %v9517_v4 = vadd.f32 %v9451_v0, %v2848_v62 }
 0x671   : > { %2947 = vmatmul.f32.gmra.mxu3 %v9517_v4 }
 0x676   : > { %v2851_v44 = vpop.f32.mrf.mxu2 }
 0x677   : > { %v9521_v17 = vadd.f32 %v9451_v0, %v2851_v44 }
 0x679   : > { %2950 = vmatmul.f32.gmra.mxu3 %v9521_v17 }
 0x67e   : > { %v2853_v54 = vpop.f32.mrf.mxu2 }
 0x67f   : > { %v9525_v18 = vadd.f32 %v9451_v0, %v2853_v54 }
 0x681   : > { %2953 = vmatmul.f32.gmra.mxu3 %v9525_v18 }
 0x686   : > { %v2856_v10 = vpop.f32.mrf.mxu2 }
 0x687   : > { %v9529_v12 = vadd.f32 %v9451_v0, %v2856_v10 }
 0x689   : > { %2956 = vmatmul.f32.gmra.mxu3 %v9529_v12 }
 0x68e   : > { %v2858_v56 = vpop.f32.mrf.mxu2 }
 0x68f   : > { %v9533_v43 = vadd.f32 %v9451_v0, %v2858_v56 }
 0x691   : > { %2959 = vmatmul.f32.gmra.mxu3 %v9533_v43 }
 0x696   : > { %v2861_v2 = vpop.f32.mrf.mxu2 }
 0x697   : > { %v9537_v14 = vadd.f32 %v9451_v0, %v2861_v2 }
 0x699   : > { %2962 = vmatmul.f32.gmra.mxu3 %v9537_v14 }
 0x69e   : > { %v2863_v46 = vpop.f32.mrf.mxu2 }
 0x69f   : > { %v9541_v23 = vadd.f32 %v9451_v0, %v2863_v46 }
 0x6a1   : > { %2965 = vmatmul.f32.gmra.mxu3 %v9541_v23 }
 0x6a6   : > { %v2866_v50 = vpop.f32.mrf.mxu2 }
 0x6a7   : > { %v9545_v39 = vadd.f32 %v9451_v0, %v2866_v50 }
 0x6a9   : > { %2968 = vmatmul.f32.gmra.mxu3 %v9545_v39 }
 0x6ac   : > { %v2921_v41 = vpop.f32.mrf.mxu3 }
 0x6ad   : > { %7157 = vmatmul.msk.f32.vlgmr.msrb.gmra.mxu0 %vm2993_vm1, %v2921_v41 }
 0x6ae   : > { %v2868_v21 = vpop.f32.mrf.mxu2 }
 0x6af   : > { %v9550_v48 = vadd.f32 %v9451_v0, %v2868_v21 }
 0x6b1   : > { %2971 = vmatmul.f32.gmra.mxu3 %v9550_v48 }
 0x6b4   : > { %v2924_v27 = vpop.f32.mrf.mxu3 }
 0x6b5   : > { %7158 = vmatmul.msk.f32.gmra.mxu0 %vm2993_vm1, %v2924_v27 }
 0x6b6   : > { %v2871_v30 = vpop.f32.mrf.mxu2 }
 0x6b7   : > { %v9555_v58 = vadd.f32 %v9451_v0, %v2871_v30 }
 0x6b9   : > { %2974 = vmatmul.f32.gmra.mxu3 %v9555_v58 }
 0x6bc   : > { %v2927_v38 = vpop.f32.mrf.mxu3 }
 0x6bd   : > { %7159 = vmatmul.msk.f32.gmra.mxu0 %vm2993_vm1, %v2927_v38 }
 0x6be   : > { %v2873_v16 = vpop.f32.mrf.mxu2 }
 0x6bf   : > { %v9560_v51 = vadd.f32 %v9451_v0, %v2873_v16 }
 0x6c1   : > { %2977 = vmatmul.f32.gmra.mxu3 %v9560_v51 }
 0x6c4   : > { %v2930_v49 = vpop.f32.mrf.mxu3 }
 0x6c5   : > { %7160 = vmatmul.msk.f32.gmra.mxu0 %vm2993_vm1, %v2930_v49 }
 0x6c6   : > { %v2876_v19 = vpop.f32.mrf.mxu2 }
 0x6c7   : > { %v9565_v11 = vadd.f32 %v9451_v0, %v2876_v19 }
 0x6c9   : > { %2980 = vmatmul.f32.gmra.mxu3 %v9565_v11 }
 0x6cc   : > { %v2933_v5 = vpop.f32.mrf.mxu3 }
 0x6cd   : > { %7161 = vmatmul.msk.f32.gmra.mxu0 %vm2993_vm1, %v2933_v5 }
 0x6ce   : > { %v2878_v8 = vpop.f32.mrf.mxu2 }
 0x6cf   : > { %v9570_v42 = vadd.f32 %v9451_v0, %v2878_v8 }
 0x6d1   : > { %2983 = vmatmul.f32.gmra.mxu3 %v9570_v42 }
 0x6d4   : > { %v2936_v63 = vpop.f32.mrf.mxu3 }
 0x6d5   : > { %7162 = vmatmul.msk.f32.gmra.mxu0 %vm2993_vm1, %v2936_v63 }
 0x6d6   : > { %v2881_v53 = vpop.f32.mrf.mxu2 }
 0x6d7   : > { %v9575_v57 = vadd.f32 %v9451_v0, %v2881_v53 }
 0x6d9   : > { %2986 = vmatmul.f32.gmra.mxu3 %v9575_v57 }
 0x6dc   : > { %v2939_v45 = vpop.f32.mrf.mxu3 }
 0x6dd   : > { %7163 = vmatmul.msk.f32.gmra.mxu0 %vm2993_vm1, %v2939_v45 }
 0x6de   : > { %v2883_v34 = vpop.f32.mrf.mxu2 }
 0x6df   : > { %v9580_v28 = vadd.f32 %v9451_v0, %v2883_v34 }
 0x6e1   : > { %2989 = vmatmul.f32.gmra.mxu3 %v9580_v28 }
 0x6e4   : > { %v2942_v61 = vpop.f32.mrf.mxu3 }
 0x6e5   : > { %7164 = vmatmul.msk.f32.gmra.mxu0 %vm2993_vm1, %v2942_v61 }
 0x6ec   : > { %v2945_v59 = vpop.f32.mrf.mxu3 }
 0x6ed   : > { %7165 = vmatmul.msk.f32.gmra.mxu0 %vm2993_vm1, %v2945_v59 }
 0x6f4   : > { %v2948_v52 = vpop.f32.mrf.mxu3 }
 0x6f5   : > { %7166 = vmatmul.msk.f32.gmra.mxu0 %vm2993_vm1, %v2948_v52 }
 0x6fc   : > { %v2951_v15 = vpop.f32.mrf.mxu3 }
 0x6fd   : > { %7167 = vmatmul.msk.f32.gmra.mxu0 %vm2993_vm1, %v2951_v15 }
 0x704   : > { %v2954_v3 = vpop.f32.mrf.mxu3 }
 0x705   : > { %7168 = vmatmul.msk.f32.gmra.mxu0 %vm2993_vm1, %v2954_v3 }
 0x70c   : > { %v2957_v26 = vpop.f32.mrf.mxu3 }
 0x70d   : > { %7169 = vmatmul.msk.f32.gmra.mxu0 %vm2993_vm1, %v2957_v26  ;;  %v7263_v26 = vld [vmem:[#allocation12 + $0x70] sm:$0xf] }
 0x714   : > { %v2960_v0 = vpop.f32.mrf.mxu3 }
 0x715   : > { %7170 = vmatmul.msk.f32.gmra.mxu0 %vm2993_vm1, %v2960_v0  ;;  %v7490_v0 = vld [vmem:[#allocation12 + $0x74] sm:$0xf0] }
 0x71c   : > { %v2963_v37 = vpop.f32.mrf.mxu3 }
 0x71d   : > { %7171 = vmatmul.msk.f32.gmra.mxu0 %vm2993_vm1, %v2963_v37  ;;  %v7489_v37 = vld [vmem:[#allocation12 + $0x74] sm:$0xf] }
 0x724   : > { %v2966_v25 = vpop.f32.mrf.mxu3 }
 0x725   : > { %7172 = vmatmul.msk.f32.gmra.mxu0 %vm2993_vm1, %v2966_v25  ;;  %v7264_v25 = vor.u32 %v7490_v0, %v7263_v26 }
 0x727   : > { %4099 = vmatpush.bf16.msrb.mxu3 %v7264_v25  ;;  %v7239_v25 = vld [vmem:[#allocation12 + $0x40] sm:$0xf] }
 0x72a   : > { %v3083_v36 = vpop.f32.mrf.mxu0 }
 0x72b   : > { %v9593_v7 = vsub.f32 %v9457_v29, %v3083_v36  ;;  %v7265_v36 = vld [vmem:[#allocation12 + $0x78] sm:$0xf0] }
 0x72c   : > { %v2969_v32 = vpop.f32.mrf.mxu3 }
 0x72d   : > { %v3179_v9 = vmul.f32 %v9593_v7, %v9593_v7  ;;  %7173 = vmatmul.msk.f32.gmra.mxu0 %vm2993_vm1, %v2969_v32  ;;  %v7268_v32 = vor.u32 %v7489_v37, %v7265_v36  ;;  %v7484_v36 = vld [vmem:[#allocation12 + $0x44] sm:$0xf0] }
 0x72f   : > { %3219 = vmatmul.f32.vlgmr.msra.gmra.mxu1 %v3179_v9  ;;  %4168 = vmatpush.bf16.msra.mxu0 %v7268_v32  ;;  %v7483_v32 = vld [vmem:[#allocation12 + $0x44] sm:$0xf] }
 0x732   : > { %v3086_v24 = vpop.f32.mrf.mxu0 }
 0x733   : > { %v9599_v13 = vsub.f32 %v9473_v22, %v3086_v24 }
 0x734   : > { %v2972_v31 = vpop.f32.mrf.mxu3 }
 0x735   : > { %v3180_v20 = vmul.f32 %v9599_v13, %v9599_v13  ;;  %7174 = vmatmul.msk.f32.gmra.mxu0 %vm2993_vm1, %v2972_v31 }
 0x737   : > { %3222 = vmatmul.f32.gmra.mxu1 %v3180_v20 }
 0x73a   : > { %v3089_v29 = vpop.f32.mrf.mxu0 }
 0x73b   : > { %v9605_v55 = vsub.f32 %v9484_v33, %v3089_v29 }
 0x73c   : > { %v2975_v62 = vpop.f32.mrf.mxu3 }
 0x73d   : > { %v3181_v44 = vmul.f32 %v9605_v55, %v9605_v55  ;;  %7175 = vmatmul.msk.f32.gmra.mxu0 %vm2993_vm1, %v2975_v62 }
 0x73f   : > { %3225 = vmatmul.f32.gmra.mxu1 %v3181_v44  ;;  %v7255_v44 = vld [vmem:[#allocation12 + $0x60] sm:$0xf] }
 0x742   : > { %v3092_v22 = vpop.f32.mrf.mxu0 }
 0x743   : > { %v9611_v54 = vsub.f32 %v9489_v40, %v3092_v22  ;;  %v7488_v22 = vld [vmem:[#allocation12 + $0x64] sm:$0xf0] }
 0x744   : > { %v2978_v10 = vpop.f32.mrf.mxu3 }
 0x745   : > { %v3182_v56 = vmul.f32 %v9611_v54, %v9611_v54  ;;  %7176 = vmatmul.msk.f32.gmra.mxu0 %vm2993_vm1, %v2978_v10  ;;  %v7487_v10 = vld [vmem:[#allocation12 + $0x64] sm:$0xf] }
 0x747   : > { %3228 = vmatmul.f32.gmra.mxu1 %v3182_v56  ;;  %v7256_v56 = vor.u32 %v7488_v22, %v7255_v44 }
 0x749   : > { %4100 = vmatpush.bf16.msrb.mxu3 %v7256_v56 }
 0x74a   : > { %v3095_v33 = vpop.f32.mrf.mxu0 }
 0x74b   : > { %v9617_v2 = vsub.f32 %v9496_v47, %v3095_v33  ;;  %v7257_v33 = vld [vmem:[#allocation12 + $0x68] sm:$0xf0] }
 0x74c   : > { %v2981_v46 = vpop.f32.mrf.mxu3 }
 0x74d   : > { %v3183_v50 = vmul.f32 %v9617_v2, %v9617_v2  ;;  %7177 = vmatmul.msk.f32.gmra.mxu0 %vm2993_vm1, %v2981_v46  ;;  %v7260_v46 = vor.u32 %v7487_v10, %v7257_v33  ;;  %v7231_v33 = vld [vmem:[#allocation12 + $0x30] sm:$0xf] }
 0x74f   : > { %3231 = vmatmul.f32.gmra.mxu1 %v3183_v50  ;;  %4169 = vmatpush.bf16.msra.mxu0 %v7260_v46  ;;  %v7482_v46 = vld [vmem:[#allocation12 + $0x34] sm:$0xf0] }
 0x752   : > { %v3098_v40 = vpop.f32.mrf.mxu0 }
 0x753   : > { %v9623_v41 = vsub.f32 %v9500_v60, %v3098_v40 }
 0x754   : > { %v2984_v21 = vpop.f32.mrf.mxu3 }
 0x755   : > { %v3184_v27 = vmul.f32 %v9623_v41, %v9623_v41  ;;  %7178 = vmatmul.msk.f32.gmra.mxu0 %vm2993_vm1, %v2984_v21 }
 0x757   : > { %3234 = vmatmul.f32.gmra.mxu1 %v3184_v27 }
 0x75a   : > { %v3101_v47 = vpop.f32.mrf.mxu0 }
 0x75b   : > { %v9629_v30 = vsub.f32 %v9505_v6, %v3101_v47 }
 0x75c   : > { %v2987_v38 = vpop.f32.mrf.mxu3 }
 0x75d   : > { %v3185_v16 = vmul.f32 %v9629_v30, %v9629_v30  ;;  %7179 = vmatmul.msk.f32.gmra.mxu0 %vm2993_vm1, %v2987_v38 }
 0x75f   : > { %3237 = vmatmul.f32.gmra.mxu1 %v3185_v16 }
 0x762   : > { %v3104_v60 = vpop.f32.mrf.mxu0 }
 0x763   : > { %v9635_v49 = vsub.f32 %v9509_v1, %v3104_v60 }
 0x764   : > { %v2990_v19 = vpop.f32.mrf.mxu3 }
 0x765   : > { %v3186_v5 = vmul.f32 %v9635_v49, %v9635_v49  ;;  %7180 = vmatmul.msk.f32.gmra.mxu0 %vm2993_vm1, %v2990_v19 }
 0x767   : > { %3240 = vmatmul.f32.gmra.mxu1 %v3186_v5  ;;  %v7247_v5 = vld [vmem:[#allocation12 + $0x50] sm:$0xf] }
 0x76a   : > { %v3107_v6 = vpop.f32.mrf.mxu0 }
 0x76b   : > { %v9641_v8 = vsub.f32 %v9513_v35, %v3107_v6  ;;  %v7485_v6 = vld [vmem:[#allocation12 + $0x54] sm:$0xf] }
 0x76d   : > { %v3187_v63 = vmul.f32 %v9641_v8, %v9641_v8 }
 0x76f   : > { %3243 = vmatmul.f32.gmra.mxu1 %v3187_v63 }
 0x772   : > { %v3110_v53 = vpop.f32.mrf.mxu0 }
 0x773   : > { %v9646_v45 = vsub.f32 %v9517_v4, %v3110_v53  ;;  %v7249_v53 = vld [vmem:[#allocation12 + $0x58] sm:$0xf0] }
 0x775   : > { %v3188_v1 = vmul.f32 %v9646_v45, %v9646_v45 }
 0x777   : > { %3246 = vmatmul.f32.gmra.mxu1 %v3188_v1  ;;  %v7252_v1 = vor.u32 %v7485_v6, %v7249_v53  ;;  %v4268_v53 = vld [vmem:[%s12393_s13 + $0xf8] sm:$0xff] }
 0x778   : > { %4374 = vmatpush.msrb.mxu2 %v4268_v53  ;;  %v7476_v53 = vld [vmem:[#allocation12 + $0x4] sm:$0xf0] }
 0x779   : > { %4170 = vmatpush.bf16.msra.mxu0 %v7252_v1 }
 0x77a   : > { %v3113_v34 = vpop.f32.mrf.mxu0 }
 0x77b   : > { %v9651_v61 = vsub.f32 %v9521_v17, %v3113_v34 }
 0x77d   : > { %v3189_v35 = vmul.f32 %v9651_v61, %v9651_v61 }
 0x77f   : > { %3249 = vmatmul.f32.gmra.mxu1 %v3189_v35 }
 0x782   : > { %v3116_v59 = vpop.f32.mrf.mxu0 }
 0x783   : > { %v9656_v52 = vsub.f32 %v9525_v18, %v3116_v59 }
 0x785   : > { %v3190_v4 = vmul.f32 %v9656_v52, %v9656_v52 }
 0x787   : > { %3252 = vmatmul.f32.gmra.mxu1 %v3190_v4 }
 0x78a   : > { %v3119_v15 = vpop.f32.mrf.mxu0 }
 0x78b   : > { %v9661_v3 = vsub.f32 %v9529_v12, %v3119_v15 }
 0x78d   : > { %v3191_v17 = vmul.f32 %v9661_v3, %v9661_v3 }
 0x78f   : > { %3255 = vmatmul.f32.gmra.mxu1 %v3191_v17 }
 0x792   : > { %v3122_v18 = vpop.f32.mrf.mxu0 }
 0x793   : > { %v9666_v9 = vsub.f32 %v9533_v43, %v3122_v18 }
 0x795   : > { %v3192_v12 = vmul.f32 %v9666_v9, %v9666_v9 }
 0x797   : > { %3258 = vmatmul.f32.gmra.mxu1 %v3192_v12  ;;  %v7241_v12 = vld [vmem:[#allocation12 + $0x48] sm:$0xf0] }
 0x79a   : > { %v3125_v24 = vpop.f32.mrf.mxu0 }
 0x79b   : > { %v9671_v31 = vsub.f32 %v9537_v14, %v3125_v24  ;;  %v7244_v24 = vor.u32 %v7483_v32, %v7241_v12  ;;  %v4251_v12 = vld [vmem:[%s12393_s13 + $0x70] sm:$0xff] }
 0x79d   : > { %v3193_v20 = vmul.f32 %v9671_v31, %v9671_v31  ;;  %4171 = vmatpush.bf16.msra.mxu0 %v7244_v24 }
 0x79f   : > { %3261 = vmatmul.f32.gmra.mxu1 %v3193_v20 }
 0x7a2   : > { %v3128_v29 = vpop.f32.mrf.mxu0 }
 0x7a3   : > { %v9676_v62 = vsub.f32 %v9541_v23, %v3128_v29 }
 0x7a5   : > { %v3194_v43 = vmul.f32 %v9676_v62, %v9676_v62 }
 0x7a7   : > { %3264 = vmatmul.f32.gmra.mxu1 %v3194_v43 }
 0x7aa   : > { %v3131_v14 = vpop.f32.mrf.mxu0 }
 0x7ab   : > { %v9681_v50 = vsub.f32 %v9545_v39, %v3131_v14  ;;  %v7481_v14 = vld [vmem:[#allocation12 + $0x34] sm:$0xf] }
 0x7ac   : > { %v3220_v40 = vpop.f32.mrf.mxu1 }
 0x7ad   : > { %v3195_v23 = vmul.f32 %v9681_v50, %v9681_v50  ;;  %7181 = vmatmul.msk.f32.vlgmr.msra.gmra.mxu2 %vm2993_vm1, %v3220_v40  ;;  %v7232_v40 = vor.u32 %v7482_v46, %v7231_v33  ;;  %v4250_v46 = vld [vmem:[%s12393_s13 + $0x68] sm:$0xff] }
 0x7af   : > { %3267 = vmatmul.f32.gmra.mxu1 %v3195_v23  ;;  %v7233_v23 = vld [vmem:[#allocation12 + $0x38] sm:$0xf0] }
 0x7b2   : > { %v3134_v21 = vpop.f32.mrf.mxu0 }
 0x7b3   : > { %v9687_v27 = vsub.f32 %v9550_v48, %v3134_v21  ;;  %v7486_v48 = vld [vmem:[#allocation12 + $0x54] sm:$0xf0]  ;;  %v7236_v21 = vor.u32 %v7481_v14, %v7233_v23 }
 0x7b4   : > { %v3223_v47 = vpop.f32.mrf.mxu1  ;;  %v7248_v63 = vor.u32 %v7486_v48, %v7247_v5  ;;  %v7225_v48 = vld [vmem:[#allocation12 + $0x28] sm:$0xf0] }
 0x7b5   : > { %v3196_v38 = vmul.f32 %v9687_v27, %v9687_v27  ;;  %7182 = vmatmul.msk.f32.gmra.mxu2 %vm2993_vm1, %v3223_v47  ;;  %4172 = vmatpush.bf16.msra.mxu0 %v7236_v21 }
 0x7b6   : > { %4101 = vmatpush.bf16.msrb.mxu3 %v7248_v63 }
 0x7b7   : > { %3270 = vmatmul.f32.gmra.mxu1 %v3196_v38 }
 0x7ba   : > { %v3137_v39 = vpop.f32.mrf.mxu0 }
 0x7bb   : > { %v9693_v16 = vsub.f32 %v9555_v58, %v3137_v39  ;;  %v7223_v39 = vld [vmem:[#allocation12 + $0x20] sm:$0xf] }
 0x7bc   : > { %v3226_v60 = vpop.f32.mrf.mxu1 }
 0x7bd   : > { %v3197_v19 = vmul.f32 %v9693_v16, %v9693_v16  ;;  %7183 = vmatmul.msk.f32.gmra.mxu2 %vm2993_vm1, %v3226_v60  ;;  %v7480_v60 = vld [vmem:[#allocation12 + $0x24] sm:$0xf0] }
 0x7be   : > { %v7224_v5 = vor.u32 %v7480_v60, %v7223_v39 }
 0x7bf   : > { %3273 = vmatmul.f32.gmra.mxu1 %v3197_v19  ;;  %v7479_v19 = vld [vmem:[#allocation12 + $0x24] sm:$0xf] }
 0x7c0   : > { %v7228_v6 = vor.u32 %v7479_v19, %v7225_v48  ;;  %v9760_v48 = vld [vmem:[#allocation9 + $0x2] ss:$0 sm:$0xff] }
 0x7c2   : > { %v3140_v34 = vpop.f32.mrf.mxu0  ;;  %4173 = vmatpush.bf16.msra.mxu0 %v7228_v6 }
 0x7c3   : > { %v9699_v35 = vsub.f32 %v9560_v51, %v3140_v34 }
 0x7c4   : > { %v3229_v58 = vpop.f32.mrf.mxu1 }
 0x7c5   : > { %v3198_v59 = vmul.f32 %v9699_v35, %v9699_v35  ;;  %7184 = vmatmul.msk.f32.gmra.mxu2 %vm2993_vm1, %v3229_v58 }
 0x7c7   : > { %3276 = vmatmul.f32.gmra.mxu1 %v3198_v59  ;;  %v4252_v59 = vld [vmem:[%s12393_s13 + $0x78] sm:$0xff] }
 0x7c8   : > { %4285 = vmatpush.msrb.mxu1 %v4252_v59  ;;  %v7475_v59 = vld [vmem:[#allocation12 + $0x4] sm:$0xf] }
 0x7ca   : > { %v3143_v4 = vpop.f32.mrf.mxu0  ;;  %4286 = vmatpush.msrb.mxu1 %v4251_v12 }
 0x7cb   : > { %v9705_v15 = vsub.f32 %v9565_v11, %v3143_v4  ;;  %v7240_v11 = vor.u32 %v7484_v36, %v7239_v25  ;;  %v7478_v25 = vld [vmem:[#allocation12 + $0x14] sm:$0xf0] }
 0x7cc   : > { %v3232_v17 = vpop.f32.mrf.mxu1  ;;  %4287 = vmatpush.msrb.mxu1 %v4250_v46 }
 0x7cd   : > { %v3199_v26 = vmul.f32 %v9705_v15, %v9705_v15  ;;  %7185 = vmatmul.msk.f32.gmra.mxu2 %vm2993_vm1, %v3232_v17  ;;  %4102 = vmatpush.bf16.msrb.mxu3 %v7240_v11  ;;  %v7217_v11 = vld [vmem:[#allocation12 + $0x18] sm:$0xf0] }
 0x7cf   : > { %3279 = vmatmul.f32.gmra.mxu1 %v3199_v26 }
 0x7d1   : > { %4103 = vmatpush.bf16.msrb.mxu3 %v7232_v40 }
 0x7d2   : > { %v3146_v51 = vpop.f32.mrf.mxu0 }
 0x7d3   : > { %v9711_v0 = vsub.f32 %v9570_v42, %v3146_v51  ;;  %v4267_v51 = vld [vmem:[%s12393_s13 + $0xf0] sm:$0xff] }
 0x7d4   : > { %v3235_v37 = vpop.f32.mrf.mxu1  ;;  %4375 = vmatpush.msrb.mxu2 %v4267_v51  ;;  %v4249_v51 = vld [vmem:[%s12393_s13 + $0x60] sm:$0xff] }
 0x7d5   : > { %v3200_v18 = vmul.f32 %v9711_v0, %v9711_v0  ;;  %7186 = vmatmul.msk.f32.gmra.mxu2 %vm2993_vm1, %v3235_v37  ;;  %4104 = vmatpush.bf16.msrb.mxu3 %v7224_v5  ;;  %v7215_v37 = vld [vmem:[#allocation12 + $0x10] sm:$0xf] }
 0x7d6   : > { %v7216_v32 = vor.u32 %v7478_v25, %v7215_v37  ;;  %4288 = vmatpush.msrb.mxu1 %v4249_v51 }
 0x7d7   : > { %3282 = vmatmul.f32.gmra.mxu1 %v3200_v18  ;;  %v7477_v18 = vld [vmem:[#allocation12 + $0x14] sm:$0xf] }
 0x7d8   : > { %v7220_v24 = vor.u32 %v7477_v18, %v7217_v11 }
 0x7d9   : > { %4105 = vmatpush.bf16.msrb.mxu3 %v7216_v32 }
 0x7da   : > { %v3149_v20 = vpop.f32.mrf.mxu0  ;;  %4174 = vmatpush.bf16.msra.mxu0 %v7220_v24 }
 0x7db   : > { %v9717_v29 = vsub.f32 %v9575_v57, %v3149_v20  ;;  %v4266_v20 = vld [vmem:[%s12393_s13 + $0xe8] sm:$0xff] }
 0x7dc   : > { %v3238_v42 = vpop.f32.mrf.mxu1  ;;  %4376 = vmatpush.msrb.mxu2 %v4266_v20 }
 0x7dd   : > { %v3201_v43 = vmul.f32 %v9717_v29, %v9717_v29  ;;  %7187 = vmatmul.msk.f32.gmra.mxu2 %vm2993_vm1, %v3238_v42 }
 0x7df   : > { %3285 = vmatmul.f32.gmra.mxu1 %v3201_v43 }
 0x7e2   : > { %v3152_v44 = vpop.f32.mrf.mxu0 }
 0x7e3   : > { %v9723_v22 = vsub.f32 %v9580_v28, %v3152_v44 }
 0x7e4   : > { %v3241_v10 = vpop.f32.mrf.mxu1 }
 0x7e5   : > { %v3202_v56 = vmul.f32 %v9723_v22, %v9723_v22  ;;  %7188 = vmatmul.msk.f32.gmra.mxu2 %vm2993_vm1, %v3241_v10 }
 0x7e7   : > { %3288 = vmatmul.f32.gmra.mxu1 %v3202_v56 }
 0x7ec   : > { %v3244_v57 = vpop.f32.mrf.mxu1 }
 0x7ed   : > { %7189 = vmatmul.msk.f32.gmra.mxu2 %vm2993_vm1, %v3244_v57 }
 0x7f4   : > { %v3247_v28 = vpop.f32.mrf.mxu1 }
 0x7f5   : > { %7190 = vmatmul.msk.f32.gmra.mxu2 %vm2993_vm1, %v3247_v28 }
 0x7fc   : > { %v3250_v47 = vpop.f32.mrf.mxu1 }
 0x7fd   : > { %7191 = vmatmul.msk.f32.gmra.mxu2 %vm2993_vm1, %v3250_v47 }
 0x804   : > { %v3253_v38 = vpop.f32.mrf.mxu1 }
 0x805   : > { %7192 = vmatmul.msk.f32.gmra.mxu2 %vm2993_vm1, %v3253_v38  ;;  %v9757_v38 = vld [vmem:[#allocation9 + $0x1] ss:$0 sm:$0xff] }
 0x80c   : > { %v3256_v63 = vpop.f32.mrf.mxu1 }
 0x80d   : > { %7193 = vmatmul.msk.f32.gmra.mxu2 %vm2993_vm1, %v3256_v63  ;;  %v7207_v63 = vld [vmem:[#allocation12] sm:$0xf] }
 0x814   : > { %v3259_v1 = vpop.f32.mrf.mxu1 }
 0x815   : > { %7194 = vmatmul.msk.f32.gmra.mxu2 %vm2993_vm1, %v3259_v1 }
 0x81c   : > { %v3262_v34 = vpop.f32.mrf.mxu1 }
 0x81d   : > { %7195 = vmatmul.msk.f32.gmra.mxu2 %vm2993_vm1, %v3262_v34  ;;  %v4265_v34 = vld [vmem:[%s12393_s13 + $0xe0] sm:$0xff] }
 0x81e   : > { %4377 = vmatpush.msrb.mxu2 %v4265_v34 }
 0x824   : > { %v3265_v58 = vpop.f32.mrf.mxu1 }
 0x825   : > { %7196 = vmatmul.msk.f32.gmra.mxu2 %vm2993_vm1, %v3265_v58  ;;  %v7208_v58 = vor.u32 %v7476_v53, %v7207_v63 }
 0x827   : > { %4106 = vmatpush.bf16.msrb.mxu3 %v7208_v58 }
 0x82c   : > { %v3268_v4 = vpop.f32.mrf.mxu1 }
 0x82d   : > { %7197 = vmatmul.msk.f32.gmra.mxu2 %vm2993_vm1, %v3268_v4  ;;  %v7209_v4 = vld [vmem:[#allocation12 + $0x8] sm:$0xf0] }
 0x830   : > { %v3381_v17 = vpop.f32.mrf.mxu2 }
 0x831   : > { %v3382_v26 = vadd.f32 1e-06, %v3381_v17 }
 0x833   : > { %7766 = vrsqrt.f32 %v3382_v26  ;;  %vm3459_vm4 = vweird.f32 %v3382_v26 }
 0x834   : > { %v3271_v36 = vpop.f32.mrf.mxu1 }
 0x835   : > { %7198 = vmatmul.msk.f32.gmra.mxu2 %vm2993_vm1, %v3271_v36 }
 0x838   : > { %v3384_v42 = vpop.f32.mrf.mxu2 }
 0x839   : > { %v7767_v43 = vpop.eup %7766  ;;  %v3385_v44 = vadd.f32 1e-06, %v3384_v42 }
 0x83a   : > { %v3454_v10 = vmul.f32 %v7767_v43, %v3382_v26  ;;  %vm3460_vm2 = vweird.f32 %v7767_v43 }
 0x83b   : > { %7768 = vrsqrt.f32 %v3385_v44  ;;  %vm3461_vm5 = vmor %vm3459_vm4, %vm3460_vm2  ;;  %vm3469_vm7 = vweird.f32 %v3385_v44 }
 0x83c   : > { %v3455_v56 = vmul.f32 %v7767_v43, %v3454_v10  ;;  %v3274_v57 = vpop.f32.mrf.mxu1 }
 0x83d   : > { %7199 = vmatmul.msk.f32.gmra.mxu2 %vm2993_vm1, %v3274_v57 }
 0x83e   : > { %v3456_v33 = vmul.f32 0.5, %v3455_v56  ;;  %v4264_v56 = vld [vmem:[%s12393_s13 + $0xd8] sm:$0xff] }
 0x83f   : > { %4378 = vmatpush.msrb.mxu2 %v4264_v56  ;;  %v9817_v56 = vld [vmem:[%s12393_s13 + $0x50] sm:$0xff] }
 0x840   : > { %v3457_v14 = vsub.f32 1.5, %v3456_v33  ;;  %v3387_v40 = vpop.f32.mrf.mxu2 }
 0x841   : > { %v7769_v23 = vpop.eup %7768  ;;  %v3388_v21 = vadd.f32 1e-06, %v3387_v40 }
 0x842   : > { %v3458_v28 = vmul.f32 %v7767_v43, %v3457_v14  ;;  %v3464_v47 = vmul.f32 %v7769_v23, %v3385_v44  ;;  %vm3470_vm6 = vweird.f32 %v7769_v23 }
 0x843   : > { %7770 = vrsqrt.f32 %v3388_v21  ;;  %vm3471_vm0 = vmor %vm3469_vm7, %vm3470_vm6  ;;  %vm3479_vm9 = vweird.f32 %v3388_v21 }
 0x844   : > { %v3462_v39 = vsel %vm3461_vm5, %v7767_v43, %v3458_v28  ;;  %v3465_v60 = vmul.f32 %v7769_v23, %v3464_v47  ;;  %v3277_v19 = vpop.f32.mrf.mxu1 }
 0x845   : > { %v3693_v5 = vmul.f32 %v3462_v39, %v9593_v7  ;;  %7200 = vmatmul.msk.f32.gmra.mxu2 %vm2993_vm1, %v3277_v19  ;;  %v7212_v7 = vor.u32 %v7475_v59, %v7209_v4 }
 0x846   : > { %v3466_v6 = vmul.f32 0.5, %v3465_v60 }
 0x847   : > { %v3719_v1 = vmul.f32 %v9757_v38, %v3693_v5  ;;  %4175 = vmatpush.bf16.msra.mxu0 %v7212_v7 }
 0x848   : > { %v3467_v17 = vsub.f32 1.5, %v3466_v6  ;;  %v3390_v26 = vpop.f32.mrf.mxu2 }
 0x849   : > { %v7771_v37 = vpop.eup %7770  ;;  %v9771_v25 = vadd.f32 %v9760_v48, %v3719_v1  ;;  %v3391_v36 = vadd.f32 1e-06, %v3390_v26 }
 0x84a   : > { %v3468_v32 = vmul.f32 %v7769_v23, %v3467_v17  ;;  %v3474_v18 = vmul.f32 %v7771_v37, %v3388_v21  ;;  %vm3480_vm8 = vweird.f32 %v7771_v37  ;;  %v4248_v21 = vld [vmem:[%s12393_s13 + $0x58] sm:$0xff] }
 0x84b   : > { %v3769_v11 = vmul.f32 %v9771_v25, %v9771_v25  ;;  %7772 = vrsqrt.f32 %v3391_v36  ;;  %vm3481_vm10 = vmor %vm3479_vm9, %vm3480_vm8  ;;  %4289 = vmatpush.msrb.mxu1 %v4248_v21  ;;  %vm3489_vm12 = vweird.f32 %v3391_v36 }
 0x84c   : > { %v3472_v12 = vsel %vm3471_vm0, %v7769_v23, %v3468_v32  ;;  %v3475_v24 = vmul.f32 %v7771_v37, %v3474_v18  ;;  %v3280_v20 = vpop.f32.mrf.mxu1 }
 0x84d   : > { %v3694_v42 = vmul.f32 %v3472_v12, %v9599_v13  ;;  %7201 = vmatmul.msk.f32.gmra.mxu2 %vm2993_vm1, %v3280_v20  ;;  %v3793_v43 = vmul.f32 %v3769_v11, %v9771_v25  ;;  %4290 = vmatpush.msrb.mxu1 %v9817_v56 }
 0x84e   : > { %v3476_v10 = vmul.f32 0.5, %v3475_v24 }
 0x84f   : > { %v3720_v44 = vmul.f32 %v9757_v38, %v3694_v42  ;;  %v3817_v57 = vmul.f32 0.044715, %v3793_v43 }
 0x850   : > { %v3477_v33 = vsub.f32 1.5, %v3476_v10  ;;  %v3393_v46 = vpop.f32.mrf.mxu2 }
 0x851   : > { %v7773_v14 = vpop.eup %7772  ;;  %v9784_v40 = vadd.f32 %v9760_v48, %v3720_v44  ;;  %v3394_v13 = vadd.f32 1e-06, %v3393_v46  ;;  %v3841_v23 = vadd.f32 %v3817_v57, %v9771_v25  ;;  %v9812_v44 = vld [vmem:[%s12393_s13 + $0xd0] sm:$0xff] }
 0x852   : > { %v3478_v28 = vmul.f32 %v7771_v37, %v3477_v33  ;;  %v3484_v47 = vmul.f32 %v7773_v14, %v3391_v36  ;;  %vm3490_vm11 = vweird.f32 %v7773_v14  ;;  %4379 = vmatpush.msrb.mxu2 %v9812_v44 }
 0x853   : > { %v3770_v39 = vmul.f32 %v9784_v40, %v9784_v40  ;;  %7774 = vrsqrt.f32 %v3394_v13  ;;  %v3865_v60 = vmul.f32 0.7978846, %v3841_v23  ;;  %vm3491_vm13 = vmor %vm3489_vm12, %vm3490_vm11  ;;  %vm3499_vm15 = vweird.f32 %v3394_v13 }
 0x854   : > { %v3482_v19 = vsel %vm3481_vm10, %v7771_v37, %v3478_v28  ;;  %v3485_v5 = vmul.f32 %v7773_v14, %v3484_v47  ;;  %v3283_v6 = vpop.f32.mrf.mxu1 }
 0x855   : > { %v3695_v63 = vmul.f32 %v3482_v19, %v9605_v55  ;;  %7202 = vmatmul.msk.f32.gmra.mxu2 %vm2993_vm1, %v3283_v6  ;;  %v3794_v53 = vmul.f32 %v3770_v39, %v9784_v40  ;;  %7776 = vtanh.f32 %v3865_v60 }
 0x856   : > { %v3486_v1 = vmul.f32 0.5, %v3485_v5 }
 0x857   : > { %v3721_v34 = vmul.f32 %v9757_v38, %v3695_v63  ;;  %v3818_v58 = vmul.f32 0.044715, %v3794_v53 }
 0x858   : > { %v3487_v59 = vsub.f32 1.5, %v3486_v1  ;;  %v3396_v4 = vpop.f32.mrf.mxu2 }
 0x859   : > { %v7775_v17 = vpop.eup %7774  ;;  %v9796_v26 = vadd.f32 1e-06, %v3396_v4  ;;  %v3842_v55 = vadd.f32 %v3818_v58, %v9784_v40  ;;  %v9800_v7 = vadd.f32 %v9760_v48, %v3721_v34 }
 0x85a   : > { %v3488_v51 = vmul.f32 %v7773_v14, %v3487_v59  ;;  %v3494_v37 = vmul.f32 %v7775_v17, %v3394_v13  ;;  %vm3500_vm14 = vweird.f32 %v7775_v17 }
 0x85b   : > { %7778 = vrsqrt.f32 %v9796_v26  ;;  %v3866_v32 = vmul.f32 0.7978846, %v3842_v55  ;;  %v3771_v18 = vmul.f32 %v9800_v7, %v9800_v7  ;;  %v7777_v20 = vpop.eup %7776  ;;  %vm3501_vm2 = vmor %vm3499_vm15, %vm3500_vm14 }
 0x85c   : > { %v3492_v11 = vsel %vm3491_vm13, %v7773_v14, %v3488_v51  ;;  %v3495_v12 = vmul.f32 %v7775_v17, %v3494_v37  ;;  %v3286_v24 = vpop.f32.mrf.mxu1  ;;  %v3913_v46 = vadd.f32 1.0, %v7777_v20  ;;  %v9838_v51 = vld [vmem:[%s12393_s13 + $0xc8] sm:$0xff] }
 0x85d   : > { %v3696_v42 = vmul.f32 %v3492_v11, %v9611_v54  ;;  %7203 = vmatmul.msk.f32.gmra.mxu2 %vm2993_vm1, %v3286_v24  ;;  %7780 = vtanh.f32 %v3866_v32  ;;  %v3795_v43 = vmul.f32 %v3771_v18, %v9800_v7 }
 0x85e   : > { %v3496_v36 = vmul.f32 0.5, %v3495_v12  ;;  %v3937_v21 = vmul.f32 0.5, %v3913_v46  ;;  %4380 = vmatpush.msrb.mxu2 %v9838_v51 }
 0x85f   : > { %v3722_v10 = vmul.f32 %v9757_v38, %v3696_v42  ;;  %v3819_v57 = vmul.f32 0.044715, %v3795_v43 }
 0x860   : > { %v3497_v54 = vsub.f32 1.5, %v3496_v36  ;;  %v3399_v33 = vpop.f32.mrf.mxu2 }
 0x861   : > { %v7779_v14 = vpop.eup %7778  ;;  %v9821_v23 = vadd.f32 1e-06, %v3399_v33  ;;  %v9824_v28 = vadd.f32 %v9760_v48, %v3722_v10  ;;  %v3843_v47 = vadd.f32 %v3819_v57, %v9800_v7 }
 0x862   : > { %v3498_v39 = vmul.f32 %v7775_v17, %v3497_v54  ;;  %v3504_v60 = vmul.f32 %v7779_v14, %v9796_v26  ;;  %vm3510_vm4 = vweird.f32 %v7779_v14 }
 0x863   : > { %v7781_v19 = vpop.eup %7780  ;;  %7782 = vrsqrt.f32 %v9821_v23  ;;  %v3772_v5 = vmul.f32 %v9824_v28, %v9824_v28  ;;  %v3867_v6 = vmul.f32 0.7978846, %v3843_v47  ;;  %vm3519_vm7 = vweird.f32 %v9821_v23 }
 0x864   : > { %v3502_v63 = vsel %vm3501_vm2, %v7775_v17, %v3498_v39  ;;  %v3505_v53 = vmul.f32 %v7779_v14, %v3504_v60  ;;  %v3289_v1 = vpop.f32.mrf.mxu1  ;;  %v3914_v34 = vadd.f32 1.0, %v7781_v19  ;;  %v9860_v39 = vld [vmem:[%s12393_s13 + $0x48] sm:$0xff] }
 0x865   : > { %v3697_v58 = vmul.f32 %v3502_v63, %v9617_v2  ;;  %7204 = vmatmul.msk.f32.gmra.mxu2 %vm2993_vm1, %v3289_v1  ;;  %v3796_v13 = vmul.f32 %v3772_v5, %v9824_v28  ;;  %7784 = vtanh.f32 %v3867_v6  ;;  %v3961_v2 = vmul.f32 %v3937_v21, %v9771_v25  ;;  %4291 = vmatpush.msrb.mxu1 %v9860_v39 }
 0x866   : > { %v3506_v59 = vmul.f32 0.5, %v3505_v53  ;;  %v3938_v4 = vmul.f32 0.5, %v3914_v34  ;;  %vm3509_vm1 = vweird.f32 %v9796_v26 }
 0x867   : > { %v3723_v55 = vmul.f32 %v9757_v38, %v3697_v58  ;;  %v3820_v17 = vmul.f32 0.044715, %v3796_v13  ;;  %vm3511_vm5 = vmor %vm3509_vm1, %vm3510_vm4 }
 0x868   : > { %v3507_v37 = vsub.f32 1.5, %v3506_v59  ;;  %v3402_v32 = vpop.f32.mrf.mxu2  ;;  %v3962_v18 = vmul.f32 %v3938_v4, %v9784_v40 }
 0x869   : > { %v7783_v11 = vpop.eup %7782  ;;  %v9843_v12 = vadd.f32 1e-06, %v3402_v32  ;;  %v3844_v24 = vadd.f32 %v3820_v17, %v9824_v28  ;;  %v9847_v20 = vadd.f32 %v9760_v48, %v3723_v55 }
 0x86a   : > { %v3508_v42 = vmul.f32 %v7779_v14, %v3507_v37  ;;  %v3514_v43 = vmul.f32 %v7783_v11, %v9821_v23  ;;  %v3985_v36 = vpack.c.bf16 %v3962_v18, %v3961_v2  ;;  %vm3520_vm6 = vweird.f32 %v7783_v11 }
 0x86b   : > { %7786 = vrsqrt.f32 %v9843_v12  ;;  %v3868_v25 = vmul.f32 0.7978846, %v3844_v24  ;;  %v3773_v40 = vmul.f32 %v9847_v20, %v9847_v20  ;;  %v7785_v54 = vpop.eup %7784  ;;  %vm3521_vm0 = vmor %vm3519_vm7, %vm3520_vm6  ;;  %v9880_v24 = vld [vmem:[%s12393_s13 + $0xc0] sm:$0xff]  ;;  %vm3529_vm9 = vweird.f32 %v9843_v12 }
 0x86c   : > { %v3512_v10 = vsel %vm3511_vm5, %v7779_v14, %v3508_v42  ;;  %v3515_v57 = vmul.f32 %v7783_v11, %v3514_v43  ;;  %4107 = vmatmul.bf16.vlgmr.msrb.gmra.mxu3 %v3985_v36  ;;  %4176 = vmatmul.bf16.vlgmr.msra.gmra.mxu0 %v3985_v36  ;;  %v3915_v5 = vadd.f32 1.0, %v7785_v54 }
 0x86d   : > { %v3698_v33 = vmul.f32 %v3512_v10, %v9623_v41  ;;  %7788 = vtanh.f32 %v3868_v25  ;;  %v3797_v26 = vmul.f32 %v3773_v40, %v9847_v20  ;;  %4381 = vmatpush.msrb.mxu2 %v9880_v24 }
 0x86e   : > { %v3516_v46 = vmul.f32 0.5, %v3515_v57  ;;  %v3939_v17 = vmul.f32 0.5, %v3915_v5 }
 0x86f   : > { %v3724_v47 = vmul.f32 %v9757_v38, %v3698_v33  ;;  %v3821_v60 = vmul.f32 0.044715, %v3797_v26 }
 0x870   : > { %v3517_v19 = vsub.f32 1.5, %v3516_v46  ;;  %v3405_v14 = vpop.f32.mrf.mxu2  ;;  %v3963_v36 = vmul.f32 %v3939_v17, %v9800_v7 }
 0x871   : > { %v7787_v6 = vpop.eup %7786  ;;  %v9863_v41 = vadd.f32 1e-06, %v3405_v14  ;;  %v9866_v63 = vadd.f32 %v9760_v48, %v3724_v47  ;;  %v3845_v53 = vadd.f32 %v3821_v60, %v9847_v20 }
 0x872   : > { %v3518_v1 = vmul.f32 %v7783_v11, %v3517_v19  ;;  %v3524_v34 = vmul.f32 %v7787_v6, %v9843_v12  ;;  %vm3530_vm8 = vweird.f32 %v7787_v6 }
 0x873   : > { %v7789_v21 = vpop.eup %7788  ;;  %7790 = vrsqrt.f32 %v9863_v41  ;;  %v3774_v58 = vmul.f32 %v9866_v63, %v9866_v63  ;;  %v3869_v13 = vmul.f32 0.7978846, %v3845_v53  ;;  %vm3531_vm10 = vmor %vm3529_vm9, %vm3530_vm8  ;;  %vm3539_vm12 = vweird.f32 %v9863_v41 }
 0x874   : > { %v3522_v59 = vsel %vm3521_vm0, %v7783_v11, %v3518_v1  ;;  %v3525_v4 = vmul.f32 %v7787_v6, %v3524_v34  ;;  %v3916_v55 = vadd.f32 1.0, %v7789_v21  ;;  %v9885_v11 = vld [vmem:[%s12393_s13 + $0x40] sm:$0xff]  ;;  %v9908_v1 = vld [vmem:[%s12393_s13 + $0xb8] sm:$0xff] }
 0x875   : > { %v3699_v37 = vmul.f32 %v3522_v59, %v9629_v30  ;;  %v3798_v32 = vmul.f32 %v3774_v58, %v9866_v63  ;;  %7792 = vtanh.f32 %v3869_v13  ;;  %4292 = vmatpush.msrb.mxu1 %v9885_v11  ;;  %4382 = vmatpush.msrb.mxu2 %v9908_v1 }
 0x876   : > { %v3526_v2 = vmul.f32 0.5, %v3525_v4  ;;  %v3940_v23 = vmul.f32 0.5, %v3916_v55 }
 0x877   : > { %v3725_v18 = vmul.f32 %v9757_v38, %v3699_v37  ;;  %v3822_v42 = vmul.f32 0.044715, %v3798_v32 }
 0x878   : > { %v3527_v43 = vsub.f32 1.5, %v3526_v2  ;;  %v3408_v30 = vpop.f32.mrf.mxu2  ;;  %v3964_v25 = vmul.f32 %v3940_v23, %v9824_v28 }
 0x879   : > { %v7791_v40 = vpop.eup %7790  ;;  %v9891_v10 = vadd.f32 1e-06, %v3408_v30  ;;  %v3846_v57 = vadd.f32 %v3822_v42, %v9866_v63  ;;  %v9895_v54 = vadd.f32 %v9760_v48, %v3725_v18 }
 0x87a   : > { %v3528_v33 = vmul.f32 %v7787_v6, %v3527_v43  ;;  %v3534_v26 = vmul.f32 %v7791_v40, %v9863_v41  ;;  %v3986_v7 = vpack.c.bf16 %v3964_v25, %v3963_v36  ;;  %vm3540_vm11 = vweird.f32 %v7791_v40 }
 0x87b   : > { %7794 = vrsqrt.f32 %v9891_v10  ;;  %v3870_v28 = vmul.f32 0.7978846, %v3846_v57  ;;  %v3775_v46 = vmul.f32 %v9895_v54, %v9895_v54  ;;  %v7793_v19 = vpop.eup %7792  ;;  %vm3541_vm13 = vmor %vm3539_vm12, %vm3540_vm11  ;;  %vm3549_vm15 = vweird.f32 %v9891_v10 }
 0x87c   : > { %v3532_v47 = vsel %vm3531_vm10, %v7787_v6, %v3528_v33  ;;  %v3535_v60 = vmul.f32 %v7791_v40, %v3534_v26  ;;  %4112 = vmatmul.bf16.gmra.mxu3 %v3986_v7  ;;  %4181 = vmatmul.bf16.gmra.mxu0 %v3986_v7  ;;  %v3917_v58 = vadd.f32 1.0, %v7793_v19  ;;  %v9928_v33 = vld [vmem:[%s12393_s13 + $0x38] sm:$0xff] }
 0x87d   : > { %v3700_v14 = vmul.f32 %v3532_v47, %v9635_v49  ;;  %7796 = vtanh.f32 %v3870_v28  ;;  %v3799_v12 = vmul.f32 %v3775_v46, %v9895_v54  ;;  %4293 = vmatpush.msrb.mxu1 %v9928_v33 }
 0x87e   : > { %v3536_v5 = vmul.f32 0.5, %v3535_v60  ;;  %v3941_v43 = vmul.f32 0.5, %v3917_v58 }
 0x87f   : > { %v3726_v53 = vmul.f32 %v9757_v38, %v3700_v14  ;;  %v3823_v34 = vmul.f32 0.044715, %v3799_v12 }
 0x880   : > { %v3537_v21 = vsub.f32 1.5, %v3536_v5  ;;  %v3411_v6 = vpop.f32.mrf.mxu2  ;;  %v3965_v28 = vmul.f32 %v3941_v43, %v9847_v20 }
 0x881   : > { %v7795_v13 = vpop.eup %7794  ;;  %v9911_v49 = vadd.f32 1e-06, %v3411_v6  ;;  %v9914_v59 = vadd.f32 %v9760_v48, %v3726_v53  ;;  %v3847_v4 = vadd.f32 %v3823_v34, %v9895_v54 }
 0x882   : > { %v3538_v55 = vmul.f32 %v7791_v40, %v3537_v21  ;;  %v3544_v17 = vmul.f32 %v7795_v13, %v9891_v10  ;;  %vm3550_vm14 = vweird.f32 %v7795_v13 }
 0x883   : > { %v7797_v37 = vpop.eup %7796  ;;  %7798 = vrsqrt.f32 %v9911_v49  ;;  %v3776_v32 = vmul.f32 %v9914_v59, %v9914_v59  ;;  %v3871_v2 = vmul.f32 0.7978846, %v3847_v4  ;;  %vm3551_vm2 = vmor %vm3549_vm15, %vm3550_vm14  ;;  %vm3559_vm1 = vweird.f32 %v9911_v49 }
 0x884   : > { %v3542_v23 = vsel %vm3541_vm13, %v7791_v40, %v3538_v55  ;;  %v3545_v18 = vmul.f32 %v7795_v13, %v3544_v17  ;;  %v3918_v42 = vadd.f32 1.0, %v7797_v37  ;;  %v9950_v55 = vld [vmem:[%s12393_s13 + $0xb0] sm:$0xff] }
 0x885   : > { %v3701_v30 = vmul.f32 %v3542_v23, %v9641_v8  ;;  %v3800_v36 = vmul.f32 %v3776_v32, %v9914_v59  ;;  %7800 = vtanh.f32 %v3871_v2  ;;  %4383 = vmatpush.msrb.mxu2 %v9950_v55 }
 0x886   : > { %v3546_v25 = vmul.f32 0.5, %v3545_v18  ;;  %v3942_v41 = vmul.f32 0.5, %v3918_v42 }
 0x887   : > { %v3727_v57 = vmul.f32 %v9757_v38, %v3701_v30  ;;  %v3824_v26 = vmul.f32 0.044715, %v3800_v36 }
 0x888   : > { %v3547_v7 = vsub.f32 1.5, %v3546_v25  ;;  %v3414_v40 = vpop.f32.mrf.mxu2  ;;  %v3966_v8 = vmul.f32 %v3942_v41, %v9866_v63 }
 0x889   : > { %v7799_v46 = vpop.eup %7798  ;;  %v9933_v47 = vadd.f32 1e-06, %v3414_v40  ;;  %v3848_v60 = vadd.f32 %v3824_v26, %v9914_v59  ;;  %v9937_v19 = vadd.f32 %v9760_v48, %v3727_v57 }
 0x88a   : > { %v3548_v14 = vmul.f32 %v7795_v13, %v3547_v7  ;;  %v3554_v12 = vmul.f32 %v7799_v46, %v9911_v49  ;;  %v3987_v5 = vpack.c.bf16 %v3966_v8, %v3965_v28  ;;  %vm3560_vm4 = vweird.f32 %v7799_v46 }
 0x88b   : > { %7802 = vrsqrt.f32 %v9933_v47  ;;  %v3872_v20 = vmul.f32 0.7978846, %v3848_v60  ;;  %v3777_v63 = vmul.f32 %v9937_v19, %v9937_v19  ;;  %v7801_v21 = vpop.eup %7800  ;;  %vm3561_vm5 = vmor %vm3559_vm1, %vm3560_vm4  ;;  %vm3569_vm7 = vweird.f32 %v9933_v47 }
 0x88c   : > { %v3552_v53 = vsel %vm3551_vm2, %v7795_v13, %v3548_v14  ;;  %v3555_v34 = vmul.f32 %v7799_v46, %v3554_v12  ;;  %4117 = vmatmul.bf16.gmra.mxu3 %v3987_v5  ;;  %4186 = vmatmul.bf16.gmra.mxu0 %v3987_v5  ;;  %v9955_v13 = vld [vmem:[%s12393_s13 + $0x30] sm:$0xff]  ;;  %v3919_v32 = vadd.f32 1.0, %v7801_v21  ;;  %v9976_v12 = vld [vmem:[%s12393_s13 + $0xa8] sm:$0xff] }
 0x88d   : > { %v3702_v6 = vmul.f32 %v3552_v53, %v9646_v45  ;;  %7804 = vtanh.f32 %v3872_v20  ;;  %v3801_v10 = vmul.f32 %v3777_v63, %v9937_v19  ;;  %4294 = vmatpush.msrb.mxu1 %v9955_v13  ;;  %4384 = vmatpush.msrb.mxu2 %v9976_v12 }
 0x88e   : > { %v3556_v58 = vmul.f32 0.5, %v3555_v34  ;;  %v3943_v40 = vmul.f32 0.5, %v3919_v32 }
 0x88f   : > { %v3728_v4 = vmul.f32 %v9757_v38, %v3702_v6  ;;  %v3825_v17 = vmul.f32 0.044715, %v3801_v10 }
 0x890   : > { %v3557_v37 = vsub.f32 1.5, %v3556_v58  ;;  %v3417_v45 = vpop.f32.mrf.mxu2  ;;  %v3967_v63 = vmul.f32 %v3943_v40, %v9895_v54 }
 0x891   : > { %v7803_v2 = vpop.eup %7802  ;;  %v9959_v23 = vadd.f32 1e-06, %v3417_v45  ;;  %v9962_v18 = vadd.f32 %v9760_v48, %v3728_v4  ;;  %v3849_v42 = vadd.f32 %v3825_v17, %v9937_v19 }
 0x892   : > { %v3558_v43 = vmul.f32 %v7799_v46, %v3557_v37  ;;  %v3564_v30 = vmul.f32 %v7803_v2, %v9933_v47  ;;  %vm3570_vm6 = vweird.f32 %v7803_v2 }
 0x893   : > { %v7805_v36 = vpop.eup %7804  ;;  %7806 = vrsqrt.f32 %v9959_v23  ;;  %v3778_v25 = vmul.f32 %v9962_v18, %v9962_v18  ;;  %v3873_v41 = vmul.f32 0.7978846, %v3849_v42  ;;  %vm3571_vm0 = vmor %vm3569_vm7, %vm3570_vm6  ;;  %vm3579_vm9 = vweird.f32 %v9959_v23 }
 0x894   : > { %v3562_v57 = vsel %vm3561_vm5, %v7799_v46, %v3558_v43  ;;  %v3565_v26 = vmul.f32 %v7803_v2, %v3564_v30  ;;  %v3920_v7 = vadd.f32 1.0, %v7805_v36  ;;  %v9998_v30 = vld [vmem:[%s12393_s13 + $0x28] sm:$0xff] }
 0x895   : > { %v3703_v28 = vmul.f32 %v3562_v57, %v9651_v61  ;;  %v3802_v8 = vmul.f32 %v3778_v25, %v9962_v18  ;;  %7808 = vtanh.f32 %v3873_v41  ;;  %4295 = vmatpush.msrb.mxu1 %v9998_v30 }
 0x896   : > { %v3566_v60 = vmul.f32 0.5, %v3565_v26  ;;  %v3944_v49 = vmul.f32 0.5, %v3920_v7 }
 0x897   : > { %v3729_v14 = vmul.f32 %v9757_v38, %v3703_v28  ;;  %v3826_v5 = vmul.f32 0.044715, %v3802_v8 }
 0x898   : > { %v3567_v20 = vsub.f32 1.5, %v3566_v60  ;;  %v3420_v46 = vpop.f32.mrf.mxu2  ;;  %v3968_v61 = vmul.f32 %v3944_v49, %v9914_v59 }
 0x899   : > { %v7807_v53 = vpop.eup %7806  ;;  %v9981_v34 = vadd.f32 1e-06, %v3420_v46  ;;  %v3850_v21 = vadd.f32 %v3826_v5, %v9962_v18  ;;  %v9985_v6 = vadd.f32 %v9760_v48, %v3729_v14 }
 0x89a   : > { %v3568_v10 = vmul.f32 %v7803_v2, %v3567_v20  ;;  %v3574_v58 = vmul.f32 %v7807_v53, %v9959_v23  ;;  %v3988_v4 = vpack.c.bf16 %v3968_v61, %v3967_v63  ;;  %vm3580_vm8 = vweird.f32 %v7807_v53 }
 0x89b   : > { %7810 = vrsqrt.f32 %v9981_v34  ;;  %v3874_v54 = vmul.f32 0.7978846, %v3850_v21  ;;  %v3779_v59 = vmul.f32 %v9985_v6, %v9985_v6  ;;  %v7809_v45 = vpop.eup %7808  ;;  %vm3581_vm10 = vmor %vm3579_vm9, %vm3580_vm8  ;;  %vm3589_vm12 = vweird.f32 %v9981_v34 }
 0x89c   : > { %v3572_v17 = vsel %vm3571_vm0, %v7803_v2, %v3568_v10  ;;  %v3575_v37 = vmul.f32 %v7807_v53, %v3574_v58  ;;  %4122 = vmatmul.bf16.gmra.mxu3 %v3988_v4  ;;  %4191 = vmatmul.bf16.gmra.mxu0 %v3988_v4  ;;  %v3921_v41 = vadd.f32 1.0, %v7809_v45  ;;  %v10018_v58 = vld [vmem:[%s12393_s13 + $0xa0] sm:$0xff]  ;;  %v10020_v4 = vld [vmem:[#allocation15 + $0x70] sm:$0xff] }
 0x89d   : > { %v3704_v32 = vmul.f32 %v3572_v17, %v9656_v52  ;;  %7812 = vtanh.f32 %v3874_v54  ;;  %v3803_v47 = vmul.f32 %v3779_v59, %v9985_v6  ;;  %v10022_v54 = vld [vmem:[#allocation15 + $0x78] sm:$0xff]  ;;  %4385 = vmatpush.msrb.mxu2 %v10018_v58  ;;  %4543 = vmatpush.msra.mxu3 %v10020_v4  ;;  %v10031_v45 = vld [vmem:[%s12393_s13 + $0x20] sm:$0xff] }
 0x89e   : > { %v3576_v42 = vmul.f32 0.5, %v3575_v37  ;;  %v3945_v46 = vmul.f32 0.5, %v3921_v41  ;;  %4632 = vmatpush.msrb.mxu0 %v10022_v54  ;;  %4296 = vmatpush.msrb.mxu1 %v10031_v45 }
 0x89f   : > { %v3730_v43 = vmul.f32 %v9757_v38, %v3704_v32  ;;  %v3827_v36 = vmul.f32 0.044715, %v3803_v47 }
 0x8a0   : > { %v3577_v25 = vsub.f32 1.5, %v3576_v42  ;;  %v3423_v2 = vpop.f32.mrf.mxu2  ;;  %v3969_v17 = vmul.f32 %v3945_v46, %v9937_v19 }
 0x8a1   : > { %v7811_v57 = vpop.eup %7810  ;;  %v10001_v52 = vadd.f32 1e-06, %v3423_v2  ;;  %v10004_v26 = vadd.f32 %v9760_v48, %v3730_v43  ;;  %v3851_v7 = vadd.f32 %v3827_v36, %v9985_v6 }
 0x8a2   : > { %v3578_v40 = vmul.f32 %v7807_v53, %v3577_v25  ;;  %v3584_v28 = vmul.f32 %v7811_v57, %v9981_v34  ;;  %vm3590_vm11 = vweird.f32 %v7811_v57 }
 0x8a3   : > { %v7813_v8 = vpop.eup %7812  ;;  %7814 = vrsqrt.f32 %v10001_v52  ;;  %v3780_v60 = vmul.f32 %v10004_v26, %v10004_v26  ;;  %v3875_v49 = vmul.f32 0.7978846, %v3851_v7  ;;  %vm3591_vm13 = vmor %vm3589_vm12, %vm3590_vm11  ;;  %vm3599_vm15 = vweird.f32 %v10001_v52 }
 0x8a4   : > { %v3582_v14 = vsel %vm3581_vm10, %v7807_v53, %v3578_v40  ;;  %v3585_v5 = vmul.f32 %v7811_v57, %v3584_v28  ;;  %v3922_v20 = vadd.f32 1.0, %v7813_v8 }
 0x8a5   : > { %v3705_v63 = vmul.f32 %v3582_v14, %v9661_v3  ;;  %v3804_v61 = vmul.f32 %v3780_v60, %v10004_v26  ;;  %7816 = vtanh.f32 %v3875_v49  ;;  %v10053_v49 = vld [vmem:[%s12393_s13 + $0x98] sm:$0xff] }
 0x8a6   : > { %v3586_v21 = vmul.f32 0.5, %v3585_v5  ;;  %v3946_v23 = vmul.f32 0.5, %v3922_v20  ;;  %4386 = vmatpush.msrb.mxu2 %v10053_v49 }
 0x8a7   : > { %v3731_v10 = vmul.f32 %v9757_v38, %v3705_v63  ;;  %v3828_v53 = vmul.f32 0.044715, %v3804_v61 }
 0x8a8   : > { %v3587_v59 = vsub.f32 1.5, %v3586_v21  ;;  %v3426_v3 = vpop.f32.mrf.mxu2  ;;  %v3970_v37 = vmul.f32 %v3946_v23, %v9962_v18 }
 0x8a9   : > { %v7815_v32 = vpop.eup %7814  ;;  %v10033_v47 = vadd.f32 1e-06, %v3426_v3  ;;  %v3852_v19 = vadd.f32 %v3828_v53, %v10004_v26  ;;  %v10039_v18 = vadd.f32 %v9760_v48, %v3731_v10 }
 0x8aa   : > { %v3588_v42 = vmul.f32 %v7811_v57, %v3587_v59  ;;  %v3594_v43 = vmul.f32 %v7815_v32, %v10001_v52  ;;  %v3989_v36 = vpack.c.bf16 %v3970_v37, %v3969_v17  ;;  %vm3600_vm14 = vweird.f32 %v7815_v32 }
 0x8ab   : > { %7818 = vrsqrt.f32 %v10033_v47  ;;  %v3876_v25 = vmul.f32 0.7978846, %v3852_v19  ;;  %v3781_v2 = vmul.f32 %v10039_v18, %v10039_v18  ;;  %v7817_v40 = vpop.eup %7816  ;;  %vm3601_vm2 = vmor %vm3599_vm15, %vm3600_vm14  ;;  %vm3609_vm1 = vweird.f32 %v10033_v47 }
 0x8ac   : > { %v3592_v41 = vsel %vm3591_vm13, %v7811_v57, %v3588_v42  ;;  %v3595_v7 = vmul.f32 %v7815_v32, %v3594_v43  ;;  %4127 = vmatmul.bf16.gmra.mxu3 %v3989_v36  ;;  %4196 = vmatmul.bf16.gmra.mxu0 %v3989_v36  ;;  %v3923_v20 = vadd.f32 1.0, %v7817_v40 }
 0x8ad   : > { %v3706_v28 = vmul.f32 %v3592_v41, %v9666_v9  ;;  %7820 = vtanh.f32 %v3876_v25  ;;  %v3805_v34 = vmul.f32 %v3781_v2, %v10039_v18  ;;  %v10073_v2 = vld [vmem:[%s12393_s13 + $0x18] sm:$0xff] }
 0x8ae   : > { %v3596_v8 = vmul.f32 0.5, %v3595_v7  ;;  %v3947_v19 = vmul.f32 0.5, %v3923_v20  ;;  %4297 = vmatpush.msrb.mxu1 %v10073_v2 }
 0x8af   : > { %v3732_v60 = vmul.f32 %v9757_v38, %v3706_v28  ;;  %v3829_v14 = vmul.f32 0.044715, %v3805_v34 }
 0x8b0   : > { %v3597_v5 = vsub.f32 1.5, %v3596_v8  ;;  %v3429_v57 = vpop.f32.mrf.mxu2  ;;  %v3971_v40 = vmul.f32 %v3947_v19, %v9985_v6 }
 0x8b1   : > { %v7819_v46 = vpop.eup %7818  ;;  %v10056_v9 = vadd.f32 1e-06, %v3429_v57  ;;  %v10059_v63 = vadd.f32 %v9760_v48, %v3732_v60  ;;  %v3853_v61 = vadd.f32 %v3829_v14, %v10039_v18 }
 0x8b2   : > { %v3598_v21 = vmul.f32 %v7815_v32, %v3597_v5  ;;  %v3604_v23 = vmul.f32 %v7819_v46, %v10033_v47  ;;  %vm3610_vm4 = vweird.f32 %v7819_v46 }
 0x8b3   : > { %v7821_v10 = vpop.eup %7820  ;;  %7822 = vrsqrt.f32 %v10056_v9  ;;  %v3782_v53 = vmul.f32 %v10059_v63, %v10059_v63  ;;  %v3877_v59 = vmul.f32 0.7978846, %v3853_v61  ;;  %vm3611_vm5 = vmor %vm3609_vm1, %vm3610_vm4  ;;  %vm3619_vm7 = vweird.f32 %v10056_v9 }
 0x8b4   : > { %v3602_v3 = vsel %vm3601_vm2, %v7815_v32, %v3598_v21  ;;  %v3605_v17 = vmul.f32 %v7819_v46, %v3604_v23  ;;  %v3924_v37 = vadd.f32 1.0, %v7821_v10 }
 0x8b5   : > { %v3707_v42 = vmul.f32 %v3602_v3, %v9671_v31  ;;  %v3806_v43 = vmul.f32 %v3782_v53, %v10059_v63  ;;  %7824 = vtanh.f32 %v3877_v59  ;;  %v10095_v59 = vld [vmem:[%s12393_s13 + $0x90] sm:$0xff]  ;;  %v10097_v3 = vld [vmem:[#allocation15 + $0x60] sm:$0xff] }
 0x8b6   : > { %v3606_v36 = vmul.f32 0.5, %v3605_v17  ;;  %v3948_v52 = vmul.f32 0.5, %v3924_v37  ;;  %4387 = vmatpush.msrb.mxu2 %v10095_v59  ;;  %4544 = vmatpush.msra.mxu3 %v10097_v3 }
 0x8b7   : > { %v3733_v25 = vmul.f32 %v9757_v38, %v3707_v42  ;;  %v3830_v41 = vmul.f32 0.044715, %v3806_v43  ;;  %v10106_v42 = vld [vmem:[%s12393_s13 + $0x10] sm:$0xff] }
 0x8b8   : > { %v3607_v7 = vsub.f32 1.5, %v3606_v36  ;;  %v3432_v32 = vpop.f32.mrf.mxu2  ;;  %v3972_v31 = vmul.f32 %v3948_v52, %v10004_v26  ;;  %4298 = vmatpush.msrb.mxu1 %v10106_v42 }
 0x8b9   : > { %v7823_v28 = vpop.eup %7822  ;;  %v10078_v34 = vadd.f32 1e-06, %v3432_v32  ;;  %v3854_v8 = vadd.f32 %v3830_v41, %v10059_v63  ;;  %v10082_v60 = vadd.f32 %v9760_v48, %v3733_v25 }
 0x8ba   : > { %v3608_v14 = vmul.f32 %v7819_v46, %v3607_v7  ;;  %v3614_v5 = vmul.f32 %v7823_v28, %v10056_v9  ;;  %v3990_v57 = vpack.c.bf16 %v3972_v31, %v3971_v40  ;;  %vm3620_vm6 = vweird.f32 %v7823_v28 }
 0x8bb   : > { %7826 = vrsqrt.f32 %v10078_v34  ;;  %v3878_v6 = vmul.f32 0.7978846, %v3854_v8  ;;  %v3783_v26 = vmul.f32 %v10082_v60, %v10082_v60  ;;  %v7825_v21 = vpop.eup %7824  ;;  %vm3621_vm0 = vmor %vm3619_vm7, %vm3620_vm6  ;;  %vm3629_vm9 = vweird.f32 %v10078_v34 }
 0x8bc   : > { %v3612_v20 = vsel %vm3611_vm5, %v7819_v46, %v3608_v14  ;;  %v3615_v61 = vmul.f32 %v7823_v28, %v3614_v5  ;;  %4132 = vmatmul.bf16.gmra.mxu3 %v3990_v57  ;;  %4201 = vmatmul.bf16.gmra.mxu0 %v3990_v57  ;;  %v10099_v46 = vld [vmem:[#allocation15 + $0x68] sm:$0xff] }
 0x8bd   : > { %v3708_v23 = vmul.f32 %v3612_v20, %v9676_v62  ;;  %7828 = vtanh.f32 %v3878_v6  ;;  %v3807_v47 = vmul.f32 %v3783_v26, %v10082_v60  ;;  %v3925_v62 = vadd.f32 1.0, %v7825_v21  ;;  %4633 = vmatpush.msrb.mxu0 %v10099_v46  ;;  %v10128_v21 = vld [vmem:[%s12393_s13 + $0x88] sm:$0xff] }
 0x8be   : > { %v3616_v10 = vmul.f32 0.5, %v3615_v61  ;;  %4388 = vmatpush.msrb.mxu2 %v10128_v21 }
 0x8bf   : > { %v3734_v53 = vmul.f32 %v9757_v38, %v3708_v23  ;;  %v3831_v17 = vmul.f32 0.044715, %v3807_v47  ;;  %v3949_v57 = vmul.f32 0.5, %v3925_v62 }
 0x8c0   : > { %v3617_v37 = vsub.f32 1.5, %v3616_v10  ;;  %v3435_v19 = vpop.f32.mrf.mxu2 }
 0x8c1   : > { %v7827_v43 = vpop.eup %7826  ;;  %v10108_v36 = vadd.f32 1e-06, %v3435_v19  ;;  %v10113_v52 = vadd.f32 %v9760_v48, %v3734_v53  ;;  %v3855_v25 = vadd.f32 %v3831_v17, %v10082_v60  ;;  %v3973_v10 = vmul.f32 %v3949_v57, %v10039_v18 }
 0x8c2   : > { %v3618_v41 = vmul.f32 %v7823_v28, %v3617_v37  ;;  %v3624_v7 = vmul.f32 %v7827_v43, %v10078_v34  ;;  %vm3630_vm8 = vweird.f32 %v7827_v43 }
 0x8c3   : > { %v7829_v32 = vpop.eup %7828  ;;  %7830 = vrsqrt.f32 %v10108_v36  ;;  %v3784_v40 = vmul.f32 %v10113_v52, %v10113_v52  ;;  %v3879_v31 = vmul.f32 0.7978846, %v3855_v25  ;;  %vm3631_vm10 = vmor %vm3629_vm9, %vm3630_vm8  ;;  %vm3639_vm12 = vweird.f32 %v10108_v36 }
 0x8c4   : > { %v3622_v8 = vsel %vm3621_vm0, %v7823_v28, %v3618_v41  ;;  %v3625_v14 = vmul.f32 %v7827_v43, %v3624_v7  ;;  %v3926_v5 = vadd.f32 1.0, %v7829_v32 }
 0x8c5   : > { %v3709_v6 = vmul.f32 %v3622_v8, %v9681_v50  ;;  %v3808_v26 = vmul.f32 %v3784_v40, %v10113_v52  ;;  %7832 = vtanh.f32 %v3879_v31  ;;  %v8056_v31 = vld [vmem:[%s12393_s13 + $0xf8] sm:$0xff] }
 0x8c6   : > { %v3626_v9 = vmul.f32 0.5, %v3625_v14  ;;  %v3950_v20 = vmul.f32 0.5, %v3926_v5  ;;  %v10162_v14 = vld [vmem:[%s12393_s13 + $0x8] sm:$0xff] }
 0x8c7   : > { %v3735_v61 = vmul.f32 %v9757_v38, %v3709_v6  ;;  %v3832_v23 = vmul.f32 0.044715, %v3808_v26  ;;  %4299 = vmatpush.msrb.mxu1 %v10162_v14  ;;  %v8058_v6 = vld [vmem:[%s12393_s13 + $0xf0] sm:$0xff] }
 0x8c8   : > { %v3627_v47 = vsub.f32 1.5, %v3626_v9  ;;  %v3438_v28 = vpop.f32.mrf.mxu2  ;;  %v3974_v50 = vmul.f32 %v3950_v20, %v10059_v63  ;;  %v10147_v63 = vld [vmem:[%s12393_s13 + $0x80] sm:$0xff] }
 0x8c9   : > { %v10133_v53 = vpop.eup %7830  ;;  %v10135_v17 = vadd.f32 1e-06, %v3438_v28  ;;  %v3856_v38 = vadd.f32 %v3832_v23, %v10113_v52  ;;  %v10139_v37 = vadd.f32 %v9760_v48, %v3735_v61  ;;  %4389 = vmatpush.msrb.mxu2 %v10147_v63  ;;  %v10175_v20 = vld [vmem:[%s12393_s13] sm:$0xff] }
 0x8ca   : > { %v3628_v19 = vmul.f32 %v7827_v43, %v3627_v47  ;;  %v3634_v62 = vmul.f32 %v10133_v53, %v10108_v36  ;;  %v3991_v18 = vpack.c.bf16 %v3974_v50, %v3973_v10  ;;  %vm3640_vm11 = vweird.f32 %v10133_v53  ;;  %4300 = vmatpush.msrb.mxu1 %v10175_v20  ;;  %v10182_v47 = vld [vmem:[#allocation9 + $0x2] ss:$0 sm:$0xff]  ;;  %v8060_v50 = vld [vmem:[%s12393_s13 + $0xe8] sm:$0xff]  ;;  %v8062_v36 = vld [vmem:[%s12393_s13 + $0xe0] sm:$0xff] }
 0x8cb   : > { %7834 = vrsqrt.f32 %v10135_v17  ;;  %v3880_v25 = vmul.f32 0.7978846, %v3856_v38  ;;  %v3785_v48 = vmul.f32 %v10139_v37, %v10139_v37  ;;  %v7833_v41 = vpop.eup %7832  ;;  %4898 = vmatpush.msra.mxu2 %v8056_v31  ;;  %vm3641_vm13 = vmor %vm3639_vm12, %vm3640_vm11  ;;  %vm3649_vm15 = vweird.f32 %v10135_v17 }
 0x8cc   : > { %v3632_v34 = vsel %vm3631_vm10, %v7827_v43, %v3628_v19  ;;  %v3635_v7 = vmul.f32 %v10133_v53, %v3634_v62  ;;  %4137 = vmatmul.bf16.gmra.mxu3 %v3991_v18  ;;  %4206 = vmatmul.bf16.gmra.mxu0 %v3991_v18  ;;  %v10164_v43 = vld [vmem:[#allocation9 + $0x1] ss:$0 sm:$0xff] }
 0x8cd   : > { %v3710_v32 = vmul.f32 %v3632_v34, %v9687_v27  ;;  %7836 = vtanh.f32 %v3880_v25  ;;  %v3809_v40 = vmul.f32 %v3785_v48, %v10139_v37  ;;  %v3927_v27 = vadd.f32 1.0, %v7833_v41  ;;  %4899 = vmatpush.msra.mxu2 %v8058_v6  ;;  %v8061_v62 = vld [vmem:[%s12393_s13 + $0x78] sm:$0xff] }
 0x8ce   : > { %v3636_v8 = vmul.f32 0.5, %v3635_v7  ;;  %4809 = vmatpush.msra.mxu1 %v8061_v62 }
 0x8cf   : > { %v3736_v5 = vmul.f32 %v10164_v43, %v3710_v32  ;;  %v3833_v57 = vmul.f32 0.044715, %v3809_v40  ;;  %4900 = vmatpush.msra.mxu2 %v8060_v50  ;;  %v3951_v25 = vmul.f32 0.5, %v3927_v27  ;;  %v8063_v40 = vld [vmem:[%s12393_s13 + $0x70] sm:$0xff] }
 0x8d0   : > { %v3637_v26 = vsub.f32 1.5, %v3636_v8  ;;  %v3441_v9 = vpop.f32.mrf.mxu2  ;;  %4810 = vmatpush.msra.mxu1 %v8063_v40 }
 0x8d1   : > { %v10177_v61 = vpop.eup %7834  ;;  %v10179_v23 = vadd.f32 1e-06, %v3441_v9  ;;  %v10185_v28 = vadd.f32 %v10182_v47, %v3736_v5  ;;  %v3857_v10 = vadd.f32 %v3833_v57, %v10139_v37  ;;  %4901 = vmatpush.msra.mxu2 %v8062_v36  ;;  %v8064_v5 = vld [vmem:[%s12393_s13 + $0xd8] sm:$0xff]  ;;  %v8065_v57 = vld [vmem:[%s12393_s13 + $0x68] sm:$0xff] }
 0x8d2   : > { %v3638_v38 = vmul.f32 %v10133_v53, %v3637_v26  ;;  %v3644_v19 = vmul.f32 %v10177_v61, %v10135_v17  ;;  %4811 = vmatpush.msra.mxu1 %v8065_v57  ;;  %v3975_v26 = vmul.f32 %v3951_v25, %v10082_v60  ;;  %v10221_v9 = vld [vmem:[#allocation15 + $0x50] sm:$0xff]  ;;  %vm3650_vm14 = vweird.f32 %v10177_v61 }
 0x8d3   : > { %v7837_v18 = vpop.eup %7836  ;;  %7838 = vrsqrt.f32 %v10179_v23  ;;  %v3786_v48 = vmul.f32 %v10185_v28, %v10185_v28  ;;  %v3881_v32 = vmul.f32 0.7978846, %v3857_v10  ;;  %4902 = vmatpush.msra.mxu2 %v8064_v5  ;;  %4545 = vmatpush.msra.mxu3 %v10221_v9  ;;  %vm3651_vm2 = vmor %vm3649_vm15, %vm3650_vm14  ;;  %vm3659_vm1 = vweird.f32 %v10179_v23 }
 0x8d4   : > { %v3642_v41 = vsel %vm3641_vm13, %v10133_v53, %v3638_v38  ;;  %v3645_v34 = vmul.f32 %v10177_v61, %v3644_v19  ;;  %v3928_v7 = vadd.f32 1.0, %v7837_v18 }
 0x8d5   : > { %v3711_v31 = vmul.f32 %v3642_v41, %v9693_v16  ;;  %v3810_v8 = vmul.f32 %v3786_v48, %v10185_v28  ;;  %v10223_v16 = vld [vmem:[#allocation15 + $0x58] sm:$0xff]  ;;  %4903 = vmatpush.msra.mxu2 %v9812_v44  ;;  %7840 = vtanh.f32 %v3881_v32  ;;  %v8066_v44 = vld [vmem:[%s12393_s13 + $0x60] sm:$0xff] }
 0x8d6   : > { %v3646_v27 = vmul.f32 0.5, %v3645_v34  ;;  %v3952_v53 = vmul.f32 0.5, %v3928_v7  ;;  %4634 = vmatpush.msrb.mxu0 %v10223_v16  ;;  %4812 = vmatpush.msra.mxu1 %v8066_v44 }
 0x8d7   : > { %v3737_v6 = vmul.f32 %v10164_v43, %v3711_v31  ;;  %v3834_v10 = vmul.f32 0.044715, %v3810_v8  ;;  %4904 = vmatpush.msra.mxu2 %v9838_v51  ;;  %v8067_v51 = vld [vmem:[%s12393_s13 + $0x58] sm:$0xff] }
 0x8d8   : > { %v3647_v50 = vsub.f32 1.5, %v3646_v27  ;;  %v3444_v38 = vpop.f32.mrf.mxu2  ;;  %v3976_v19 = vmul.f32 %v3952_v53, %v10113_v52  ;;  %4813 = vmatpush.msra.mxu1 %v8067_v51  ;;  %v10258_v27 = vld [vmem:[#allocation15 + $0x40] sm:$0xff] }
 0x8d9   : > { %v7839_v62 = vpop.eup %7838  ;;  %v10230_v60 = vadd.f32 1e-06, %v3444_v38  ;;  %v3858_v18 = vadd.f32 %v3834_v10, %v10185_v28  ;;  %v10234_v25 = vadd.f32 %v10182_v47, %v3737_v6  ;;  %4905 = vmatpush.msra.mxu2 %v9880_v24  ;;  %v10260_v24 = vld [vmem:[#allocation15 + $0x48] sm:$0xff]  ;;  %4546 = vmatpush.msra.mxu3 %v10258_v27 }
 0x8da   : > { %v3648_v52 = vmul.f32 %v10177_v61, %v3647_v50  ;;  %v3654_v48 = vmul.f32 %v7839_v62, %v10179_v23  ;;  %v3992_v36 = vpack.c.bf16 %v3976_v19, %v3975_v26  ;;  %4814 = vmatpush.msra.mxu1 %v9817_v56  ;;  %vm3660_vm4 = vweird.f32 %v7839_v62  ;;  %4635 = vmatpush.msrb.mxu0 %v10260_v24  ;;  %v4013_v50 = vld [vmem:[#allocation13] ss:$4 sm:$0x3] }
 0x8db   : > { %7842 = vrsqrt.f32 %v10230_v60  ;;  %v3882_v41 = vmul.f32 0.7978846, %v3858_v18  ;;  %v3787_v34 = vmul.f32 %v10234_v25, %v10234_v25  ;;  %4906 = vmatpush.msra.mxu2 %v9908_v1  ;;  %v7841_v31 = vpop.eup %7840  ;;  %vm3661_vm5 = vmor %vm3659_vm1, %vm3660_vm4  ;;  %vm3669_vm7 = vweird.f32 %v10230_v60 }
 0x8dc   : > { %v3652_v17 = vsel %vm3651_vm2, %v10177_v61, %v3648_v52  ;;  %v3655_v7 = vmul.f32 %v7839_v62, %v3654_v48  ;;  %4142 = vmatmul.bf16.gmra.mxu3 %v3992_v36  ;;  %4211 = vmatmul.bf16.gmra.mxu0 %v3992_v36  ;;  %v3929_v57 = vadd.f32 1.0, %v7841_v31  ;;  %v10290_v36 = vperm.slane %v4013_v50, 1 }
 0x8dd   : > { %v3712_v32 = vmul.f32 %v3652_v17, %v9699_v35  ;;  %7844 = vtanh.f32 %v3882_v41  ;;  %v3811_v40 = vmul.f32 %v3787_v34, %v10234_v25  ;;  %4815 = vmatpush.msra.mxu1 %v9860_v39  ;;  %4907 = vmatpush.msra.mxu2 %v9950_v55  ;;  %v10319_v31 = vperm.slane %v4013_v50, 0 }
 0x8de   : > { %v3656_v8 = vmul.f32 0.5, %v3655_v7  ;;  %v3953_v44 = vmul.f32 0.5, %v3929_v57 }
 0x8df   : > { %v3738_v5 = vmul.f32 %v10164_v43, %v3712_v32  ;;  %v3835_v61 = vmul.f32 0.044715, %v3811_v40  ;;  %4816 = vmatpush.msra.mxu1 %v9885_v11  ;;  %4908 = vmatpush.msra.mxu2 %v9976_v12 }
 0x8e0   : > { %v3657_v35 = vsub.f32 1.5, %v3656_v8  ;;  %v3447_v53 = vpop.f32.mrf.mxu2  ;;  %v3977_v17 = vmul.f32 %v3953_v44, %v10139_v37 }
 0x8e1   : > { %v10266_v56 = vpop.eup %7842  ;;  %v10268_v1 = vadd.f32 1e-06, %v3447_v53  ;;  %v10271_v6 = vadd.f32 %v10182_v47, %v3738_v5  ;;  %v3859_v26 = vadd.f32 %v3835_v61, %v10234_v25  ;;  %4817 = vmatpush.msra.mxu1 %v9928_v33  ;;  %4909 = vmatpush.msra.mxu2 %v10018_v58 }
 0x8e2   : > { %v3658_v39 = vmul.f32 %v7839_v62, %v3657_v35  ;;  %v3664_v55 = vmul.f32 %v10266_v56, %v10230_v60  ;;  %vm3670_vm6 = vweird.f32 %v10266_v56 }
 0x8e3   : > { %v7845_v10 = vpop.eup %7844  ;;  %7846 = vrsqrt.f32 %v10268_v1  ;;  %v3788_v38 = vmul.f32 %v10271_v6, %v10271_v6  ;;  %v3883_v19 = vmul.f32 0.7978846, %v3859_v26  ;;  %4818 = vmatpush.msra.mxu1 %v9955_v13  ;;  %4910 = vmatpush.msra.mxu2 %v10053_v49  ;;  %vm3671_vm0 = vmor %vm3669_vm7, %vm3670_vm6  ;;  %vm3679_vm9 = vweird.f32 %v10268_v1 }
 0x8e4   : > { %v3662_v11 = vsel %vm3661_vm5, %v7839_v62, %v3658_v39  ;;  %v3665_v12 = vmul.f32 %v10266_v56, %v3664_v55  ;;  %v3930_v23 = vadd.f32 1.0, %v7845_v10 }
 0x8e5   : > { %v3713_v18 = vmul.f32 %v3662_v11, %v9705_v15  ;;  %v3812_v52 = vmul.f32 %v3788_v38, %v10271_v6  ;;  %7848 = vtanh.f32 %v3883_v19  ;;  %4819 = vmatpush.msra.mxu1 %v9998_v30  ;;  %4911 = vmatpush.msra.mxu2 %v10095_v59  ;;  %v10340_v38 = vld [vmem:[#allocation15 + $0x30] sm:$0xff]  ;;  %v10342_v19 = vld [vmem:[#allocation15 + $0x38] sm:$0xff] }
 0x8e6   : > { %v3666_v48 = vmul.f32 0.5, %v3665_v12  ;;  %v3954_v41 = vmul.f32 0.5, %v3930_v23  ;;  %4547 = vmatpush.msra.mxu3 %v10340_v38  ;;  %4636 = vmatpush.msrb.mxu0 %v10342_v19 }
 0x8e7   : > { %v3739_v33 = vmul.f32 %v10164_v43, %v3713_v18  ;;  %v3836_v58 = vmul.f32 0.044715, %v3812_v52  ;;  %4820 = vmatpush.msra.mxu1 %v10031_v45  ;;  %4912 = vmatpush.msra.mxu2 %v10128_v21 }
 0x8e8   : > { %v3667_v15 = vsub.f32 1.5, %v3666_v48  ;;  %v3450_v62 = vpop.f32.mrf.mxu2  ;;  %v3978_v13 = vmul.f32 %v3954_v41, %v10185_v28 }
 0x8e9   : > { %v7847_v34 = vpop.eup %7846  ;;  %v10297_v49 = vadd.f32 1e-06, %v3450_v62  ;;  %v4177_v51 = vpop.f32.mrf.mxu0  ;;  %v3860_v7 = vadd.f32 %v3836_v58, %v10271_v6  ;;  %v10302_v32 = vadd.f32 %v10182_v47, %v3739_v33  ;;  %4821 = vmatpush.msra.mxu1 %v10073_v2  ;;  %4913 = vmatpush.msra.mxu2 %v10147_v63 }
 0x8ea   : > { %v3668_v30 = vmul.f32 %v10266_v56, %v3667_v15  ;;  %v3674_v59 = vmul.f32 %v7847_v34, %v10268_v1  ;;  %v10310_v28 = vadd.f32 %v4177_v51, %v10290_v36  ;;  %v3993_v37 = vpack.c.bf16 %v3978_v13, %v3977_v17 }
 0x8eb   : > { %7850 = vrsqrt.f32 %v10297_v49  ;;  %v3884_v40 = vmul.f32 0.7978846, %v3860_v7  ;;  %v7849_v45 = vpop.eup %7848  ;;  %v3789_v8 = vmul.f32 %v10302_v32, %v10302_v32  ;;  %4822 = vmatpush.msra.mxu1 %v10106_v42  ;;  %vm3680_vm8 = vweird.f32 %v7847_v34 }
 0x8ec   : > { %v3672_v21 = vsel %vm3671_vm0, %v10266_v56, %v3668_v30  ;;  %v3675_v60 = vmul.f32 %v7847_v34, %v3674_v59  ;;  %4390 = vmatmul.f32.vlgmr.msrb.gmra.mxu2 %v10310_v28  ;;  %4147 = vmatmul.bf16.gmra.mxu3 %v3993_v37  ;;  %v3931_v53 = vadd.f32 1.0, %v7849_v45  ;;  %vm3681_vm10 = vmor %vm3679_vm9, %vm3680_vm8  ;;  %vm3689_vm12 = vweird.f32 %v10297_v49 }
 0x8ed   : > { %v3714_v5 = vmul.f32 %v3672_v21, %v9711_v0  ;;  %4216 = vmatmul.bf16.gmra.mxu0 %v3993_v37  ;;  %7852 = vtanh.f32 %v3884_v40  ;;  %v3813_v2 = vmul.f32 %v3789_v8, %v10302_v32  ;;  %4823 = vmatpush.msra.mxu1 %v10162_v14 }
 0x8ee   : > { %v3676_v61 = vmul.f32 0.5, %v3675_v60  ;;  %v3955_v11 = vmul.f32 0.5, %v3931_v53 }
 0x8ef   : > { %v3740_v63 = vmul.f32 %v10164_v43, %v3714_v5  ;;  %v4108_v35 = vpop.f32.mrf.mxu3  ;;  %v3837_v26 = vmul.f32 0.044715, %v3813_v2  ;;  %4824 = vmatpush.msra.mxu1 %v10175_v20 }
 0x8f0   : > { %v3677_v56 = vsub.f32 1.5, %v3676_v61  ;;  %v10328_v57 = vadd.f32 %v4108_v35, %v10319_v31  ;;  %v3979_v13 = vmul.f32 %v3955_v11, %v10234_v25 }
 0x8f1   : > { %v7851_v0 = vpop.eup %7850  ;;  %v4179_v39 = vpop.f32.mrf.mxu0  ;;  %v10332_v55 = vadd.f32 %v10182_v47, %v3740_v63  ;;  %v3861_v1 = vadd.f32 %v3837_v26, %v10302_v32 }
 0x8f2   : > { %v3678_v10 = vmul.f32 %v7847_v34, %v3677_v56  ;;  %v3684_v42 = vmul.f32 %v7851_v0, %v10297_v49  ;;  %v10337_v50 = vadd.f32 %v4179_v39, %v10290_v36  ;;  %4301 = vmatmul.f32.vlgmr.msrb.gmra.mxu1 %v10328_v57  ;;  %vm3690_vm11 = vweird.f32 %v7851_v0 }
 0x8f3   : > { %v7853_v14 = vpop.eup %7852  ;;  %v3790_v12 = vmul.f32 %v10332_v55, %v10332_v55  ;;  %v3885_v41 = vmul.f32 0.7978846, %v3861_v1  ;;  %vm3691_vm13 = vmor %vm3689_vm12, %vm3690_vm11 }
 0x8f4   : > { %v3682_v23 = vsel %vm3681_vm10, %v7847_v34, %v3678_v10  ;;  %v3685_v18 = vmul.f32 %v7851_v0, %v3684_v42  ;;  %4393 = vmatmul.f32.gmra.mxu2 %v10337_v50  ;;  %v3932_v44 = vadd.f32 1.0, %v7853_v14 }
 0x8f5   : > { %v3715_v52 = vmul.f32 %v3682_v23, %v9717_v29  ;;  %v3814_v48 = vmul.f32 %v3790_v12, %v10332_v55  ;;  %7854 = vtanh.f32 %v3885_v41  ;;  %v10394_v41 = vld [vmem:[#allocation15 + $0x20] sm:$0xff] }
 0x8f6   : > { %v3686_v33 = vmul.f32 0.5, %v3685_v18  ;;  %v3956_v58 = vmul.f32 0.5, %v3932_v44  ;;  %4548 = vmatpush.msra.mxu3 %v10394_v41 }
 0x8f7   : > { %v3741_v15 = vmul.f32 %v10164_v43, %v3715_v52  ;;  %v4110_v62 = vpop.f32.mrf.mxu3  ;;  %v3838_v51 = vmul.f32 0.044715, %v3814_v48 }
 0x8f8   : > { %v3687_v34 = vsub.f32 1.5, %v3686_v33  ;;  %v10357_v17 = vadd.f32 %v4110_v62, %v10319_v31  ;;  %v3980_v20 = vmul.f32 %v3956_v58, %v10271_v6  ;;  %v10396_v33 = vld [vmem:[#allocation15 + $0x28] sm:$0xff] }
 0x8f9   : > { %v4182_v29 = vpop.f32.mrf.mxu0  ;;  %v3862_v7 = vadd.f32 %v3838_v51, %v10332_v55  ;;  %v10362_v30 = vadd.f32 %v10182_v47, %v3741_v15  ;;  %4637 = vmatpush.msrb.mxu0 %v10396_v33 }
 0x8fa   : > { %v3688_v59 = vmul.f32 %v7851_v0, %v3687_v34  ;;  %v10366_v25 = vadd.f32 %v4182_v29, %v10290_v36  ;;  %4304 = vmatmul.f32.gmra.mxu1 %v10357_v17  ;;  %v3994_v37 = vpack.c.bf16 %v3980_v20, %v3979_v13 }
 0x8fb   : > { %v3886_v40 = vmul.f32 0.7978846, %v3862_v7  ;;  %v3791_v6 = vmul.f32 %v10362_v30, %v10362_v30  ;;  %v7855_v21 = vpop.eup %7854 }
 0x8fc   : > { %v3692_v45 = vsel %vm3691_vm13, %v7851_v0, %v3688_v59  ;;  %4396 = vmatmul.f32.gmra.mxu2 %v10366_v25  ;;  %4152 = vmatmul.bf16.gmra.mxu3 %v3994_v37  ;;  %v3933_v63 = vadd.f32 1.0, %v7855_v21 }
 0x8fd   : > { %v3716_v60 = vmul.f32 %v3692_v45, %v9723_v22  ;;  %4221 = vmatmul.bf16.gmra.mxu0 %v3994_v37  ;;  %7856 = vtanh.f32 %v3886_v40  ;;  %v3815_v49 = vmul.f32 %v3791_v6, %v10362_v30 }
 0x8fe   : > { %v3957_v10 = vmul.f32 0.5, %v3933_v63  ;;  %v4272_v63 = vld [vmem:[#allocation15 + $0x18] sm:$0xff] }
 0x8ff   : > { %v3742_v8 = vmul.f32 %v10164_v43, %v3716_v60  ;;  %v4113_v5 = vpop.f32.mrf.mxu3  ;;  %v3839_v61 = vmul.f32 0.044715, %v3815_v49  ;;  %4638 = vmatpush.msrb.mxu0 %v4272_v63 }
 0x900   : > { %v10376_v2 = vadd.f32 %v4113_v5, %v10319_v31  ;;  %v3981_v1 = vmul.f32 %v3957_v10, %v10302_v32 }
 0x901   : > { %v4184_v35 = vpop.f32.mrf.mxu0  ;;  %v3768_v53 = vadd.f32 %v10182_v47, %v3742_v8  ;;  %v3863_v56 = vadd.f32 %v3839_v61, %v10362_v30 }
 0x902   : > { %v10381_v22 = vadd.f32 %v4184_v35, %v10290_v36  ;;  %4307 = vmatmul.f32.gmra.mxu1 %v10376_v2 }
 0x903   : > { %v7857_v26 = vpop.eup %7856  ;;  %v3792_v0 = vmul.f32 %v3768_v53, %v3768_v53  ;;  %v3887_v39 = vmul.f32 0.7978846, %v3863_v56 }
 0x904   : > { %4399 = vmatmul.f32.gmra.mxu2 %v10381_v22  ;;  %v3934_v43 = vadd.f32 1.0, %v7857_v26 }
 0x905   : > { %v3816_v42 = vmul.f32 %v3792_v0, %v3768_v53  ;;  %7858 = vtanh.f32 %v3887_v39 }
 0x906   : > { %v3958_v14 = vmul.f32 0.5, %v3934_v43 }
 0x907   : > { %v4115_v11 = vpop.f32.mrf.mxu3  ;;  %v3840_v12 = vmul.f32 0.044715, %v3816_v42 }
 0x908   : > { %v10386_v47 = vadd.f32 %v4115_v11, %v10319_v31  ;;  %v3982_v23 = vmul.f32 %v3958_v14, %v10332_v55 }
 0x909   : > { %v4187_v18 = vpop.f32.mrf.mxu0  ;;  %v3864_v44 = vadd.f32 %v3840_v12, %v3768_v53 }
 0x90a   : > { %v10391_v52 = vadd.f32 %v4187_v18, %v10290_v36  ;;  %4310 = vmatmul.f32.gmra.mxu1 %v10386_v47  ;;  %v3995_v48 = vpack.c.bf16 %v3982_v23, %v3981_v1  ;;  %v4269_v1 = vld [vmem:[#allocation15] sm:$0xff]  ;;  %v4270_v23 = vld [vmem:[#allocation15 + $0x8] sm:$0xff] }
 0x90b   : > { %v3888_v58 = vmul.f32 0.7978846, %v3864_v44  ;;  %v7859_v32 = vpop.eup %7858  ;;  %4639 = vmatpush.msrb.mxu0 %v4270_v23 }
 0x90c   : > { %4402 = vmatmul.f32.gmra.mxu2 %v10391_v52  ;;  %4157 = vmatmul.bf16.gmra.mxu3 %v3995_v48  ;;  %v3935_v62 = vadd.f32 1.0, %v7859_v32 }
 0x90d   : > { %4226 = vmatmul.bf16.gmra.mxu0 %v3995_v48  ;;  %7860 = vtanh.f32 %v3888_v58 }
 0x90e   : > { %v3959_v29 = vmul.f32 0.5, %v3935_v62  ;;  %5156 = vmatpush.msra.mxu0 %v10022_v54 }
 0x90f   : > { %v4118_v55 = vpop.f32.mrf.mxu3 }
 0x910   : > { %v10402_v15 = vadd.f32 %v4118_v55, %v10319_v31  ;;  %v3983_v40 = vmul.f32 %v3959_v29, %v10362_v30  ;;  %v4271_v30 = vld [vmem:[#allocation15 + $0x10] sm:$0xff]  ;;  %5157 = vmatpush.msra.mxu0 %v10099_v46 }
 0x911   : > { %v4189_v13 = vpop.f32.mrf.mxu0  ;;  %4549 = vmatpush.msra.mxu3 %v4271_v30 }
 0x912   : > { %v10405_v51 = vadd.f32 %v4189_v13, %v10290_v36  ;;  %4313 = vmatmul.f32.gmra.mxu1 %v10402_v15  ;;  %5158 = vmatpush.msra.mxu0 %v10223_v16 }
 0x913   : > { %v7861_v34 = vpop.eup %7860  ;;  %4550 = vmatpush.msra.mxu3 %v4269_v1 }
 0x914   : > { %4405 = vmatmul.f32.gmra.mxu2 %v10405_v51  ;;  %v3936_v20 = vadd.f32 1.0, %v7861_v34  ;;  %5159 = vmatpush.msra.mxu0 %v10260_v24 }
 0x915   : > { %5067 = vmatpush.msrb.mxu3 %v10020_v4 }
 0x916   : > { %v3960_v7 = vmul.f32 0.5, %v3936_v20  ;;  %5160 = vmatpush.msra.mxu0 %v10342_v19 }
 0x917   : > { %v4120_v59 = vpop.f32.mrf.mxu3  ;;  %5068 = vmatpush.msrb.mxu3 %v10097_v3 }
 0x918   : > { %v10410_v37 = vadd.f32 %v4120_v59, %v10319_v31  ;;  %v3984_v6 = vmul.f32 %v3960_v7, %v3768_v53  ;;  %5161 = vmatpush.msra.mxu0 %v10396_v33 }
 0x919   : > { %v4192_v45 = vpop.f32.mrf.mxu0  ;;  %5069 = vmatpush.msrb.mxu3 %v10221_v9 }
 0x91a   : > { %v10414_v21 = vadd.f32 %v4192_v45, %v10290_v36  ;;  %4316 = vmatmul.f32.gmra.mxu1 %v10410_v37  ;;  %v3996_v60 = vpack.c.bf16 %v3984_v6, %v3983_v40  ;;  %5162 = vmatpush.msra.mxu0 %v4272_v63 }
 0x91b   : > { %5070 = vmatpush.msrb.mxu3 %v10258_v27 }
 0x91c   : > { %4408 = vmatmul.f32.gmra.mxu2 %v10414_v21  ;;  %4162 = vmatmul.bf16.gmra.mxu3 %v3996_v60 }
 0x91d   : > { %4231 = vmatmul.bf16.gmra.mxu0 %v3996_v60  ;;  %5071 = vmatpush.msrb.mxu3 %v10340_v38 }
 0x91e   : > { %5163 = vmatpush.msra.mxu0 %v4270_v23 }
 0x91f   : > { %v4123_v49 = vpop.f32.mrf.mxu3  ;;  %5072 = vmatpush.msrb.mxu3 %v10394_v41 }
 0x920   : > { %v10419_v8 = vadd.f32 %v4123_v49, %v10319_v31 }
 0x921   : > { %v4194_v5 = vpop.f32.mrf.mxu0  ;;  %5073 = vmatpush.msrb.mxu3 %v4271_v30 }
 0x922   : > { %v10422_v61 = vadd.f32 %v4194_v5, %v10290_v36  ;;  %4319 = vmatmul.f32.gmra.mxu1 %v10419_v8 }
 0x923   : > { %5074 = vmatpush.msrb.mxu3 %v4269_v1 }
 0x924   : > { %4411 = vmatmul.f32.gmra.mxu2 %v10422_v61 }
 0x927   : > { %v4125_v35 = vpop.f32.mrf.mxu3 }
 0x928   : > { %v10427_v53 = vadd.f32 %v4125_v35, %v10319_v31 }
 0x929   : > { %v4197_v56 = vpop.f32.mrf.mxu0 }
 0x92a   : > { %v10430_v26 = vadd.f32 %v4197_v56, %v10290_v36  ;;  %4322 = vmatmul.f32.gmra.mxu1 %v10427_v53 }
 0x92c   : > { %4414 = vmatmul.f32.gmra.mxu2 %v10430_v26 }
 0x92f   : > { %v4128_v0 = vpop.f32.mrf.mxu3 }
 0x930   : > { %v10435_v39 = vadd.f32 %v4128_v0, %v10319_v31 }
 0x931   : > { %v4199_v43 = vpop.f32.mrf.mxu0 }
 0x932   : > { %v10438_v10 = vadd.f32 %v4199_v43, %v10290_v36  ;;  %4325 = vmatmul.f32.gmra.mxu1 %v10435_v39 }
 0x934   : > { %4417 = vmatmul.f32.gmra.mxu2 %v10438_v10 }
 0x937   : > { %v4130_v42 = vpop.f32.mrf.mxu3 }
 0x938   : > { %v10443_v14 = vadd.f32 %v4130_v42, %v10319_v31 }
 0x939   : > { %v4202_v11 = vpop.f32.mrf.mxu0 }
 0x93a   : > { %v10446_v12 = vadd.f32 %v4202_v11, %v10290_v36  ;;  %4328 = vmatmul.f32.gmra.mxu1 %v10443_v14 }
 0x93c   : > { %4420 = vmatmul.f32.gmra.mxu2 %v10446_v12 }
 0x93f   : > { %v4133_v18 = vpop.f32.mrf.mxu3 }
 0x940   : > { %v10455_v44 = vadd.f32 %v4133_v18, %v10319_v31 }
 0x941   : > { %v4204_v48 = vpop.f32.mrf.mxu0 }
 0x942   : > { %v10460_v58 = vadd.f32 %v4204_v48, %v10290_v36  ;;  %4331 = vmatmul.f32.gmra.mxu1 %v10455_v44 }
 0x944   : > { %4423 = vmatmul.f32.gmra.mxu2 %v10460_v58 }
 0x947   : > { %v4135_v4 = vpop.f32.mrf.mxu3 }
 0x948   : > { %v10471_v54 = vadd.f32 %v4135_v4, %v10319_v31 }
 0x949   : > { %v4207_v3 = vpop.f32.mrf.mxu0 }
 0x94a   : > { %v10474_v46 = vadd.f32 %v4207_v3, %v10290_v36  ;;  %4334 = vmatmul.f32.gmra.mxu1 %v10471_v54 }
 0x94c   : > { %4426 = vmatmul.f32.gmra.mxu2 %v10474_v46 }
 0x94f   : > { %v4138_v9 = vpop.f32.mrf.mxu3 }
 0x950   : > { %v10479_v16 = vadd.f32 %v4138_v9, %v10319_v31 }
 0x951   : > { %v4209_v27 = vpop.f32.mrf.mxu0 }
 0x952   : > { %v10482_v24 = vadd.f32 %v4209_v27, %v10290_v36  ;;  %4337 = vmatmul.f32.gmra.mxu1 %v10479_v16 }
 0x954   : > { %4429 = vmatmul.f32.gmra.mxu2 %v10482_v24 }
 0x957   : > { %v4140_v38 = vpop.f32.mrf.mxu3 }
 0x958   : > { %v10487_v19 = vadd.f32 %v4140_v38, %v10319_v31 }
 0x959   : > { %v4212_v41 = vpop.f32.mrf.mxu0 }
 0x95a   : > { %v10490_v33 = vadd.f32 %v4212_v41, %v10290_v36  ;;  %4340 = vmatmul.f32.gmra.mxu1 %v10487_v19 }
 0x95c   : > { %4432 = vmatmul.f32.gmra.mxu2 %v10490_v33 }
 0x95f   : > { %v4143_v32 = vpop.f32.mrf.mxu3 }
 0x960   : > { %v10495_v55 = vadd.f32 %v4143_v32, %v10319_v31 }
 0x961   : > { %v4214_v62 = vpop.f32.mrf.mxu0 }
 0x962   : > { %v10498_v13 = vadd.f32 %v4214_v62, %v10290_v36  ;;  %4343 = vmatmul.f32.gmra.mxu1 %v10495_v55 }
 0x964   : > { %4435 = vmatmul.f32.gmra.mxu2 %v10498_v13 }
 0x967   : > { %v4145_v34 = vpop.f32.mrf.mxu3 }
 0x968   : > { %v10503_v20 = vadd.f32 %v4145_v34, %v10319_v31 }
 0x96a   : > { %v4217_v29 = vpop.f32.mrf.mxu0  ;;  %4346 = vmatmul.f32.gmra.mxu1 %v10503_v20 }
 0x96b   : > { %v10507_v7 = vadd.f32 %v4217_v29, %v10290_v36 }
 0x96d   : > { %4438 = vmatmul.f32.gmra.mxu2 %v10507_v7 }
 0x96f   : > { %v4302_v59 = vpop.f32.mrf.mxu1  ;;  %v4391_v40 = vpop.f32.mrf.mxu2 }
 0x970   : > { %v4148_v6 = vpop.f32.mrf.mxu3  ;;  %v4392_v45 = vadd.f32 %v4391_v40, %v4302_v59 }
 0x971   : > { %v10511_v60 = vadd.f32 %v4148_v6, %v10319_v31 }
 0x972   : > { %v4219_v49 = vpop.f32.mrf.mxu0  ;;  %7269 = vmatmul.msk.f32.vlgmr.msra.gmra.mxu3 %vm1509_vm3, %v4392_v45  ;;  %7293 = vmatmul.msk.f32.vlgmr.msrb.gmra.mxu0 %vm1509_vm3, %v4392_v45 }
 0x973   : > { %v10516_v5 = vadd.f32 %v4219_v49, %v10290_v36  ;;  %4349 = vmatmul.f32.gmra.mxu1 %v10511_v60 }
 0x975   : > { %4441 = vmatmul.f32.gmra.mxu2 %v10516_v5 }
 0x977   : > { %v4305_v30 = vpop.f32.mrf.mxu1  ;;  %v4394_v63 = vpop.f32.mrf.mxu2 }
 0x978   : > { %v4150_v35 = vpop.f32.mrf.mxu3  ;;  %v4395_v56 = vadd.f32 %v4394_v63, %v4305_v30 }
 0x979   : > { %v10521_v0 = vadd.f32 %v4150_v35, %v10319_v31 }
 0x97a   : > { %v4222_v43 = vpop.f32.mrf.mxu0  ;;  %7270 = vmatmul.msk.f32.gmra.mxu3 %vm1509_vm3, %v4395_v56  ;;  %7294 = vmatmul.msk.f32.gmra.mxu0 %vm1509_vm3, %v4395_v56 }
 0x97b   : > { %v10526_v42 = vadd.f32 %v4222_v43, %v10290_v36  ;;  %4352 = vmatmul.f32.gmra.mxu1 %v10521_v0 }
 0x97d   : > { %4444 = vmatmul.f32.gmra.mxu2 %v10526_v42 }
 0x97f   : > { %v4308_v11 = vpop.f32.mrf.mxu1  ;;  %v4397_v1 = vpop.f32.mrf.mxu2 }
 0x980   : > { %v4153_v23 = vpop.f32.mrf.mxu3  ;;  %v4398_v18 = vadd.f32 %v4397_v1, %v4308_v11 }
 0x981   : > { %v10531_v48 = vadd.f32 %v4153_v23, %v10319_v31 }
 0x982   : > { %v4224_v4 = vpop.f32.mrf.mxu0  ;;  %7271 = vmatmul.msk.f32.gmra.mxu3 %vm1509_vm3, %v4398_v18  ;;  %7295 = vmatmul.msk.f32.gmra.mxu0 %vm1509_vm3, %v4398_v18 }
 0x983   : > { %v10536_v3 = vadd.f32 %v4224_v4, %v10290_v36  ;;  %4355 = vmatmul.f32.gmra.mxu1 %v10531_v48 }
 0x985   : > { %4447 = vmatmul.f32.gmra.mxu2 %v10536_v3 }
 0x987   : > { %v4311_v9 = vpop.f32.mrf.mxu1  ;;  %v4400_v27 = vpop.f32.mrf.mxu2 }
 0x988   : > { %v4155_v38 = vpop.f32.mrf.mxu3  ;;  %v4401_v41 = vadd.f32 %v4400_v27, %v4311_v9 }
 0x989   : > { %v10541_v32 = vadd.f32 %v4155_v38, %v10319_v31 }
 0x98a   : > { %v4227_v62 = vpop.f32.mrf.mxu0  ;;  %7272 = vmatmul.msk.f32.gmra.mxu3 %vm1509_vm3, %v4401_v41  ;;  %7296 = vmatmul.msk.f32.gmra.mxu0 %vm1509_vm3, %v4401_v41 }
 0x98b   : > { %v10546_v34 = vadd.f32 %v4227_v62, %v10290_v36  ;;  %4358 = vmatmul.f32.gmra.mxu1 %v10541_v32 }
 0x98d   : > { %4450 = vmatmul.f32.gmra.mxu2 %v10546_v34 }
 0x98f   : > { %v4314_v29 = vpop.f32.mrf.mxu1  ;;  %v4403_v59 = vpop.f32.mrf.mxu2 }
 0x990   : > { %v4158_v40 = vpop.f32.mrf.mxu3  ;;  %v4404_v6 = vadd.f32 %v4403_v59, %v4314_v29 }
 0x991   : > { %v10551_v45 = vadd.f32 %v4158_v40, %v10319_v31 }
 0x992   : > { %v4229_v49 = vpop.f32.mrf.mxu0  ;;  %7273 = vmatmul.msk.f32.gmra.mxu3 %vm1509_vm3, %v4404_v6  ;;  %7297 = vmatmul.msk.f32.gmra.mxu0 %vm1509_vm3, %v4404_v6 }
 0x993   : > { %v10556_v30 = vadd.f32 %v4229_v49, %v10290_v36  ;;  %4361 = vmatmul.f32.gmra.mxu1 %v10551_v45 }
 0x995   : > { %4453 = vmatmul.f32.gmra.mxu2 %v10556_v30 }
 0x997   : > { %v4317_v63 = vpop.f32.mrf.mxu1  ;;  %v4406_v35 = vpop.f32.mrf.mxu2 }
 0x998   : > { %v4160_v56 = vpop.f32.mrf.mxu3  ;;  %v4407_v43 = vadd.f32 %v4406_v35, %v4317_v63 }
 0x999   : > { %v10561_v11 = vadd.f32 %v4160_v56, %v10319_v31 }
 0x99a   : > { %v4232_v1 = vpop.f32.mrf.mxu0  ;;  %7274 = vmatmul.msk.f32.gmra.mxu3 %vm1509_vm3, %v4407_v43  ;;  %7298 = vmatmul.msk.f32.gmra.mxu0 %vm1509_vm3, %v4407_v43 }
 0x99b   : > { %v10566_v23 = vadd.f32 %v4232_v1, %v10290_v36  ;;  %4364 = vmatmul.f32.gmra.mxu1 %v10561_v11 }
 0x99d   : > { %4456 = vmatmul.f32.gmra.mxu2 %v10566_v23 }
 0x99f   : > { %v4320_v18 = vpop.f32.mrf.mxu1  ;;  %v4409_v4 = vpop.f32.mrf.mxu2 }
 0x9a0   : > { %v4163_v9 = vpop.f32.mrf.mxu3  ;;  %v4410_v27 = vadd.f32 %v4409_v4, %v4320_v18 }
 0x9a1   : > { %v10571_v38 = vadd.f32 %v4163_v9, %v10319_v31 }
 0x9a2   : > { %v4234_v41 = vpop.f32.mrf.mxu0  ;;  %7275 = vmatmul.msk.f32.gmra.mxu3 %vm1509_vm3, %v4410_v27  ;;  %7299 = vmatmul.msk.f32.gmra.mxu0 %vm1509_vm3, %v4410_v27 }
 0x9a3   : > { %v10576_v62 = vadd.f32 %v4234_v41, %v10290_v36  ;;  %4367 = vmatmul.f32.gmra.mxu1 %v10571_v38 }
 0x9a5   : > { %4459 = vmatmul.f32.gmra.mxu2 %v10576_v62 }
 0x9a7   : > { %v4323_v29 = vpop.f32.mrf.mxu1  ;;  %v4412_v59 = vpop.f32.mrf.mxu2 }
 0x9a8   : > { %v4165_v40 = vpop.f32.mrf.mxu3  ;;  %v4413_v6 = vadd.f32 %v4412_v59, %v4323_v29 }
 0x9a9   : > { %v10581_v49 = vadd.f32 %v4165_v40, %v10319_v31 }
 0x9aa   : > { %7276 = vmatmul.msk.f32.gmra.mxu3 %vm1509_vm3, %v4413_v6  ;;  %7300 = vmatmul.msk.f32.gmra.mxu0 %vm1509_vm3, %v4413_v6 }
 0x9ab   : > { %4370 = vmatmul.f32.gmra.mxu1 %v10581_v49 }
 0x9af   : > { %v4326_v63 = vpop.f32.mrf.mxu1  ;;  %v4415_v36 = vpop.f32.mrf.mxu2 }
 0x9b0   : > { %v4416_v35 = vadd.f32 %v4415_v36, %v4326_v63 }
 0x9b2   : > { %7277 = vmatmul.msk.f32.gmra.mxu3 %vm1509_vm3, %v4416_v35  ;;  %7301 = vmatmul.msk.f32.gmra.mxu0 %vm1509_vm3, %v4416_v35 }
 0x9b7   : > { %v4329_v56 = vpop.f32.mrf.mxu1  ;;  %v4418_v43 = vpop.f32.mrf.mxu2 }
 0x9b8   : > { %v4419_v1 = vadd.f32 %v4418_v43, %v4329_v56 }
 0x9ba   : > { %7278 = vmatmul.msk.f32.gmra.mxu3 %vm1509_vm3, %v4419_v1  ;;  %7302 = vmatmul.msk.f32.gmra.mxu0 %vm1509_vm3, %v4419_v1 }
 0x9bf   : > { %v4332_v31 = vpop.f32.mrf.mxu1  ;;  %v4421_v18 = vpop.f32.mrf.mxu2 }
 0x9c0   : > { %v4422_v4 = vadd.f32 %v4421_v18, %v4332_v31 }
 0x9c2   : > { %7279 = vmatmul.msk.f32.gmra.mxu3 %vm1509_vm3, %v4422_v4  ;;  %7303 = vmatmul.msk.f32.gmra.mxu0 %vm1509_vm3, %v4422_v4 }
 0x9c7   : > { %v4335_v9 = vpop.f32.mrf.mxu1  ;;  %v4424_v27 = vpop.f32.mrf.mxu2 }
 0x9c8   : > { %v4425_v41 = vadd.f32 %v4424_v27, %v4335_v9 }
 0x9ca   : > { %7280 = vmatmul.msk.f32.gmra.mxu3 %vm1509_vm3, %v4425_v41  ;;  %7304 = vmatmul.msk.f32.gmra.mxu0 %vm1509_vm3, %v4425_v41 }
 0x9cf   : > { %v4338_v29 = vpop.f32.mrf.mxu1  ;;  %v4427_v59 = vpop.f32.mrf.mxu2 }
 0x9d0   : > { %v4428_v40 = vadd.f32 %v4427_v59, %v4338_v29 }
 0x9d2   : > { %7281 = vmatmul.msk.f32.gmra.mxu3 %vm1509_vm3, %v4428_v40  ;;  %7305 = vmatmul.msk.f32.gmra.mxu0 %vm1509_vm3, %v4428_v40 }
 0x9d7   : > { %v4341_v6 = vpop.f32.mrf.mxu1  ;;  %v4430_v63 = vpop.f32.mrf.mxu2 }
 0x9d8   : > { %v4431_v36 = vadd.f32 %v4430_v63, %v4341_v6 }
 0x9da   : > { %7282 = vmatmul.msk.f32.gmra.mxu3 %vm1509_vm3, %v4431_v36  ;;  %7306 = vmatmul.msk.f32.gmra.mxu0 %vm1509_vm3, %v4431_v36 }
 0x9df   : > { %v4344_v35 = vpop.f32.mrf.mxu1  ;;  %v4433_v56 = vpop.f32.mrf.mxu2 }
 0x9e0   : > { %v4434_v43 = vadd.f32 %v4433_v56, %v4344_v35 }
 0x9e2   : > { %7283 = vmatmul.msk.f32.gmra.mxu3 %vm1509_vm3, %v4434_v43  ;;  %7307 = vmatmul.msk.f32.gmra.mxu0 %vm1509_vm3, %v4434_v43 }
 0x9e7   : > { %v4347_v1 = vpop.f32.mrf.mxu1  ;;  %v4436_v31 = vpop.f32.mrf.mxu2 }
 0x9e8   : > { %v4437_v18 = vadd.f32 %v4436_v31, %v4347_v1 }
 0x9ea   : > { %7284 = vmatmul.msk.f32.gmra.mxu3 %vm1509_vm3, %v4437_v18  ;;  %7308 = vmatmul.msk.f32.gmra.mxu0 %vm1509_vm3, %v4437_v18 }
 0x9ef   : > { %v4641_v4 = vpop.f32.mrf.mxu0 }
 0x9f0   : > { %v4350_v9 = vpop.f32.mrf.mxu1  ;;  %v4439_v27 = vpop.f32.mrf.mxu2  ;;  %v10603_v41 = vsub.f32 %v10310_v28, %v4641_v4 }
 0x9f1   : > { %v4440_v29 = vadd.f32 %v4439_v27, %v4350_v9 }
 0x9f2   : > { %v4762_v59 = vmul.f32 %v10603_v41, %v10603_v41 }
 0x9f3   : > { %7285 = vmatmul.msk.f32.gmra.mxu3 %vm1509_vm3, %v4440_v29  ;;  %7309 = vmatmul.msk.f32.gmra.mxu0 %vm1509_vm3, %v4440_v29 }
 0x9f4   : > { %4914 = vmatmul.f32.vlgmr.msra.gmra.mxu2 %v4762_v59 }
 0x9f5   : > { %v4552_v40 = vpop.f32.mrf.mxu3 }
 0x9f6   : > { %v10610_v6 = vsub.f32 %v10328_v57, %v4552_v40 }
 0x9f7   : > { %v4644_v63 = vpop.f32.mrf.mxu0 }
 0x9f8   : > { %v4761_v36 = vmul.f32 %v10610_v6, %v10610_v6  ;;  %v4353_v35 = vpop.f32.mrf.mxu1  ;;  %v4442_v28 = vpop.f32.mrf.mxu2  ;;  %v10615_v56 = vsub.f32 %v10337_v50, %v4644_v63 }
 0x9f9   : > { %v4443_v43 = vadd.f32 %v4442_v28, %v4353_v35 }
 0x9fa   : > { %v4764_v1 = vmul.f32 %v10615_v56, %v10615_v56  ;;  %4825 = vmatmul.f32.vlgmr.msra.gmra.mxu1 %v4761_v36 }
 0x9fb   : > { %7286 = vmatmul.msk.f32.gmra.mxu3 %vm1509_vm3, %v4443_v43  ;;  %7310 = vmatmul.msk.f32.gmra.mxu0 %vm1509_vm3, %v4443_v43 }
 0x9fc   : > { %4917 = vmatmul.f32.gmra.mxu2 %v4764_v1 }
 0x9fd   : > { %v4555_v57 = vpop.f32.mrf.mxu3 }
 0x9fe   : > { %v10622_v31 = vsub.f32 %v10357_v17, %v4555_v57 }
 0x9ff   : > { %v4647_v18 = vpop.f32.mrf.mxu0 }
 0xa00   : > { %v4763_v4 = vmul.f32 %v10622_v31, %v10622_v31  ;;  %v4356_v50 = vpop.f32.mrf.mxu1  ;;  %v4445_v9 = vpop.f32.mrf.mxu2  ;;  %v10627_v27 = vsub.f32 %v10366_v25, %v4647_v18 }
 0xa01   : > { %v4446_v29 = vadd.f32 %v4445_v9, %v4356_v50 }
 0xa02   : > { %v4766_v59 = vmul.f32 %v10627_v27, %v10627_v27  ;;  %4828 = vmatmul.f32.gmra.mxu1 %v4763_v4 }
 0xa03   : > { %7287 = vmatmul.msk.f32.gmra.mxu3 %vm1509_vm3, %v4446_v29  ;;  %7311 = vmatmul.msk.f32.gmra.mxu0 %vm1509_vm3, %v4446_v29 }
 0xa04   : > { %4920 = vmatmul.f32.gmra.mxu2 %v4766_v59 }
 0xa05   : > { %v4558_v17 = vpop.f32.mrf.mxu3 }
 0xa06   : > { %v10634_v40 = vsub.f32 %v10376_v2, %v4558_v17 }
 0xa07   : > { %v4650_v63 = vpop.f32.mrf.mxu0 }
 0xa08   : > { %v4765_v36 = vmul.f32 %v10634_v40, %v10634_v40  ;;  %v4359_v25 = vpop.f32.mrf.mxu1  ;;  %v4448_v35 = vpop.f32.mrf.mxu2  ;;  %v10639_v28 = vsub.f32 %v10381_v22, %v4650_v63 }
 0xa09   : > { %v4449_v43 = vadd.f32 %v4448_v35, %v4359_v25 }
 0xa0a   : > { %v4768_v1 = vmul.f32 %v10639_v28, %v10639_v28  ;;  %4831 = vmatmul.f32.gmra.mxu1 %v4765_v36 }
 0xa0b   : > { %7288 = vmatmul.msk.f32.gmra.mxu3 %vm1509_vm3, %v4449_v43  ;;  %7312 = vmatmul.msk.f32.gmra.mxu0 %vm1509_vm3, %v4449_v43 }
 0xa0c   : > { %4923 = vmatmul.f32.gmra.mxu2 %v4768_v1 }
 0xa0d   : > { %v4561_v2 = vpop.f32.mrf.mxu3 }
 0xa0e   : > { %v10646_v57 = vsub.f32 %v10386_v47, %v4561_v2 }
 0xa0f   : > { %v4653_v18 = vpop.f32.mrf.mxu0 }
 0xa10   : > { %v4767_v4 = vmul.f32 %v10646_v57, %v10646_v57  ;;  %v4362_v22 = vpop.f32.mrf.mxu1  ;;  %v4451_v50 = vpop.f32.mrf.mxu2  ;;  %v10651_v9 = vsub.f32 %v10391_v52, %v4653_v18 }
 0xa11   : > { %v4452_v29 = vadd.f32 %v4451_v50, %v4362_v22 }
 0xa12   : > { %v4770_v59 = vmul.f32 %v10651_v9, %v10651_v9  ;;  %4834 = vmatmul.f32.gmra.mxu1 %v4767_v4 }
 0xa13   : > { %7289 = vmatmul.msk.f32.gmra.mxu3 %vm1509_vm3, %v4452_v29  ;;  %7313 = vmatmul.msk.f32.gmra.mxu0 %vm1509_vm3, %v4452_v29 }
 0xa14   : > { %4926 = vmatmul.f32.gmra.mxu2 %v4770_v59 }
 0xa15   : > { %v4564_v47 = vpop.f32.mrf.mxu3 }
 0xa16   : > { %v10658_v17 = vsub.f32 %v10402_v15, %v4564_v47 }
 0xa17   : > { %v4656_v63 = vpop.f32.mrf.mxu0 }
 0xa18   : > { %v4769_v36 = vmul.f32 %v10658_v17, %v10658_v17  ;;  %v4365_v52 = vpop.f32.mrf.mxu1  ;;  %v4454_v25 = vpop.f32.mrf.mxu2  ;;  %v10663_v35 = vsub.f32 %v10405_v51, %v4656_v63 }
 0xa19   : > { %v4455_v43 = vadd.f32 %v4454_v25, %v4365_v52 }
 0xa1a   : > { %v4772_v1 = vmul.f32 %v10663_v35, %v10663_v35  ;;  %4837 = vmatmul.f32.gmra.mxu1 %v4769_v36 }
 0xa1b   : > { %7290 = vmatmul.msk.f32.gmra.mxu3 %vm1509_vm3, %v4455_v43  ;;  %7314 = vmatmul.msk.f32.gmra.mxu0 %vm1509_vm3, %v4455_v43 }
 0xa1c   : > { %4929 = vmatmul.f32.gmra.mxu2 %v4772_v1 }
 0xa1d   : > { %v4567_v15 = vpop.f32.mrf.mxu3 }
 0xa1e   : > { %v10670_v2 = vsub.f32 %v10410_v37, %v4567_v15 }
 0xa1f   : > { %v4659_v18 = vpop.f32.mrf.mxu0 }
 0xa20   : > { %v4771_v4 = vmul.f32 %v10670_v2, %v10670_v2  ;;  %v4368_v51 = vpop.f32.mrf.mxu1  ;;  %v4457_v22 = vpop.f32.mrf.mxu2  ;;  %v10675_v50 = vsub.f32 %v10414_v21, %v4659_v18 }
 0xa21   : > { %v4458_v29 = vadd.f32 %v4457_v22, %v4368_v51 }
 0xa22   : > { %v4774_v59 = vmul.f32 %v10675_v50, %v10675_v50  ;;  %4840 = vmatmul.f32.gmra.mxu1 %v4771_v4 }
 0xa23   : > { %7291 = vmatmul.msk.f32.gmra.mxu3 %vm1509_vm3, %v4458_v29  ;;  %7315 = vmatmul.msk.f32.gmra.mxu0 %vm1509_vm3, %v4458_v29 }
 0xa24   : > { %4932 = vmatmul.f32.gmra.mxu2 %v4774_v59 }
 0xa25   : > { %v4570_v37 = vpop.f32.mrf.mxu3 }
 0xa26   : > { %v10682_v47 = vsub.f32 %v10419_v8, %v4570_v37 }
 0xa27   : > { %v4662_v63 = vpop.f32.mrf.mxu0 }
 0xa28   : > { %v4773_v36 = vmul.f32 %v10682_v47, %v10682_v47  ;;  %v4371_v21 = vpop.f32.mrf.mxu1  ;;  %v4460_v52 = vpop.f32.mrf.mxu2  ;;  %v10687_v25 = vsub.f32 %v10422_v61, %v4662_v63 }
 0xa29   : > { %v4461_v43 = vadd.f32 %v4460_v52, %v4371_v21 }
 0xa2a   : > { %v4776_v1 = vmul.f32 %v10687_v25, %v10687_v25  ;;  %4843 = vmatmul.f32.gmra.mxu1 %v4773_v36 }
 0xa2b   : > { %7292 = vmatmul.msk.f32.gmra.mxu3 %vm1509_vm3, %v4461_v43  ;;  %7316 = vmatmul.msk.f32.gmra.mxu0 %vm1509_vm3, %v4461_v43 }
 0xa2c   : > { %4935 = vmatmul.f32.gmra.mxu2 %v4776_v1 }
 0xa2d   : > { %v4573_v8 = vpop.f32.mrf.mxu3 }
 0xa2e   : > { %v10694_v15 = vsub.f32 %v10427_v53, %v4573_v8 }
 0xa2f   : > { %v4665_v18 = vpop.f32.mrf.mxu0 }
 0xa30   : > { %v4775_v4 = vmul.f32 %v10694_v15, %v10694_v15  ;;  %v10699_v61 = vsub.f32 %v10430_v26, %v4665_v18 }
 0xa32   : > { %v4778_v51 = vmul.f32 %v10699_v61, %v10699_v61  ;;  %4846 = vmatmul.f32.gmra.mxu1 %v4775_v4 }
 0xa34   : > { %4938 = vmatmul.f32.gmra.mxu2 %v4778_v51 }
 0xa35   : > { %v4576_v22 = vpop.f32.mrf.mxu3 }
 0xa36   : > { %v10704_v29 = vsub.f32 %v10435_v39, %v4576_v22 }
 0xa37   : > { %v4668_v59 = vpop.f32.mrf.mxu0 }
 0xa38   : > { %v4777_v53 = vmul.f32 %v10704_v29, %v10704_v29  ;;  %v10709_v37 = vsub.f32 %v10438_v10, %v4668_v59 }
 0xa3a   : > { %v4780_v26 = vmul.f32 %v10709_v37, %v10709_v37  ;;  %4849 = vmatmul.f32.gmra.mxu1 %v4777_v53 }
 0xa3c   : > { %4941 = vmatmul.f32.gmra.mxu2 %v4780_v26 }
 0xa3d   : > { %v4579_v63 = vpop.f32.mrf.mxu3 }
 0xa3e   : > { %v10714_v36 = vsub.f32 %v10443_v14, %v4579_v63 }
 0xa3f   : > { %v4671_v21 = vpop.f32.mrf.mxu0 }
 0xa40   : > { %v4779_v39 = vmul.f32 %v10714_v36, %v10714_v36  ;;  %v10719_v52 = vsub.f32 %v10446_v12, %v4671_v21 }
 0xa42   : > { %v4782_v10 = vmul.f32 %v10719_v52, %v10719_v52  ;;  %4852 = vmatmul.f32.gmra.mxu1 %v4779_v39 }
 0xa44   : > { %4944 = vmatmul.f32.gmra.mxu2 %v4782_v10 }
 0xa45   : > { %v4582_v43 = vpop.f32.mrf.mxu3 }
 0xa46   : > { %v10724_v1 = vsub.f32 %v10455_v44, %v4582_v43 }
 0xa47   : > { %v4674_v8 = vpop.f32.mrf.mxu0 }
 0xa48   : > { %v4781_v14 = vmul.f32 %v10724_v1, %v10724_v1  ;;  %v10729_v18 = vsub.f32 %v10460_v58, %v4674_v8 }
 0xa4a   : > { %v4784_v12 = vmul.f32 %v10729_v18, %v10729_v18  ;;  %4855 = vmatmul.f32.gmra.mxu1 %v4781_v14 }
 0xa4c   : > { %4947 = vmatmul.f32.gmra.mxu2 %v4784_v12 }
 0xa4d   : > { %v4585_v4 = vpop.f32.mrf.mxu3 }
 0xa4e   : > { %v10734_v51 = vsub.f32 %v10471_v54, %v4585_v4 }
 0xa4f   : > { %v4677_v22 = vpop.f32.mrf.mxu0 }
 0xa50   : > { %v4783_v44 = vmul.f32 %v10734_v51, %v10734_v51  ;;  %v10739_v59 = vsub.f32 %v10474_v46, %v4677_v22  ;;  %v7506_v46 = vld [vmem:[%s12439_s20 + $0x78] sm:$0xff] }
 0xa51   : > { %6532 = vmatpush.bf16.msrb.mxu2 %v7506_v46 }
 0xa52   : > { %v4786_v58 = vmul.f32 %v10739_v59, %v10739_v59  ;;  %4858 = vmatmul.f32.gmra.mxu1 %v4783_v44 }
 0xa54   : > { %4950 = vmatmul.f32.gmra.mxu2 %v4786_v58 }
 0xa55   : > { %v4588_v53 = vpop.f32.mrf.mxu3 }
 0xa56   : > { %v10744_v26 = vsub.f32 %v10479_v16, %v4588_v53  ;;  %v7498_v16 = vld [vmem:[%s12439_s20 + $0x38] sm:$0xff] }
 0xa57   : > { %v4680_v63 = vpop.f32.mrf.mxu0  ;;  %6463 = vmatpush.bf16.msrb.mxu1 %v7498_v16 }
 0xa58   : > { %v4785_v54 = vmul.f32 %v10744_v26, %v10744_v26  ;;  %v10749_v21 = vsub.f32 %v10482_v24, %v4680_v63 }
 0xa5a   : > { %v4788_v39 = vmul.f32 %v10749_v21, %v10749_v21  ;;  %4861 = vmatmul.f32.gmra.mxu1 %v4785_v54 }
 0xa5c   : > { %4953 = vmatmul.f32.gmra.mxu2 %v4788_v39 }
 0xa5d   : > { %v4591_v10 = vpop.f32.mrf.mxu3 }
 0xa5e   : > { %v10760_v43 = vsub.f32 %v10487_v19, %v4591_v10 }
 0xa5f   : > { %v4683_v24 = vpop.f32.mrf.mxu0 }
 0xa60   : > { %v4787_v8 = vmul.f32 %v10760_v43, %v10760_v43  ;;  %v10765_v14 = vsub.f32 %v10490_v33, %v4683_v24 }
 0xa62   : > { %v4790_v12 = vmul.f32 %v10765_v14, %v10765_v14  ;;  %4864 = vmatmul.f32.gmra.mxu1 %v4787_v8 }
 0xa64   : > { %4956 = vmatmul.f32.gmra.mxu2 %v4790_v12 }
 0xa65   : > { %v4594_v4 = vpop.f32.mrf.mxu3 }
 0xa66   : > { %v10770_v22 = vsub.f32 %v10495_v55, %v4594_v4 }
 0xa67   : > { %v4686_v44 = vpop.f32.mrf.mxu0 }
 0xa68   : > { %v4789_v19 = vmul.f32 %v10770_v22, %v10770_v22  ;;  %v10775_v58 = vsub.f32 %v10498_v13, %v4686_v44  ;;  %v7505_v13 = vld [vmem:[%s12439_s20 + $0x70] sm:$0xff] }
 0xa69   : > { %6533 = vmatpush.bf16.msrb.mxu2 %v7505_v13 }
 0xa6a   : > { %12440 = vst [vmem:[#allocation25_spill] sm:$0xff] %v10775_v58  ;;  %v4792_v33 = vmul.f32 %v10775_v58, %v10775_v58  ;;  %4867 = vmatmul.f32.gmra.mxu1 %v4789_v19 }
 0xa6c   : > { %4959 = vmatmul.f32.gmra.mxu2 %v4792_v33 }
 0xa6d   : > { %v4597_v53 = vpop.f32.mrf.mxu3 }
 0xa6e   : > { %v10780_v63 = vsub.f32 %v10503_v20, %v4597_v53  ;;  %v7497_v20 = vld [vmem:[%s12439_s20 + $0x30] sm:$0xff] }
 0xa6f   : > { %6464 = vmatpush.bf16.msrb.mxu1 %v7497_v20 }
 0xa70   : > { %12441 = vst [vmem:[#allocation26_spill] sm:$0xff] %v10780_v63  ;;  %v4791_v55 = vmul.f32 %v10780_v63, %v10780_v63  ;;  %v4689_v54 = vpop.f32.mrf.mxu0 }
 0xa71   : > { %v10785_v46 = vsub.f32 %v10507_v7, %v4689_v54 }
 0xa72   : > { %4870 = vmatmul.f32.gmra.mxu1 %v4791_v55 }
 0xa73   : > { %12442 = vst [vmem:[#allocation27_spill] sm:$0xff] %v10785_v46  ;;  %v4794_v39 = vmul.f32 %v10785_v46, %v10785_v46 }
 0xa75   : > { %4962 = vmatmul.f32.gmra.mxu2 %v4794_v39 }
 0xa76   : > { %v4600_v16 = vpop.f32.mrf.mxu3 }
 0xa77   : > { %v10796_v10 = vsub.f32 %v10511_v60, %v4600_v16  ;;  %v4826_v7 = vpop.f32.mrf.mxu1  ;;  %v4915_v24 = vpop.f32.mrf.mxu2 }
 0xa78   : > { %v4692_v8 = vpop.f32.mrf.mxu0  ;;  %v4916_v12 = vadd.f32 %v4915_v24, %v4826_v7 }
 0xa79   : > { %12443 = vst [vmem:[#allocation28_spill] sm:$0xff] %v10796_v10  ;;  %v4793_v4 = vmul.f32 %v10796_v10, %v10796_v10  ;;  %v10801_v44 = vsub.f32 %v10516_v5, %v4692_v8 }
 0xa7a   : > { %7317 = vmatmul.msk.f32.vlgmr.msrb.gmra.mxu3 %vm1509_vm3, %v4916_v12  ;;  %7341 = vmatmul.msk.f32.vlgmr.msra.gmra.mxu0 %vm1509_vm3, %v4916_v12 }
 0xa7b   : > { %12444 = vst [vmem:[#allocation29_spill] sm:$0xff] %v10801_v44  ;;  %v4796_v19 = vmul.f32 %v10801_v44, %v10801_v44  ;;  %4873 = vmatmul.f32.gmra.mxu1 %v4793_v4 }
 0xa7d   : > { %4965 = vmatmul.f32.gmra.mxu2 %v4796_v19  ;;  %v7504_v19 = vld [vmem:[%s12439_s20 + $0x68] sm:$0xff] }
 0xa7e   : > { %v4603_v60 = vpop.f32.mrf.mxu3  ;;  %6534 = vmatpush.bf16.msrb.mxu2 %v7504_v19 }
 0xa7f   : > { %v10808_v33 = vsub.f32 %v10521_v0, %v4603_v60  ;;  %v4829_v53 = vpop.f32.mrf.mxu1  ;;  %v4918_v55 = vpop.f32.mrf.mxu2  ;;  %v7496_v60 = vld [vmem:[%s12439_s20 + $0x28] sm:$0xff] }
 0xa80   : > { %v4695_v54 = vpop.f32.mrf.mxu0  ;;  %v4919_v13 = vadd.f32 %v4918_v55, %v4829_v53  ;;  %6465 = vmatpush.bf16.msrb.mxu1 %v7496_v60  ;;  %v7503_v60 = vld [vmem:[%s12439_s20 + $0x60] sm:$0xff] }
 0xa81   : > { %12445 = vst [vmem:[#allocation30_spill] sm:$0xff] %v10808_v33  ;;  %v4795_v5 = vmul.f32 %v10808_v33, %v10808_v33  ;;  %v10813_v39 = vsub.f32 %v10526_v42, %v4695_v54 }
 0xa82   : > { %7318 = vmatmul.msk.f32.gmra.mxu3 %vm1509_vm3, %v4919_v13  ;;  %7342 = vmatmul.msk.f32.gmra.mxu0 %vm1509_vm3, %v4919_v13 }
 0xa83   : > { %12446 = vst [vmem:[#allocation31_spill] sm:$0xff] %v10813_v39  ;;  %v4798_v20 = vmul.f32 %v10813_v39, %v10813_v39  ;;  %4876 = vmatmul.f32.gmra.mxu1 %v4795_v5  ;;  %6535 = vmatpush.bf16.msrb.mxu2 %v7503_v60 }
 0xa85   : > { %4968 = vmatmul.f32.gmra.mxu2 %v4798_v20 }
 0xa86   : > { %v4606_v0 = vpop.f32.mrf.mxu3 }
 0xa87   : > { %v10820_v16 = vsub.f32 %v10531_v48, %v4606_v0  ;;  %v4832_v7 = vpop.f32.mrf.mxu1  ;;  %v4921_v24 = vpop.f32.mrf.mxu2 }
 0xa88   : > { %v4698_v8 = vpop.f32.mrf.mxu0  ;;  %v4922_v12 = vadd.f32 %v4921_v24, %v4832_v7 }
 0xa89   : > { %12447 = vst [vmem:[#allocation32_spill] sm:$0xff] %v10820_v16  ;;  %v4797_v42 = vmul.f32 %v10820_v16, %v10820_v16  ;;  %v10825_v4 = vsub.f32 %v10536_v3, %v4698_v8 }
 0xa8a   : > { %7319 = vmatmul.msk.f32.gmra.mxu3 %vm1509_vm3, %v4922_v12  ;;  %7343 = vmatmul.msk.f32.gmra.mxu0 %vm1509_vm3, %v4922_v12 }
 0xa8b   : > { %12448 = vst [vmem:[#allocation33_spill] sm:$0xff] %v10825_v4  ;;  %v4800_v48 = vmul.f32 %v10825_v4, %v10825_v4  ;;  %4879 = vmatmul.f32.gmra.mxu1 %v4797_v42 }
 0xa8d   : > { %4971 = vmatmul.f32.gmra.mxu2 %v4800_v48 }
 0xa8e   : > { %v4609_v3 = vpop.f32.mrf.mxu3 }
 0xa8f   : > { %v10838_v53 = vsub.f32 %v10541_v32, %v4609_v3  ;;  %v4835_v55 = vpop.f32.mrf.mxu1  ;;  %v4924_v54 = vpop.f32.mrf.mxu2 }
 0xa90   : > { %v4701_v13 = vpop.f32.mrf.mxu0  ;;  %v4925_v5 = vadd.f32 %v4924_v54, %v4835_v55 }
 0xa91   : > { %12449 = vst [vmem:[#allocation34_spill] sm:$0xff] %v10838_v53  ;;  %v4799_v20 = vmul.f32 %v10838_v53, %v10838_v53  ;;  %v10843_v0 = vsub.f32 %v10546_v34, %v4701_v13  ;;  %v7499_v53 = vld [vmem:[%s12439_s20 + $0x40] sm:$0xff] }
 0xa92   : > { %7320 = vmatmul.msk.f32.gmra.mxu3 %vm1509_vm3, %v4925_v5  ;;  %7344 = vmatmul.msk.f32.gmra.mxu0 %vm1509_vm3, %v4925_v5 }
 0xa93   : > { %12450 = vst [vmem:[#allocation35_spill] sm:$0xff] %v10843_v0  ;;  %v4802_v7 = vmul.f32 %v10843_v0, %v10843_v0  ;;  %4882 = vmatmul.f32.gmra.mxu1 %v4799_v20  ;;  %v7495_v20 = vld [vmem:[%s12439_s20 + $0x20] sm:$0xff] }
 0xa94   : > { %6466 = vmatpush.bf16.msrb.mxu1 %v7495_v20  ;;  %v7502_v20 = vld [vmem:[%s12439_s20 + $0x58] sm:$0xff] }
 0xa95   : > { %4974 = vmatmul.f32.gmra.mxu2 %v4802_v7 }
 0xa96   : > { %v4612_v32 = vpop.f32.mrf.mxu3  ;;  %6536 = vmatpush.bf16.msrb.mxu2 %v7502_v20 }
 0xa97   : > { %v10850_v24 = vsub.f32 %v10551_v45, %v4612_v32  ;;  %v4838_v8 = vpop.f32.mrf.mxu1  ;;  %v4927_v12 = vpop.f32.mrf.mxu2 }
 0xa98   : > { %v4704_v42 = vpop.f32.mrf.mxu0  ;;  %v4928_v19 = vadd.f32 %v4927_v12, %v4838_v8 }
 0xa99   : > { %12451 = vst [vmem:[#allocation36_spill] sm:$0xff] %v10850_v24  ;;  %v4801_v34 = vmul.f32 %v10850_v24, %v10850_v24  ;;  %v10855_v48 = vsub.f32 %v10556_v30, %v4704_v42 }
 0xa9a   : > { %7321 = vmatmul.msk.f32.gmra.mxu3 %vm1509_vm3, %v4928_v19  ;;  %7345 = vmatmul.msk.f32.gmra.mxu0 %vm1509_vm3, %v4928_v19 }
 0xa9b   : > { %12452 = vst [vmem:[#allocation37_spill] sm:$0xff] %v10855_v48  ;;  %v4804_v45 = vmul.f32 %v10855_v48, %v10855_v48  ;;  %4885 = vmatmul.f32.gmra.mxu1 %v4801_v34 }
 0xa9d   : > { %4977 = vmatmul.f32.gmra.mxu2 %v4804_v45 }
 0xa9e   : > { %v4615_v3 = vpop.f32.mrf.mxu3 }
 0xa9f   : > { %v10865_v55 = vsub.f32 %v10561_v11, %v4615_v3  ;;  %v4841_v30 = vpop.f32.mrf.mxu1  ;;  %v4930_v54 = vpop.f32.mrf.mxu2 }
 0xaa0   : > { %v4707_v13 = vpop.f32.mrf.mxu0  ;;  %v4931_v5 = vadd.f32 %v4930_v54, %v4841_v30 }
 0xaa1   : > { %12453 = vst [vmem:[#allocation38_spill] sm:$0xff] %v10865_v55  ;;  %v4803_v7 = vmul.f32 %v10865_v55, %v10865_v55  ;;  %v10873_v32 = vsub.f32 %v10566_v23, %v4707_v13  ;;  %v5821_v55 = vld [vmem:[#allocation13 + $0x2] ss:$4 sm:$0x3] }
 0xaa2   : > { %7322 = vmatmul.msk.f32.gmra.mxu3 %vm1509_vm3, %v4931_v5  ;;  %7346 = vmatmul.msk.f32.gmra.mxu0 %vm1509_vm3, %v4931_v5 }
 0xaa3   : > { %12454 = vst [vmem:[#allocation39_spill] sm:$0xff] %v10873_v32  ;;  %v4806_v11 = vmul.f32 %v10873_v32, %v10873_v32  ;;  %4888 = vmatmul.f32.gmra.mxu1 %v4803_v7 }
 0xaa5   : > { %4980 = vmatmul.f32.gmra.mxu2 %v4806_v11 }
 0xaa6   : > { %v4618_v8 = vpop.f32.mrf.mxu3 }
 0xaa7   : > { %v10880_v12 = vsub.f32 %v10571_v38, %v4618_v8  ;;  %v4844_v42 = vpop.f32.mrf.mxu1  ;;  %v4933_v19 = vpop.f32.mrf.mxu2  ;;  %v7494_v8 = vld [vmem:[%s12439_s20 + $0x18] sm:$0xff] }
 0xaa8   : > { %v4710_v34 = vpop.f32.mrf.mxu0  ;;  %v4934_v60 = vadd.f32 %v4933_v19, %v4844_v42  ;;  %6467 = vmatpush.bf16.msrb.mxu1 %v7494_v8 }
 0xaa9   : > { %12455 = vst [vmem:[#allocation40_spill] sm:$0xff] %v10880_v12  ;;  %v4805_v23 = vmul.f32 %v10880_v12, %v10880_v12  ;;  %v10885_v45 = vsub.f32 %v10576_v62, %v4710_v34 }
 0xaaa   : > { %7323 = vmatmul.msk.f32.gmra.mxu3 %vm1509_vm3, %v4934_v60  ;;  %7347 = vmatmul.msk.f32.gmra.mxu0 %vm1509_vm3, %v4934_v60 }
 0xaab   : > { %12456 = vst [vmem:[#allocation41_spill] sm:$0xff] %v10885_v45  ;;  %v4808_v3 = vmul.f32 %v10885_v45, %v10885_v45  ;;  %4891 = vmatmul.f32.gmra.mxu1 %v4805_v23 }
 0xaad   : > { %4983 = vmatmul.f32.gmra.mxu2 %v4808_v3 }
 0xaae   : > { %v4621_v38 = vpop.f32.mrf.mxu3 }
 0xaaf   : > { %v10892_v30 = vsub.f32 %v10581_v49, %v4621_v38  ;;  %v4847_v54 = vpop.f32.mrf.mxu1  ;;  %v4936_v13 = vpop.f32.mrf.mxu2  ;;  %v7501_v38 = vld [vmem:[%s12439_s20 + $0x50] sm:$0xff] }
 0xab0   : > { %v4937_v5 = vadd.f32 %v4936_v13, %v4847_v54  ;;  %6537 = vmatpush.bf16.msrb.mxu2 %v7501_v38 }
 0xab1   : > { %12457 = vst [vmem:[#allocation42_spill] sm:$0xff] %v10892_v30  ;;  %v4807_v62 = vmul.f32 %v10892_v30, %v10892_v30 }
 0xab2   : > { %7324 = vmatmul.msk.f32.gmra.mxu3 %vm1509_vm3, %v4937_v5  ;;  %7348 = vmatmul.msk.f32.gmra.mxu0 %vm1509_vm3, %v4937_v5 }
 0xab3   : > { %4894 = vmatmul.f32.gmra.mxu1 %v4807_v62  ;;  %v7493_v62 = vld [vmem:[%s12439_s20 + $0x10] sm:$0xff] }
 0xab4   : > { %6468 = vmatpush.bf16.msrb.mxu1 %v7493_v62 }
 0xab7   : > { %v4850_v7 = vpop.f32.mrf.mxu1  ;;  %v4939_v11 = vpop.f32.mrf.mxu2 }
 0xab8   : > { %v4940_v49 = vadd.f32 %v4939_v11, %v4850_v7 }
 0xaba   : > { %7325 = vmatmul.msk.f32.gmra.mxu3 %vm1509_vm3, %v4940_v49  ;;  %7349 = vmatmul.msk.f32.gmra.mxu0 %vm1509_vm3, %v4940_v49 }
 0xabf   : > { %v4853_v42 = vpop.f32.mrf.mxu1  ;;  %v4942_v19 = vpop.f32.mrf.mxu2 }
 0xac0   : > { %v4943_v34 = vadd.f32 %v4942_v19, %v4853_v42 }
 0xac2   : > { %7326 = vmatmul.msk.f32.gmra.mxu3 %vm1509_vm3, %v4943_v34  ;;  %7350 = vmatmul.msk.f32.gmra.mxu0 %vm1509_vm3, %v4943_v34 }
 0xac7   : > { %v4856_v60 = vpop.f32.mrf.mxu1  ;;  %v4945_v23 = vpop.f32.mrf.mxu2 }
 0xac8   : > { %v4946_v3 = vadd.f32 %v4945_v23, %v4856_v60 }
 0xaca   : > { %7327 = vmatmul.msk.f32.gmra.mxu3 %vm1509_vm3, %v4946_v3  ;;  %7351 = vmatmul.msk.f32.gmra.mxu0 %vm1509_vm3, %v4946_v3 }
 0xacf   : > { %v4859_v54 = vpop.f32.mrf.mxu1  ;;  %v4948_v13 = vpop.f32.mrf.mxu2 }
 0xad0   : > { %v4949_v5 = vadd.f32 %v4948_v13, %v4859_v54 }
 0xad2   : > { %7328 = vmatmul.msk.f32.gmra.mxu3 %vm1509_vm3, %v4949_v5  ;;  %7352 = vmatmul.msk.f32.gmra.mxu0 %vm1509_vm3, %v4949_v5 }
 0xad7   : > { %v4862_v20 = vpop.f32.mrf.mxu1  ;;  %v4951_v7 = vpop.f32.mrf.mxu2 }
 0xad8   : > { %v4952_v11 = vadd.f32 %v4951_v7, %v4862_v20 }
 0xada   : > { %7329 = vmatmul.msk.f32.gmra.mxu3 %vm1509_vm3, %v4952_v11  ;;  %7353 = vmatmul.msk.f32.gmra.mxu0 %vm1509_vm3, %v4952_v11 }
 0xadf   : > { %v4865_v49 = vpop.f32.mrf.mxu1  ;;  %v4954_v8 = vpop.f32.mrf.mxu2 }
 0xae0   : > { %v4955_v42 = vadd.f32 %v4954_v8, %v4865_v49 }
 0xae2   : > { %7330 = vmatmul.msk.f32.gmra.mxu3 %vm1509_vm3, %v4955_v42  ;;  %7354 = vmatmul.msk.f32.gmra.mxu0 %vm1509_vm3, %v4955_v42 }
 0xae7   : > { %v4868_v19 = vpop.f32.mrf.mxu1  ;;  %v4957_v34 = vpop.f32.mrf.mxu2 }
 0xae8   : > { %v4958_v60 = vadd.f32 %v4957_v34, %v4868_v19 }
 0xaea   : > { %7331 = vmatmul.msk.f32.gmra.mxu3 %vm1509_vm3, %v4958_v60  ;;  %7355 = vmatmul.msk.f32.gmra.mxu0 %vm1509_vm3, %v4958_v60 }
 0xaef   : > { %v4871_v23 = vpop.f32.mrf.mxu1  ;;  %v4960_v3 = vpop.f32.mrf.mxu2 }
 0xaf0   : > { %v4961_v38 = vadd.f32 %v4960_v3, %v4871_v23  ;;  %v7500_v3 = vld [vmem:[%s12439_s20 + $0x48] sm:$0xff] }
 0xaf1   : > { %6538 = vmatpush.bf16.msrb.mxu2 %v7500_v3 }
 0xaf2   : > { %7332 = vmatmul.msk.f32.gmra.mxu3 %vm1509_vm3, %v4961_v38  ;;  %7356 = vmatmul.msk.f32.gmra.mxu0 %vm1509_vm3, %v4961_v38  ;;  %v7492_v38 = vld [vmem:[%s12439_s20 + $0x8] sm:$0xff] }
 0xaf3   : > { %6469 = vmatpush.bf16.msrb.mxu1 %v7492_v38 }
 0xaf5   : > { %6539 = vmatpush.bf16.msrb.mxu2 %v7499_v53 }
 0xaf7   : > { %v5165_v54 = vpop.f32.mrf.mxu0 }
 0xaf8   : > { %v4874_v13 = vpop.f32.mrf.mxu1  ;;  %v4963_v5 = vpop.f32.mrf.mxu2  ;;  %v5166_v62 = vadd.f32 1e-06, %v5165_v54 }
 0xaf9   : > { %v4964_v20 = vadd.f32 %v4963_v5, %v4874_v13 }
 0xafa   : > { %7862 = vrsqrt.f32 %v5166_v62  ;;  %vm5253_vm15 = vweird.f32 %v5166_v62 }
 0xafb   : > { %7333 = vmatmul.msk.f32.gmra.mxu3 %vm1509_vm3, %v4964_v20  ;;  %7357 = vmatmul.msk.f32.gmra.mxu0 %vm1509_vm3, %v4964_v20 }
 0xafd   : > { %v5076_v7 = vpop.f32.mrf.mxu3 }
 0xafe   : > { %v5077_v11 = vadd.f32 1e-06, %v5076_v7 }
 0xaff   : > { %v5168_v49 = vpop.f32.mrf.mxu0 }
 0xb00   : > { %v7863_v8 = vpop.eup %7862  ;;  %7864 = vrsqrt.f32 %v5077_v11  ;;  %v4877_v42 = vpop.f32.mrf.mxu1  ;;  %v10928_v34 = vadd.f32 1e-06, %v5168_v49  ;;  %vm5243_vm1 = vweird.f32 %v5077_v11 }
 0xb01   : > { %v4966_v19 = vpop.f32.mrf.mxu2  ;;  %v5248_v60 = vmul.f32 %v7863_v8, %v5166_v62  ;;  %vm5254_vm14 = vweird.f32 %v7863_v8 }
 0xb02   : > { %v4967_v23 = vadd.f32 %v4966_v19, %v4877_v42  ;;  %7866 = vrsqrt.f32 %v10928_v34  ;;  %v5766_v42 = vld [vmem:[#allocation13 + $0x1] ss:$4 sm:$0x3]  ;;  %vm5255_vm2 = vmor %vm5253_vm15, %vm5254_vm14  ;;  %vm5273_vm7 = vweird.f32 %v10928_v34 }
 0xb03   : > { %v5249_v54 = vmul.f32 %v7863_v8, %v5248_v60 }
 0xb04   : > { %7334 = vmatmul.msk.f32.gmra.mxu3 %vm1509_vm3, %v4967_v23  ;;  %7358 = vmatmul.msk.f32.gmra.mxu0 %vm1509_vm3, %v4967_v23 }
 0xb05   : > { %v5250_v13 = vmul.f32 0.5, %v5249_v54  ;;  %v5079_v5 = vpop.f32.mrf.mxu3  ;;  %v10945_v54 = vperm.slane %v5766_v42, 1 }
 0xb06   : > { %v7865_v20 = vpop.eup %7864  ;;  %v10939_v7 = vadd.f32 1e-06, %v5079_v5 }
 0xb07   : > { %v5251_v49 = vsub.f32 1.5, %v5250_v13  ;;  %v5238_v19 = vmul.f32 %v7865_v20, %v5077_v11  ;;  %v5171_v30 = vpop.f32.mrf.mxu0  ;;  %vm5244_vm4 = vweird.f32 %v7865_v20 }
 0xb08   : > { %v7867_v45 = vpop.eup %7866  ;;  %7868 = vrsqrt.f32 %v10939_v7  ;;  %v4880_v60 = vpop.f32.mrf.mxu1  ;;  %v10942_v32 = vadd.f32 1e-06, %v5171_v30  ;;  %vm10962_vm6 = vmor %vm5243_vm1, %vm5244_vm4  ;;  %vm5263_vm9 = vweird.f32 %v10939_v7 }
 0xb09   : > { %v4969_v12 = vpop.f32.mrf.mxu2  ;;  %v5252_v23 = vmul.f32 %v7863_v8, %v5251_v49  ;;  %v5239_v3 = vmul.f32 %v7865_v20, %v5238_v19  ;;  %v5268_v38 = vmul.f32 %v7867_v45, %v10928_v34  ;;  %vm5274_vm5 = vweird.f32 %v7867_v45 }
 0xb0a   : > { %v4970_v13 = vadd.f32 %v4969_v12, %v4880_v60  ;;  %7870 = vrsqrt.f32 %v10942_v32  ;;  %v10954_v60 = vperm.slane %v5821_v55, 1  ;;  %vm5275_vm0 = vmor %vm5273_vm7, %vm5274_vm5  ;;  %vm5293_vm12 = vweird.f32 %v10942_v32 }
 0xb0b   : > { %v5256_v5 = vsel %vm5255_vm2, %v7863_v8, %v5252_v23  ;;  %v5240_v48 = vmul.f32 0.5, %v5239_v3  ;;  %v5269_v24 = vmul.f32 %v7867_v45, %v5268_v38 }
 0xb0c   : > { %v5718_v0 = vmul.f32 %v5256_v5, %v10603_v41  ;;  %7335 = vmatmul.msk.f32.gmra.mxu3 %vm1509_vm3, %v4970_v13  ;;  %7359 = vmatmul.msk.f32.gmra.mxu0 %vm1509_vm3, %v4970_v13 }
 0xb0d   : > { %v5241_v30 = vsub.f32 1.5, %v5240_v48  ;;  %v5270_v62 = vmul.f32 0.5, %v5269_v24  ;;  %v5082_v49 = vpop.f32.mrf.mxu3 }
 0xb0e   : > { %v10951_v19 = vpop.eup %7868  ;;  %v5773_v12 = vmul.f32 %v10945_v54, %v5718_v0  ;;  %v10956_v8 = vadd.f32 1e-06, %v5082_v49 }
 0xb0f   : > { %v5242_v23 = vmul.f32 %v7865_v20, %v5241_v30  ;;  %v5271_v3 = vsub.f32 1.5, %v5270_v62  ;;  %v5258_v41 = vmul.f32 %v10951_v19, %v10939_v7  ;;  %v5174_v38 = vpop.f32.mrf.mxu0  ;;  %vm5264_vm8 = vweird.f32 %v10951_v19 }
 0xb10   : > { %v10960_v48 = vpop.eup %7870  ;;  %7872 = vrsqrt.f32 %v10956_v8  ;;  %v4883_v0 = vpop.f32.mrf.mxu1  ;;  %v10968_v13 = vadd.f32 1e-06, %v5174_v38  ;;  %v10979_v34 = vadd.f32 %v10954_v60, %v5773_v12  ;;  %vm5265_vm10 = vmor %vm5263_vm9, %vm5264_vm8  ;;  %vm5283_vm15 = vweird.f32 %v10956_v8 }
 0xb11   : > { %v4972_v11 = vpop.f32.mrf.mxu2  ;;  %v5246_v5 = vsel %vm10962_vm6, %v7865_v20, %v5242_v23  ;;  %v5272_v30 = vmul.f32 %v7867_v45, %v5271_v3  ;;  %v5259_v62 = vmul.f32 %v10951_v19, %v5258_v41  ;;  %v5288_v49 = vmul.f32 %v10960_v48, %v10942_v32 }
 0xb12   : > { %v4973_v38 = vadd.f32 %v4972_v11, %v4883_v0  ;;  %7874 = vrsqrt.f32 %v10968_v13  ;;  %v5717_v23 = vmul.f32 %v5246_v5, %v10610_v6  ;;  %v10985_v3 = vperm.slane %v5766_v42, 0  ;;  %v7491_v5 = vld [vmem:[%s12439_s20] sm:$0xff] }
 0xb13   : > { %v5276_v4 = vsel %vm5275_vm0, %v7867_v45, %v5272_v30  ;;  %v5260_v16 = vmul.f32 0.5, %v5259_v62  ;;  %v5289_v20 = vmul.f32 %v10960_v48, %v5288_v49  ;;  %v5876_v53 = vmul.f32 %v10979_v34, %v10979_v34  ;;  %6470 = vmatpush.bf16.msrb.mxu1 %v7491_v5 }
 0xb14   : > { %v5720_v41 = vmul.f32 %v5276_v4, %v10615_v56  ;;  %7336 = vmatmul.msk.f32.gmra.mxu3 %vm1509_vm3, %v4973_v38  ;;  %7360 = vmatmul.msk.f32.gmra.mxu0 %vm1509_vm3, %v4973_v38  ;;  %v5772_v30 = vmul.f32 %v10985_v3, %v5717_v23  ;;  %v11006_v62 = vperm.slane %v5821_v55, 0  ;;  %vm5294_vm11 = vweird.f32 %v10960_v48 }
 0xb15   : > { %v5261_v12 = vsub.f32 1.5, %v5260_v16  ;;  %v5290_v45 = vmul.f32 0.5, %v5289_v20  ;;  %v5085_v24 = vpop.f32.mrf.mxu3  ;;  %vm11037_vm13 = vmor %vm5293_vm12, %vm5294_vm11  ;;  %vm5313_vm4 = vweird.f32 %v10968_v13 }
 0xb16   : > { %v10991_v0 = vpop.eup %7872  ;;  %v5775_v6 = vmul.f32 %v10945_v54, %v5720_v41  ;;  %v10996_v42 = vadd.f32 1e-06, %v5085_v24 }
 0xb17   : > { %v5262_v56 = vmul.f32 %v10951_v19, %v5261_v12  ;;  %v5291_v4 = vsub.f32 1.5, %v5290_v45  ;;  %v5278_v16 = vmul.f32 %v10991_v0, %v10956_v8  ;;  %v5177_v11 = vpop.f32.mrf.mxu0  ;;  %v5924_v12 = vmul.f32 %v5876_v53, %v10979_v34 }
 0xb18   : > { %v11009_v49 = vadd.f32 %v10954_v60, %v5775_v6  ;;  %7876 = vrsqrt.f32 %v10996_v42  ;;  %v4886_v7 = vpop.f32.mrf.mxu1  ;;  %v11014_v20 = vpop.eup %7874  ;;  %vm5284_vm14 = vweird.f32 %v10991_v0  ;;  %vm5303_vm1 = vweird.f32 %v10996_v42 }
 0xb19   : > { %v4975_v38 = vpop.f32.mrf.mxu2  ;;  %v5266_v41 = vsel %vm5265_vm10, %v10951_v19, %v5262_v56  ;;  %v5279_v23 = vmul.f32 %v10991_v0, %v5278_v16  ;;  %v5292_v24 = vmul.f32 %v10960_v48, %v5291_v4  ;;  %v5308_v6 = vmul.f32 %v11014_v20, %v10968_v13  ;;  %vm11061_vm2 = vmor %vm5283_vm15, %vm5284_vm14 }
 0xb1a   : > { %v4976_v55 = vadd.f32 %v4975_v38, %v4886_v7  ;;  %v5878_v45 = vmul.f32 %v11009_v49, %v11009_v49  ;;  %v5719_v39 = vmul.f32 %v5266_v41, %v10622_v31  ;;  %v11026_v19 = vadd.f32 1e-06, %v5177_v11 }
 0xb1b   : > { %v5280_v33 = vmul.f32 0.5, %v5279_v23  ;;  %v11029_v56 = vadd.f32 %v11006_v62, %v5772_v30  ;;  %v5309_v53 = vmul.f32 %v11014_v20, %v5308_v6  ;;  %v5296_v32 = vsel %vm11037_vm13, %v10960_v48, %v5292_v24 }
 0xb1c   : > { %7337 = vmatmul.msk.f32.gmra.mxu3 %vm1509_vm3, %v4976_v55  ;;  %v5926_v16 = vmul.f32 %v5878_v45, %v11009_v49  ;;  %7878 = vrsqrt.f32 %v11026_v19  ;;  %7361 = vmatmul.msk.f32.gmra.mxu0 %vm1509_vm3, %v4976_v55  ;;  %v5972_v38 = vmul.f32 0.044715, %v5924_v12  ;;  %v5774_v41 = vmul.f32 %v10985_v3, %v5719_v39 }
 0xb1d   : > { %v5281_v31 = vsub.f32 1.5, %v5280_v33  ;;  %v5088_v11 = vpop.f32.mrf.mxu3  ;;  %v5310_v30 = vmul.f32 0.5, %v5309_v53  ;;  %v5875_v45 = vmul.f32 %v11029_v56, %v11029_v56  ;;  %v5722_v39 = vmul.f32 %v5296_v32, %v10627_v27 }
 0xb1e   : > { %v11043_v5 = vpop.eup %7876  ;;  %v11048_v7 = vadd.f32 1e-06, %v5088_v11  ;;  %v5974_v4 = vmul.f32 0.044715, %v5926_v16  ;;  %v6020_v32 = vadd.f32 %v5972_v38, %v10979_v34  ;;  %vm5314_vm5 = vweird.f32 %v11014_v20 }
 0xb1f   : > { %v5282_v23 = vmul.f32 %v10991_v0, %v5281_v31  ;;  %v5298_v33 = vmul.f32 %v11043_v5, %v10996_v42  ;;  %v5180_v55 = vpop.f32.mrf.mxu0  ;;  %v5311_v48 = vsub.f32 1.5, %v5310_v30  ;;  %v11072_v30 = vadd.f32 %v11006_v62, %v5774_v41  ;;  %vm11101_vm7 = vmor %vm5313_vm4, %vm5314_vm5 }
 0xb20   : > { %7880 = vrsqrt.f32 %v11048_v7  ;;  %v4889_v24 = vpop.f32.mrf.mxu1  ;;  %v11067_v8 = vadd.f32 1e-06, %v5180_v55  ;;  %v5777_v41 = vmul.f32 %v10945_v54, %v5722_v39  ;;  %v6022_v38 = vadd.f32 %v5974_v4, %v11009_v49 }
 0xb21   : > { %v4978_v12 = vpop.f32.mrf.mxu2  ;;  %v5299_v6 = vmul.f32 %v11043_v5, %v5298_v33  ;;  %v5286_v27 = vsel %vm11061_vm2, %v10991_v0, %v5282_v23  ;;  %v5923_v33 = vmul.f32 %v5875_v45, %v11029_v56  ;;  %vm5304_vm6 = vweird.f32 %v11043_v5 }
 0xb22   : > { %v4979_v53 = vadd.f32 %v4978_v12, %v4889_v24  ;;  %v11069_v11 = vpop.eup %7878  ;;  %v5312_v24 = vmul.f32 %v11014_v20, %v5311_v48  ;;  %7882 = vrsqrt.f32 %v11067_v8  ;;  %v5721_v45 = vmul.f32 %v5286_v27, %v10634_v40  ;;  %vm11124_vm8 = vmor %vm5303_vm1, %vm5304_vm6 }
 0xb23   : > { %v5300_v16 = vmul.f32 0.5, %v5299_v6  ;;  %v5328_v55 = vmul.f32 %v11069_v11, %v11026_v19  ;;  %v5877_v39 = vmul.f32 %v11072_v30, %v11072_v30  ;;  %v6068_v27 = vmul.f32 0.7978846, %v6020_v32 }
 0xb24   : > { %7338 = vmatmul.msk.f32.gmra.mxu3 %vm1509_vm3, %v4979_v53  ;;  %7362 = vmatmul.msk.f32.gmra.mxu0 %vm1509_vm3, %v4979_v53  ;;  %vm5333_vm0 = vweird.f32 %v11026_v19  ;;  %v6070_v46 = vmul.f32 0.7978846, %v6022_v38  ;;  %v11117_v63 = vadd.f32 %v10954_v60, %v5777_v41  ;;  %v5776_v32 = vmul.f32 %v10985_v3, %v5721_v45 }
 0xb25   : > { %v5301_v12 = vsub.f32 1.5, %v5300_v16  ;;  %v5091_v0 = vpop.f32.mrf.mxu3  ;;  %v5329_v48 = vmul.f32 %v11069_v11, %v5328_v55  ;;  %v5316_v16 = vsel %vm11101_vm7, %v11014_v20, %v5312_v24  ;;  %v5925_v53 = vmul.f32 %v5877_v39, %v11072_v30 }
 0xb26   : > { %v11088_v23 = vpop.eup %7880  ;;  %v11093_v6 = vadd.f32 1e-06, %v5091_v0  ;;  %v5724_v38 = vmul.f32 %v5316_v16, %v10639_v28  ;;  %vm5323_vm9 = vweird.f32 %v11048_v7  ;;  %vm5334_vm10 = vweird.f32 %v11069_v11 }
 0xb27   : > { %v5302_v4 = vmul.f32 %v11043_v5, %v5301_v12  ;;  %v5318_v40 = vmul.f32 %v11088_v23, %v11048_v7  ;;  %v5183_v31 = vpop.f32.mrf.mxu0  ;;  %v5330_v55 = vmul.f32 0.5, %v5329_v48  ;;  %vm5353_vm11 = vweird.f32 %v11067_v8  ;;  %vm11165_vm13 = vmor %vm5333_vm0, %vm5334_vm10 }
 0xb28   : > { %7884 = vrsqrt.f32 %v11093_v6  ;;  %v4892_v0 = vpop.f32.mrf.mxu1  ;;  %v11112_v44 = vadd.f32 1e-06, %v5183_v31  ;;  %v11129_v48 = vpop.eup %7882  ;;  %vm5324_vm12 = vweird.f32 %v11088_v23  ;;  %vm5343_vm14 = vweird.f32 %v11093_v6 }
 0xb29   : > { %v4981_v13 = vpop.f32.mrf.mxu2  ;;  %v5319_v12 = vmul.f32 %v11088_v23, %v5318_v40  ;;  %v5331_v24 = vsub.f32 1.5, %v5330_v55  ;;  %v5306_v41 = vsel %vm11124_vm8, %v11043_v5, %v5302_v4  ;;  %v5348_v42 = vmul.f32 %v11129_v48, %v11067_v8  ;;  %vm11190_vm2 = vmor %vm5323_vm9, %vm5324_vm12 }
 0xb2a   : > { %v4982_v10 = vadd.f32 %v4981_v13, %v4892_v0  ;;  %7886 = vrsqrt.f32 %v11112_v44  ;;  %v5971_v40 = vmul.f32 0.044715, %v5923_v33  ;;  %v5723_v39 = vmul.f32 %v5306_v41, %v10646_v57 }
 0xb2b   : > { %v5320_v45 = vmul.f32 0.5, %v5319_v12  ;;  %7888 = vtanh.f32 %v6068_v27  ;;  %v5332_v31 = vmul.f32 %v11069_v11, %v5331_v24  ;;  %v5349_v27 = vmul.f32 %v11129_v48, %v5348_v42 }
 0xb2c   : > { %7339 = vmatmul.msk.f32.gmra.mxu3 %vm1509_vm3, %v4982_v10  ;;  %7363 = vmatmul.msk.f32.gmra.mxu0 %vm1509_vm3, %v4982_v10  ;;  %7890 = vtanh.f32 %v6070_v46  ;;  %v11151_v33 = vadd.f32 %v11006_v62, %v5776_v32  ;;  %v11154_v55 = vmul.f32 %v10945_v54, %v5724_v38  ;;  %v5973_v24 = vmul.f32 0.044715, %v5925_v53 }
 0xb2d   : > { %v5321_v28 = vsub.f32 1.5, %v5320_v45  ;;  %v5094_v5 = vpop.f32.mrf.mxu3  ;;  %v5350_v13 = vmul.f32 0.5, %v5349_v27  ;;  %v5336_v41 = vsel %vm11165_vm13, %v11069_v11, %v5332_v31  ;;  %v6019_v53 = vadd.f32 %v5971_v40, %v11029_v56 }
 0xb2e   : > { %v11143_v4 = vpop.eup %7884  ;;  %v11148_v16 = vadd.f32 1e-06, %v5094_v5  ;;  %v5778_v5 = vmul.f32 %v10985_v3, %v5723_v39  ;;  %vm5354_vm15 = vweird.f32 %v11129_v48  ;;  %v5726_v31 = vmul.f32 %v5336_v41, %v10651_v9 }
 0xb2f   : > { %v5338_v46 = vmul.f32 %v11143_v4, %v11093_v6  ;;  %v5186_v10 = vpop.f32.mrf.mxu0  ;;  %v5322_v45 = vmul.f32 %v11088_v23, %v5321_v28  ;;  %v5351_v27 = vsub.f32 1.5, %v5350_v13  ;;  %vm11207_vm4 = vmor %vm5353_vm11, %vm5354_vm15  ;;  %vm5344_vm1 = vweird.f32 %v11143_v4 }
 0xb30   : > { %v11159_v0 = vpop.eup %7886  ;;  %7892 = vrsqrt.f32 %v11148_v16  ;;  %v4895_v12 = vpop.f32.mrf.mxu1  ;;  %v11170_v20 = vadd.f32 1e-06, %v5186_v10  ;;  %vm11233_vm6 = vmor %vm5343_vm14, %vm5344_vm1  ;;  %vm5373_vm7 = vweird.f32 %v11112_v44  ;;  %vm5363_vm8 = vweird.f32 %v11148_v16 }
 0xb31   : > { %v4984_v32 = vpop.f32.mrf.mxu2  ;;  %v7889_v38 = vpop.eup %7888  ;;  %v5339_v19 = vmul.f32 %v11143_v4, %v5338_v46  ;;  %v5368_v42 = vmul.f32 %v11159_v0, %v11112_v44  ;;  %v5352_v40 = vmul.f32 %v11129_v48, %v5351_v27  ;;  %v6021_v46 = vadd.f32 %v5973_v24, %v11072_v30 }
 0xb32   : > { %v4985_v10 = vadd.f32 %v4984_v32, %v4895_v12  ;;  %v7891_v58 = vpop.eup %7890  ;;  %7894 = vrsqrt.f32 %v11170_v20  ;;  %v6164_v39 = vadd.f32 1.0, %v7889_v38  ;;  %v5326_v13 = vsel %vm11190_vm2, %v11088_v23, %v5322_v45 }
 0xb33   : > { %v5340_v57 = vmul.f32 0.5, %v5339_v19  ;;  %v5369_v11 = vmul.f32 %v11159_v0, %v5368_v42  ;;  %v6166_v7 = vadd.f32 1.0, %v7891_v58  ;;  %v6067_v45 = vmul.f32 0.7978846, %v6019_v53 }
 0xb34   : > { %7340 = vmatmul.msk.f32.gmra.mxu3 %vm1509_vm3, %v4985_v10  ;;  %7364 = vmatmul.msk.f32.gmra.mxu0 %vm1509_vm3, %v4985_v10  ;;  %v6212_v24 = vmul.f32 0.5, %v6164_v39  ;;  %v5356_v58 = vsel %vm11207_vm4, %v11129_v48, %v5352_v40  ;;  %v5781_v10 = vmul.f32 %v10945_v54, %v5726_v31  ;;  %vm5374_vm5 = vweird.f32 %v11159_v0 }
 0xb35   : > { %v5341_v9 = vsub.f32 1.5, %v5340_v57  ;;  %v5370_v12 = vmul.f32 0.5, %v5369_v11  ;;  %v5097_v32 = vpop.f32.mrf.mxu3  ;;  %v5725_v57 = vmul.f32 %v5326_v13, %v10658_v17  ;;  %v6214_v11 = vmul.f32 0.5, %v6166_v7  ;;  %vm11253_vm0 = vmor %vm5373_vm7, %vm5374_vm5 }
 0xb36   : > { %v11201_v41 = vpop.eup %7892  ;;  %v11212_v23 = vadd.f32 1e-06, %v5097_v32  ;;  %v6069_v40 = vmul.f32 0.7978846, %v6021_v46  ;;  %v5728_v39 = vmul.f32 %v5356_v58, %v10663_v35  ;;  %v6260_v13 = vmul.f32 %v6212_v24, %v10979_v34 }
 0xb37   : > { %v5342_v19 = vmul.f32 %v11143_v4, %v5341_v9  ;;  %v5371_v42 = vsub.f32 1.5, %v5370_v12  ;;  %v5358_v8 = vmul.f32 %v11201_v41, %v11148_v16  ;;  %v5189_v27 = vpop.f32.mrf.mxu0  ;;  %v6262_v9 = vmul.f32 %v6214_v11, %v11009_v49 }
 0xb38   : > { %7896 = vrsqrt.f32 %v11212_v23  ;;  %v11223_v28 = vpop.eup %7894  ;;  %v11243_v46 = vadd.f32 %v10954_v60, %v11154_v55  ;;  %v11250_v12 = vadd.f32 %v11006_v62, %v5778_v5  ;;  %v5780_v7 = vmul.f32 %v10985_v3, %v5725_v57 }
 0xb39   : > { %v5372_v53 = vmul.f32 %v11159_v0, %v5371_v42  ;;  %v5359_v48 = vmul.f32 %v11201_v41, %v5358_v8  ;;  %v5388_v31 = vmul.f32 %v11223_v28, %v11170_v20  ;;  %v5346_v35 = vsel %vm11233_vm6, %v11143_v4, %v5342_v19 }
 0xb3a   : > { %v6308_v55 = vpack.c.bf16 %v6262_v9, %v6260_v13  ;;  %v11259_v32 = vadd.f32 %v10954_v60, %v5781_v10  ;;  %v11265_v4 = vadd.f32 1e-06, %v5189_v27  ;;  %7898 = vtanh.f32 %v6067_v45 }
 0xb3b   : > { %v5360_v6 = vmul.f32 0.5, %v5359_v48  ;;  %v5389_v49 = vmul.f32 %v11223_v28, %v5388_v31  ;;  %v5376_v44 = vsel %vm11253_vm0, %v11159_v0, %v5372_v53  ;;  %v5783_v24 = vmul.f32 %v10945_v54, %v5728_v39 }
 0xb3c   : > { %v5727_v58 = vmul.f32 %v5346_v35, %v10670_v2  ;;  %vm5393_vm9 = vweird.f32 %v11170_v20  ;;  %6540 = vmatmul.bf16.vlgmr.msrb.gmra.mxu2 %v6308_v55  ;;  %7900 = vtanh.f32 %v6069_v40  ;;  %v5880_v45 = vmul.f32 %v11117_v63, %v11117_v63 }
 0xb3d   : > { %v5100_v5 = vpop.f32.mrf.mxu3  ;;  %v5390_v19 = vmul.f32 0.5, %v5389_v49  ;;  %v5361_v42 = vsub.f32 1.5, %v5360_v6  ;;  %7902 = vrsqrt.f32 %v11265_v4  ;;  %v11278_v27 = vadd.f32 %v11006_v62, %v5780_v7 }
 0xb3e   : > { %v11267_v38 = vpop.eup %7896  ;;  %v5730_v2 = vmul.f32 %v5376_v44, %v10675_v50  ;;  %v11281_v57 = vadd.f32 1e-06, %v5100_v5  ;;  %vm5364_vm10 = vweird.f32 %v11201_v41  ;;  %v5882_v48 = vmul.f32 %v11243_v46, %v11243_v46 }
 0xb3f   : > { %v5378_v0 = vmul.f32 %v11267_v38, %v11212_v23  ;;  %v5192_v8 = vpop.f32.mrf.mxu0  ;;  %v5391_v10 = vsub.f32 1.5, %v5390_v19  ;;  %v11290_v40 = vadd.f32 %v10954_v60, %v5783_v24  ;;  %v5782_v39 = vmul.f32 %v10985_v3, %v5727_v58  ;;  %vm11311_vm13 = vmor %vm5363_vm8, %vm5364_vm10 }
 0xb40   : > { %v11285_v53 = vadd.f32 1e-06, %v5192_v8  ;;  %vm5394_vm11 = vweird.f32 %v11223_v28  ;;  %7904 = vrsqrt.f32 %v11281_v57  ;;  %v7899_v50 = vpop.eup %7898  ;;  %v5362_v17 = vmul.f32 %v11201_v41, %v5361_v42 }
 0xb41   : > { %v5379_v11 = vmul.f32 %v11267_v38, %v5378_v0  ;;  %v5928_v13 = vmul.f32 %v5880_v45, %v11117_v63  ;;  %v5785_v35 = vmul.f32 %v10945_v54, %v5730_v2  ;;  %v5392_v6 = vmul.f32 %v11223_v28, %v5391_v10  ;;  %vm11325_vm15 = vmor %vm5393_vm9, %vm5394_vm11 }
 0xb42   : > { %7906 = vrsqrt.f32 %v11285_v53  ;;  %v7901_v9 = vpop.eup %7900  ;;  %v6163_v7 = vadd.f32 1.0, %v7899_v50  ;;  %v5930_v34 = vmul.f32 %v5882_v48, %v11243_v46  ;;  %vm5383_vm12 = vweird.f32 %v11212_v23 }
 0xb43   : > { %v5380_v31 = vmul.f32 0.5, %v5379_v11  ;;  %v11301_v49 = vpop.eup %7902  ;;  %v6165_v44 = vadd.f32 1.0, %v7901_v9  ;;  %v5976_v5 = vmul.f32 0.044715, %v5928_v13  ;;  %v11305_v58 = vadd.f32 %v11006_v62, %v5782_v39 }
 0xb44   : > { %vm5384_vm14 = vweird.f32 %v11267_v38  ;;  %v5408_v42 = vmul.f32 %v11301_v49, %v11265_v4  ;;  %v6211_v0 = vmul.f32 0.5, %v6163_v7  ;;  %v5366_v8 = vsel %vm11311_vm13, %v11201_v41, %v5362_v17 }
 0xb45   : > { %v5381_v55 = vsub.f32 1.5, %v5380_v31  ;;  %v5103_v24 = vpop.f32.mrf.mxu3  ;;  %v6213_v2 = vmul.f32 0.5, %v6165_v44  ;;  %v5978_v10 = vmul.f32 0.044715, %v5930_v34  ;;  %v11333_v39 = vadd.f32 %v10954_v60, %v5785_v35  ;;  %vm11346_vm2 = vmor %vm5383_vm12, %vm5384_vm14 }
 0xb46   : > { %v11330_v48 = vpop.eup %7904  ;;  %v5396_v41 = vsel %vm11325_vm15, %v11223_v28, %v5392_v6  ;;  %v5409_v20 = vmul.f32 %v11301_v49, %v5408_v42  ;;  %v6024_v50 = vadd.f32 %v5976_v5, %v11117_v63  ;;  %v6259_v13 = vmul.f32 %v6211_v0, %v11029_v56 }
 0xb47   : > { %v5382_v45 = vmul.f32 %v11267_v38, %v5381_v55  ;;  %v5195_v11 = vpop.f32.mrf.mxu0  ;;  %v6261_v9 = vmul.f32 %v6213_v2, %v11072_v30  ;;  %v5398_v28 = vmul.f32 %v11330_v48, %v11281_v57  ;;  %v11354_v35 = vadd.f32 1e-06, %v5103_v24 }
 0xb48   : > { %v11340_v17 = vpop.eup %7906  ;;  %v5729_v6 = vmul.f32 %v5366_v8, %v10682_v47  ;;  %v5410_v23 = vmul.f32 0.5, %v5409_v20  ;;  %v5732_v55 = vmul.f32 %v5396_v41, %v10687_v25  ;;  %v6026_v44 = vadd.f32 %v5978_v10, %v11243_v46 }
 0xb49   : > { %v5386_v7 = vsel %vm11346_vm2, %v11267_v38, %v5382_v45  ;;  %v5428_v34 = vmul.f32 %v11340_v17, %v11285_v53  ;;  %v6307_v56 = vpack.c.bf16 %v6261_v9, %v6259_v13  ;;  %v5399_v30 = vmul.f32 %v11330_v48, %v5398_v28 }
 0xb4a   : > { %v5411_v5 = vsub.f32 1.5, %v5410_v23  ;;  %vm5414_vm4 = vweird.f32 %v11301_v49  ;;  %v6072_v24 = vmul.f32 0.7978846, %v6024_v50  ;;  %v5731_v19 = vmul.f32 %v5386_v7, %v10694_v15 }
 0xb4b   : > { %v5429_v47 = vmul.f32 %v11340_v17, %v5428_v34  ;;  %6471 = vmatmul.bf16.vlgmr.msrb.gmra.mxu1 %v6307_v56  ;;  %v5400_v38 = vmul.f32 0.5, %v5399_v30  ;;  %v6074_v42 = vmul.f32 0.7978846, %v6026_v44  ;;  %7908 = vrsqrt.f32 %v11354_v35 }
 0xb4c   : > { %v5412_v25 = vmul.f32 %v11301_v49, %v5411_v5  ;;  %vm5413_vm1 = vweird.f32 %v11265_v4  ;;  %7910 = vtanh.f32 %v6072_v24  ;;  %v11371_v45 = vadd.f32 1e-06, %v5195_v11 }
 0xb4d   : > { %v5106_v0 = vpop.f32.mrf.mxu3  ;;  %v5430_v8 = vmul.f32 0.5, %v5429_v47  ;;  %v5401_v16 = vsub.f32 1.5, %v5400_v38  ;;  %7912 = vtanh.f32 %v6074_v42  ;;  %v5879_v2 = vmul.f32 %v11151_v33, %v11151_v33  ;;  %vm11379_vm5 = vmor %vm5413_vm1, %vm5414_vm4 }
 0xb4e   : > { %v5784_v15 = vmul.f32 %v10985_v3, %v5729_v6  ;;  %v5787_v10 = vmul.f32 %v10945_v54, %v5732_v55  ;;  %v5881_v4 = vmul.f32 %v11250_v12, %v11250_v12  ;;  %v11385_v20 = vadd.f32 1e-06, %v5106_v0 }
 0xb4f   : > { %v5198_v11 = vpop.f32.mrf.mxu0  ;;  %v5786_v50 = vmul.f32 %v10985_v3, %v5731_v19  ;;  %v5416_v31 = vsel %vm11379_vm5, %v11301_v49, %v5412_v25  ;;  %vm5404_vm6 = vweird.f32 %v11330_v48  ;;  %7914 = vrsqrt.f32 %v11371_v45 }
 0xb50   : > { %v5402_v13 = vmul.f32 %v11330_v48, %v5401_v16  ;;  %v5927_v9 = vmul.f32 %v5879_v2, %v11151_v33  ;;  %v5929_v28 = vmul.f32 %v5881_v4, %v11250_v12  ;;  %7916 = vrsqrt.f32 %v11385_v20 }
 0xb51   : > { %v11397_v6 = vpop.eup %7908  ;;  %vm5403_vm7 = vweird.f32 %v11281_v57  ;;  %v5431_v7 = vsub.f32 1.5, %v5430_v8  ;;  %vm5433_vm0 = vweird.f32 %v11285_v53  ;;  %v11401_v49 = vadd.f32 1e-06, %v5198_v11 }
 0xb52   : > { %v7911_v23 = vpop.eup %7910  ;;  %v11404_v34 = vadd.f32 %v11006_v62, %v5784_v15  ;;  %v11407_v55 = vadd.f32 %v10954_v60, %v5787_v10  ;;  %vm5434_vm8 = vweird.f32 %v11340_v17  ;;  %v5418_v56 = vmul.f32 %v11397_v6, %v11354_v35  ;;  %vm11418_vm9 = vmor %vm5403_vm7, %vm5404_vm6 }
 0xb53   : > { %v7913_v30 = vpop.eup %7912  ;;  %v11413_v57 = vadd.f32 %v11006_v62, %v5786_v50  ;;  %v5734_v44 = vmul.f32 %v5416_v31, %v10699_v61  ;;  %v6168_v47 = vadd.f32 1.0, %v7911_v23  ;;  %vm5423_vm10 = vweird.f32 %v11354_v35  ;;  %vm11445_vm12 = vmor %vm5433_vm0, %vm5434_vm8 }
 0xb54   : > { %v5975_v24 = vmul.f32 0.044715, %v5927_v9  ;;  %v5406_v19 = vsel %vm11418_vm9, %v11330_v48, %v5402_v13  ;;  %v6170_v38 = vadd.f32 1.0, %v7913_v30  ;;  %v5419_v42 = vmul.f32 %v11397_v6, %v5418_v56 }
 0xb55   : > { %v5977_v0 = vmul.f32 0.044715, %v5929_v28  ;;  %v11427_v25 = vpop.eup %7914  ;;  %v5432_v61 = vmul.f32 %v11340_v17, %v5431_v7  ;;  %v6216_v8 = vmul.f32 0.5, %v6168_v47  ;;  %7918 = vrsqrt.f32 %v11401_v49  ;;  %v5109_v47 = vpop.f32.mrf.mxu3 }
 0xb56   : > { %v6023_v16 = vadd.f32 %v5975_v24, %v11151_v33  ;;  %v11432_v2 = vpop.eup %7916  ;;  %v6218_v15 = vmul.f32 0.5, %v6170_v38  ;;  %v5420_v10 = vmul.f32 0.5, %v5419_v42  ;;  %v5448_v48 = vmul.f32 %v11427_v25, %v11371_v45 }
 0xb57   : > { %vm5453_vm11 = vweird.f32 %v11371_v45  ;;  %v5789_v41 = vmul.f32 %v10945_v54, %v5734_v44  ;;  %v5733_v4 = vmul.f32 %v5406_v19, %v10704_v29  ;;  %v6264_v11 = vmul.f32 %v6216_v8, %v11117_v63  ;;  %v5201_v24 = vpop.f32.mrf.mxu0 }
 0xb58   : > { %v6025_v50 = vadd.f32 %v5977_v0, %v11250_v12  ;;  %v6266_v13 = vmul.f32 %v6218_v15, %v11243_v46  ;;  %v5421_v9 = vsub.f32 1.5, %v5420_v10  ;;  %v5449_v28 = vmul.f32 %v11427_v25, %v5448_v48 }
 0xb59   : > { %v6071_v7 = vmul.f32 0.7978846, %v6023_v16  ;;  %v5436_v29 = vsel %vm11445_vm12, %v11340_v17, %v5432_v61  ;;  %vm5424_vm13 = vweird.f32 %v11397_v6  ;;  %v5438_v53 = vmul.f32 %v11432_v2, %v11385_v20 }
 0xb5a   : > { %v6073_v63 = vmul.f32 0.7978846, %v6025_v50  ;;  %v6310_v23 = vpack.c.bf16 %v6266_v13, %v6264_v11  ;;  %v5422_v56 = vmul.f32 %v11397_v6, %v5421_v9  ;;  %v5450_v30 = vmul.f32 0.5, %v5449_v28  ;;  %vm11470_vm14 = vmor %vm5423_vm10, %vm5424_vm13 }
 0xb5b   : > { %7920 = vtanh.f32 %v6071_v7  ;;  %v11458_v46 = vpop.eup %7918  ;;  %v5439_v44 = vmul.f32 %v11432_v2, %v5438_v53  ;;  %v5884_v5 = vmul.f32 %v11259_v32, %v11259_v32  ;;  %v5886_v17 = vmul.f32 %v11290_v40, %v11290_v40 }
 0xb5c   : > { %7922 = vtanh.f32 %v6073_v63  ;;  %v5736_v19 = vmul.f32 %v5436_v29, %v10709_v37  ;;  %6545 = vmatmul.bf16.gmra.mxu2 %v6310_v23  ;;  %v5451_v42 = vsub.f32 1.5, %v5450_v30  ;;  %vm5454_vm15 = vweird.f32 %v11427_v25 }
 0xb5d   : > { %v5468_v0 = vmul.f32 %v11458_v46, %v11401_v49  ;;  %v5426_v61 = vsel %vm11470_vm14, %v11397_v6, %v5422_v56  ;;  %v5440_v37 = vmul.f32 0.5, %v5439_v44  ;;  %vm5443_vm2 = vweird.f32 %v11385_v20  ;;  %vm11494_vm4 = vmor %vm5453_vm11, %vm5454_vm15 }
 0xb5e   : > { %v5932_v8 = vmul.f32 %v5884_v5, %v11259_v32  ;;  %v5934_v35 = vmul.f32 %v5886_v17, %v11290_v40  ;;  %v5452_v16 = vmul.f32 %v11427_v25, %v5451_v42  ;;  %v11485_v10 = vadd.f32 1e-06, %v5109_v47 }
 0xb5f   : > { %v5469_v15 = vmul.f32 %v11458_v46, %v5468_v0  ;;  %v11487_v48 = vadd.f32 1e-06, %v5201_v24  ;;  %v11490_v11 = vadd.f32 %v10954_v60, %v5789_v41  ;;  %v5441_v50 = vsub.f32 1.5, %v5440_v37 }
 0xb60   : > { %v5980_v31 = vmul.f32 0.044715, %v5932_v8  ;;  %v5982_v13 = vmul.f32 0.044715, %v5934_v35  ;;  %v5788_v28 = vmul.f32 %v10985_v3, %v5733_v4  ;;  %v5456_v7 = vsel %vm11494_vm4, %v11427_v25, %v5452_v16  ;;  %v5112_v8 = vpop.f32.mrf.mxu3  ;;  %v5204_v35 = vpop.f32.mrf.mxu0 }
 0xb61   : > { %v7921_v9 = vpop.eup %7920  ;;  %v5470_v29 = vmul.f32 0.5, %v5469_v15  ;;  %7924 = vrsqrt.f32 %v11485_v10  ;;  %v5791_v45 = vmul.f32 %v10945_v54, %v5736_v19  ;;  %v5735_v63 = vmul.f32 %v5426_v61, %v10714_v36 }
 0xb62   : > { %v7923_v41 = vpop.eup %7922  ;;  %v6167_v53 = vadd.f32 1.0, %v7921_v9  ;;  %vm5444_vm1 = vweird.f32 %v11432_v2  ;;  %v6028_v30 = vadd.f32 %v5980_v31, %v11259_v32  ;;  %v6030_v4 = vadd.f32 %v5982_v13, %v11290_v40 }
 0xb63   : > { %v6169_v23 = vadd.f32 1.0, %v7923_v41  ;;  %v5471_v56 = vsub.f32 1.5, %v5470_v29  ;;  %v5738_v44 = vmul.f32 %v5456_v7, %v10719_v52  ;;  %v5442_v5 = vmul.f32 %v11432_v2, %v5441_v50  ;;  %vm11528_vm6 = vmor %vm5443_vm2, %vm5444_vm1 }
 0xb64   : > { %v6215_v25 = vmul.f32 0.5, %v6167_v53  ;;  %7926 = vrsqrt.f32 %v11487_v48  ;;  %vm5474_vm5 = vweird.f32 %v11458_v46  ;;  %v6076_v36 = vmul.f32 0.7978846, %v6028_v30 }
 0xb65   : > { %v6217_v17 = vmul.f32 0.5, %v6169_v23  ;;  %v5472_v47 = vmul.f32 %v11458_v46, %v5471_v56  ;;  %v11514_v24 = vadd.f32 %v11006_v62, %v5788_v28  ;;  %v11517_v19 = vadd.f32 %v10954_v60, %v5791_v45 }
 0xb66   : > { %v5790_v38 = vmul.f32 %v10985_v3, %v5735_v63  ;;  %v6078_v52 = vmul.f32 0.7978846, %v6030_v4  ;;  %v6263_v0 = vmul.f32 %v6215_v25, %v11151_v33  ;;  %vm5473_vm7 = vweird.f32 %v11401_v49 }
 0xb67   : > { %v11520_v42 = vpop.eup %7924  ;;  %v6265_v61 = vmul.f32 %v6217_v17, %v11250_v12  ;;  %7928 = vtanh.f32 %v6076_v36  ;;  %v5793_v16 = vmul.f32 %v10945_v54, %v5738_v44  ;;  %v5446_v33 = vsel %vm11528_vm6, %v11432_v2, %v5442_v5  ;;  %vm11539_vm0 = vmor %vm5473_vm7, %vm5474_vm5 }
 0xb68   : > { %7930 = vtanh.f32 %v6078_v52  ;;  %v5458_v20 = vmul.f32 %v11520_v42, %v11485_v10  ;;  %vm5463_vm8 = vweird.f32 %v11485_v10  ;;  %v5476_v15 = vsel %vm11539_vm0, %v11458_v46, %v5472_v47  ;;  %v5115_v12 = vpop.f32.mrf.mxu3 }
 0xb69   : > { %v6309_v49 = vpack.c.bf16 %v6265_v61, %v6263_v0  ;;  %v5883_v2 = vmul.f32 %v11278_v27, %v11278_v27  ;;  %v5885_v6 = vmul.f32 %v11305_v58, %v11305_v58  ;;  %v11556_v31 = vadd.f32 %v11006_v62, %v5790_v38 }
 0xb6a   : > { %v11553_v50 = vpop.eup %7926  ;;  %v5459_v13 = vmul.f32 %v11520_v42, %v5458_v20  ;;  %v11559_v9 = vadd.f32 1e-06, %v5112_v8  ;;  %v11561_v28 = vadd.f32 1e-06, %v5204_v35  ;;  %v5737_v46 = vmul.f32 %v5446_v33, %v10724_v1 }
 0xb6b   : > { %6476 = vmatmul.bf16.gmra.mxu1 %v6309_v49  ;;  %v5488_v7 = vmul.f32 %v11553_v50, %v11487_v48  ;;  %v5931_v29 = vmul.f32 %v5883_v2, %v11278_v27  ;;  %v5933_v41 = vmul.f32 %v5885_v6, %v11305_v58  ;;  %v11569_v45 = vadd.f32 %v10954_v60, %v5793_v16 }
 0xb6c   : > { %v5740_v63 = vmul.f32 %v5476_v15, %v10729_v18  ;;  %v5460_v53 = vmul.f32 0.5, %v5459_v13  ;;  %7932 = vrsqrt.f32 %v11559_v9  ;;  %vm5464_vm9 = vweird.f32 %v11520_v42 }
 0xb6d   : > { %v7929_v23 = vpop.eup %7928  ;;  %v5489_v56 = vmul.f32 %v11553_v50, %v5488_v7  ;;  %v5979_v30 = vmul.f32 0.044715, %v5931_v29  ;;  %v5981_v1 = vmul.f32 0.044715, %v5933_v41  ;;  %7934 = vrsqrt.f32 %v11561_v28  ;;  %vm11586_vm10 = vmor %vm5463_vm8, %vm5464_vm9 }
 0xb6e   : > { %v7931_v4 = vpop.eup %7930  ;;  %v6172_v44 = vadd.f32 1.0, %v7929_v23  ;;  %v5461_v25 = vsub.f32 1.5, %v5460_v53  ;;  %v5888_v5 = vmul.f32 %v11333_v39, %v11333_v39  ;;  %v5890_v0 = vmul.f32 %v11407_v55, %v11407_v55  ;;  %v5207_v23 = vpop.f32.mrf.mxu0 }
 0xb6f   : > { %v6174_v17 = vadd.f32 1.0, %v7931_v4  ;;  %v5490_v18 = vmul.f32 0.5, %v5489_v56  ;;  %v6027_v47 = vadd.f32 %v5979_v30, %v11278_v27  ;;  %v6029_v36 = vadd.f32 %v5981_v1, %v11305_v58 }
 0xb70   : > { %v6220_v38 = vmul.f32 0.5, %v6172_v44  ;;  %v5462_v52 = vmul.f32 %v11520_v42, %v5461_v25  ;;  %v5936_v61 = vmul.f32 %v5888_v5, %v11333_v39  ;;  %vm5494_vm11 = vweird.f32 %v11553_v50 }
 0xb71   : > { %v6222_v37 = vmul.f32 0.5, %v6174_v17  ;;  %v5491_v35 = vsub.f32 1.5, %v5490_v18  ;;  %v6075_v16 = vmul.f32 0.7978846, %v6027_v47  ;;  %v6077_v33 = vmul.f32 0.7978846, %v6029_v36 }
 0xb72   : > { %v11590_v20 = vpop.eup %7932  ;;  %v6268_v49 = vmul.f32 %v6220_v38, %v11259_v32  ;;  %v5466_v15 = vsel %vm11586_vm10, %v11520_v42, %v5462_v52  ;;  %v5938_v10 = vmul.f32 %v5890_v0, %v11407_v55  ;;  %v5984_v7 = vmul.f32 0.044715, %v5936_v61 }
 0xb73   : > { %v11598_v2 = vpop.eup %7934  ;;  %v6270_v6 = vmul.f32 %v6222_v37, %v11290_v40  ;;  %v5492_v13 = vmul.f32 %v11553_v50, %v5491_v35  ;;  %7936 = vtanh.f32 %v6075_v16  ;;  %vm5493_vm12 = vweird.f32 %v11487_v48  ;;  %v5118_v35 = vpop.f32.mrf.mxu3 }
 0xb74   : > { %7938 = vtanh.f32 %v6077_v33  ;;  %v5478_v32 = vmul.f32 %v11590_v20, %v11559_v9  ;;  %v5508_v42 = vmul.f32 %v11598_v2, %v11561_v28  ;;  %v5792_v29 = vmul.f32 %v10985_v3, %v5737_v46  ;;  %vm11612_vm13 = vmor %vm5493_vm12, %vm5494_vm11 }
 0xb75   : > { %v5795_v41 = vmul.f32 %v10945_v54, %v5740_v63  ;;  %v6312_v53 = vpack.c.bf16 %v6270_v6, %v6268_v49  ;;  %v5739_v40 = vmul.f32 %v5466_v15, %v10734_v51  ;;  %vm5483_vm14 = vweird.f32 %v11559_v9 }
 0xb76   : > { %v5479_v48 = vmul.f32 %v11590_v20, %v5478_v32  ;;  %v5509_v30 = vmul.f32 %v11598_v2, %v5508_v42  ;;  %v5986_v1 = vmul.f32 0.044715, %v5938_v10  ;;  %v5496_v46 = vsel %vm11612_vm13, %v11553_v50, %v5492_v13 }
 0xb77   : > { %6550 = vmatmul.bf16.gmra.mxu2 %v6312_v53  ;;  %vm5484_vm15 = vweird.f32 %v11590_v20  ;;  %v6032_v51 = vadd.f32 %v5984_v7, %v11333_v39  ;;  %v11624_v63 = vadd.f32 1e-06, %v5115_v12  ;;  %v11627_v5 = vadd.f32 1e-06, %v5207_v23  ;;  %v5210_v53 = vpop.f32.mrf.mxu0 }
 0xb78   : > { %v5480_v4 = vmul.f32 0.5, %v5479_v48  ;;  %v5510_v44 = vmul.f32 0.5, %v5509_v30  ;;  %v6034_v25 = vadd.f32 %v5986_v1, %v11407_v55  ;;  %v5794_v18 = vmul.f32 %v10985_v3, %v5739_v40  ;;  %vm11651_vm4 = vmor %vm5483_vm14, %vm5484_vm15 }
 0xb79   : > { %v7937_v17 = vpop.eup %7936  ;;  %vm5514_vm2 = vweird.f32 %v11598_v2  ;;  %v6080_v47 = vmul.f32 0.7978846, %v6032_v51  ;;  %7940 = vrsqrt.f32 %v11624_v63  ;;  %v5742_v36 = vmul.f32 %v5496_v46, %v10739_v59 }
 0xb7a   : > { %v7939_v50 = vpop.eup %7938  ;;  %v6171_v38 = vadd.f32 1.0, %v7937_v17  ;;  %v5481_v52 = vsub.f32 1.5, %v5480_v4  ;;  %v5511_v0 = vsub.f32 1.5, %v5510_v44  ;;  %v6082_v37 = vmul.f32 0.7978846, %v6034_v25 }
 0xb7b   : > { %v6173_v61 = vadd.f32 1.0, %v7939_v50  ;;  %7942 = vtanh.f32 %v6080_v47  ;;  %v5887_v8 = vmul.f32 %v11404_v34, %v11404_v34  ;;  %v5889_v59 = vmul.f32 %v11413_v57, %v11413_v57 }
 0xb7c   : > { %v6219_v16 = vmul.f32 0.5, %v6171_v38  ;;  %v5482_v33 = vmul.f32 %v11590_v20, %v5481_v52  ;;  %v5512_v12 = vmul.f32 %v11598_v2, %v5511_v0  ;;  %7944 = vrsqrt.f32 %v11627_v5 }
 0xb7d   : > { %v6221_v49 = vmul.f32 0.5, %v6173_v61  ;;  %7946 = vtanh.f32 %v6082_v37  ;;  %v5935_v15 = vmul.f32 %v5887_v8, %v11404_v34  ;;  %v11642_v10 = vadd.f32 %v11006_v62, %v5792_v29 }
 0xb7e   : > { %v11645_v6 = vadd.f32 %v10954_v60, %v5795_v41  ;;  %vm5513_vm1 = vweird.f32 %v11561_v28  ;;  %v11656_v7 = vadd.f32 1e-06, %v5118_v35  ;;  %v6267_v42 = vmul.f32 %v6219_v16, %v11278_v27 }
 0xb7f   : > { %v11658_v32 = vpop.eup %7940  ;;  %v6269_v29 = vmul.f32 %v6221_v49, %v11305_v58  ;;  %v5486_v41 = vsel %vm11651_vm4, %v11590_v20, %v5482_v33  ;;  %vm11667_vm5 = vmor %vm5513_vm1, %vm5514_vm2  ;;  %v5937_v28 = vmul.f32 %v5889_v59, %v11413_v57  ;;  %v5983_v58 = vmul.f32 0.044715, %v5935_v15  ;;  %v5121_v33 = vpop.f32.mrf.mxu3 }
 0xb80   : > { %v5516_v40 = vsel %vm11667_vm5, %v11598_v2, %v5512_v12  ;;  %v5498_v27 = vmul.f32 %v11658_v32, %v11624_v63  ;;  %7948 = vrsqrt.f32 %v11656_v7  ;;  %v11679_v23 = vadd.f32 %v11006_v62, %v5794_v18 }
 0xb81   : > { %v7943_v20 = vpop.eup %7942  ;;  %v5797_v56 = vmul.f32 %v10945_v54, %v5742_v36  ;;  %v6311_v48 = vpack.c.bf16 %v6269_v29, %v6267_v42  ;;  %v5985_v30 = vmul.f32 0.044715, %v5937_v28  ;;  %vm5503_vm6 = vweird.f32 %v11624_v63  ;;  %v5213_v29 = vpop.f32.mrf.mxu0 }
 0xb82   : > { %v11682_v1 = vpop.eup %7944  ;;  %v6176_v46 = vadd.f32 1.0, %v7943_v20  ;;  %v5499_v51 = vmul.f32 %v11658_v32, %v5498_v27  ;;  %v6031_v2 = vadd.f32 %v5983_v58, %v11404_v34  ;;  %v5741_v44 = vmul.f32 %v5486_v41, %v10744_v26 }
 0xb83   : > { %v7947_v4 = vpop.eup %7946  ;;  %6481 = vmatmul.bf16.gmra.mxu1 %v6311_v48  ;;  %v5744_v25 = vmul.f32 %v5516_v40, %v10749_v21  ;;  %v5528_v17 = vmul.f32 %v11682_v1, %v11627_v5  ;;  %vm5533_vm7 = vweird.f32 %v11627_v5  ;;  %v6033_v36 = vadd.f32 %v5985_v30, %v11413_v57 }
 0xb84   : > { %v6178_v18 = vadd.f32 1.0, %v7947_v4  ;;  %v6224_v47 = vmul.f32 0.5, %v6176_v46  ;;  %v5500_v50 = vmul.f32 0.5, %v5499_v51  ;;  %vm5504_vm0 = vweird.f32 %v11658_v32 }
 0xb85   : > { %v5529_v38 = vmul.f32 %v11682_v1, %v5528_v17  ;;  %v6079_v52 = vmul.f32 0.7978846, %v6031_v2  ;;  %v11695_v0 = vadd.f32 1e-06, %v5210_v53  ;;  %v6081_v37 = vmul.f32 0.7978846, %v6033_v36  ;;  %vm11722_vm9 = vmor %vm5503_vm6, %vm5504_vm0 }
 0xb86   : > { %v11697_v26 = vpop.eup %7948  ;;  %v6226_v21 = vmul.f32 0.5, %v6178_v18  ;;  %v5501_v61 = vsub.f32 1.5, %v5500_v50  ;;  %v5892_v8 = vmul.f32 %v11490_v11, %v11490_v11  ;;  %vm5534_vm8 = vweird.f32 %v11682_v1 }
 0xb87   : > { %v5530_v35 = vmul.f32 0.5, %v5529_v38  ;;  %7950 = vtanh.f32 %v6079_v52  ;;  %v5518_v16 = vmul.f32 %v11697_v26, %v11656_v7  ;;  %v6272_v12 = vmul.f32 %v6224_v47, %v11333_v39  ;;  %vm11733_vm10 = vmor %vm5533_vm7, %vm5534_vm8 }
 0xb88   : > { %v6274_v49 = vmul.f32 %v6226_v21, %v11407_v55  ;;  %v5502_v59 = vmul.f32 %v11658_v32, %v5501_v61  ;;  %7952 = vtanh.f32 %v6081_v37  ;;  %v5894_v42 = vmul.f32 %v11517_v19, %v11517_v19 }
 0xb89   : > { %v5531_v15 = vsub.f32 1.5, %v5530_v35  ;;  %v5519_v13 = vmul.f32 %v11697_v26, %v5518_v16  ;;  %7954 = vrsqrt.f32 %v11695_v0  ;;  %v11712_v41 = vadd.f32 %v10954_v60, %v5797_v56 }
 0xb8a   : > { %v6314_v9 = vpack.c.bf16 %v6274_v49, %v6272_v12  ;;  %v5940_v39 = vmul.f32 %v5892_v8, %v11490_v11  ;;  %v11715_v28 = vadd.f32 1e-06, %v5121_v33  ;;  %v5796_v55 = vmul.f32 %v10985_v3, %v5741_v44 }
 0xb8b   : > { %v5532_v40 = vmul.f32 %v11682_v1, %v5531_v15  ;;  %v5520_v27 = vmul.f32 0.5, %v5519_v13  ;;  %v5942_v58 = vmul.f32 %v5894_v42, %v11517_v19  ;;  %v5799_v20 = vmul.f32 %v10945_v54, %v5744_v25 }
 0xb8c   : > { %6555 = vmatmul.bf16.gmra.mxu2 %v6314_v9  ;;  %v5988_v63 = vmul.f32 0.044715, %v5940_v39  ;;  %7956 = vrsqrt.f32 %v11715_v28  ;;  %v11738_v48 = vadd.f32 1e-06, %v5213_v29  ;;  %v5506_v46 = vsel %vm11722_vm9, %v11658_v32, %v5502_v59  ;;  %v5216_v9 = vpop.f32.mrf.mxu0 }
 0xb8d   : > { %v7951_v30 = vpop.eup %7950  ;;  %v5536_v51 = vsel %vm11733_vm10, %v11682_v1, %v5532_v40  ;;  %v5521_v2 = vsub.f32 1.5, %v5520_v27  ;;  %v5990_v5 = vmul.f32 0.044715, %v5942_v58  ;;  %vm5524_vm11 = vweird.f32 %v11697_v26 }
 0xb8e   : > { %v7953_v4 = vpop.eup %7952  ;;  %v6175_v44 = vadd.f32 1.0, %v7951_v30  ;;  %v6036_v25 = vadd.f32 %v5988_v63, %v11490_v11  ;;  %7958 = vrsqrt.f32 %v11738_v48  ;;  %vm5523_vm12 = vweird.f32 %v11656_v7 }
 0xb8f   : > { %v7955_v17 = vpop.eup %7954  ;;  %v6177_v18 = vadd.f32 1.0, %v7953_v4  ;;  %v5522_v47 = vmul.f32 %v11697_v26, %v5521_v2  ;;  %v6038_v32 = vadd.f32 %v5990_v5, %v11517_v19  ;;  %v5743_v1 = vmul.f32 %v5506_v46, %v10760_v43  ;;  %vm11758_vm13 = vmor %vm5523_vm12, %vm5524_vm11 }
 0xb90   : > { %v5746_v50 = vmul.f32 %v5536_v51, %v10765_v14  ;;  %v6223_v36 = vmul.f32 0.5, %v6175_v44  ;;  %v5548_v38 = vmul.f32 %v7955_v17, %v11695_v0  ;;  %v11756_v52 = vadd.f32 %v11006_v62, %v5796_v55 }
 0xb91   : > { %v6225_v21 = vmul.f32 0.5, %v6177_v18  ;;  %v6084_v37 = vmul.f32 0.7978846, %v6036_v25  ;;  %v6086_v8 = vmul.f32 0.7978846, %v6038_v32  ;;  %v11765_v35 = vadd.f32 %v10954_v60, %v5799_v20 }
 0xb92   : > { %v11762_v7 = vpop.eup %7956  ;;  %v5526_v43 = vsel %vm11758_vm13, %v11697_v26, %v5522_v47  ;;  %v5549_v14 = vmul.f32 %v7955_v17, %v5548_v38  ;;  %vm5553_vm14 = vweird.f32 %v11695_v0  ;;  %v6271_v16 = vmul.f32 %v6223_v36, %v11404_v34  ;;  %v5124_v26 = vpop.f32.mrf.mxu3  ;;  %v12512_v47 = vld [vmem:[#allocation25_spill] sm:$0xff] }
 0xb93   : > { %v6273_v33 = vmul.f32 %v6225_v21, %v11413_v57  ;;  %7960 = vtanh.f32 %v6084_v37  ;;  %v5538_v12 = vmul.f32 %v11762_v7, %v11715_v28  ;;  %v5798_v59 = vmul.f32 %v10985_v3, %v5743_v1 }
 0xb94   : > { %v11775_v49 = vpop.eup %7958  ;;  %v5801_v15 = vmul.f32 %v10945_v54, %v5746_v50  ;;  %v5550_v13 = vmul.f32 0.5, %v5549_v14  ;;  %7962 = vtanh.f32 %v6086_v8  ;;  %v5745_v29 = vmul.f32 %v5526_v43, %v10770_v22 }
 0xb95   : > { %v6313_v42 = vpack.c.bf16 %v6273_v33, %v6271_v16  ;;  %v5539_v34 = vmul.f32 %v11762_v7, %v5538_v12  ;;  %vm5543_vm15 = vweird.f32 %v11715_v28  ;;  %v5568_v57 = vmul.f32 %v11775_v49, %v11738_v48 }
 0xb96   : > { %v5551_v39 = vsub.f32 1.5, %v5550_v13  ;;  %vm5554_vm2 = vweird.f32 %v7955_v17  ;;  %v5891_v55 = vmul.f32 %v11514_v24, %v11514_v24  ;;  %v5893_v53 = vmul.f32 %v11556_v31, %v11556_v31 }
 0xb97   : > { %6486 = vmatmul.bf16.gmra.mxu1 %v6313_v42  ;;  %v5540_v40 = vmul.f32 0.5, %v5539_v34  ;;  %vm5544_vm4 = vweird.f32 %v11762_v7  ;;  %v5569_v22 = vmul.f32 %v11775_v49, %v5568_v57  ;;  %v11790_v27 = vadd.f32 1e-06, %v5124_v26  ;;  %vm5555_vm1 = vmor %vm5553_vm14, %vm5554_vm2 }
 0xb98   : > { %v5552_v58 = vmul.f32 %v7955_v17, %v5551_v39  ;;  %v5939_v20 = vmul.f32 %v5891_v55, %v11514_v24  ;;  %v5941_v56 = vmul.f32 %v5893_v53, %v11556_v31  ;;  %v11794_v63 = vadd.f32 1e-06, %v5216_v9  ;;  %vm11815_vm6 = vmor %vm5543_vm15, %vm5544_vm4  ;;  %v12517_v39 = vld [vmem:[#allocation26_spill] sm:$0xff] }
 0xb99   : > { %v7961_v30 = vpop.eup %7960  ;;  %v5800_v46 = vmul.f32 %v10985_v3, %v5745_v29  ;;  %v5541_v51 = vsub.f32 1.5, %v5540_v40  ;;  %v5570_v2 = vmul.f32 0.5, %v5569_v22  ;;  %7964 = vrsqrt.f32 %v11790_v27 }
 0xb9a   : > { %v7963_v5 = vpop.eup %7962  ;;  %v5556_v4 = vsel %vm5555_vm1, %v7955_v17, %v5552_v58  ;;  %v6180_v44 = vadd.f32 1.0, %v7961_v30  ;;  %v5987_v25 = vmul.f32 0.044715, %v5939_v20  ;;  %v5989_v18 = vmul.f32 0.044715, %v5941_v56  ;;  %v5127_v28 = vpop.f32.mrf.mxu3  ;;  %v12518_v20 = vld [vmem:[#allocation27_spill] sm:$0xff] }
 0xb9b   : > { %v5748_v32 = vmul.f32 %v5556_v4, %v12512_v47  ;;  %v6182_v1 = vadd.f32 1.0, %v7963_v5  ;;  %v5542_v50 = vmul.f32 %v11762_v7, %v5541_v51  ;;  %v5571_v36 = vsub.f32 1.5, %v5570_v2 }
 0xb9c   : > { %v6228_v38 = vmul.f32 0.5, %v6180_v44  ;;  %v6035_v21 = vadd.f32 %v5987_v25, %v11514_v24  ;;  %v6037_v0 = vadd.f32 %v5989_v18, %v11556_v31  ;;  %7966 = vrsqrt.f32 %v11794_v63 }
 0xb9d   : > { %v11806_v61 = vadd.f32 %v11006_v62, %v5798_v59  ;;  %v6230_v17 = vmul.f32 0.5, %v6182_v1  ;;  %v5572_v37 = vmul.f32 %v11775_v49, %v5571_v36  ;;  %vm5574_vm5 = vweird.f32 %v11775_v49 }
 0xb9e   : > { %v5803_v8 = vmul.f32 %v10945_v54, %v5748_v32  ;;  %v6083_v14 = vmul.f32 0.7978846, %v6035_v21  ;;  %v6085_v16 = vmul.f32 0.7978846, %v6037_v0  ;;  %v5896_v33 = vmul.f32 %v11569_v45, %v11569_v45 }
 0xb9f   : > { %v11821_v12 = vpop.eup %7964  ;;  %v6276_v59 = vmul.f32 %v6228_v38, %v11490_v11  ;;  %v6278_v13 = vmul.f32 %v6230_v17, %v11517_v19  ;;  %v5546_v26 = vsel %vm11815_vm6, %v11762_v7, %v5542_v50  ;;  %vm5573_vm7 = vweird.f32 %v11738_v48 }
 0xba0   : > { %v11830_v42 = vadd.f32 %v10954_v60, %v5801_v15  ;;  %v11833_v29 = vadd.f32 %v11006_v62, %v5800_v46  ;;  %vm11835_vm0 = vmor %vm5573_vm7, %vm5574_vm5  ;;  %7968 = vtanh.f32 %v6083_v14  ;;  %v5558_v11 = vmul.f32 %v11821_v12, %v11790_v27  ;;  %v5219_v15 = vpop.f32.mrf.mxu0 }
 0xba1   : > { %v6316_v19 = vpack.c.bf16 %v6278_v13, %v6276_v59  ;;  %v5576_v48 = vsel %vm11835_vm0, %v11775_v49, %v5572_v37  ;;  %7970 = vtanh.f32 %v6085_v16  ;;  %vm5563_vm8 = vweird.f32 %v11790_v27 }
 0xba2   : > { %v5898_v7 = vmul.f32 %v11645_v6, %v11645_v6  ;;  %v11847_v57 = vpop.eup %7966  ;;  %v11850_v9 = vadd.f32 %v10954_v60, %v5803_v8  ;;  %v5747_v55 = vmul.f32 %v5546_v26, %v12517_v39  ;;  %v5559_v53 = vmul.f32 %v11821_v12, %v5558_v11  ;;  %v5130_v14 = vpop.f32.mrf.mxu3 }
 0xba3   : > { %v5944_v40 = vmul.f32 %v5896_v33, %v11569_v45  ;;  %6560 = vmatmul.bf16.gmra.mxu2 %v6316_v19  ;;  %v5588_v49 = vmul.f32 %v11847_v57, %v11794_v63  ;;  %vm5593_vm9 = vweird.f32 %v11794_v63  ;;  %v11859_v58 = vadd.f32 1e-06, %v5127_v28 }
 0xba4   : > { %v5946_v22 = vmul.f32 %v5898_v7, %v11645_v6  ;;  %v5750_v56 = vmul.f32 %v5576_v48, %v12518_v20  ;;  %v5560_v30 = vmul.f32 0.5, %v5559_v53  ;;  %v11862_v51 = vadd.f32 1e-06, %v5219_v15 }
 0xba5   : > { %v5992_v46 = vmul.f32 0.044715, %v5944_v40  ;;  %vm5564_vm10 = vweird.f32 %v11821_v12  ;;  %v5589_v2 = vmul.f32 %v11847_v57, %v5588_v49  ;;  %7972 = vrsqrt.f32 %v11859_v58 }
 0xba6   : > { %v5994_v5 = vmul.f32 0.044715, %v5946_v22  ;;  %v7969_v4 = vpop.eup %7968  ;;  %v5561_v44 = vsub.f32 1.5, %v5560_v30  ;;  %vm5594_vm11 = vweird.f32 %v11847_v57  ;;  %7974 = vrsqrt.f32 %v11862_v51  ;;  %vm11884_vm12 = vmor %vm5563_vm8, %vm5564_vm10  ;;  %v12524_v30 = vld [vmem:[#allocation29_spill] sm:$0xff] }
 0xba7   : > { %v6040_v25 = vadd.f32 %v5992_v46, %v11569_v45  ;;  %v7971_v18 = vpop.eup %7970  ;;  %v6179_v47 = vadd.f32 1.0, %v7969_v4  ;;  %v5590_v32 = vmul.f32 0.5, %v5589_v2  ;;  %v5895_v50 = vmul.f32 %v11642_v10, %v11642_v10  ;;  %vm11904_vm13 = vmor %vm5593_vm9, %vm5594_vm11 }
 0xba8   : > { %v6042_v1 = vadd.f32 %v5994_v5, %v11645_v6  ;;  %v6181_v36 = vadd.f32 1.0, %v7971_v18  ;;  %v5562_v38 = vmul.f32 %v11821_v12, %v5561_v44  ;;  %v5897_v0 = vmul.f32 %v11679_v23, %v11679_v23 }
 0xba9   : > { %v6088_v21 = vmul.f32 0.7978846, %v6040_v25  ;;  %v6227_v17 = vmul.f32 0.5, %v6179_v47  ;;  %v5591_v37 = vsub.f32 1.5, %v5590_v32  ;;  %v5943_v43 = vmul.f32 %v5895_v50, %v11642_v10 }
 0xbaa   : > { %v6090_v8 = vmul.f32 0.7978846, %v6042_v1  ;;  %v11878_v16 = vmul.f32 %v10985_v3, %v5747_v55  ;;  %v6229_v33 = vmul.f32 0.5, %v6181_v36  ;;  %v5945_v13 = vmul.f32 %v5897_v0, %v11679_v23  ;;  %v12523_v55 = vld [vmem:[#allocation28_spill] sm:$0xff]  ;;  %v5133_v0 = vpop.f32.mrf.mxu3 }
 0xbab   : > { %7976 = vtanh.f32 %v6088_v21  ;;  %v11889_v26 = vpop.eup %7972  ;;  %v5805_v28 = vmul.f32 %v10945_v54, %v5750_v56  ;;  %v5566_v34 = vsel %vm11884_vm12, %v11821_v12, %v5562_v38  ;;  %v5592_v11 = vmul.f32 %v11847_v57, %v5591_v37 }
 0xbac   : > { %7978 = vtanh.f32 %v6090_v8  ;;  %v11896_v19 = vpop.eup %7974  ;;  %v6275_v27 = vmul.f32 %v6227_v17, %v11514_v24  ;;  %v6277_v48 = vmul.f32 %v6229_v33, %v11556_v31  ;;  %v5578_v12 = vmul.f32 %v11889_v26, %v11859_v58  ;;  %v5222_v31 = vpop.f32.mrf.mxu0 }
 0xbad   : > { %v5991_v15 = vmul.f32 0.044715, %v5943_v43  ;;  %v5596_v39 = vsel %vm11904_vm13, %v11847_v57, %v5592_v11  ;;  %vm5583_vm14 = vweird.f32 %v11859_v58  ;;  %v5608_v24 = vmul.f32 %v11896_v19, %v11862_v51 }
 0xbae   : > { %vm5613_vm15 = vweird.f32 %v11862_v51  ;;  %v6315_v63 = vpack.c.bf16 %v6277_v48, %v6275_v27  ;;  %v5749_v53 = vmul.f32 %v5566_v34, %v12523_v55  ;;  %v5579_v40 = vmul.f32 %v11889_v26, %v5578_v12 }
 0xbaf   : > { %v5993_v49 = vmul.f32 0.044715, %v5945_v13  ;;  %vm5584_vm2 = vweird.f32 %v11889_v26  ;;  %v5609_v22 = vmul.f32 %v11896_v19, %v5608_v24  ;;  %v6039_v57 = vadd.f32 %v5991_v15, %v11642_v10 }
 0xbb0   : > { %v11922_v20 = vadd.f32 1e-06, %v5130_v14  ;;  %6491 = vmatmul.bf16.gmra.mxu1 %v6315_v63  ;;  %v5752_v46 = vmul.f32 %v5596_v39, %v12524_v30  ;;  %v5580_v2 = vmul.f32 0.5, %v5579_v40  ;;  %v11926_v4 = vadd.f32 1e-06, %v5222_v31  ;;  %vm11938_vm1 = vmor %vm5583_vm14, %vm5584_vm2 }
 0xbb1   : > { %v7977_v56 = vpop.eup %7976  ;;  %v6041_v5 = vadd.f32 %v5993_v49, %v11679_v23  ;;  %v5610_v18 = vmul.f32 0.5, %v5609_v22  ;;  %v6087_v47 = vmul.f32 0.7978846, %v6039_v57  ;;  %v5804_v32 = vmul.f32 %v10985_v3, %v5749_v53  ;;  %v12530_v53 = vld [vmem:[#allocation31_spill] sm:$0xff] }
 0xbb2   : > { %v7979_v44 = vpop.eup %7978  ;;  %v6184_v25 = vadd.f32 1.0, %v7977_v56  ;;  %7980 = vrsqrt.f32 %v11922_v20  ;;  %v5581_v50 = vsub.f32 1.5, %v5580_v2  ;;  %vm5614_vm4 = vweird.f32 %v11896_v19 }
 0xbb3   : > { %v6186_v1 = vadd.f32 1.0, %v7979_v44  ;;  %v6089_v36 = vmul.f32 0.7978846, %v6041_v5  ;;  %v5611_v21 = vsub.f32 1.5, %v5610_v18  ;;  %7982 = vtanh.f32 %v6087_v47  ;;  %vm11952_vm5 = vmor %vm5613_vm15, %vm5614_vm4 }
 0xbb4   : > { %v6232_v38 = vmul.f32 0.5, %v6184_v25  ;;  %v5807_v17 = vmul.f32 %v10945_v54, %v5752_v46  ;;  %v5582_v8 = vmul.f32 %v11889_v26, %v5581_v50  ;;  %v5900_v59 = vmul.f32 %v11712_v41, %v11712_v41  ;;  %v5225_v7 = vpop.f32.mrf.mxu0 }
 0xbb5   : > { %v6234_v37 = vmul.f32 0.5, %v6186_v1  ;;  %7984 = vtanh.f32 %v6089_v36  ;;  %v5612_v33 = vmul.f32 %v11896_v19, %v5611_v21  ;;  %v5902_v34 = vmul.f32 %v11765_v35, %v11765_v35 }
 0xbb6   : > { %v6280_v43 = vmul.f32 %v6232_v38, %v11569_v45  ;;  %7986 = vrsqrt.f32 %v11926_v4  ;;  %v5586_v45 = vsel %vm11938_vm1, %v11889_v26, %v5582_v8  ;;  %v11958_v11 = vadd.f32 1e-06, %v5133_v0  ;;  %v5136_v8 = vpop.f32.mrf.mxu3 }
 0xbb7   : > { %v6282_v13 = vmul.f32 %v6234_v37, %v11645_v6  ;;  %v11964_v6 = vadd.f32 %v11006_v62, %v11878_v16  ;;  %v11967_v48 = vadd.f32 %v10954_v60, %v5805_v28  ;;  %v5616_v51 = vsel %vm11952_vm5, %v11896_v19, %v5612_v33  ;;  %v12529_v28 = vld [vmem:[#allocation30_spill] sm:$0xff] }
 0xbb8   : > { %v11960_v27 = vpop.eup %7980  ;;  %v5948_v26 = vmul.f32 %v5900_v59, %v11712_v41  ;;  %v11974_v12 = vadd.f32 %v11006_v62, %v5804_v32  ;;  %v11977_v15 = vadd.f32 %v10954_v60, %v5807_v17  ;;  %v5751_v31 = vmul.f32 %v5586_v45, %v12529_v28 }
 0xbb9   : > { %v6318_v39 = vpack.c.bf16 %v6282_v13, %v6280_v43  ;;  %v5598_v16 = vmul.f32 %v11960_v27, %v11922_v20  ;;  %v7983_v24 = vpop.eup %7982  ;;  %v5950_v63 = vmul.f32 %v5902_v34, %v11765_v35  ;;  %7988 = vrsqrt.f32 %v11958_v11 }
 0xbba   : > { %v5996_v55 = vmul.f32 0.044715, %v5948_v26  ;;  %v5754_v40 = vmul.f32 %v5616_v51, %v12530_v53  ;;  %v6183_v49 = vadd.f32 1.0, %v7983_v24  ;;  %v11986_v57 = vadd.f32 1e-06, %v5225_v7 }
 0xbbb   : > { %v7985_v19 = vpop.eup %7984  ;;  %6565 = vmatmul.bf16.gmra.mxu2 %v6318_v39  ;;  %v5599_v22 = vmul.f32 %v11960_v27, %v5598_v16  ;;  %vm5603_vm6 = vweird.f32 %v11922_v20  ;;  %v5998_v46 = vmul.f32 0.044715, %v5950_v63  ;;  %vm5604_vm7 = vweird.f32 %v11960_v27  ;;  %v12533_v63 = vld [vmem:[#allocation32_spill] sm:$0xff] }
 0xbbc   : > { %v7987_v56 = vpop.eup %7986  ;;  %v6185_v30 = vadd.f32 1.0, %v7985_v19  ;;  %v6044_v2 = vadd.f32 %v5996_v55, %v11712_v41  ;;  %v6231_v5 = vmul.f32 0.5, %v6183_v49  ;;  %vm5633_vm0 = vweird.f32 %v11926_v4  ;;  %vm12006_vm10 = vmor %vm5603_vm6, %vm5604_vm7  ;;  %v5228_v20 = vpop.f32.mrf.mxu0 }
 0xbbd   : > { %v5600_v44 = vmul.f32 0.5, %v5599_v22  ;;  %v5628_v25 = vmul.f32 %v7987_v56, %v11926_v4  ;;  %v5806_v18 = vmul.f32 %v10985_v3, %v5751_v31  ;;  %v6046_v32 = vadd.f32 %v5998_v46, %v11765_v35 }
 0xbbe   : > { %v6233_v47 = vmul.f32 0.5, %v6185_v30  ;;  %v6092_v1 = vmul.f32 0.7978846, %v6044_v2  ;;  %v5809_v50 = vmul.f32 %v10945_v54, %v5754_v40  ;;  %7990 = vrsqrt.f32 %v11986_v57 }
 0xbbf   : > { %v5601_v36 = vsub.f32 1.5, %v5600_v44  ;;  %v5629_v38 = vmul.f32 %v7987_v56, %v5628_v25  ;;  %v7989_v21 = vpop.eup %7988  ;;  %v6279_v0 = vmul.f32 %v6231_v5, %v11642_v10  ;;  %v6094_v37 = vmul.f32 0.7978846, %v6046_v32  ;;  %v12534_v5 = vld [vmem:[#allocation33_spill] sm:$0xff] }
 0xbc0   : > { %v6281_v17 = vmul.f32 %v6233_v47, %v11679_v23  ;;  %7992 = vtanh.f32 %v6092_v1  ;;  %vm5634_vm8 = vweird.f32 %v7987_v56  ;;  %v5618_v33 = vmul.f32 %v7989_v21, %v11958_v11 }
 0xbc1   : > { %v5602_v43 = vmul.f32 %v11960_v27, %v5601_v36  ;;  %v5630_v14 = vmul.f32 0.5, %v5629_v38  ;;  %vm5623_vm9 = vweird.f32 %v11958_v11  ;;  %7994 = vtanh.f32 %v6094_v37  ;;  %vm5635_vm12 = vmor %vm5633_vm0, %vm5634_vm8 }
 0xbc2   : > { %v6317_v59 = vpack.c.bf16 %v6281_v17, %v6279_v0  ;;  %v5899_v23 = vmul.f32 %v11756_v52, %v11756_v52  ;;  %v5901_v13 = vmul.f32 %v11806_v61, %v11806_v61  ;;  %v5619_v34 = vmul.f32 %v7989_v21, %v5618_v33 }
 0xbc3   : > { %v5606_v45 = vsel %vm12006_vm10, %v11960_v27, %v5602_v43  ;;  %v5631_v58 = vsub.f32 1.5, %v5630_v14  ;;  %v12017_v51 = vadd.f32 1e-06, %v5136_v8  ;;  %v12020_v26 = vadd.f32 %v11006_v62, %v5806_v18  ;;  %v12535_v43 = vld [vmem:[#allocation34_spill] sm:$0xff] }
 0xbc4   : > { %v12023_v7 = vadd.f32 %v10954_v60, %v5809_v50  ;;  %6496 = vmatmul.bf16.gmra.mxu1 %v6317_v59  ;;  %v5947_v39 = vmul.f32 %v5899_v23, %v11756_v52  ;;  %v5949_v16 = vmul.f32 %v5901_v13, %v11806_v61  ;;  %v7991_v24 = vpop.eup %7990  ;;  %v5620_v31 = vmul.f32 0.5, %v5619_v34  ;;  %v5139_v59 = vpop.f32.mrf.mxu3 }
 0xbc5   : > { %v5632_v28 = vmul.f32 %v7987_v56, %v5631_v58  ;;  %vm5624_vm11 = vweird.f32 %v7989_v21  ;;  %7996 = vrsqrt.f32 %v12017_v51  ;;  %v5753_v55 = vmul.f32 %v5606_v45, %v12533_v63 }
 0xbc6   : > { %v7993_v27 = vpop.eup %7992  ;;  %v5648_v19 = vmul.f32 %v7991_v24, %v11986_v57  ;;  %v5995_v53 = vmul.f32 0.044715, %v5947_v39  ;;  %v12033_v40 = vadd.f32 1e-06, %v5228_v20  ;;  %v5621_v30 = vsub.f32 1.5, %v5620_v31  ;;  %vm5625_vm14 = vmor %vm5623_vm9, %vm5624_vm11 }
 0xbc7   : > { %v5636_v49 = vsel %vm5635_vm12, %v7987_v56, %v5632_v28  ;;  %v6188_v22 = vadd.f32 1.0, %v7993_v27  ;;  %v5997_v46 = vmul.f32 0.044715, %v5949_v16  ;;  %v7995_v2 = vpop.eup %7994  ;;  %vm5653_vm13 = vweird.f32 %v11986_v57 }
 0xbc8   : > { %v5756_v44 = vmul.f32 %v5636_v49, %v12534_v5  ;;  %v5649_v25 = vmul.f32 %v7991_v24, %v5648_v19  ;;  %v6043_v18 = vadd.f32 %v5995_v53, %v11756_v52  ;;  %v6190_v47 = vadd.f32 1.0, %v7995_v2 }
 0xbc9   : > { %v6236_v4 = vmul.f32 0.5, %v6188_v22  ;;  %v5622_v32 = vmul.f32 %v7989_v21, %v5621_v30  ;;  %v6045_v1 = vadd.f32 %v5997_v46, %v11806_v61  ;;  %v5808_v50 = vmul.f32 %v10985_v3, %v5753_v55  ;;  %v12536_v55 = vld [vmem:[#allocation35_spill] sm:$0xff] }
 0xbca   : > { %v5650_v56 = vmul.f32 0.5, %v5649_v25  ;;  %v6091_v36 = vmul.f32 0.7978846, %v6043_v18  ;;  %7998 = vrsqrt.f32 %v12033_v40  ;;  %v6238_v0 = vmul.f32 0.5, %v6190_v47 }
 0xbcb   : > { %v12044_v38 = vpop.eup %7996  ;;  %v5626_v17 = vsel %vm5625_vm14, %v7989_v21, %v5622_v32  ;;  %vm5654_vm15 = vweird.f32 %v7991_v24  ;;  %v6093_v37 = vmul.f32 0.7978846, %v6045_v1  ;;  %v5811_v8 = vmul.f32 %v10945_v54, %v5756_v44  ;;  %v5231_v21 = vpop.f32.mrf.mxu0 }
 0xbcc   : > { %v5755_v14 = vmul.f32 %v5626_v17, %v12535_v43  ;;  %v5651_v33 = vsub.f32 1.5, %v5650_v56  ;;  %8000 = vtanh.f32 %v6091_v36  ;;  %v6284_v11 = vmul.f32 %v6236_v4, %v11712_v41  ;;  %vm5655_vm4 = vmor %vm5653_vm13, %vm5654_vm15 }
 0xbcd   : > { %v6286_v10 = vmul.f32 %v6238_v0, %v11765_v35  ;;  %8002 = vtanh.f32 %v6093_v37  ;;  %v5638_v23 = vmul.f32 %v12044_v38, %v12017_v51  ;;  %vm5643_vm2 = vweird.f32 %v12017_v51  ;;  %v5142_v51 = vpop.f32.mrf.mxu3 }
 0xbce   : > { %v12054_v13 = vadd.f32 %v11006_v62, %v5808_v50  ;;  %v5810_v45 = vmul.f32 %v10985_v3, %v5755_v14  ;;  %v5652_v58 = vmul.f32 %v7991_v24, %v5651_v33  ;;  %v5904_v34 = vmul.f32 %v11830_v42, %v11830_v42 }
 0xbcf   : > { %v6320_v20 = vpack.c.bf16 %v6286_v10, %v6284_v11  ;;  %v5639_v41 = vmul.f32 %v12044_v38, %v5638_v23  ;;  %v5906_v35 = vmul.f32 %v11850_v9, %v11850_v9  ;;  %v12065_v39 = vadd.f32 1e-06, %v5139_v59  ;;  %v12537_v59 = vld [vmem:[#allocation36_spill] sm:$0xff] }
 0xbd0   : > { %v7999_v16 = vpop.eup %7998  ;;  %v12068_v28 = vadd.f32 %v10954_v60, %v5811_v8  ;;  %v5656_v31 = vsel %vm5655_vm4, %v7991_v24, %v5652_v58  ;;  %v5952_v27 = vmul.f32 %v5904_v34, %v11830_v42  ;;  %v12071_v63 = vadd.f32 1e-06, %v5231_v21 }
 0xbd1   : > { %6570 = vmatmul.bf16.gmra.mxu2 %v6320_v20  ;;  %v5758_v57 = vmul.f32 %v5656_v31, %v12536_v55  ;;  %v5640_v19 = vmul.f32 0.5, %v5639_v41  ;;  %vm5644_vm1 = vweird.f32 %v12044_v38  ;;  %v5668_v53 = vmul.f32 %v7999_v16, %v12033_v40  ;;  %v12538_v31 = vld [vmem:[#allocation37_spill] sm:$0xff] }
 0xbd2   : > { %v8001_v49 = vpop.eup %8000  ;;  %vm5673_vm5 = vweird.f32 %v12033_v40  ;;  %v5954_v22 = vmul.f32 %v5906_v35, %v11850_v9  ;;  %v6000_v30 = vmul.f32 0.044715, %v5952_v27  ;;  %8004 = vrsqrt.f32 %v12065_v39  ;;  %vm5645_vm6 = vmor %vm5643_vm2, %vm5644_vm1 }
 0xbd3   : > { %v8003_v24 = vpop.eup %8002  ;;  %v12080_v46 = vadd.f32 %v11006_v62, %v5810_v45  ;;  %v6187_v2 = vadd.f32 1.0, %v8001_v49  ;;  %v5641_v5 = vsub.f32 1.5, %v5640_v19  ;;  %v5669_v44 = vmul.f32 %v7999_v16, %v5668_v53  ;;  %v6472_v49 = vpop.f32.mrf.mxu1 }
 0xbd4   : > { %v6189_v25 = vadd.f32 1.0, %v8003_v24  ;;  %v6002_v18 = vmul.f32 0.044715, %v5954_v22  ;;  %v6048_v47 = vadd.f32 %v6000_v30, %v11830_v42  ;;  %8006 = vrsqrt.f32 %v12071_v63 }
 0xbd5   : > { %v5813_v4 = vmul.f32 %v10945_v54, %v5758_v57  ;;  %v6235_v32 = vmul.f32 0.5, %v6187_v2  ;;  %v5642_v1 = vmul.f32 %v12044_v38, %v5641_v5  ;;  %v5670_v50 = vmul.f32 0.5, %v5669_v44  ;;  %v12125_v44 = vpop.f32.mrf.mxu2 }
 0xbd6   : > { %v6237_v56 = vmul.f32 0.5, %v6189_v25  ;;  %vm5674_vm7 = vweird.f32 %v7999_v16  ;;  %v6050_v36 = vadd.f32 %v6002_v18, %v11850_v9  ;;  %v6096_v0 = vmul.f32 0.7978846, %v6048_v47 }
 0xbd7   : > { %v6283_v17 = vmul.f32 %v6235_v32, %v11756_v52  ;;  %v5646_v37 = vsel %vm5645_vm6, %v12044_v38, %v5642_v1  ;;  %v5671_v8 = vsub.f32 1.5, %v5670_v50  ;;  %v5903_v43 = vmul.f32 %v11833_v29, %v11833_v29  ;;  %vm5675_vm8 = vmor %vm5673_vm5, %vm5674_vm7 }
 0xbd8   : > { %v8005_v14 = vpop.eup %8004  ;;  %v6285_v33 = vmul.f32 %v6237_v56, %v11806_v61  ;;  %v5757_v11 = vmul.f32 %v5646_v37, %v12537_v59  ;;  %v6098_v10 = vmul.f32 0.7978846, %v6050_v36  ;;  %8008 = vtanh.f32 %v6096_v0  ;;  %v5145_v59 = vpop.f32.mrf.mxu3 }
 0xbd9   : > { %v12098_v23 = vadd.f32 %v10954_v60, %v5813_v4  ;;  %v5672_v21 = vmul.f32 %v7999_v16, %v5671_v8  ;;  %v5658_v52 = vmul.f32 %v8005_v14, %v12065_v39  ;;  %vm5663_vm0 = vweird.f32 %v12065_v39 }
 0xbda   : > { %v5905_v38 = vmul.f32 %v11964_v6, %v11964_v6  ;;  %v12104_v45 = vpop.eup %8006  ;;  %v6319_v58 = vpack.c.bf16 %v6285_v33, %v6283_v17  ;;  %v5812_v61 = vmul.f32 %v10985_v3, %v5757_v11  ;;  %8010 = vtanh.f32 %v6098_v10 }
 0xbdb   : > { %v5951_v34 = vmul.f32 %v5903_v43, %v11833_v29  ;;  %v5676_v20 = vsel %vm5675_vm8, %v7999_v16, %v5672_v21  ;;  %v5659_v41 = vmul.f32 %v8005_v14, %v5658_v52  ;;  %v5688_v35 = vmul.f32 %v12104_v45, %v12071_v63  ;;  %v5234_v16 = vpop.f32.mrf.mxu0  ;;  %v12539_v52 = vld [vmem:[#allocation38_spill] sm:$0xff] }
 0xbdc   : > { %vm5693_vm9 = vweird.f32 %v12071_v63  ;;  %6501 = vmatmul.bf16.gmra.mxu1 %v6319_v58  ;;  %v5760_v27 = vmul.f32 %v5676_v20, %v12538_v31  ;;  %vm5664_vm10 = vweird.f32 %v8005_v14  ;;  %v5953_v55 = vmul.f32 %v5905_v38, %v11964_v6  ;;  %v12157_v20 = vld [vmem:[#allocation16] ss:$0 sm:$0xff] }
 0xbdd   : > { %v5999_v57 = vmul.f32 0.044715, %v5951_v34  ;;  %v5660_v19 = vmul.f32 0.5, %v5659_v41  ;;  %v5689_v40 = vmul.f32 %v12104_v45, %v5688_v35  ;;  %vm5694_vm11 = vweird.f32 %v12104_v45  ;;  %vm5665_vm12 = vmor %vm5663_vm0, %vm5664_vm10  ;;  %v12540_v41 = vld [vmem:[#allocation39_spill] sm:$0xff] }
 0xbde   : > { %v12118_v53 = vadd.f32 1e-06, %v5142_v51  ;;  %v8009_v22 = vpop.eup %8008  ;;  %v12121_v30 = vadd.f32 %v11006_v62, %v5812_v61  ;;  %v5815_v24 = vmul.f32 %v10945_v54, %v5760_v27  ;;  %v6001_v2 = vmul.f32 0.044715, %v5953_v55  ;;  %vm5695_vm13 = vmor %vm5693_vm9, %vm5694_vm11  ;;  %v6474_v27 = vpop.f32.mrf.mxu1 }
 0xbdf   : > { %v6047_v5 = vadd.f32 %v5999_v57, %v11833_v29  ;;  %v6192_v25 = vadd.f32 1.0, %v8009_v22  ;;  %v5661_v18 = vsub.f32 1.5, %v5660_v19  ;;  %v5690_v47 = vmul.f32 0.5, %v5689_v40  ;;  %v6543_v55 = vpop.f32.mrf.mxu2 }
 0xbe0   : > { %8012 = vrsqrt.f32 %v12118_v53  ;;  %v8011_v4 = vpop.eup %8010  ;;  %v6049_v32 = vadd.f32 %v6001_v2, %v11964_v6  ;;  %v12129_v50 = vadd.f32 1e-06, %v5234_v16  ;;  %v5908_v56 = vmul.f32 %v11967_v48, %v11967_v48 }
 0xbe1   : > { %v6095_v1 = vmul.f32 0.7978846, %v6047_v5  ;;  %v6194_v36 = vadd.f32 1.0, %v8011_v4  ;;  %v6240_v0 = vmul.f32 0.5, %v6192_v25  ;;  %v5662_v17 = vmul.f32 %v8005_v14, %v5661_v18 }
 0xbe2   : > { %v5691_v37 = vsub.f32 1.5, %v5690_v47  ;;  %v12134_v8 = vadd.f32 %v10954_v60, %v5815_v24  ;;  %v6097_v43 = vmul.f32 0.7978846, %v6049_v32  ;;  %v5910_v33 = vmul.f32 %v11977_v15, %v11977_v15 }
 0xbe3   : > { %8014 = vtanh.f32 %v6095_v1  ;;  %v6242_v11 = vmul.f32 0.5, %v6194_v36  ;;  %v6288_v10 = vmul.f32 %v6240_v0, %v11830_v42  ;;  %v5666_v51 = vsel %vm5665_vm12, %v8005_v14, %v5662_v17 }
 0xbe4   : > { %v5692_v21 = vmul.f32 %v12104_v45, %v5691_v37  ;;  %v5759_v38 = vmul.f32 %v5666_v51, %v12539_v52  ;;  %8016 = vtanh.f32 %v6097_v43  ;;  %v5956_v39 = vmul.f32 %v5908_v56, %v11967_v48 }
 0xbe5   : > { %v5958_v58 = vmul.f32 %v5910_v33, %v11977_v15  ;;  %v6290_v34 = vmul.f32 %v6242_v11, %v11850_v9  ;;  %8018 = vrsqrt.f32 %v12129_v50  ;;  %v12155_v14 = vadd.f32 1e-06, %v5145_v59 }
 0xbe6   : > { %v12150_v61 = vpop.eup %8012  ;;  %v5696_v42 = vsel %vm5695_vm13, %v12104_v45, %v5692_v21  ;;  %v5814_v63 = vmul.f32 %v10985_v3, %v5759_v38  ;;  %vm5683_vm14 = vweird.f32 %v12118_v53  ;;  %v6004_v57 = vmul.f32 0.044715, %v5956_v39 }
 0xbe7   : > { %v5762_v35 = vmul.f32 %v5696_v42, %v12540_v41  ;;  %v5678_v31 = vmul.f32 %v12150_v61, %v12118_v53  ;;  %v6322_v9 = vpack.c.bf16 %v6290_v34, %v6288_v10  ;;  %v6006_v45 = vmul.f32 0.044715, %v5958_v58  ;;  %v6546_v39 = vpop.f32.mrf.mxu2 }
 0xbe8   : > { %8020 = vrsqrt.f32 %v12155_v14  ;;  %v12166_v40 = vadd.f32 %v11006_v62, %v5814_v63  ;;  %vm5684_vm15 = vweird.f32 %v12150_v61  ;;  %v6052_v2 = vadd.f32 %v6004_v57, %v11967_v48 }
 0xbe9   : > { %v8015_v19 = vpop.eup %8014  ;;  %v5817_v16 = vmul.f32 %v10945_v54, %v5762_v35  ;;  %v5679_v22 = vmul.f32 %v12150_v61, %v5678_v31  ;;  %6575 = vmatmul.bf16.gmra.mxu2 %v6322_v9  ;;  %v6054_v5 = vadd.f32 %v6006_v45, %v11977_v15  ;;  %v6473_v25 = vadd.f32 %v12157_v20, %v6472_v49  ;;  %vm5685_vm5 = vmor %vm5683_vm14, %vm5684_vm15  ;;  %v12542_v9 = vld [vmem:[#allocation40_spill] sm:$0xff] }
 0xbea   : > { %v6191_v24 = vadd.f32 1.0, %v8015_v19  ;;  %v8017_v18 = vpop.eup %8016  ;;  %v5907_v32 = vmul.f32 %v11974_v12, %v11974_v12  ;;  %v5909_v1 = vmul.f32 %v12020_v26, %v12020_v26  ;;  %v6100_v0 = vmul.f32 0.7978846, %v6052_v2 }
 0xbeb   : > { %v12175_v47 = vadd.f32 %v10954_v60, %v5817_v16  ;;  %v5680_v4 = vmul.f32 0.5, %v5679_v22  ;;  %v12181_v56 = vpop.eup %8018  ;;  %v6193_v49 = vadd.f32 1.0, %v8017_v18  ;;  %v6102_v17 = vmul.f32 0.7978846, %v6054_v5 }
 0xbec   : > { %v6239_v36 = vmul.f32 0.5, %v6191_v24  ;;  %v5708_v43 = vmul.f32 %v12181_v56, %v12129_v50  ;;  %vm5713_vm2 = vweird.f32 %v12129_v50  ;;  %vm5714_vm4 = vweird.f32 %v12181_v56 }
 0xbed   : > { %v5681_v37 = vsub.f32 1.5, %v5680_v4  ;;  %v6542_v33 = vadd.f32 %v12125_v44, %v6473_v25  ;;  %v6241_v11 = vmul.f32 0.5, %v6193_v49  ;;  %8022 = vtanh.f32 %v6100_v0  ;;  %v6477_v44 = vpop.f32.mrf.mxu1  ;;  %vm5715_vm7 = vmor %vm5713_vm2, %vm5714_vm4 }
 0xbee   : > { %v12195_v59 = vpop.eup %8020  ;;  %v6287_v10 = vmul.f32 %v6239_v36, %v11833_v29  ;;  %v5955_v51 = vmul.f32 %v5907_v32, %v11974_v12  ;;  %v5709_v52 = vmul.f32 %v12181_v56, %v5708_v43  ;;  %8024 = vtanh.f32 %v6102_v17 }
 0xbef   : > { %v5682_v21 = vmul.f32 %v12150_v61, %v5681_v37  ;;  %v5698_v38 = vmul.f32 %v12195_v59, %v12155_v14  ;;  %vm5703_vm1 = vweird.f32 %v12155_v14  ;;  %6601 = vst.msk [vmem:[%s12188_s29] sm:$0xff] %vm1509_vm3, %v6542_v33  ;;  %v6289_v58 = vmul.f32 %v6241_v11, %v11964_v6  ;;  %v12543_v33 = vld [vmem:[#allocation41_spill] sm:$0xff] }
 0xbf0   : > { %vm5704_vm6 = vweird.f32 %v12195_v59  ;;  %v5957_v29 = vmul.f32 %v5909_v1, %v12020_v26  ;;  %v6003_v34 = vmul.f32 0.044715, %v5955_v51  ;;  %v5710_v63 = vmul.f32 0.5, %v5709_v52 }
 0xbf1   : > { %v5686_v42 = vsel %vm5685_vm5, %v12150_v61, %v5682_v21  ;;  %v5699_v41 = vmul.f32 %v12195_v59, %v5698_v38  ;;  %v6475_v35 = vadd.f32 %v12157_v20, %v6474_v27  ;;  %v6321_v31 = vpack.c.bf16 %v6289_v58, %v6287_v10  ;;  %vm5705_vm0 = vmor %vm5703_vm1, %vm5704_vm6  ;;  %v6548_v21 = vpop.f32.mrf.mxu2 }
 0xbf2   : > { %v5761_v6 = vmul.f32 %v5686_v42, %v12542_v9  ;;  %v6005_v57 = vmul.f32 0.044715, %v5957_v29  ;;  %v6051_v53 = vadd.f32 %v6003_v34, %v11974_v12  ;;  %v5711_v45 = vsub.f32 1.5, %v5710_v63  ;;  %v12544_v42 = vld [vmem:[#allocation42_spill] sm:$0xff] }
 0xbf3   : > { %v5700_v19 = vmul.f32 0.5, %v5699_v41  ;;  %v6544_v16 = vadd.f32 %v6543_v55, %v6475_v35  ;;  %v5912_v22 = vmul.f32 %v12023_v7, %v12023_v7  ;;  %v8023_v24 = vpop.eup %8022  ;;  %6506 = vmatmul.bf16.gmra.mxu1 %v6321_v31  ;;  %v5914_v5 = vmul.f32 %v12068_v28, %v12068_v28 }
 0xbf4   : > { %v5816_v61 = vmul.f32 %v10985_v3, %v5761_v6  ;;  %v6053_v2 = vadd.f32 %v6005_v57, %v12020_v26  ;;  %v6099_v27 = vmul.f32 0.7978846, %v6051_v53  ;;  %v8025_v25 = vpop.eup %8024  ;;  %v5712_v18 = vmul.f32 %v12181_v56, %v5711_v45 }
 0xbf5   : > { %v6196_v4 = vadd.f32 1.0, %v8023_v24  ;;  %v5701_v32 = vsub.f32 1.5, %v5700_v19  ;;  %6602 = vst.msk [vmem:[%s12188_s29 + $0x8] sm:$0xff] %vm1509_vm3, %v6544_v16  ;;  %v5960_v55 = vmul.f32 %v5912_v22, %v12023_v7  ;;  %v6198_v49 = vadd.f32 1.0, %v8025_v25  ;;  %v6479_v51 = vpop.f32.mrf.mxu1 }
 0xbf6   : > { %v12229_v1 = vadd.f32 %v11006_v62, %v5816_v61  ;;  %v6101_v36 = vmul.f32 0.7978846, %v6053_v2  ;;  %8026 = vtanh.f32 %v6099_v27  ;;  %v5716_v0 = vsel %vm5715_vm7, %v12181_v56, %v5712_v18 }
 0xbf7   : > { %v6244_v17 = vmul.f32 0.5, %v6196_v4  ;;  %v5702_v37 = vmul.f32 %v12195_v59, %v5701_v32  ;;  %v5962_v43 = vmul.f32 %v5914_v5, %v12068_v28  ;;  %v5764_v11 = vmul.f32 %v5716_v0, %v12543_v33 }
 0xbf8   : > { %v6246_v10 = vmul.f32 0.5, %v6198_v49  ;;  %8028 = vtanh.f32 %v6101_v36  ;;  %v6008_v50 = vmul.f32 0.044715, %v5960_v55  ;;  %v6478_v58 = vadd.f32 %v12157_v20, %v6477_v44 }
 0xbf9   : > { %v6292_v52 = vmul.f32 %v6244_v17, %v11967_v48  ;;  %v5706_v56 = vsel %vm5705_vm0, %v12195_v59, %v5702_v37  ;;  %v6010_v38 = vmul.f32 0.044715, %v5962_v43  ;;  %v5819_v29 = vmul.f32 %v10945_v54, %v5764_v11 }
 0xbfa   : > { %v6294_v34 = vmul.f32 %v6246_v10, %v11977_v15  ;;  %v5763_v63 = vmul.f32 %v5706_v56, %v12544_v42  ;;  %v6056_v14 = vadd.f32 %v6008_v50, %v12023_v7  ;;  %v6547_v35 = vadd.f32 %v6546_v39, %v6478_v58  ;;  %v6551_v0 = vpop.f32.mrf.mxu2 }
 0xbfb   : > { %v6058_v41 = vadd.f32 %v6010_v38, %v12068_v28  ;;  %v5911_v48 = vmul.f32 %v12054_v13, %v12054_v13  ;;  %v5913_v59 = vmul.f32 %v12080_v46, %v12080_v46  ;;  %v12256_v44 = vadd.f32 %v10954_v60, %v5819_v29 }
 0xbfc   : > { %v8027_v31 = vpop.eup %8026  ;;  %v6324_v54 = vpack.c.bf16 %v6294_v34, %v6292_v52  ;;  %v5818_v15 = vmul.f32 %v10985_v3, %v5763_v63  ;;  %v6104_v9 = vmul.f32 0.7978846, %v6056_v14  ;;  %6603 = vst.msk [vmem:[%s12188_s29 + $0x10] sm:$0xff] %vm1509_vm3, %v6547_v35  ;;  %v6480_v60 = vadd.f32 %v12157_v20, %v6479_v51 }
 0xbfd   : > { %v6195_v6 = vadd.f32 1.0, %v8027_v31  ;;  %v6106_v57 = vmul.f32 0.7978846, %v6058_v41  ;;  %v5959_v39 = vmul.f32 %v5911_v48, %v12054_v13  ;;  %v5961_v53 = vmul.f32 %v5913_v59, %v12080_v46 }
 0xbfe   : > { %v8029_v45 = vpop.eup %8028  ;;  %6580 = vmatmul.bf16.gmra.mxu2 %v6324_v54  ;;  %v12264_v19 = vadd.f32 %v11006_v62, %v5818_v15  ;;  %8030 = vtanh.f32 %v6104_v9  ;;  %v5916_v3 = vmul.f32 %v12098_v23, %v12098_v23  ;;  %v6549_v2 = vadd.f32 %v6548_v21, %v6480_v60 }
 0xbff   : > { %v6197_v16 = vadd.f32 1.0, %v8029_v45  ;;  %v6243_v22 = vmul.f32 0.5, %v6195_v6  ;;  %8032 = vtanh.f32 %v6106_v57  ;;  %v6007_v24 = vmul.f32 0.044715, %v5959_v39 }
 0xc00   : > { %v6009_v61 = vmul.f32 0.044715, %v5961_v53  ;;  %v5918_v27 = vmul.f32 %v12134_v8, %v12134_v8  ;;  %v5964_v5 = vmul.f32 %v5916_v3, %v12098_v23  ;;  %v5915_v4 = vmul.f32 %v12121_v30, %v12121_v30  ;;  %6604 = vst.msk [vmem:[%s12188_s29 + $0x18] sm:$0xff] %vm1509_vm3, %v6549_v2  ;;  %v6482_v36 = vpop.f32.mrf.mxu1 }
 0xc01   : > { %v6245_v62 = vmul.f32 0.5, %v6197_v16  ;;  %v6291_v25 = vmul.f32 %v6243_v22, %v11974_v12  ;;  %v6055_v18 = vadd.f32 %v6007_v24, %v12054_v13  ;;  %v5917_v17 = vmul.f32 %v12166_v40, %v12166_v40 }
 0xc02   : > { %v6057_v32 = vadd.f32 %v6009_v61, %v12080_v46  ;;  %v5966_v55 = vmul.f32 %v5918_v27, %v12134_v8  ;;  %v6012_v49 = vmul.f32 0.044715, %v5964_v5  ;;  %v6483_v43 = vadd.f32 %v12157_v20, %v6482_v36  ;;  %v6553_v2 = vpop.f32.mrf.mxu2 }
 0xc03   : > { %v6293_v37 = vmul.f32 %v6245_v62, %v12020_v26  ;;  %v6103_v12 = vmul.f32 0.7978846, %v6055_v18  ;;  %v5963_v33 = vmul.f32 %v5915_v4, %v12121_v30  ;;  %v5965_v21 = vmul.f32 %v5917_v17, %v12166_v40 }
 0xc04   : > { %v8031_v11 = vpop.eup %8030  ;;  %v6105_v10 = vmul.f32 0.7978846, %v6057_v32  ;;  %v6014_v50 = vmul.f32 0.044715, %v5966_v55  ;;  %v6060_v51 = vadd.f32 %v6012_v49, %v12098_v23  ;;  %v6552_v58 = vadd.f32 %v6551_v0, %v6483_v43 }
 0xc05   : > { %v8033_v52 = vpop.eup %8032  ;;  %v6323_v56 = vpack.c.bf16 %v6293_v37, %v6291_v25  ;;  %v6200_v38 = vadd.f32 1.0, %v8031_v11  ;;  %8034 = vtanh.f32 %v6103_v12  ;;  %v6011_v63 = vmul.f32 0.044715, %v5963_v33 }
 0xc06   : > { %v6202_v29 = vadd.f32 1.0, %v8033_v52  ;;  %8036 = vtanh.f32 %v6105_v10  ;;  %v6062_v26 = vadd.f32 %v6014_v50, %v12134_v8  ;;  %v6108_v34 = vmul.f32 0.7978846, %v6060_v51  ;;  %6605 = vst.msk [vmem:[%s12188_s29 + $0x20] sm:$0xff] %vm1509_vm3, %v6552_v58 }
 0xc07   : > { %6511 = vmatmul.bf16.gmra.mxu1 %v6323_v56  ;;  %v6248_v42 = vmul.f32 0.5, %v6200_v38  ;;  %v6013_v14 = vmul.f32 0.044715, %v5965_v21  ;;  %v5920_v41 = vmul.f32 %v12175_v47, %v12175_v47  ;;  %v5922_v59 = vmul.f32 %v12256_v44, %v12256_v44 }
 0xc08   : > { %v6250_v35 = vmul.f32 0.5, %v6202_v29  ;;  %v6110_v48 = vmul.f32 0.7978846, %v6062_v26  ;;  %8038 = vtanh.f32 %v6108_v34  ;;  %v6059_v54 = vadd.f32 %v6011_v63, %v12121_v30  ;;  %v6484_v57 = vpop.f32.mrf.mxu1 }
 0xc09   : > { %v6296_v31 = vmul.f32 %v6248_v42, %v12023_v7  ;;  %v6061_v15 = vadd.f32 %v6013_v14, %v12166_v40  ;;  %v5968_v9 = vmul.f32 %v5920_v41, %v12175_v47  ;;  %v5970_v39 = vmul.f32 %v5922_v59, %v12256_v44 }
 0xc0a   : > { %v6298_v6 = vmul.f32 %v6250_v35, %v12068_v28  ;;  %8040 = vtanh.f32 %v6110_v48  ;;  %v5919_v53 = vmul.f32 %v12229_v1, %v12229_v1  ;;  %v6107_v60 = vmul.f32 0.7978846, %v6059_v54 }
 0xc0b   : > { %v8035_v45 = vpop.eup %8034  ;;  %v6109_v3 = vmul.f32 0.7978846, %v6061_v15  ;;  %v6485_v7 = vadd.f32 %v12157_v20, %v6484_v57  ;;  %v6016_v16 = vmul.f32 0.044715, %v5968_v9  ;;  %v6018_v27 = vmul.f32 0.044715, %v5970_v39 }
 0xc0c   : > { %v8037_v22 = vpop.eup %8036  ;;  %v6326_v24 = vpack.c.bf16 %v6298_v6, %v6296_v31  ;;  %v6199_v61 = vadd.f32 1.0, %v8035_v45  ;;  %v5921_v28 = vmul.f32 %v12264_v19, %v12264_v19  ;;  %v5967_v17 = vmul.f32 %v5919_v53, %v12229_v1 }
 0xc0d   : > { %v6201_v5 = vadd.f32 1.0, %v8037_v22  ;;  %v6554_v62 = vadd.f32 %v6553_v2, %v6485_v7  ;;  %8042 = vtanh.f32 %v6109_v3  ;;  %v6066_v4 = vadd.f32 %v6018_v27, %v12256_v44 }
 0xc0e   : > { %v8039_v25 = vpop.eup %8038  ;;  %6585 = vmatmul.bf16.gmra.mxu2 %v6326_v24  ;;  %v6247_v18 = vmul.f32 0.5, %v6199_v61  ;;  %v6064_v55 = vadd.f32 %v6016_v16, %v12175_v47  ;;  %v5969_v49 = vmul.f32 %v5921_v28, %v12264_v19  ;;  %8044 = vtanh.f32 %v6107_v60 }
 0xc0f   : > { %v6249_v32 = vmul.f32 0.5, %v6201_v5  ;;  %6606 = vst.msk [vmem:[%s12188_s29 + $0x28] sm:$0xff] %vm1509_vm3, %v6554_v62  ;;  %v6204_v0 = vadd.f32 1.0, %v8039_v25  ;;  %v6114_v33 = vmul.f32 0.7978846, %v6066_v4  ;;  %v6556_v26 = vpop.f32.mrf.mxu2 }
 0xc10   : > { %v8041_v36 = vpop.eup %8040  ;;  %v6295_v37 = vmul.f32 %v6247_v18, %v12054_v13  ;;  %v6017_v11 = vmul.f32 0.044715, %v5969_v49  ;;  %v6112_v51 = vmul.f32 0.7978846, %v6064_v55  ;;  %v6015_v56 = vmul.f32 0.044715, %v5967_v17 }
 0xc11   : > { %v6297_v12 = vmul.f32 %v6249_v32, %v12080_v46  ;;  %v6206_v43 = vadd.f32 1.0, %v8041_v36  ;;  %v6252_v52 = vmul.f32 0.5, %v6204_v0  ;;  %8046 = vtanh.f32 %v6114_v33 }
 0xc12   : > { %v6065_v13 = vadd.f32 %v6017_v11, %v12264_v19  ;;  %8048 = vtanh.f32 %v6112_v51  ;;  %v6063_v63 = vadd.f32 %v6015_v56, %v12229_v1 }
 0xc13   : > { %v6325_v10 = vpack.c.bf16 %v6297_v12, %v6295_v37  ;;  %v6254_v50 = vmul.f32 0.5, %v6206_v43  ;;  %v8043_v21 = vpop.eup %8042  ;;  %v6300_v42 = vmul.f32 %v6252_v52, %v12098_v23 }
 0xc14   : > { %v8045_v38 = vpop.eup %8044  ;;  %v6487_v29 = vpop.f32.mrf.mxu1  ;;  %v6205_v46 = vadd.f32 1.0, %v8043_v21  ;;  %v6113_v48 = vmul.f32 0.7978846, %v6065_v13  ;;  %v6111_v31 = vmul.f32 0.7978846, %v6063_v63 }
 0xc15   : > { %v6302_v58 = vmul.f32 %v6254_v50, %v12134_v8  ;;  %v6488_v34 = vadd.f32 %v12157_v20, %v6487_v29  ;;  %v6203_v14 = vadd.f32 1.0, %v8045_v38 }
 0xc16   : > { %v6253_v8 = vmul.f32 0.5, %v6205_v46  ;;  %8050 = vtanh.f32 %v6113_v48 }
 0xc17   : > { %6516 = vmatmul.bf16.gmra.mxu1 %v6325_v10  ;;  %v6557_v41 = vadd.f32 %v6556_v26, %v6488_v34  ;;  %v6328_v35 = vpack.c.bf16 %v6302_v58, %v6300_v42  ;;  %v8047_v59 = vpop.eup %8046  ;;  %v6251_v15 = vmul.f32 0.5, %v6203_v14  ;;  %8052 = vtanh.f32 %v6111_v31  ;;  %v6558_v53 = vpop.f32.mrf.mxu2 }
 0xc18   : > { %v8049_v54 = vpop.eup %8048  ;;  %v6210_v9 = vadd.f32 1.0, %v8047_v59  ;;  %v6301_v23 = vmul.f32 %v6253_v8, %v12166_v40 }
 0xc19   : > { %6607 = vst.msk [vmem:[%s12188_s29 + $0x30] sm:$0xff] %vm1509_vm3, %v6557_v41  ;;  %v6208_v39 = vadd.f32 1.0, %v8049_v54  ;;  %v6299_v45 = vmul.f32 %v6251_v15, %v12121_v30 }
 0xc1a   : > { %v6258_v3 = vmul.f32 0.5, %v6210_v9 }
 0xc1b   : > { %v6327_v7 = vpack.c.bf16 %v6301_v23, %v6299_v45  ;;  %v6256_v22 = vmul.f32 0.5, %v6208_v39 }
 0xc1c   : > { %v6489_v6 = vpop.f32.mrf.mxu1  ;;  %v8051_v16 = vpop.eup %8050  ;;  %v6306_v61 = vmul.f32 %v6258_v3, %v12256_v44 }
 0xc1d   : > { %v6490_v57 = vadd.f32 %v12157_v20, %v6489_v6  ;;  %v8053_v24 = vpop.eup %8052  ;;  %v6209_v40 = vadd.f32 1.0, %v8051_v16  ;;  %v6304_v2 = vmul.f32 %v6256_v22, %v12175_v47 }
 0xc1e   : > { %6590 = vmatmul.bf16.gmra.mxu2 %v6328_v35  ;;  %v6207_v27 = vadd.f32 1.0, %v8053_v24 }
 0xc1f   : > { %v6559_v60 = vadd.f32 %v6558_v53, %v6490_v57  ;;  %v6330_v28 = vpack.c.bf16 %v6306_v61, %v6304_v2  ;;  %v6257_v5 = vmul.f32 0.5, %v6209_v40 }
 0xc20   : > { %v6255_v30 = vmul.f32 0.5, %v6207_v27 }
 0xc21   : > { %6608 = vst.msk [vmem:[%s12188_s29 + $0x38] sm:$0xff] %vm1509_vm3, %v6559_v60  ;;  %v6305_v25 = vmul.f32 %v6257_v5, %v12264_v19 }
 0xc22   : > { %v6303_v44 = vmul.f32 %v6255_v30, %v12229_v1 }
 0xc24   : > { %v6329_v55 = vpack.c.bf16 %v6305_v25, %v6303_v44 }
 0xc26   : > { %v6561_v62 = vpop.f32.mrf.mxu2 }
 0xc27   : > { %6521 = vmatmul.bf16.gmra.mxu1 %v6327_v7 }
 0xc2d   : > { %v6492_v18 = vpop.f32.mrf.mxu1 }
 0xc2e   : > { %6595 = vmatmul.bf16.gmra.mxu2 %v6330_v28  ;;  %v6493_v4 = vadd.f32 %v12157_v20, %v6492_v18  ;;  %v6563_v36 = vpop.f32.mrf.mxu2 }
 0xc30   : > { %v6562_v32 = vadd.f32 %v6561_v62, %v6493_v4 }
 0xc32   : > { %6609 = vst.msk [vmem:[%s12188_s29 + $0x40] sm:$0xff] %vm1509_vm3, %v6562_v32 }
 0xc35   : > { %v6494_v47 = vpop.f32.mrf.mxu1 }
 0xc36   : > { %v6495_v49 = vadd.f32 %v12157_v20, %v6494_v47 }
 0xc37   : > { %6526 = vmatmul.bf16.gmra.mxu1 %v6329_v55 }
 0xc38   : > { %v6564_v0 = vadd.f32 %v6563_v36, %v6495_v49 }
 0xc3a   : > { %6610 = vst.msk [vmem:[%s12188_s29 + $0x48] sm:$0xff] %vm1509_vm3, %v6564_v0 }
 0xc3e   : > { %v6566_v17 = vpop.f32.mrf.mxu2 }
 0xc41   : > { %v6497_v19 = vpop.f32.mrf.mxu1 }
 0xc42   : > { %v6498_v37 = vadd.f32 %v12157_v20, %v6497_v19 }
 0xc44   : > { %v6567_v12 = vadd.f32 %v6566_v17, %v6498_v37 }
 0xc46   : > { %6611 = vst.msk [vmem:[%s12188_s29 + $0x50] sm:$0xff] %vm1509_vm3, %v6567_v12  ;;  %v6568_v33 = vpop.f32.mrf.mxu2 }
 0xc49   : > { %v6499_v1 = vpop.f32.mrf.mxu1 }
 0xc4a   : > { %v6500_v43 = vadd.f32 %v12157_v20, %v6499_v1 }
 0xc4c   : > { %v6569_v11 = vadd.f32 %v6568_v33, %v6500_v43 }
 0xc4e   : > { %6612 = vst.msk [vmem:[%s12188_s29 + $0x58] sm:$0xff] %vm1509_vm3, %v6569_v11 }
 0xc54   : > { %v6571_v10 = vpop.f32.mrf.mxu2 }
 0xc59   : > { %v6502_v50 = vpop.f32.mrf.mxu1 }
 0xc5a   : > { %v6503_v51 = vadd.f32 %v12157_v20, %v6502_v50 }
 0xc5c   : > { %v6572_v21 = vadd.f32 %v6571_v10, %v6503_v51  ;;  %v6573_v38 = vpop.f32.mrf.mxu2 }
 0xc5e   : > { %6613 = vst.msk [vmem:[%s12188_s29 + $0x60] sm:$0xff] %vm1509_vm3, %v6572_v21 }
 0xc61   : > { %v6504_v52 = vpop.f32.mrf.mxu1 }
 0xc62   : > { %v6505_v56 = vadd.f32 %v12157_v20, %v6504_v52 }
 0xc64   : > { %v6574_v58 = vadd.f32 %v6573_v38, %v6505_v56 }
 0xc66   : > { %6614 = vst.msk [vmem:[%s12188_s29 + $0x68] sm:$0xff] %vm1509_vm3, %v6574_v58 }
 0xc6c   : > { %v6576_v29 = vpop.f32.mrf.mxu2 }
 0xc70   : > { %v6507_v26 = vpop.f32.mrf.mxu1 }
 0xc71   : > { %v6508_v13 = vadd.f32 %v12157_v20, %v6507_v26 }
 0xc73   : > { %v6577_v46 = vadd.f32 %v6576_v29, %v6508_v13 }
 0xc74   : > { %v6578_v34 = vpop.f32.mrf.mxu2 }
 0xc75   : > { %6615 = vst.msk [vmem:[%s12188_s29 + $0x70] sm:$0xff] %vm1509_vm3, %v6577_v46 }
 0xc78   : > { %v6509_v42 = vpop.f32.mrf.mxu1 }
 0xc79   : > { %v6510_v63 = vadd.f32 %v12157_v20, %v6509_v42 }
 0xc7b   : > { %v6579_v14 = vadd.f32 %v6578_v34, %v6510_v63 }
 0xc7d   : > { %6616 = vst.msk [vmem:[%s12188_s29 + $0x78] sm:$0xff] %vm1509_vm3, %v6579_v14 }
 0xc81   : > { %v6581_v41 = vpop.f32.mrf.mxu2 }
 0xc84   : > { %v6512_v35 = vpop.f32.mrf.mxu1 }
 0xc85   : > { %v6513_v48 = vadd.f32 %v12157_v20, %v6512_v35 }
 0xc87   : > { %v6582_v59 = vadd.f32 %v6581_v41, %v6513_v48 }
 0xc89   : > { %6617 = vst.msk [vmem:[%s12188_s29 + $0x80] sm:$0xff] %vm1509_vm3, %v6582_v59  ;;  %v6583_v8 = vpop.f32.mrf.mxu2 }
 0xc8c   : > { %v6514_v31 = vpop.f32.mrf.mxu1 }
 0xc8d   : > { %v6515_v54 = vadd.f32 %v12157_v20, %v6514_v31 }
 0xc8f   : > { %v6584_v15 = vadd.f32 %v6583_v8, %v6515_v54 }
 0xc91   : > { %6618 = vst.msk [vmem:[%s12188_s29 + $0x88] sm:$0xff] %vm1509_vm3, %v6584_v15  ;;  %v6586_v9 = vpop.f32.mrf.mxu2 }
 0xc94   : > { %v6517_v6 = vpop.f32.mrf.mxu1 }
 0xc95   : > { %v6518_v23 = vadd.f32 %v12157_v20, %v6517_v6 }
 0xc97   : > { %v6587_v57 = vadd.f32 %v6586_v9, %v6518_v23 }
 0xc99   : > { %6619 = vst.msk [vmem:[%s12188_s29 + $0x90] sm:$0xff] %vm1509_vm3, %v6587_v57  ;;  %v6588_v39 = vpop.f32.mrf.mxu2 }
 0xc9c   : > { %v6519_v53 = vpop.f32.mrf.mxu1 }
 0xc9d   : > { %v6520_v45 = vadd.f32 %v12157_v20, %v6519_v53 }
 0xc9f   : > { %v6589_v60 = vadd.f32 %v6588_v39, %v6520_v45 }
 0xca1   : > { %6620 = vst.msk [vmem:[%s12188_s29 + $0x98] sm:$0xff] %vm1509_vm3, %v6589_v60  ;;  %v6591_v3 = vpop.f32.mrf.mxu2 }
 0xca4   : > { %v6522_v7 = vpop.f32.mrf.mxu1 }
 0xca5   : > { %v6523_v16 = vadd.f32 %v12157_v20, %v6522_v7 }
 0xca7   : > { %v6592_v22 = vadd.f32 %v6591_v3, %v6523_v16 }
 0xca9   : > { %6621 = vst.msk [vmem:[%s12188_s29 + $0xa0] sm:$0xff] %vm1509_vm3, %v6592_v22  ;;  %v6593_v24 = vpop.f32.mrf.mxu2 }
 0xcac   : > { %v6524_v61 = vpop.f32.mrf.mxu1 }
 0xcad   : > { %v6525_v40 = vadd.f32 %v12157_v20, %v6524_v61 }
 0xcaf   : > { %v6594_v2 = vadd.f32 %v6593_v24, %v6525_v40 }
 0xcb1   : > { %6622 = vst.msk [vmem:[%s12188_s29 + $0xa8] sm:$0xff] %vm1509_vm3, %v6594_v2  ;;  %v6596_v28 = vpop.f32.mrf.mxu2 }
 0xcb4   : > { %v6527_v27 = vpop.f32.mrf.mxu1 }
 0xcb5   : > { %v6528_v5 = vadd.f32 %v12157_v20, %v6527_v27 }
 0xcb7   : > { %v6597_v30 = vadd.f32 %v6596_v28, %v6528_v5 }
 0xcb9   : > { %6623 = vst.msk [vmem:[%s12188_s29 + $0xb0] sm:$0xff] %vm1509_vm3, %v6597_v30  ;;  %v6598_v18 = vpop.f32.mrf.mxu2 }
 0xcbc   : > { %v6529_v62 = vpop.f32.mrf.mxu1 }
 0xcbd   : > { %v6530_v25 = vadd.f32 %v12157_v20, %v6529_v62 }
 0xcbf   : > { %v6599_v4 = vadd.f32 %v6598_v18, %v6530_v25 }
 0xcc1   : > { %6624 = vst.msk [vmem:[%s12188_s29 + $0xb8] sm:$0xff] %vm1509_vm3, %v6599_v4 }
 0xcc2 PF: > { %s12545_s28 = sld [smem:[#allocation24_spill]] }
 0xcc8   : > { %s33_s24 = sadd.s32 1, %s12545_s28  }
 0xcc9   : > { %p30_p7 = scmp.ge.s32.totalorder %s33_s24, 4  }
 0xccb   :  { %32 = sbr.rel (!%p30_p7) target bundleno = 14 (0xe), region = 169 }
 0xcd0   :  { %6646 = vsyncpa [#allocation3], 1 }
 0xcd1   :  { %6648 = vsyncpa [#allocation3 + $0x1], 1 }
 0xcd2   :  { %6649 = vsyncpa [#allocation5], 1 }
 0xcd3   :  { %6650 = vsyncpa [#allocation8], 1 }
 0xcd4   :  { %6651 = vsyncpa [#allocation11], 1 }
 0xcd5   :  { %6652 = vsyncpa [#allocation14], 1 }
 0xcd6   :  { %6653 = vsyncpa [#allocation17], 1 }

</bundles_post_ra>
